<compile_context>
chip_gen: v6e
topology: v6e:2x2x1
jax: 0.10.0
libtpu: 0.0.40
codegen_flags: <defaults>
</compile_context>

<pallas_src>
import functools

import numpy as np
import jax
import jax.numpy as jnp
from jax.experimental import pallas as pl
from jax.experimental.pallas import tpu as pltpu

LEAKY_SLOPE = 0.2
BN_EPS = 1e-5
K, S, P = 4, 2, 1            # conv kernel / stride / padding (fixed by module)
C1, C2, FC1 = 64, 128, 1024  # channel sizes fixed by the module


# ------------------------------ fused kernel ---------------------------------
def _disc_kernel(cols1_ref, w1_ref, b1_ref,
                 w2_ref, b2_ref, bn2g_ref, bn2b_ref,
                 fc1w_ref, fc1b_ref, bn3g_ref, bn3b_ref,
                 fc2w_ref, fc2b_ref,
                 out_ref, pad_ref, *, n_batch, oh2, ow2, sigmoid):
    s2 = oh2 * ow2
    c4 = 4 * C1                       # s2d channel width (rh, rw, c1)
    bf16 = jnp.bfloat16

    def leaky(v):
        return jnp.maximum(v, LEAKY_SLOPE * v)

    def batchnorm(v, g, b):
        # batch statistics over rows (N*H*W for conv features, N for fc),
        # biased variance, eps=1e-5 -> torch BatchNorm training-mode default.
        m = jnp.mean(v, axis=0, keepdims=True)
        var = jnp.mean((v - m) * (v - m), axis=0, keepdims=True)
        return (v - m) * jax.lax.rsqrt(var + BN_EPS) * g + b

    # ---- conv1: ONE im2col matmul (block-diag s2d weight) + bias + LeakyReLU.
    # rows: (qh, qw, n)   cols: (rh, rw, c1)  -> already space-to-depth layout.
    z1 = jnp.dot(cols1_ref[...], w1_ref[...], preferred_element_type=jnp.float32)
    a1 = leaky(z1 + b1_ref[...]).astype(bf16)                 # (s2*N, 4*C1)

    # ---- stage a1 into the zero-padded s2d scratch ---------------------------
    # pad_ref layout: (ph, pw*N + n, (rh, rw, c1)); border rows/cols stay zero
    # (that IS the conv2 padding).
    pad_ref[...] = jnp.zeros(pad_ref.shape, pad_ref.dtype)
    for qh in range(oh2):
        pad_ref[qh + 1, n_batch:(ow2 + 1) * n_batch, :] = \
            a1[qh * ow2 * n_batch:(qh + 1) * ow2 * n_batch, :]

    # ---- conv2: 9 contiguous shifted slices -> ONE deep-K (2304) matmul ------
    row_blocks = []
    for o_h in range(oh2):
        taps = [pad_ref[o_h + dh, dw * n_batch:(dw + ow2) * n_batch, :]
                for dh in range(3) for dw in range(3)]        # each (ow2*N, 4*C1)
        row_blocks.append(jnp.concatenate(taps, axis=-1))     # (ow2*N, 9*4*C1)
    cols2 = jnp.concatenate(row_blocks, axis=0)               # (s2*N, 2304)
    z2 = jnp.dot(cols2, w2_ref[...], preferred_element_type=jnp.float32)
    z2 = leaky(batchnorm(z2 + b2_ref[...], bn2g_ref[...], bn2b_ref[...]))

    # ---- flatten + fc1 as ONE matmul -----------------------------------------
    # conv2 rows are ordered (s, n): lane-concat the s blocks -> (N, s2*C2);
    # the PyTorch NCHW flatten permutation is folded into fc1w's row order.
    z2b = z2.astype(bf16)
    z2f = jnp.concatenate(
        [z2b[s * n_batch:(s + 1) * n_batch, :] for s in range(s2)], axis=-1)
    y1 = jnp.dot(z2f, fc1w_ref[...], preferred_element_type=jnp.float32)
    y1 = leaky(batchnorm(y1 + fc1b_ref[...], bn3g_ref[...], bn3b_ref[...]))

    # ---- fc2 (output padded to 128 lanes -> dense stores; sliced outside) ----
    y2 = jnp.dot(y1.astype(bf16), fc2w_ref[...],
                 preferred_element_type=jnp.float32) + fc2b_ref[...]
    if sigmoid:
        y2 = jax.nn.sigmoid(y2)
    out_ref[...] = y2


# ------------------------------- glue / prep ---------------------------------
def _im2col_conv1_s2d(x_nhwc):
    """Conv1 im2col in space-to-depth order.

    Returns (OH2*OW2*N, 4*Cin*K*K):
      rows ordered (qh, qw, n), cols ordered (rh, rw, cin, kh, kw),
    where conv1 output position (oh1, ow1) = (2*qh + rh, 2*qw + rw).
    Input-sized glue only; runs in XLA outside the kernel.
    """
    N, H, W, C = x_nhwc.shape
    OH1, OW1 = H // 2, W // 2
    OH2, OW2 = H // 4, W // 4
    xp = jnp.pad(x_nhwc, ((0, 0), (P, P), (P, P), (0, 0)))
    patches = []
    for kh in range(K):
        for kw in range(K):
            patches.append(xp[:, kh:kh + 2 * OH1 - 1:2, kw:kw + 2 * OW1 - 1:2, :])
    pt = jnp.stack(patches, axis=3).reshape(N, OH1, OW1, K, K, C)
    pt = jnp.transpose(pt, (0, 1, 2, 5, 3, 4))        # (N, OH1, OW1, C, kh, kw)
    ckk = C * K * K
    pt = pt.reshape(N, OH2, 2, OW2, 2, ckk)           # (N, qh, rh, qw, rw, ckk)
    pt = jnp.transpose(pt, (1, 3, 0, 2, 4, 5))        # (qh, qw, N, rh, rw, ckk)
    return pt.reshape(OH2 * OW2 * N, 4 * ckk)


def prepare_params(p, batch, input_dim, input_h, input_w):
    """One-time weight re-layout (outside the hot path)."""
    oh2, ow2 = input_h // 4, input_w // 4
    s2 = oh2 * ow2
    odim = int(p['fc2_w'].shape[0])
    assert odim <= 128
    ckk = input_dim * K * K
    f32, bf16 = jnp.float32, jnp.bfloat16

    # conv1 weight as a block-diagonal (4*ckk, 4*C1) matrix: the four 2x2 s2d
    # sub-positions share the conv1 weight but occupy disjoint column / lane
    # blocks, so conv1 emits the s2d channel layout (rh, rw, c1) directly.
    w1f = np.asarray(p['w_conv1'], np.float32).reshape(C1, ckk).T      # (ckk, C1)
    w1b = np.zeros((4 * ckk, 4 * C1), np.float32)
    for r in range(4):
        w1b[r * ckk:(r + 1) * ckk, r * C1:(r + 1) * C1] = w1f
    b1t = np.tile(np.asarray(p['b_conv1'], np.float32), 4).reshape(1, 4 * C1)

    # conv2 weight in space-to-depth form: rows ordered (dh, dw, rh, rw, c1);
    # taps whose (kh, kw) falls outside the 4x4 kernel are structural zeros.
    w2 = np.asarray(p['w_conv2'], np.float32)                          # (C2,C1,K,K)
    w2s = np.zeros((3, 3, 2, 2, C1, C2), np.float32)
    for kh in range(K):
        rh = (kh + 1) % 2
        dh = (kh - 1 - rh) // 2                                        # -1, 0, 0, 1
        for kw in range(K):
            rw = (kw + 1) % 2
            dw = (kw - 1 - rw) // 2
            w2s[dh + 1, dw + 1, rh, rw] = w2[:, :, kh, kw].T           # (C1, C2)
    w2s = w2s.reshape(9 * 4 * C1, C2)

    # fc1: fold the PyTorch NCHW flatten (c2-major) into the weight row order
    # (s2, c2) used by the kernel's lane-concat of the conv2 output blocks.
    fc1w = (np.asarray(p['fc1_w'], np.float32)
            .reshape(FC1, C2, s2).transpose(2, 1, 0).reshape(s2 * C2, FC1))

    fc2w = np.zeros((FC1, 128), np.float32)
    fc2w[:, :odim] = np.asarray(p['fc2_w'], np.float32).T
    fc2b = np.zeros((1, 128), np.float32)
    fc2b[0, :odim] = np.asarray(p['fc2_b'], np.float32)

    return dict(
        batch=batch, odim=odim, oh2=oh2, ow2=ow2,
        w1=jnp.asarray(w1b, bf16), b1=jnp.asarray(b1t, f32),
        w2=jnp.asarray(w2s, bf16),
        b2=jnp.asarray(np.asarray(p['b_conv2']).reshape(1, C2), f32),
        bn2g=jnp.asarray(np.asarray(p['bn2_g']).reshape(1, C2), f32),
        bn2b=jnp.asarray(np.asarray(p['bn2_b']).reshape(1, C2), f32),
        fc1w=jnp.asarray(fc1w, bf16),
        fc1b=jnp.asarray(np.asarray(p['fc1_b']).reshape(1, FC1), f32),
        bn3g=jnp.asarray(np.asarray(p['bn3_g']).reshape(1, FC1), f32),
        bn3b=jnp.asarray(np.asarray(p['bn3_b']).reshape(1, FC1), f32),
        fc2w=jnp.asarray(fc2w, bf16), fc2b=jnp.asarray(fc2b, f32),
    )


def discriminator_forward(x_nchw, prep, out_nonlinearity=None):
    assert out_nonlinearity in (None, 'sigmoid')
    n = x_nchw.shape[0]
    assert n == prep['batch']
    oh2, ow2 = prep['oh2'], prep['ow2']
    s2 = oh2 * ow2

    x = jnp.transpose(x_nchw, (0, 2, 3, 1))                   # NHWC
    cols1 = _im2col_conv1_s2d(x).astype(jnp.bfloat16)         # (s2*N, 4*Cin*16)

    kernel = functools.partial(_disc_kernel, n_batch=n, oh2=oh2, ow2=ow2,
                               sigmoid=(out_nonlinearity == 'sigmoid'))
    operands = (cols1, prep['w1'], prep['b1'],
                prep['w2'], prep['b2'], prep['bn2g'], prep['bn2b'],
                prep['fc1w'], prep['fc1b'], prep['bn3g'], prep['bn3b'],
                prep['fc2w'], prep['fc2b'])

    flops = (2 * (s2 * n) * prep['w1'].shape[0] * prep['w1'].shape[1]   # conv1
             + 2 * (s2 * n) * prep['w2'].shape[0] * C2                  # conv2
             + 2 * n * prep['fc1w'].shape[0] * FC1                      # fc1
             + 2 * n * FC1 * 128)                                       # fc2
    bytes_acc = (sum(int(np.prod(o.shape)) * o.dtype.itemsize for o in operands)
                 + n * 128 * 4)

    vmem = pl.BlockSpec(memory_space=pltpu.MemorySpace.VMEM)
    out = pl.pallas_call(
        kernel,
        out_shape=jax.ShapeDtypeStruct((n, 128), jnp.float32),
        in_specs=[vmem] * len(operands),
        out_specs=vmem,
        scratch_shapes=[pltpu.VMEM((oh2 + 2, (ow2 + 2) * n, 4 * C1),
                                   jnp.bfloat16)],
        compiler_params=pltpu.CompilerParams(
            vmem_limit_bytes=32 * 1024 * 1024),
        cost_estimate=pl.CostEstimate(flops=int(flops),
                                      transcendentals=int(n * 128),
                                      bytes_accessed=int(bytes_acc)),
    )(*operands)
    return out[:, :prep['odim']]


def init_params(key, input_dim, input_h, input_w, output_dim):
    """Deterministic synthetic init (~ util.initialize_weights: N(0,0.02))."""
    ks = jax.random.split(key, 8)
    fc_in = C2 * (input_h // 4) * (input_w // 4)
    nrm = lambda k, s: 0.02 * jax.random.normal(k, s, jnp.float32)
    return dict(
        w_conv1=nrm(ks[0], (C1, input_dim, K, K)),
        b_conv1=jnp.zeros((C1,), jnp.float32),
        w_conv2=nrm(ks[1], (C2, C1, K, K)),
        b_conv2=jnp.zeros((C2,), jnp.float32),
        bn2_g=jnp.ones((C2,), jnp.float32) + nrm(ks[2], (C2,)),
        bn2_b=jnp.zeros((C2,), jnp.float32),
        fc1_w=nrm(ks[3], (FC1, fc_in)),
        fc1_b=jnp.zeros((FC1,), jnp.float32),
        bn3_g=jnp.ones((FC1,), jnp.float32) + nrm(ks[4], (FC1,)),
        bn3_b=jnp.zeros((FC1,), jnp.float32),
        fc2_w=nrm(ks[5], (output_dim, FC1)),
        fc2_b=jnp.zeros((output_dim,), jnp.float32),
    )


# --------------------------- pure-JAX reference -------------------------------
def ref_forward(x_nchw, p, out_nonlinearity='sigmoid'):
    prec = jax.lax.Precision.HIGHEST
    lrelu = lambda v: jnp.where(v > 0, v, LEAKY_SLOPE * v)
    x = jax.lax.conv_general_dilated(
        x_nchw, p['w_conv1'], (2, 2), ((1, 1), (1, 1)),
        dimension_numbers=('NCHW', 'OIHW', 'NCHW'), precision=prec)
    x = lrelu(x + p['b_conv1'][None, :, None, None])
    x = jax.lax.conv_general_dilated(
        x, p['w_conv2'], (2, 2), ((1, 1), (1, 1)),
        dimension_numbers=('NCHW', 'OIHW', 'NCHW'), precision=prec)
    x = x + p['b_conv2'][None, :, None, None]
    m = x.mean(axis=(0, 2, 3), keepdims=True)
    v = ((x - m) ** 2).mean(axis=(0, 2, 3), keepdims=True)
    x = (x - m) * jax.lax.rsqrt(v + BN_EPS)
    x = lrelu(x * p['bn2_g'][None, :, None, None] + p['bn2_b'][None, :, None, None])
    x = x.reshape(x.shape[0], -1)
    x = jnp.dot(x, p['fc1_w'].T, precision=prec) + p['fc1_b']
    m = x.mean(0, keepdims=True)
    v = ((x - m) ** 2).mean(0, keepdims=True)
    x = lrelu((x - m) * jax.lax.rsqrt(v + BN_EPS) * p['bn3_g'] + p['bn3_b'])
    x = jnp.dot(x, p['fc2_w'].T, precision=prec) + p['fc2_b']
    if out_nonlinearity == 'sigmoid':
        x = jax.nn.sigmoid(x)
    return x


if __name__ == "__main__":
    key = jax.random.PRNGKey(0)
    kx, kp = jax.random.split(key)

    N, C, H, W = 4, 4, 16, 16
    output_dim = 1

    x = jax.random.normal(kx, (N, C, H, W), jnp.float32)
    params = init_params(kp, C, H, W, output_dim)
    prep = prepare_params(params, N, C, H, W)

    fwd = jax.jit(lambda inp: discriminator_forward(inp, prep, 'sigmoid'))
    out = jax.block_until_ready(fwd(x))

    assert out.shape == (N, output_dim), out.shape
    ref = ref_forward(x, params, 'sigmoid')
    # tolerant of bf16-MXU vs f32-XLA precision differences
    if not bool(jnp.allclose(out, ref, atol=2e-2, rtol=2e-2)):
        raise AssertionError(f"mismatch vs reference:\n{out}\nvs\n{ref}")

    print("KERNEL_OK")
</pallas_src>

<mosaic_0001>
module attributes {stable_mosaic.version = 11 : i64} {
  func.func @_disc_kernel(%arg0: memref<64x256xbf16, #tpu.memory_space<vmem>>, %arg1: memref<256x256xbf16, #tpu.memory_space<vmem>>, %arg2: memref<1x256xf32, #tpu.memory_space<vmem>>, %arg3: memref<2304x128xbf16, #tpu.memory_space<vmem>>, %arg4: memref<1x128xf32, #tpu.memory_space<vmem>>, %arg5: memref<1x128xf32, #tpu.memory_space<vmem>>, %arg6: memref<1x128xf32, #tpu.memory_space<vmem>>, %arg7: memref<2048x1024xbf16, #tpu.memory_space<vmem>>, %arg8: memref<1x1024xf32, #tpu.memory_space<vmem>>, %arg9: memref<1x1024xf32, #tpu.memory_space<vmem>>, %arg10: memref<1x1024xf32, #tpu.memory_space<vmem>>, %arg11: memref<1024x128xbf16, #tpu.memory_space<vmem>>, %arg12: memref<1x128xf32, #tpu.memory_space<vmem>>, %arg13: memref<4x128xf32, #tpu.memory_space<vmem>>, %arg14: memref<6x24x256xbf16, #tpu.memory_space<vmem>>) attributes {dimension_semantics = [], scalar_prefetch = 0 : i64, scratch_operands = 1 : i64, tpu.core_type = #tpu.core_type<tc>} {
    %c0 = arith.constant 0 : index
    %c0_0 = arith.constant 0 : index
    %0 = vector.load %arg0[%c0, %c0_0] : memref<64x256xbf16, #tpu.memory_space<vmem>>, vector<64x256xbf16>
    %c0_1 = arith.constant 0 : index
    %c0_2 = arith.constant 0 : index
    %1 = vector.load %arg1[%c0_1, %c0_2] : memref<256x256xbf16, #tpu.memory_space<vmem>>, vector<256x256xbf16>
    %cst = arith.constant dense<0.000000e+00> : vector<64x256xf32>
    %2 = tpu.matmul %0, %1, %cst {dimension_numbers = #tpu.dot_dimension_numbers<[1], [0], [0], [1], [0, 0, 1, 1], [], []>} : vector<64x256xbf16>, vector<256x256xbf16>, vector<64x256xf32> -> vector<64x256xf32>
    %c0_3 = arith.constant 0 : index
    %c0_4 = arith.constant 0 : index
    %3 = vector.load %arg2[%c0_3, %c0_4] : memref<1x256xf32, #tpu.memory_space<vmem>>, vector<1x256xf32>
    %4 = vector.broadcast %3 : vector<1x256xf32> to vector<64x256xf32>
    %5 = arith.addf %2, %4 : vector<64x256xf32>
    %cst_5 = arith.constant 2.000000e-01 : f32
    %6 = vector.broadcast %cst_5 : f32 to vector<64x256xf32>
    %7 = arith.mulf %6, %5 : vector<64x256xf32>
    %8 = arith.maximumf %5, %7 : vector<64x256xf32>
    %9 = arith.truncf %8 : vector<64x256xf32> to vector<64x256xbf16>
    %cst_6 = arith.constant 0.000000e+00 : bf16
    %10 = vector.broadcast %cst_6 : bf16 to vector<6x24x256xbf16>
    %c0_7 = arith.constant 0 : index
    %c0_8 = arith.constant 0 : index
    %c0_9 = arith.constant 0 : index
    %11 = vector.load %arg14[%c0_7, %c0_8, %c0_9] : memref<6x24x256xbf16, #tpu.memory_space<vmem>>, vector<6x24x256xbf16>
    tpu.vector_store %arg14[%c0_7, %c0_8, %c0_9], %10 {strides = array<i32>} : memref<6x24x256xbf16, #tpu.memory_space<vmem>>, vector<6x24x256xbf16>,
    %12 = vector.extract_strided_slice %9 {offsets = [0, 0], sizes = [16, 256], strides = [1, 1]} : vector<64x256xbf16> to vector<16x256xbf16>
    %c1 = arith.constant 1 : index
    %c4 = arith.constant 4 : index
    %c0_10 = arith.constant 0 : index
    %13 = vector.load %arg14[%c1, %c4, %c0_10] : memref<6x24x256xbf16, #tpu.memory_space<vmem>>, vector<1x16x256xbf16>
    %14 = vector.shape_cast %13 : vector<1x16x256xbf16> to vector<16x256xbf16>
    %15 = vector.shape_cast %12 : vector<16x256xbf16> to vector<1x16x256xbf16>
    tpu.vector_store %arg14[%c1, %c4, %c0_10], %15 {strides = array<i32>} : memref<6x24x256xbf16, #tpu.memory_space<vmem>>, vector<1x16x256xbf16>,
    %16 = vector.extract_strided_slice %9 {offsets = [16, 0], sizes = [16, 256], strides = [1, 1]} : vector<64x256xbf16> to vector<16x256xbf16>
    %c2 = arith.constant 2 : index
    %c4_11 = arith.constant 4 : index
    %c0_12 = arith.constant 0 : index
    %17 = vector.load %arg14[%c2, %c4_11, %c0_12] : memref<6x24x256xbf16, #tpu.memory_space<vmem>>, vector<1x16x256xbf16>
    %18 = vector.shape_cast %17 : vector<1x16x256xbf16> to vector<16x256xbf16>
    %19 = vector.shape_cast %16 : vector<16x256xbf16> to vector<1x16x256xbf16>
    tpu.vector_store %arg14[%c2, %c4_11, %c0_12], %19 {strides = array<i32>} : memref<6x24x256xbf16, #tpu.memory_space<vmem>>, vector<1x16x256xbf16>,
    %20 = vector.extract_strided_slice %9 {offsets = [32, 0], sizes = [16, 256], strides = [1, 1]} : vector<64x256xbf16> to vector<16x256xbf16>
    %c3 = arith.constant 3 : index
    %c4_13 = arith.constant 4 : index
    %c0_14 = arith.constant 0 : index
    %21 = vector.load %arg14[%c3, %c4_13, %c0_14] : memref<6x24x256xbf16, #tpu.memory_space<vmem>>, vector<1x16x256xbf16>
    %22 = vector.shape_cast %21 : vector<1x16x256xbf16> to vector<16x256xbf16>
    %23 = vector.shape_cast %20 : vector<16x256xbf16> to vector<1x16x256xbf16>
    tpu.vector_store %arg14[%c3, %c4_13, %c0_14], %23 {strides = array<i32>} : memref<6x24x256xbf16, #tpu.memory_space<vmem>>, vector<1x16x256xbf16>,
    %24 = vector.extract_strided_slice %9 {offsets = [48, 0], sizes = [16, 256], strides = [1, 1]} : vector<64x256xbf16> to vector<16x256xbf16>
    %c4_15 = arith.constant 4 : index
    %c4_16 = arith.constant 4 : index
    %c0_17 = arith.constant 0 : index
    %25 = vector.load %arg14[%c4_15, %c4_16, %c0_17] : memref<6x24x256xbf16, #tpu.memory_space<vmem>>, vector<1x16x256xbf16>
    %26 = vector.shape_cast %25 : vector<1x16x256xbf16> to vector<16x256xbf16>
    %27 = vector.shape_cast %24 : vector<16x256xbf16> to vector<1x16x256xbf16>
    tpu.vector_store %arg14[%c4_15, %c4_16, %c0_17], %27 {strides = array<i32>} : memref<6x24x256xbf16, #tpu.memory_space<vmem>>, vector<1x16x256xbf16>,
    %c0_18 = arith.constant 0 : index
    %c0_19 = arith.constant 0 : index
    %c0_20 = arith.constant 0 : index
    %28 = vector.load %arg14[%c0_18, %c0_19, %c0_20] : memref<6x24x256xbf16, #tpu.memory_space<vmem>>, vector<1x16x256xbf16>
    %29 = vector.shape_cast %28 : vector<1x16x256xbf16> to vector<16x256xbf16>
    %c0_21 = arith.constant 0 : index
    %c4_22 = arith.constant 4 : index
    %c0_23 = arith.constant 0 : index
    %30 = vector.load %arg14[%c0_21, %c4_22, %c0_23] : memref<6x24x256xbf16, #tpu.memory_space<vmem>>, vector<1x16x256xbf16>
    %31 = vector.shape_cast %30 : vector<1x16x256xbf16> to vector<16x256xbf16>
    %c0_24 = arith.constant 0 : index
    %c8 = arith.constant 8 : index
    %c0_25 = arith.constant 0 : index
    %32 = vector.load %arg14[%c0_24, %c8, %c0_25] : memref<6x24x256xbf16, #tpu.memory_space<vmem>>, vector<1x16x256xbf16>
    %33 = vector.shape_cast %32 : vector<1x16x256xbf16> to vector<16x256xbf16>
    %c1_26 = arith.constant 1 : index
    %c0_27 = arith.constant 0 : index
    %c0_28 = arith.constant 0 : index
    %34 = vector.load %arg14[%c1_26, %c0_27, %c0_28] : memref<6x24x256xbf16, #tpu.memory_space<vmem>>, vector<1x16x256xbf16>
    %35 = vector.shape_cast %34 : vector<1x16x256xbf16> to vector<16x256xbf16>
    %c1_29 = arith.constant 1 : index
    %c4_30 = arith.constant 4 : index
    %c0_31 = arith.constant 0 : index
    %36 = vector.load %arg14[%c1_29, %c4_30, %c0_31] : memref<6x24x256xbf16, #tpu.memory_space<vmem>>, vector<1x16x256xbf16>
    %37 = vector.shape_cast %36 : vector<1x16x256xbf16> to vector<16x256xbf16>
    %c1_32 = arith.constant 1 : index
    %c8_33 = arith.constant 8 : index
    %c0_34 = arith.constant 0 : index
    %38 = vector.load %arg14[%c1_32, %c8_33, %c0_34] : memref<6x24x256xbf16, #tpu.memory_space<vmem>>, vector<1x16x256xbf16>
    %39 = vector.shape_cast %38 : vector<1x16x256xbf16> to vector<16x256xbf16>
    %c2_35 = arith.constant 2 : index
    %c0_36 = arith.constant 0 : index
    %c0_37 = arith.constant 0 : index
    %40 = vector.load %arg14[%c2_35, %c0_36, %c0_37] : memref<6x24x256xbf16, #tpu.memory_space<vmem>>, vector<1x16x256xbf16>
    %41 = vector.shape_cast %40 : vector<1x16x256xbf16> to vector<16x256xbf16>
    %c2_38 = arith.constant 2 : index
    %c4_39 = arith.constant 4 : index
    %c0_40 = arith.constant 0 : index
    %42 = vector.load %arg14[%c2_38, %c4_39, %c0_40] : memref<6x24x256xbf16, #tpu.memory_space<vmem>>, vector<1x16x256xbf16>
    %43 = vector.shape_cast %42 : vector<1x16x256xbf16> to vector<16x256xbf16>
    %c2_41 = arith.constant 2 : index
    %c8_42 = arith.constant 8 : index
    %c0_43 = arith.constant 0 : index
    %44 = vector.load %arg14[%c2_41, %c8_42, %c0_43] : memref<6x24x256xbf16, #tpu.memory_space<vmem>>, vector<1x16x256xbf16>
    %45 = vector.shape_cast %44 : vector<1x16x256xbf16> to vector<16x256xbf16>
    %46 = tpu.concatenate %29, %31, %33, %35, %37, %39, %41, %43, %45 in 1 : vector<16x256xbf16>, vector<16x256xbf16>, vector<16x256xbf16>, vector<16x256xbf16>, vector<16x256xbf16>, vector<16x256xbf16>, vector<16x256xbf16>, vector<16x256xbf16>, vector<16x256xbf16> -> vector<16x2304xbf16>
    %c1_44 = arith.constant 1 : index
    %c0_45 = arith.constant 0 : index
    %c0_46 = arith.constant 0 : index
    %47 = vector.load %arg14[%c1_44, %c0_45, %c0_46] : memref<6x24x256xbf16, #tpu.memory_space<vmem>>, vector<1x16x256xbf16>
    %48 = vector.shape_cast %47 : vector<1x16x256xbf16> to vector<16x256xbf16>
    %c1_47 = arith.constant 1 : index
    %c4_48 = arith.constant 4 : index
    %c0_49 = arith.constant 0 : index
    %49 = vector.load %arg14[%c1_47, %c4_48, %c0_49] : memref<6x24x256xbf16, #tpu.memory_space<vmem>>, vector<1x16x256xbf16>
    %50 = vector.shape_cast %49 : vector<1x16x256xbf16> to vector<16x256xbf16>
    %c1_50 = arith.constant 1 : index
    %c8_51 = arith.constant 8 : index
    %c0_52 = arith.constant 0 : index
    %51 = vector.load %arg14[%c1_50, %c8_51, %c0_52] : memref<6x24x256xbf16, #tpu.memory_space<vmem>>, vector<1x16x256xbf16>
    %52 = vector.shape_cast %51 : vector<1x16x256xbf16> to vector<16x256xbf16>
    %c2_53 = arith.constant 2 : index
    %c0_54 = arith.constant 0 : index
    %c0_55 = arith.constant 0 : index
    %53 = vector.load %arg14[%c2_53, %c0_54, %c0_55] : memref<6x24x256xbf16, #tpu.memory_space<vmem>>, vector<1x16x256xbf16>
    %54 = vector.shape_cast %53 : vector<1x16x256xbf16> to vector<16x256xbf16>
    %c2_56 = arith.constant 2 : index
    %c4_57 = arith.constant 4 : index
    %c0_58 = arith.constant 0 : index
    %55 = vector.load %arg14[%c2_56, %c4_57, %c0_58] : memref<6x24x256xbf16, #tpu.memory_space<vmem>>, vector<1x16x256xbf16>
    %56 = vector.shape_cast %55 : vector<1x16x256xbf16> to vector<16x256xbf16>
    %c2_59 = arith.constant 2 : index
    %c8_60 = arith.constant 8 : index
    %c0_61 = arith.constant 0 : index
    %57 = vector.load %arg14[%c2_59, %c8_60, %c0_61] : memref<6x24x256xbf16, #tpu.memory_space<vmem>>, vector<1x16x256xbf16>
    %58 = vector.shape_cast %57 : vector<1x16x256xbf16> to vector<16x256xbf16>
    %c3_62 = arith.constant 3 : index
    %c0_63 = arith.constant 0 : index
    %c0_64 = arith.constant 0 : index
    %59 = vector.load %arg14[%c3_62, %c0_63, %c0_64] : memref<6x24x256xbf16, #tpu.memory_space<vmem>>, vector<1x16x256xbf16>
    %60 = vector.shape_cast %59 : vector<1x16x256xbf16> to vector<16x256xbf16>
    %c3_65 = arith.constant 3 : index
    %c4_66 = arith.constant 4 : index
    %c0_67 = arith.constant 0 : index
    %61 = vector.load %arg14[%c3_65, %c4_66, %c0_67] : memref<6x24x256xbf16, #tpu.memory_space<vmem>>, vector<1x16x256xbf16>
    %62 = vector.shape_cast %61 : vector<1x16x256xbf16> to vector<16x256xbf16>
    %c3_68 = arith.constant 3 : index
    %c8_69 = arith.constant 8 : index
    %c0_70 = arith.constant 0 : index
    %63 = vector.load %arg14[%c3_68, %c8_69, %c0_70] : memref<6x24x256xbf16, #tpu.memory_space<vmem>>, vector<1x16x256xbf16>
    %64 = vector.shape_cast %63 : vector<1x16x256xbf16> to vector<16x256xbf16>
    %65 = tpu.concatenate %48, %50, %52, %54, %56, %58, %60, %62, %64 in 1 : vector<16x256xbf16>, vector<16x256xbf16>, vector<16x256xbf16>, vector<16x256xbf16>, vector<16x256xbf16>, vector<16x256xbf16>, vector<16x256xbf16>, vector<16x256xbf16>, vector<16x256xbf16> -> vector<16x2304xbf16>
    %c2_71 = arith.constant 2 : index
    %c0_72 = arith.constant 0 : index
    %c0_73 = arith.constant 0 : index
    %66 = vector.load %arg14[%c2_71, %c0_72, %c0_73] : memref<6x24x256xbf16, #tpu.memory_space<vmem>>, vector<1x16x256xbf16>
    %67 = vector.shape_cast %66 : vector<1x16x256xbf16> to vector<16x256xbf16>
    %c2_74 = arith.constant 2 : index
    %c4_75 = arith.constant 4 : index
    %c0_76 = arith.constant 0 : index
    %68 = vector.load %arg14[%c2_74, %c4_75, %c0_76] : memref<6x24x256xbf16, #tpu.memory_space<vmem>>, vector<1x16x256xbf16>
    %69 = vector.shape_cast %68 : vector<1x16x256xbf16> to vector<16x256xbf16>
    %c2_77 = arith.constant 2 : index
    %c8_78 = arith.constant 8 : index
    %c0_79 = arith.constant 0 : index
    %70 = vector.load %arg14[%c2_77, %c8_78, %c0_79] : memref<6x24x256xbf16, #tpu.memory_space<vmem>>, vector<1x16x256xbf16>
    %71 = vector.shape_cast %70 : vector<1x16x256xbf16> to vector<16x256xbf16>
    %c3_80 = arith.constant 3 : index
    %c0_81 = arith.constant 0 : index
    %c0_82 = arith.constant 0 : index
    %72 = vector.load %arg14[%c3_80, %c0_81, %c0_82] : memref<6x24x256xbf16, #tpu.memory_space<vmem>>, vector<1x16x256xbf16>
    %73 = vector.shape_cast %72 : vector<1x16x256xbf16> to vector<16x256xbf16>
    %c3_83 = arith.constant 3 : index
    %c4_84 = arith.constant 4 : index
    %c0_85 = arith.constant 0 : index
    %74 = vector.load %arg14[%c3_83, %c4_84, %c0_85] : memref<6x24x256xbf16, #tpu.memory_space<vmem>>, vector<1x16x256xbf16>
    %75 = vector.shape_cast %74 : vector<1x16x256xbf16> to vector<16x256xbf16>
    %c3_86 = arith.constant 3 : index
    %c8_87 = arith.constant 8 : index
    %c0_88 = arith.constant 0 : index
    %76 = vector.load %arg14[%c3_86, %c8_87, %c0_88] : memref<6x24x256xbf16, #tpu.memory_space<vmem>>, vector<1x16x256xbf16>
    %77 = vector.shape_cast %76 : vector<1x16x256xbf16> to vector<16x256xbf16>
    %c4_89 = arith.constant 4 : index
    %c0_90 = arith.constant 0 : index
    %c0_91 = arith.constant 0 : index
    %78 = vector.load %arg14[%c4_89, %c0_90, %c0_91] : memref<6x24x256xbf16, #tpu.memory_space<vmem>>, vector<1x16x256xbf16>
    %79 = vector.shape_cast %78 : vector<1x16x256xbf16> to vector<16x256xbf16>
    %c4_92 = arith.constant 4 : index
    %c4_93 = arith.constant 4 : index
    %c0_94 = arith.constant 0 : index
    %80 = vector.load %arg14[%c4_92, %c4_93, %c0_94] : memref<6x24x256xbf16, #tpu.memory_space<vmem>>, vector<1x16x256xbf16>
    %81 = vector.shape_cast %80 : vector<1x16x256xbf16> to vector<16x256xbf16>
    %c4_95 = arith.constant 4 : index
    %c8_96 = arith.constant 8 : index
    %c0_97 = arith.constant 0 : index
    %82 = vector.load %arg14[%c4_95, %c8_96, %c0_97] : memref<6x24x256xbf16, #tpu.memory_space<vmem>>, vector<1x16x256xbf16>
    %83 = vector.shape_cast %82 : vector<1x16x256xbf16> to vector<16x256xbf16>
    %84 = tpu.concatenate %67, %69, %71, %73, %75, %77, %79, %81, %83 in 1 : vector<16x256xbf16>, vector<16x256xbf16>, vector<16x256xbf16>, vector<16x256xbf16>, vector<16x256xbf16>, vector<16x256xbf16>, vector<16x256xbf16>, vector<16x256xbf16>, vector<16x256xbf16> -> vector<16x2304xbf16>
    %c3_98 = arith.constant 3 : index
    %c0_99 = arith.constant 0 : index
    %c0_100 = arith.constant 0 : index
    %85 = vector.load %arg14[%c3_98, %c0_99, %c0_100] : memref<6x24x256xbf16, #tpu.memory_space<vmem>>, vector<1x16x256xbf16>
    %86 = vector.shape_cast %85 : vector<1x16x256xbf16> to vector<16x256xbf16>
    %c3_101 = arith.constant 3 : index
    %c4_102 = arith.constant 4 : index
    %c0_103 = arith.constant 0 : index
    %87 = vector.load %arg14[%c3_101, %c4_102, %c0_103] : memref<6x24x256xbf16, #tpu.memory_space<vmem>>, vector<1x16x256xbf16>
    %88 = vector.shape_cast %87 : vector<1x16x256xbf16> to vector<16x256xbf16>
    %c3_104 = arith.constant 3 : index
    %c8_105 = arith.constant 8 : index
    %c0_106 = arith.constant 0 : index
    %89 = vector.load %arg14[%c3_104, %c8_105, %c0_106] : memref<6x24x256xbf16, #tpu.memory_space<vmem>>, vector<1x16x256xbf16>
    %90 = vector.shape_cast %89 : vector<1x16x256xbf16> to vector<16x256xbf16>
    %c4_107 = arith.constant 4 : index
    %c0_108 = arith.constant 0 : index
    %c0_109 = arith.constant 0 : index
    %91 = vector.load %arg14[%c4_107, %c0_108, %c0_109] : memref<6x24x256xbf16, #tpu.memory_space<vmem>>, vector<1x16x256xbf16>
    %92 = vector.shape_cast %91 : vector<1x16x256xbf16> to vector<16x256xbf16>
    %c4_110 = arith.constant 4 : index
    %c4_111 = arith.constant 4 : index
    %c0_112 = arith.constant 0 : index
    %93 = vector.load %arg14[%c4_110, %c4_111, %c0_112] : memref<6x24x256xbf16, #tpu.memory_space<vmem>>, vector<1x16x256xbf16>
    %94 = vector.shape_cast %93 : vector<1x16x256xbf16> to vector<16x256xbf16>
    %c4_113 = arith.constant 4 : index
    %c8_114 = arith.constant 8 : index
    %c0_115 = arith.constant 0 : index
    %95 = vector.load %arg14[%c4_113, %c8_114, %c0_115] : memref<6x24x256xbf16, #tpu.memory_space<vmem>>, vector<1x16x256xbf16>
    %96 = vector.shape_cast %95 : vector<1x16x256xbf16> to vector<16x256xbf16>
    %c5 = arith.constant 5 : index
    %c0_116 = arith.constant 0 : index
    %c0_117 = arith.constant 0 : index
    %97 = vector.load %arg14[%c5, %c0_116, %c0_117] : memref<6x24x256xbf16, #tpu.memory_space<vmem>>, vector<1x16x256xbf16>
    %98 = vector.shape_cast %97 : vector<1x16x256xbf16> to vector<16x256xbf16>
    %c5_118 = arith.constant 5 : index
    %c4_119 = arith.constant 4 : index
    %c0_120 = arith.constant 0 : index
    %99 = vector.load %arg14[%c5_118, %c4_119, %c0_120] : memref<6x24x256xbf16, #tpu.memory_space<vmem>>, vector<1x16x256xbf16>
    %100 = vector.shape_cast %99 : vector<1x16x256xbf16> to vector<16x256xbf16>
    %c5_121 = arith.constant 5 : index
    %c8_122 = arith.constant 8 : index
    %c0_123 = arith.constant 0 : index
    %101 = vector.load %arg14[%c5_121, %c8_122, %c0_123] : memref<6x24x256xbf16, #tpu.memory_space<vmem>>, vector<1x16x256xbf16>
    %102 = vector.shape_cast %101 : vector<1x16x256xbf16> to vector<16x256xbf16>
    %103 = tpu.concatenate %86, %88, %90, %92, %94, %96, %98, %100, %102 in 1 : vector<16x256xbf16>, vector<16x256xbf16>, vector<16x256xbf16>, vector<16x256xbf16>, vector<16x256xbf16>, vector<16x256xbf16>, vector<16x256xbf16>, vector<16x256xbf16>, vector<16x256xbf16> -> vector<16x2304xbf16>
    %104 = tpu.concatenate %46, %65, %84, %103 in 0 : vector<16x2304xbf16>, vector<16x2304xbf16>, vector<16x2304xbf16>, vector<16x2304xbf16> -> vector<64x2304xbf16>
    %c0_124 = arith.constant 0 : index
    %c0_125 = arith.constant 0 : index
    %105 = vector.load %arg3[%c0_124, %c0_125] : memref<2304x128xbf16, #tpu.memory_space<vmem>>, vector<2304x128xbf16>
    %cst_126 = arith.constant dense<0.000000e+00> : vector<64x128xf32>
    %106 = tpu.matmul %104, %105, %cst_126 {dimension_numbers = #tpu.dot_dimension_numbers<[1], [0], [0], [1], [0, 0, 1, 1], [], []>} : vector<64x2304xbf16>, vector<2304x128xbf16>, vector<64x128xf32> -> vector<64x128xf32>
    %c0_127 = arith.constant 0 : index
    %c0_128 = arith.constant 0 : index
    %107 = vector.load %arg4[%c0_127, %c0_128] : memref<1x128xf32, #tpu.memory_space<vmem>>, vector<1x128xf32>
    %108 = vector.broadcast %107 : vector<1x128xf32> to vector<64x128xf32>
    %109 = arith.addf %106, %108 : vector<64x128xf32>
    %c0_129 = arith.constant 0 : index
    %c0_130 = arith.constant 0 : index
    %110 = vector.load %arg5[%c0_129, %c0_130] : memref<1x128xf32, #tpu.memory_space<vmem>>, vector<1x128xf32>
    %c0_131 = arith.constant 0 : index
    %c0_132 = arith.constant 0 : index
    %111 = vector.load %arg6[%c0_131, %c0_132] : memref<1x128xf32, #tpu.memory_space<vmem>>, vector<1x128xf32>
    %cst_133 = arith.constant dense<0.000000e+00> : vector<128xf32>
    %112 = vector.multi_reduction <add>, %109, %cst_133 [0] : vector<64x128xf32> to vector<128xf32>
    %113 = vector.shape_cast %112 : vector<128xf32> to vector<1x128xf32>
    %cst_134 = arith.constant 6.400000e+01 : f32
    %114 = vector.broadcast %cst_134 : f32 to vector<1x128xf32>
    %115 = arith.divf %113, %114 : vector<1x128xf32>
    %116 = vector.broadcast %115 : vector<1x128xf32> to vector<64x128xf32>
    %117 = arith.subf %109, %116 : vector<64x128xf32>
    %118 = vector.broadcast %115 : vector<1x128xf32> to vector<64x128xf32>
    %119 = arith.subf %109, %118 : vector<64x128xf32>
    %120 = arith.mulf %117, %119 : vector<64x128xf32>
    %cst_135 = arith.constant dense<0.000000e+00> : vector<128xf32>
    %121 = vector.multi_reduction <add>, %120, %cst_135 [0] : vector<64x128xf32> to vector<128xf32>
    %122 = vector.shape_cast %121 : vector<128xf32> to vector<1x128xf32>
    %cst_136 = arith.constant 6.400000e+01 : f32
    %123 = vector.broadcast %cst_136 : f32 to vector<1x128xf32>
    %124 = arith.divf %122, %123 : vector<1x128xf32>
    %125 = vector.broadcast %115 : vector<1x128xf32> to vector<64x128xf32>
    %126 = arith.subf %109, %125 : vector<64x128xf32>
    %cst_137 = arith.constant 9.99999974E-6 : f32
    %127 = vector.broadcast %cst_137 : f32 to vector<1x128xf32>
    %128 = arith.addf %124, %127 : vector<1x128xf32>
    %129 = math.rsqrt %128 : vector<1x128xf32>
    %130 = vector.broadcast %129 : vector<1x128xf32> to vector<64x128xf32>
    %131 = arith.mulf %126, %130 : vector<64x128xf32>
    %132 = vector.broadcast %110 : vector<1x128xf32> to vector<64x128xf32>
    %133 = arith.mulf %131, %132 : vector<64x128xf32>
    %134 = vector.broadcast %111 : vector<1x128xf32> to vector<64x128xf32>
    %135 = arith.addf %133, %134 : vector<64x128xf32>
    %cst_138 = arith.constant 2.000000e-01 : f32
    %136 = vector.broadcast %cst_138 : f32 to vector<64x128xf32>
    %137 = arith.mulf %136, %135 : vector<64x128xf32>
    %138 = arith.maximumf %135, %137 : vector<64x128xf32>
    %139 = arith.truncf %138 : vector<64x128xf32> to vector<64x128xbf16>
    %140 = vector.extract_strided_slice %139 {offsets = [0, 0], sizes = [4, 128], strides = [1, 1]} : vector<64x128xbf16> to vector<4x128xbf16>
    %141 = vector.extract_strided_slice %139 {offsets = [4, 0], sizes = [4, 128], strides = [1, 1]} : vector<64x128xbf16> to vector<4x128xbf16>
    %142 = vector.extract_strided_slice %139 {offsets = [8, 0], sizes = [4, 128], strides = [1, 1]} : vector<64x128xbf16> to vector<4x128xbf16>
    %143 = vector.extract_strided_slice %139 {offsets = [12, 0], sizes = [4, 128], strides = [1, 1]} : vector<64x128xbf16> to vector<4x128xbf16>
    %144 = vector.extract_strided_slice %139 {offsets = [16, 0], sizes = [4, 128], strides = [1, 1]} : vector<64x128xbf16> to vector<4x128xbf16>
    %145 = vector.extract_strided_slice %139 {offsets = [20, 0], sizes = [4, 128], strides = [1, 1]} : vector<64x128xbf16> to vector<4x128xbf16>
    %146 = vector.extract_strided_slice %139 {offsets = [24, 0], sizes = [4, 128], strides = [1, 1]} : vector<64x128xbf16> to vector<4x128xbf16>
    %147 = vector.extract_strided_slice %139 {offsets = [28, 0], sizes = [4, 128], strides = [1, 1]} : vector<64x128xbf16> to vector<4x128xbf16>
    %148 = vector.extract_strided_slice %139 {offsets = [32, 0], sizes = [4, 128], strides = [1, 1]} : vector<64x128xbf16> to vector<4x128xbf16>
    %149 = vector.extract_strided_slice %139 {offsets = [36, 0], sizes = [4, 128], strides = [1, 1]} : vector<64x128xbf16> to vector<4x128xbf16>
    %150 = vector.extract_strided_slice %139 {offsets = [40, 0], sizes = [4, 128], strides = [1, 1]} : vector<64x128xbf16> to vector<4x128xbf16>
    %151 = vector.extract_strided_slice %139 {offsets = [44, 0], sizes = [4, 128], strides = [1, 1]} : vector<64x128xbf16> to vector<4x128xbf16>
    %152 = vector.extract_strided_slice %139 {offsets = [48, 0], sizes = [4, 128], strides = [1, 1]} : vector<64x128xbf16> to vector<4x128xbf16>
    %153 = vector.extract_strided_slice %139 {offsets = [52, 0], sizes = [4, 128], strides = [1, 1]} : vector<64x128xbf16> to vector<4x128xbf16>
    %154 = vector.extract_strided_slice %139 {offsets = [56, 0], sizes = [4, 128], strides = [1, 1]} : vector<64x128xbf16> to vector<4x128xbf16>
    %155 = vector.extract_strided_slice %139 {offsets = [60, 0], sizes = [4, 128], strides = [1, 1]} : vector<64x128xbf16> to vector<4x128xbf16>
    %156 = tpu.concatenate %140, %141, %142, %143, %144, %145, %146, %147, %148, %149, %150, %151, %152, %153, %154, %155 in 1 : vector<4x128xbf16>, vector<4x128xbf16>, vector<4x128xbf16>, vector<4x128xbf16>, vector<4x128xbf16>, vector<4x128xbf16>, vector<4x128xbf16>, vector<4x128xbf16>, vector<4x128xbf16>, vector<4x128xbf16>, vector<4x128xbf16>, vector<4x128xbf16>, vector<4x128xbf16>, vector<4x128xbf16>, vector<4x128xbf16>, vector<4x128xbf16> -> vector<4x2048xbf16>
    %c0_139 = arith.constant 0 : index
    %c0_140 = arith.constant 0 : index
    %157 = vector.load %arg7[%c0_139, %c0_140] : memref<2048x1024xbf16, #tpu.memory_space<vmem>>, vector<2048x1024xbf16>
    %cst_141 = arith.constant dense<0.000000e+00> : vector<4x1024xf32>
    %158 = tpu.matmul %156, %157, %cst_141 {dimension_numbers = #tpu.dot_dimension_numbers<[1], [0], [0], [1], [0, 0, 1, 1], [], []>} : vector<4x2048xbf16>, vector<2048x1024xbf16>, vector<4x1024xf32> -> vector<4x1024xf32>
    %c0_142 = arith.constant 0 : index
    %c0_143 = arith.constant 0 : index
    %159 = vector.load %arg8[%c0_142, %c0_143] : memref<1x1024xf32, #tpu.memory_space<vmem>>, vector<1x1024xf32>
    %160 = vector.broadcast %159 : vector<1x1024xf32> to vector<4x1024xf32>
    %161 = arith.addf %158, %160 : vector<4x1024xf32>
    %c0_144 = arith.constant 0 : index
    %c0_145 = arith.constant 0 : index
    %162 = vector.load %arg9[%c0_144, %c0_145] : memref<1x1024xf32, #tpu.memory_space<vmem>>, vector<1x1024xf32>
    %c0_146 = arith.constant 0 : index
    %c0_147 = arith.constant 0 : index
    %163 = vector.load %arg10[%c0_146, %c0_147] : memref<1x1024xf32, #tpu.memory_space<vmem>>, vector<1x1024xf32>
    %cst_148 = arith.constant dense<0.000000e+00> : vector<1024xf32>
    %164 = vector.multi_reduction <add>, %161, %cst_148 [0] : vector<4x1024xf32> to vector<1024xf32>
    %165 = vector.shape_cast %164 : vector<1024xf32> to vector<1x1024xf32>
    %cst_149 = arith.constant 4.000000e+00 : f32
    %166 = vector.broadcast %cst_149 : f32 to vector<1x1024xf32>
    %167 = arith.divf %165, %166 : vector<1x1024xf32>
    %168 = vector.broadcast %167 : vector<1x1024xf32> to vector<4x1024xf32>
    %169 = arith.subf %161, %168 : vector<4x1024xf32>
    %170 = vector.broadcast %167 : vector<1x1024xf32> to vector<4x1024xf32>
    %171 = arith.subf %161, %170 : vector<4x1024xf32>
    %172 = arith.mulf %169, %171 : vector<4x1024xf32>
    %cst_150 = arith.constant dense<0.000000e+00> : vector<1024xf32>
    %173 = vector.multi_reduction <add>, %172, %cst_150 [0] : vector<4x1024xf32> to vector<1024xf32>
    %174 = vector.shape_cast %173 : vector<1024xf32> to vector<1x1024xf32>
    %cst_151 = arith.constant 4.000000e+00 : f32
    %175 = vector.broadcast %cst_151 : f32 to vector<1x1024xf32>
    %176 = arith.divf %174, %175 : vector<1x1024xf32>
    %177 = vector.broadcast %167 : vector<1x1024xf32> to vector<4x1024xf32>
    %178 = arith.subf %161, %177 : vector<4x1024xf32>
    %cst_152 = arith.constant 9.99999974E-6 : f32
    %179 = vector.broadcast %cst_152 : f32 to vector<1x1024xf32>
    %180 = arith.addf %176, %179 : vector<1x1024xf32>
    %181 = math.rsqrt %180 : vector<1x1024xf32>
    %182 = vector.broadcast %181 : vector<1x1024xf32> to vector<4x1024xf32>
    %183 = arith.mulf %178, %182 : vector<4x1024xf32>
    %184 = vector.broadcast %162 : vector<1x1024xf32> to vector<4x1024xf32>
    %185 = arith.mulf %183, %184 : vector<4x1024xf32>
    %186 = vector.broadcast %163 : vector<1x1024xf32> to vector<4x1024xf32>
    %187 = arith.addf %185, %186 : vector<4x1024xf32>
    %cst_153 = arith.constant 2.000000e-01 : f32
    %188 = vector.broadcast %cst_153 : f32 to vector<4x1024xf32>
    %189 = arith.mulf %188, %187 : vector<4x1024xf32>
    %190 = arith.maximumf %187, %189 : vector<4x1024xf32>
    %191 = arith.truncf %190 : vector<4x1024xf32> to vector<4x1024xbf16>
    %c0_154 = arith.constant 0 : index
    %c0_155 = arith.constant 0 : index
    %192 = vector.load %arg11[%c0_154, %c0_155] : memref<1024x128xbf16, #tpu.memory_space<vmem>>, vector<1024x128xbf16>
    %cst_156 = arith.constant dense<0.000000e+00> : vector<4x128xf32>
    %193 = tpu.matmul %191, %192, %cst_156 {dimension_numbers = #tpu.dot_dimension_numbers<[1], [0], [0], [1], [0, 0, 1, 1], [], []>} : vector<4x1024xbf16>, vector<1024x128xbf16>, vector<4x128xf32> -> vector<4x128xf32>
    %c0_157 = arith.constant 0 : index
    %c0_158 = arith.constant 0 : index
    %194 = vector.load %arg12[%c0_157, %c0_158] : memref<1x128xf32, #tpu.memory_space<vmem>>, vector<1x128xf32>
    %195 = vector.broadcast %194 : vector<1x128xf32> to vector<4x128xf32>
    %196 = arith.addf %193, %195 : vector<4x128xf32>
    %197 = arith.negf %196 : vector<4x128xf32>
    %198 = math.exp %197 : vector<4x128xf32>
    %cst_159 = arith.constant 1.000000e+00 : f32
    %199 = vector.broadcast %cst_159 : f32 to vector<4x128xf32>
    %200 = arith.addf %199, %198 : vector<4x128xf32>
    %201 = arith.divf %199, %200 : vector<4x128xf32>
    %c0_160 = arith.constant 0 : index
    %c0_161 = arith.constant 0 : index
    %202 = vector.load %arg13[%c0_160, %c0_161] : memref<4x128xf32, #tpu.memory_space<vmem>>, vector<4x128xf32>
    tpu.vector_store %arg13[%c0_160, %c0_161], %201 {strides = array<i32>} : memref<4x128xf32, #tpu.memory_space<vmem>>, vector<4x128xf32>,
    return
  }
}

</mosaic_0001>

<bundles_post_ra>
// kernel: _lambda_.1
= control target key start
LH: loop header
LB: loop body
LE: loop exit
PB: predicated region body
PF: predicated region fallthrough
CT: control target
= control target key end

     0   :  { %vm436_vm0 = vcmask 1041408   ;;  %vm437_vm1 = vcmask 1045508   ;;  %vm546_vm3 = vcmask 1045504   ;;  %vm10130_vm4 = vcmask 1043456   ;;  %s17891_s1 = inlined_call_operand.vmem [shape: bf16[256,256], index: 1, kind: input, shape index: {}]   ;;  %s17892_s0 = inlined_call_operand.vmem [shape: bf16[64,256], index: 0, kind: input, shape index: {}]   ;;  %s17893_s3 = inlined_call_operand.vmem [shape: bf16[2304,128], index: 3, kind: input, shape index: {}]   ;;  %s17894_s2 = inlined_call_operand.vmem [shape: f32[1,256], index: 2, kind: input, shape index: {}]   ;;  %s17895_s4 = inlined_call_operand.vmem [shape: f32[1,128], index: 4, kind: input, shape index: {}, may-alias: {4,6,12}]   ;;  %s17896_s7 = inlined_call_operand.vmem [shape: bf16[2048,1024], index: 7, kind: input, shape index: {}]   ;;  %s17897_s5 = inlined_call_operand.vmem [shape: f32[1,128], index: 5, kind: input, shape index: {}]   ;;  %s17898_s6 = inlined_call_operand.vmem [shape: f32[1,128], index: 6, kind: input, shape index: {}, may-alias: {4,6,12}]   ;;  %s17899_s8 = inlined_call_operand.vmem [shape: f32[1,1024], index: 8, kind: input, shape index: {}, may-alias: {8,10}]   ;;  %s17900_s11 = inlined_call_operand.vmem [shape: bf16[1024,128], index: 11, kind: input, shape index: {}]   ;;  %s17901_s9 = inlined_call_operand.vmem [shape: f32[1,1024], index: 9, kind: input, shape index: {}]   ;;  %s17902_s10 = inlined_call_operand.vmem [shape: f32[1,1024], index: 10, kind: input, shape index: {}, may-alias: {8,10}]   ;;  %s17903_s12 = inlined_call_operand.vmem [shape: f32[1,128], index: 12, kind: input, shape index: {}, may-alias: {4,6,12}]   ;;  %s17904_s13 = inlined_call_operand.vmem [shape: f32[4,128], index: 13, kind: output, shape index: {}]  }
   0x1   :  { %v12902_v0 = vld [vmem:[%s17891_s1 + $0x74] ss:$8 sps:$4 sm:$0xff]   ;;  %v12904_v1 = vld [vmem:[%s17891_s1 + $0x70] ss:$8 sps:$4 sm:$0xff]   ;;  %v12905_v2 = vld [vmem:[%s17891_s1 + $0x64] ss:$8 sps:$4 sm:$0xff]  }
   0x2   :  { %297 = vmatprep.subr.bf16.mxu0 %v12902_v0  ;;  %v12907_v3 = vld [vmem:[%s17891_s1 + $0x60] ss:$8 sps:$4 sm:$0xff]   ;;  %v12908_v4 = vld [vmem:[%s17891_s1 + $0x54] ss:$8 sps:$4 sm:$0xff]   ;;  %v12910_v5 = vld [vmem:[%s17891_s1 + $0x50] ss:$8 sps:$4 sm:$0xff]  }
   0x3   :  { %298 = vmatpush1.bf16.msra.mxu0 %v12904_v1  ;;  %v12911_v6 = vld [vmem:[%s17891_s1 + $0x44] ss:$8 sps:$4 sm:$0xff]   ;;  %v12913_v7 = vld [vmem:[%s17891_s1 + $0x40] ss:$8 sps:$4 sm:$0xff]   ;;  %v12914_v8 = vld [vmem:[%s17891_s1 + $0x34] ss:$8 sps:$4 sm:$0xff]  }
   0x4   :  { %299 = vmatprep.subr.bf16.mxu0 %v12905_v2  ;;  %v12916_v9 = vld [vmem:[%s17891_s1 + $0x30] ss:$8 sps:$4 sm:$0xff]   ;;  %v12917_v10 = vld [vmem:[%s17891_s1 + $0x24] ss:$8 sps:$4 sm:$0xff]   ;;  %v12919_v11 = vld [vmem:[%s17891_s1 + $0x20] ss:$8 sps:$4 sm:$0xff]  }
   0x5   :  { %v12920_v12 = vld [vmem:[%s17891_s1 + $0x14] ss:$8 sps:$4 sm:$0xff]   ;;  %v12952_v13 = vld [vmem:[%s17892_s0 + $0x4] ss:$8 sps:$4 sm:$0xff]   ;;  %v12922_v14 = vld [vmem:[%s17891_s1 + $0x10] ss:$8 sps:$4 sm:$0xff]  }
   0x6   :  { %v12923_v15 = vld [vmem:[%s17891_s1 + $0x4] ss:$8 sps:$4 sm:$0xff]   ;;  %329 = vmatprep.mubr.bf16.mxu0 %v12952_v13  ;;  %v12925_v16 = vld [vmem:[%s17891_s1] ss:$8 sps:$4 sm:$0xff]   ;;  %v12926_v17 = vld [vmem:[%s17891_s1 + $0xf4] ss:$8 sps:$4 sm:$0xff]  }
   0x7   :  { %300 = vmatpush1.bf16.msra.mxu0 %v12907_v3  ;;  %v12962_v18 = vld [vmem:[%s17893_s3 + $0x78] sm:$0xff]   ;;  %v12964_v21 = vld [vmem:[%s17893_s3 + $0x70] sm:$0xff]   ;;  %v12929_v23 = vld [vmem:[%s17891_s1 + $0xe4] ss:$8 sps:$4 sm:$0xff]   ;;  %v13208_v2 = vmov 0  }
   0x8   :  { %301 = vmatprep.subr.bf16.mxu0 %v12908_v4  ;;  %v12963_v19 = vld [vmem:[%s17893_s3 + $0x38] sm:$0xff]   ;;  %12453 = vmatprep.subr.bf16.mxu1 %v12962_v18  ;;  %v12965_v22 = vld [vmem:[%s17893_s3 + $0x30] sm:$0xff]   ;;  %v12967_v24 = vld [vmem:[%s17893_s3 + $0x68] sm:$0xff]   ;;  %413 = vst [vmem:[#allocation2 + $0x58] sm:$0xff] %v13208_v2  ;;  %v13494_v4 = vcombine.high %v13208_v2, %v13208_v2 }
   0x9   :  { %v12928_v20 = vld [vmem:[%s17891_s1 + $0xf0] ss:$8 sps:$4 sm:$0xff]   ;;  %12454 = vmatpush3.bf16.msra.mxu1 %v12963_v19  ;;  %v12931_v25 = vld [vmem:[%s17891_s1 + $0xe0] ss:$8 sps:$4 sm:$0xff]   ;;  %v12932_v27 = vld [vmem:[%s17891_s1 + $0xd4] ss:$8 sps:$4 sm:$0xff]  }
   0xa   :  { %12455 = vmatprep.subr.bf16.mxu1 %v12964_v21  ;;  %v12969_v26 = vld [vmem:[%s17893_s3 + $0x28] sm:$0xff]   ;;  %v12971_v28 = vld [vmem:[%s17893_s3 + $0x60] sm:$0xff]   ;;  %v12934_v29 = vld [vmem:[%s17891_s1 + $0xd0] ss:$8 sps:$4 sm:$0xff]   ;;  %410 = vst [vmem:[#allocation2] sm:$0xff] %v13208_v2  ;;  %1944 = vmatprep.mubr.bf16.mxu1 %v13494_v4 }
   0xb   :  { %302 = vmatpush1.bf16.msra.mxu0 %v12910_v5  ;;  %v12973_v30 = vld [vmem:[%s17893_s3 + $0x20] sm:$0xff]   ;;  %v12975_v32 = vld [vmem:[%s17893_s3 + $0x58] sm:$0xff]   ;;  %v12970_v46 = vld [vmem:[%s17893_s3 + $0x170] sm:$0xff]   ;;  %412 = vst [vmem:[#allocation2 + $0x78] sm:$0xff] %v13208_v2 }
   0xc   :  { %303 = vmatprep.subr.bf16.mxu0 %v12911_v6  ;;  %v12935_v31 = vld [vmem:[%s17891_s1 + $0xc4] ss:$8 sps:$4 sm:$0xff]   ;;  %v12937_v33 = vld [vmem:[%s17891_s1 + $0xc0] ss:$8 sps:$4 sm:$0xff]   ;;  %v12938_v34 = vld [vmem:[%s17891_s1 + $0xb4] ss:$8 sps:$4 sm:$0xff]   ;;  %v13501_v6 = vcombine.low %v13208_v2, %v13208_v2 }
   0xd   :  { %12456 = vmatpush3.bf16.msra.mxu1 %v12965_v22  ;;  %v12940_v35 = vld [vmem:[%s17891_s1 + $0xb0] ss:$8 sps:$4 sm:$0xff]   ;;  %v12941_v36 = vld [vmem:[%s17891_s1 + $0xa4] ss:$8 sps:$4 sm:$0xff]   ;;  %v12943_v37 = vld [vmem:[%s17891_s1 + $0xa0] ss:$8 sps:$4 sm:$0xff]  }
   0xe   :  { %12457 = vmatprep.subr.bf16.mxu1 %v12967_v24  ;;  %v12944_v38 = vld [vmem:[%s17891_s1 + $0x94] ss:$8 sps:$4 sm:$0xff]   ;;  %v12946_v39 = vld [vmem:[%s17891_s1 + $0x90] ss:$8 sps:$4 sm:$0xff]   ;;  %v12947_v40 = vld [vmem:[%s17891_s1 + $0x84] ss:$8 sps:$4 sm:$0xff]  }
   0xf   :  { %304 = vmatpush1.bf16.msra.mxu0 %v12913_v7  ;;  %v12949_v41 = vld [vmem:[%s17891_s1 + $0x80] ss:$8 sps:$4 sm:$0xff]   ;;  %v12966_v42 = vld [vmem:[%s17893_s3 + $0x178] sm:$0xff]   ;;  %v12972_v47 = vld [vmem:[%s17893_s3 + $0x130] sm:$0xff]   ;;  %415 = vst [vmem:[#allocation2 + $0x8] sm:$0xff] %v13208_v2 }
  0x10   :  { %305 = vmatprep.subr.bf16.mxu0 %v12914_v8  ;;  %v12950_v43 = vld [vmem:[%s17892_s0] ss:$8 sps:$4 sm:$0xff]   ;;  %v12953_v44 = vld [vmem:[%s17892_s0 + $0x14] ss:$8 sps:$4 sm:$0xff]   ;;  %v12955_v49 = vld [vmem:[%s17892_s0 + $0x10] ss:$8 sps:$4 sm:$0xff]  }
  0x11   :  { %12458 = vmatpush3.bf16.msra.mxu1 %v12969_v26  ;;  %v12968_v45 = vld [vmem:[%s17893_s3 + $0x138] sm:$0xff]   ;;  %v12974_v48 = vld [vmem:[%s17893_s3 + $0x168] sm:$0xff]   ;;  %v12979_v56 = vld [vmem:[%s17893_s3 + $0x50] sm:$0xff]   ;;  %416 = vst [vmem:[#allocation2 + $0x70] sm:$0xff] %v13208_v2 }
  0x12   :  { %12459 = vmatprep.subr.bf16.mxu1 %v12971_v28  ;;  %v12956_v50 = vld [vmem:[%s17892_s0 + $0x24] ss:$8 sps:$4 sm:$0xff]   ;;  %v12958_v52 = vld [vmem:[%s17892_s0 + $0x20] ss:$8 sps:$4 sm:$0xff]   ;;  %v12959_v53 = vld [vmem:[%s17892_s0 + $0x34] ss:$8 sps:$4 sm:$0xff]  }
  0x13   :  { %306 = vmatpush1.bf16.msra.mxu0 %v12916_v9  ;;  %v12976_v51 = vld [vmem:[%s17893_s3 + $0x128] sm:$0xff]   ;;  %v12961_v54 = vld [vmem:[%s17892_s0 + $0x30] ss:$8 sps:$4 sm:$0xff]   ;;  %v12978_v58 = vld [vmem:[%s17893_s3 + $0x160] sm:$0xff]   ;;  %418 = vst [vmem:[#allocation2 + $0x88] sm:$0xff] %v13208_v2 }
  0x14   :  { %307 = vmatprep.subr.bf16.mxu0 %v12917_v10  ;;  %v12977_v55 = vld [vmem:[%s17893_s3 + $0x18] sm:$0xff]   ;;  %v12981_v57 = vld [vmem:[%s17893_s3 + $0x10] sm:$0xff]   ;;  %v12983_v59 = vld [vmem:[%s17893_s3 + $0x48] sm:$0xff]   ;;  %419 = vst [vmem:[#allocation2 + $0x40] sm:$0xff] %v13208_v2 }
  0x15   :  { %12460 = vmatpush3.bf16.msra.mxu1 %v12973_v30  ;;  %v12980_v60 = vld [vmem:[%s17893_s3 + $0x120] sm:$0xff]   ;;  %v12985_v61 = vld [vmem:[%s17893_s3 + $0x8] sm:$0xff]   ;;  %v12982_v62 = vld [vmem:[%s17893_s3 + $0x158] sm:$0xff]   ;;  %421 = vst [vmem:[#allocation2 + $0x28] sm:$0xff] %v13208_v2 }
  0x16   :  { %12461 = vmatprep.subr.bf16.mxu1 %v12975_v32  ;;  %v12987_v63 = vld [vmem:[%s17893_s3 + $0x40] sm:$0xff]   ;;  %v12984_v0 = vld [vmem:[%s17893_s3 + $0x118] sm:$0xff]   ;;  %422 = vst [vmem:[#allocation2 + $0x10] sm:$0xff] %v13208_v2  ;;  %424 = vst [vmem:[#allocation2 + $0x30] sm:$0xff] %v13208_v2 }
  0x17   :  { %308 = vmatpush1.bf16.msra.mxu0 %v12919_v11  ;;  %v12989_v1 = vld [vmem:[%s17893_s3] sm:$0xff]   ;;  %425 = vst [vmem:[#allocation2 + $0x18] sm:$0xff] %v13208_v2  ;;  %427 = vst [vmem:[#allocation2 + $0x60] sm:$0xff] %v13208_v2  ;;  %v12986_v3 = vld [vmem:[%s17893_s3 + $0x150] sm:$0xff]  }
  0x18   :  { %309 = vmatprep.subr.bf16.mxu0 %v12920_v12  ;;  %v12988_v5 = vld [vmem:[%s17893_s3 + $0x110] sm:$0xff]   ;;  %v12990_v7 = vld [vmem:[%s17893_s3 + $0x148] sm:$0xff]   ;;  %v12994_v9 = vld [vmem:[%s17893_s3 + $0xf8] sm:$0xff]  }
  0x19   :  { %12462 = vmatpush3.bf16.msra.mxu1 %v12977_v55  ;;  %v12991_v8 = vld [vmem:[%s17893_s3 + $0x108] sm:$0xff]   ;;  %v12995_v10 = vld [vmem:[%s17893_s3 + $0xb8] sm:$0xff]   ;;  %v12992_v11 = vld [vmem:[%s17893_s3 + $0x140] sm:$0xff]  }
  0x1a   :  { %12463 = vmatprep.subr.bf16.mxu1 %v12979_v56  ;;  %v12993_v12 = vld [vmem:[%s17893_s3 + $0x100] sm:$0xff]   ;;  %v12998_v13 = vld [vmem:[%s17893_s3 + $0xf0] sm:$0xff]   ;;  %v13003_v18 = vld [vmem:[%s17893_s3 + $0xa8] sm:$0xff]  }
  0x1b   :  { %310 = vmatpush1.bf16.msra.mxu0 %v12922_v14  ;;  %v12999_v14 = vld [vmem:[%s17893_s3 + $0xb0] sm:$0xff]   ;;  %v13006_v21 = vld [vmem:[%s17893_s3 + $0xe0] sm:$0xff]   ;;  %v13005_v24 = vld [vmem:[%s17893_s3 + $0x228] sm:$0xff]  }
  0x1c   :  { %311 = vmatprep.subr.bf16.mxu0 %v12923_v15  ;;  %v12996_v15 = vld [vmem:[%s17893_s3 + $0x278] sm:$0xff]   ;;  %v13000_v19 = vld [vmem:[%s17893_s3 + $0x270] sm:$0xff]   ;;  %v13007_v22 = vld [vmem:[%s17893_s3 + $0xa0] sm:$0xff]  }
  0x1d   :  { %12464 = vmatpush3.bf16.msra.mxu1 %v12981_v57  ;;  %v13011_v26 = vld [vmem:[%s17893_s3 + $0x98] sm:$0xff]   ;;  %v13009_v28 = vld [vmem:[%s17893_s3 + $0x220] sm:$0xff]   ;;  %v13015_v30 = vld [vmem:[%s17893_s3 + $0x90] sm:$0xff]  }
  0x1e   :  { %12465 = vmatprep.subr.bf16.mxu1 %v12983_v59  ;;  %v13013_v32 = vld [vmem:[%s17893_s3 + $0x218] sm:$0xff]   ;;  %vm13644_vm2 = vmor %vm436_vm0, %vm437_vm1 }
  0x1f   :  { %312 = vmatpush1.bf16.msra.mxu0 %v12925_v16  ;;  %v12997_v16 = vld [vmem:[%s17893_s3 + $0x238] sm:$0xff]  }
  0x20   :  { %313 = vmatprep.subr.bf16.mxu0 %v12926_v17  ;;  %v13002_v17 = vld [vmem:[%s17893_s3 + $0xe8] sm:$0xff]  }
  0x21   :  { %12466 = vmatpush3.bf16.msra.mxu1 %v12985_v61 }
  0x22   :  { %12467 = vmatprep.subr.bf16.mxu1 %v12987_v63 }
  0x23   :  { %314 = vmatpush2.bf16.msra.mxu0 %v12928_v20  ;;  %v13001_v20 = vld [vmem:[%s17893_s3 + $0x230] sm:$0xff]  }
  0x24   :  { %315 = vmatprep.subr.bf16.mxu0 %v12929_v23  ;;  %v13004_v23 = vld [vmem:[%s17893_s3 + $0x268] sm:$0xff]  }
  0x25   :  { %12468 = vmatpush3.bf16.msra.mxu1 %v12989_v1 }
  0x26   :  { %12493 = vmatprep.subr.bf16.mxu1 %v12994_v9 }
  0x27   :  { %316 = vmatpush2.bf16.msra.mxu0 %v12931_v25  ;;  %v13010_v25 = vld [vmem:[%s17893_s3 + $0xd8] sm:$0xff]  }
  0x28   :  { %317 = vmatprep.subr.bf16.mxu0 %v12932_v27  ;;  %1945 = vmatmul.mubr.bf16.vlgmr.msra.gmra.mxu1 %v13501_v6  ;;  %v13008_v27 = vld [vmem:[%s17893_s3 + $0x260] sm:$0xff]  }
  0x29   :  { %12494 = vmatpush3.bf16.msra.mxu1 %v12995_v10 }
  0x2a   :  { %12495 = vmatprep.subr.bf16.mxu1 %v12998_v13 }
  0x2b   :  { %318 = vmatpush2.bf16.msra.mxu0 %v12934_v29  ;;  %v13014_v29 = vld [vmem:[%s17893_s3 + $0xd0] sm:$0xff]  }
  0x2c   :  { %319 = vmatprep.subr.bf16.mxu0 %v12935_v31  ;;  %v13012_v31 = vld [vmem:[%s17893_s3 + $0x258] sm:$0xff]  }
  0x2d   :  { %12496 = vmatpush3.bf16.msra.mxu1 %v12999_v14 }
  0x2e   :  { %12497 = vmatprep.subr.bf16.mxu1 %v13002_v17 }
  0x2f   :  { %320 = vmatpush2.bf16.msra.mxu0 %v12937_v33  ;;  %v13016_v33 = vld [vmem:[%s17893_s3 + $0x250] sm:$0xff]  }
  0x30   :  { %321 = vmatprep.subr.bf16.mxu0 %v12938_v34  ;;  %v13018_v34 = vld [vmem:[%s17893_s3 + $0xc8] sm:$0xff]  }
  0x31   :  { %12498 = vmatpush3.bf16.msra.mxu1 %v13003_v18 }
  0x32   :  { %12499 = vmatprep.subr.bf16.mxu1 %v13006_v21 }
  0x33   :  { %322 = vmatpush2.bf16.msra.mxu0 %v12940_v35  ;;  %v13017_v35 = vld [vmem:[%s17893_s3 + $0x210] sm:$0xff]  }
  0x34   :  { %323 = vmatprep.subr.bf16.mxu0 %v12941_v36  ;;  %v13019_v36 = vld [vmem:[%s17893_s3 + $0x88] sm:$0xff]  }
  0x35   :  { %12500 = vmatpush3.bf16.msra.mxu1 %v13007_v22 }
  0x36   :  { %12501 = vmatprep.subr.bf16.mxu1 %v13010_v25 }
  0x37   :  { %324 = vmatpush2.bf16.msra.mxu0 %v12943_v37  ;;  %v13020_v37 = vld [vmem:[%s17893_s3 + $0x248] sm:$0xff]  }
  0x38   :  { %325 = vmatprep.subr.bf16.mxu0 %v12944_v38  ;;  %v13024_v38 = vld [vmem:[%s17893_s3 + $0xc0] sm:$0xff]  }
  0x39   :  { %12502 = vmatpush3.bf16.msra.mxu1 %v13011_v26 }
  0x3a   :  { %12503 = vmatprep.subr.bf16.mxu1 %v13014_v29 }
  0x3b   :  { %326 = vmatpush2.bf16.msra.mxu0 %v12946_v39  ;;  %v13021_v39 = vld [vmem:[%s17893_s3 + $0x208] sm:$0xff]  }
  0x3c   :  { %327 = vmatprep.subr.bf16.mxu0 %v12947_v40  ;;  %v13025_v40 = vld [vmem:[%s17893_s3 + $0x80] sm:$0xff]  }
  0x3d   :  { %12504 = vmatpush3.bf16.msra.mxu1 %v13015_v30 }
  0x3e   :  { %12505 = vmatprep.subr.bf16.mxu1 %v13018_v34 }
  0x3f   :  { %328 = vmatpush2.bf16.msra.mxu0 %v12949_v41  ;;  %v13026_v41 = vld [vmem:[%s17893_s3 + $0x240] sm:$0xff]  }
  0x40   :  { %12533 = vmatprep.subr.bf16.mxu0 %v12966_v42  ;;  %v13027_v42 = vld [vmem:[%s17893_s3 + $0x200] sm:$0xff]  }
  0x41   :  { %12506 = vmatpush3.bf16.msra.mxu1 %v13019_v36 }
  0x42   :  { %330 = vmatmul.mubr.bf16.vlgmr.msra.gmra.mxu0 %v12950_v43  ;;  %12507 = vmatprep.subr.bf16.mxu1 %v13024_v38  ;;  %v13030_v43 = vld [vmem:[%s17893_s3 + $0x1f8] sm:$0xff]  }
  0x43   :  { %339 = vmatprep.mubr.bf16.mxu0 %v12953_v44  ;;  %12534 = vmatpush3.bf16.msra.mxu0 %v12968_v45  ;;  %v13032_v44 = vld [vmem:[%s17893_s3 + $0x378] sm:$0xff]   ;;  %v87_v45 = vlaneseq }
  0x44   :  { %12535 = vmatprep.subr.bf16.mxu0 %v12970_v46 }
  0x45   :  { %12508 = vmatpush3.bf16.msra.mxu1 %v13025_v40  ;;  %v13621_v46 = vshrl.u32 %v87_v45, 7 }
  0x46   :  { %12573 = vmatprep.subr.bf16.mxu1 %v13030_v43 }
  0x47   :  { %12536 = vmatpush3.bf16.msra.mxu0 %v12972_v47  ;;  %17915 = vst [vmem:[#allocation3_spill] sm:$0xff] %v13621_v46  ;;  %v13624_v47 = vsub.s32 0, %v13621_v46 }
  0x48   :  { %12537 = vmatprep.subr.bf16.mxu0 %v12974_v48  ;;  %v85_v48 = vld [vmem:[%s17894_s2] sm:$0x3] }
  0x49   :  { %17916 = vst [vmem:[#allocation4_spill] sm:$0xff] %v13624_v47 }
  0x4a   :  { %340 = vmatmul.mubr.bf16.gmra.mxu0 %v12955_v49  ;;  %v13630_v49 = vsub.s32 1, %v13621_v46 }
  0x4b   :  { %349 = vmatprep.mubr.bf16.mxu0 %v12956_v50  ;;  %12538 = vmatpush3.bf16.msra.mxu0 %v12976_v51  ;;  %v13633_v50 = vrot.slane %v85_v48, %v13624_v47 }
  0x4c   :  { %12539 = vmatprep.subr.bf16.mxu0 %v12978_v58  ;;  %17917 = vst [vmem:[#allocation5_spill] sm:$0xff] %v13630_v49  ;;  %v13636_v51 = vrot.slane %v85_v48, %v13630_v49 }
  0x4f   :  { %12540 = vmatpush3.bf16.msra.mxu0 %v12980_v60 }
  0x50   :  { %12541 = vmatprep.subr.bf16.mxu0 %v12982_v62 }
  0x52   :  { %350 = vmatmul.mubr.bf16.gmra.mxu0 %v12958_v52 }
  0x53   :  { %359 = vmatprep.mubr.bf16.mxu0 %v12959_v53  ;;  %12542 = vmatpush3.bf16.msra.mxu0 %v12984_v0 }
  0x54   :  { %12543 = vmatprep.subr.bf16.mxu0 %v12986_v3 }
  0x57   :  { %12544 = vmatpush3.bf16.msra.mxu0 %v12988_v5 }
  0x58   :  { %12545 = vmatprep.subr.bf16.mxu0 %v12990_v7 }
  0x5a   :  { %360 = vmatmul.mubr.bf16.gmra.mxu0 %v12961_v54 }
  0x5b   :  { %2074 = vmatprep.mubr.bf16.mxu0 %v13494_v4  ;;  %12546 = vmatpush3.bf16.msra.mxu0 %v12991_v8 }
  0x5c   :  { %12547 = vmatprep.subr.bf16.mxu0 %v12992_v11 }
  0x5f   :  { %12548 = vmatpush3.bf16.msra.mxu0 %v12993_v12 }
  0x60   :  { %12613 = vmatprep.subr.bf16.mxu0 %v12996_v15 }
  0x62   :  { %2075 = vmatmul.mubr.bf16.vlgmr.msra.gmra.mxu0 %v13501_v6 }
  0x63   :  { %12614 = vmatpush3.bf16.msra.mxu0 %v12997_v16 }
  0x64   :  { %12615 = vmatprep.subr.bf16.mxu0 %v13000_v19 }
  0x67   :  { %12616 = vmatpush3.bf16.msra.mxu0 %v13001_v20 }
  0x68   :  { %12617 = vmatprep.subr.bf16.mxu0 %v13004_v23 }
  0x6b   :  { %12618 = vmatpush3.bf16.msra.mxu0 %v13005_v24 }
  0x6c   :  { %12619 = vmatprep.subr.bf16.mxu0 %v13008_v27 }
  0x6f   :  { %12620 = vmatpush3.bf16.msra.mxu0 %v13009_v28 }
  0x70   :  { %12621 = vmatprep.subr.bf16.mxu0 %v13012_v31 }
  0x73   :  { %12622 = vmatpush3.bf16.msra.mxu0 %v13013_v32 }
  0x74   :  { %12623 = vmatprep.subr.bf16.mxu0 %v13016_v33 }
  0x77   :  { %12624 = vmatpush3.bf16.msra.mxu0 %v13017_v35 }
  0x78   :  { %12625 = vmatprep.subr.bf16.mxu0 %v13020_v37 }
  0x7b   :  { %12626 = vmatpush3.bf16.msra.mxu0 %v13021_v39 }
  0x7c   :  { %12627 = vmatprep.subr.bf16.mxu0 %v13026_v41 }
  0x7f   :  { %12628 = vmatpush3.bf16.msra.mxu0 %v13027_v42 }
  0x80   :  { %12693 = vmatprep.subr.bf16.mxu0 %v13032_v44 }
 0x102   :  { %v331_v52 = vpop.f32.mrf.mxu0 }
 0x103   :  { %v332_v53 = vadd.f32 %v331_v52, %v13633_v50 }
 0x104   :  { %v333_v54 = vpop.f32.mrf.mxu0 }
 0x105   :  { %v370_v55 = vmul.f32 0.2, %v332_v53  ;;  %v334_v56 = vadd.f32 %v333_v54, %v13636_v51 }
 0x106   :  { %v335_v57 = vpop.f32.mrf.mxu0 }
 0x107   :  { %v371_v58 = vmul.f32 0.2, %v334_v56  ;;  %v336_v59 = vadd.f32 %v335_v57, %v13633_v50  ;;  %v386_v61 = vmax.f32 %v332_v53, %v370_v55 }
 0x108   :  { %v337_v60 = vpop.f32.mrf.mxu0 }
 0x109   :  { %v387_v62 = vmax.f32 %v334_v56, %v371_v58  ;;  %v372_v63 = vmul.f32 0.2, %v336_v59  ;;  %v338_v0 = vadd.f32 %v337_v60, %v13636_v51 }
 0x10a   :  { %v341_v1 = vpop.f32.mrf.mxu0 }
 0x10b   :  { %v12445_v3 = vpack.c.bf16 %v387_v62, %v386_v61  ;;  %v373_v5 = vmul.f32 0.2, %v338_v0  ;;  %v342_v7 = vadd.f32 %v341_v1, %v13633_v50  ;;  %v388_v8 = vmax.f32 %v336_v59, %v372_v63 }
 0x10c   :  { %v343_v9 = vpop.f32.mrf.mxu0 }
 0x10d   :  { %v439_v10 = vrot.slane %v12445_v3, 6  ;;  %v389_v11 = vmax.f32 %v338_v0, %v373_v5  ;;  %v374_v12 = vmul.f32 0.2, %v342_v7  ;;  %v344_v13 = vadd.f32 %v343_v9, %v13636_v51  ;;  %v514_v9 = vld [vmem:[#allocation2 + $0x78] sm:$0x33] }
 0x10e   :  { %v345_v14 = vpop.f32.mrf.mxu0 }
 0x10f   :  { %448 = vst [vmem:[#allocation2 + $0x58] sm:$0xcc] %v439_v10  ;;  %v12446_v15 = vpack.c.bf16 %v389_v11, %v388_v8  ;;  %v375_v16 = vmul.f32 0.2, %v344_v13  ;;  %v440_v17 = vrot.slane %v439_v10, 4  ;;  %v346_v19 = vadd.f32 %v345_v14, %v13633_v50 }
 0x110   :  { %v347_v20 = vpop.f32.mrf.mxu0  ;;  %v390_v22 = vmax.f32 %v342_v7, %v374_v12  ;;  %v513_v8 = vld [vmem:[#allocation2] sm:$0xcc] }
 0x111   :  { %v441_v21 = vrot.slane %v12446_v15, 6  ;;  %v391_v23 = vmax.f32 %v344_v13, %v375_v16  ;;  %v348_v24 = vadd.f32 %v347_v20, %v13636_v51  ;;  %v376_v25 = vmul.f32 0.2, %v346_v19 }
 0x112   :  { %v351_v26 = vpop.f32.mrf.mxu0 }
 0x113   :  { %v13652_v27 = vsel %vm13644_vm2, %v440_v17, %v441_v21  ;;  %v443_v28 = vrot.slane %v441_v21, 4  ;;  %v12447_v29 = vpack.c.bf16 %v391_v23, %v390_v22  ;;  %v377_v30 = vmul.f32 0.2, %v348_v24 }
 0x114   :  { %v352_v31 = vadd.f32 %v351_v26, %v13633_v50  ;;  %v353_v32 = vpop.f32.mrf.mxu0  ;;  %v392_v34 = vmax.f32 %v346_v19, %v376_v25  ;;  %v11163_v22 = vcombine.high %v513_v8, %v13208_v2  ;;  %v11165_v23 = vcombine.high %v514_v9, %v514_v9 }
 0x115   :  { %450 = vst [vmem:[#allocation2 + $0x8] sm:$0x33] %v443_v28  ;;  %v459_v33 = vrot.slane %v12447_v29, 6  ;;  %v393_v35 = vmax.f32 %v348_v24, %v377_v30  ;;  %v354_v36 = vadd.f32 %v353_v32, %v13636_v51 }
 0x116   :  { %v378_v37 = vmul.f32 0.2, %v352_v31  ;;  %v355_v38 = vpop.f32.mrf.mxu0  ;;  %v516_v39 = vld [vmem:[#allocation2 + $0x58] sm:$0xff] }
 0x117   :  { %468 = vst [vmem:[#allocation2 + $0x70] sm:$0xcc] %v459_v33  ;;  %v12448_v40 = vpack.c.bf16 %v393_v35, %v392_v34  ;;  %v379_v41 = vmul.f32 0.2, %v354_v36  ;;  %v356_v42 = vadd.f32 %v355_v38, %v13633_v50  ;;  %v460_v43 = vrot.slane %v459_v33, 4 }
 0x118   :  { %v357_v44 = vpop.f32.mrf.mxu0  ;;  %v13658_v45 = vcombine.high %v516_v39, %v13652_v27  ;;  %v13661_v48 = vcombine.low %v516_v39, %v13652_v27  ;;  %v394_v53 = vmax.f32 %v352_v31, %v378_v37  ;;  %v551_v37 = vrot.slane %v11165_v23, 2 }
 0x119   :  { %v461_v52 = vrot.slane %v12448_v40, 6  ;;  %v395_v54 = vmax.f32 %v354_v36, %v379_v41  ;;  %v358_v55 = vadd.f32 %v357_v44, %v13636_v51  ;;  %v380_v56 = vmul.f32 0.2, %v356_v42 }
 0x11a   :  { %1952 = vmatprep.mubr.bf16.mxu1 %v13658_v45  ;;  %v361_v57 = vpop.f32.mrf.mxu0  ;;  %v550_v36 = vrot.slane %v11163_v22, 2 }
 0x11b   :  { %v13667_v58 = vsel %vm13644_vm2, %v460_v43, %v461_v52  ;;  %v463_v59 = vrot.slane %v461_v52, 4  ;;  %v12449_v60 = vpack.c.bf16 %v395_v54, %v394_v53  ;;  %1953 = vmatmul.mubr.bf16.gmra.mxu1 %v13661_v48  ;;  %v381_v61 = vmul.f32 0.2, %v358_v55  ;;  %v518_v53 = vld [vmem:[#allocation2 + $0x58] sm:$0xcc] }
 0x11c   :  { %v520_v62 = vld [vmem:[#allocation2 + $0x8] sm:$0xff]  ;;  %v362_v63 = vadd.f32 %v361_v57, %v13633_v50  ;;  %v363_v0 = vpop.f32.mrf.mxu0  ;;  %v396_v10 = vmax.f32 %v356_v42, %v380_v56  ;;  %v11164_v56 = vcombine.low %v514_v9, %v514_v9 }
 0x11d   :  { %470 = vst [vmem:[#allocation2 + $0x88] sm:$0x33] %v463_v59  ;;  %v479_v1 = vrot.slane %v12449_v60, 6  ;;  %v13672_v3 = vcombine.high %v13652_v27, %v520_v62  ;;  %v13675_v5 = vcombine.low %v13652_v27, %v520_v62  ;;  %v364_v7 = vadd.f32 %v363_v0, %v13636_v51  ;;  %v519_v41 = vld [vmem:[#allocation2 + $0x8] sm:$0x33] }
 0x11e   :  { %v397_v11 = vmax.f32 %v358_v55, %v381_v61  ;;  %v521_v12 = vld [vmem:[#allocation2 + $0x70] sm:$0xff]  ;;  %v382_v13 = vmul.f32 0.2, %v362_v63  ;;  %v365_v14 = vpop.f32.mrf.mxu0  ;;  %v11162_v55 = vcombine.low %v513_v8, %v13208_v2  ;;  %v11173_v57 = vcombine.high %v519_v41, %v519_v41 }
 0x11f   :  { %488 = vst [vmem:[#allocation2 + $0x40] sm:$0xcc] %v479_v1  ;;  %2082 = vmatprep.mubr.bf16.mxu0 %v13672_v3  ;;  %v13680_v15 = vcombine.high %v521_v12, %v13667_v58  ;;  %v13683_v16 = vcombine.low %v521_v12, %v13667_v58  ;;  %v383_v17 = vmul.f32 0.2, %v364_v7  ;;  %v366_v25 = vadd.f32 %v365_v14, %v13633_v50  ;;  %v523_v14 = vld [vmem:[#allocation2 + $0x70] sm:$0xcc] }
 0x120   :  { %v12450_v19 = vpack.c.bf16 %v397_v11, %v396_v10  ;;  %2083 = vmatmul.mubr.bf16.gmra.mxu0 %v13675_v5  ;;  %v398_v20 = vmax.f32 %v362_v63, %v382_v13  ;;  %v367_v21 = vpop.f32.mrf.mxu0  ;;  %v480_v28 = vrot.slane %v479_v1, 4  ;;  %v552_v59 = vsel %vm546_vm3, %v550_v36, %v551_v37  ;;  %v13031_v13 = vld [vmem:[%s17893_s3 + $0x1b8] sm:$0xff]  }
 0x121   :  { %1960 = vmatprep.mubr.bf16.mxu1 %v13680_v15  ;;  %v399_v24 = vmax.f32 %v364_v7, %v383_v17  ;;  %v368_v26 = vadd.f32 %v367_v21, %v13636_v51  ;;  %v384_v31 = vmul.f32 0.2, %v366_v25  ;;  %v11171_v61 = vcombine.high %v518_v53, %v13652_v27 }
 0x122   :  { %v481_v29 = vrot.slane %v12450_v19, 6  ;;  %v547_v0 = vrot.slane %v11162_v55, 2  ;;  %v548_v1 = vrot.slane %v11164_v56, 2  ;;  %v586_v7 = vrot.slane %v11173_v57, 2 }
 0x123   :  { %1961 = vmatmul.mubr.bf16.gmra.mxu1 %v13683_v16  ;;  %v12451_v30 = vpack.c.bf16 %v399_v24, %v398_v20  ;;  %v385_v32 = vmul.f32 0.2, %v368_v26  ;;  %v400_v39 = vmax.f32 %v366_v25, %v384_v31  ;;  %v585_v11 = vrot.slane %v11171_v61, 2  ;;  %v13035_v20 = vld [vmem:[%s17893_s3 + $0x1f0] sm:$0xff]  }
 0x124   :  { %v13693_v33 = vsel %vm13644_vm2, %v480_v28, %v481_v29  ;;  %v483_v34 = vrot.slane %v481_v29, 4  ;;  %v525_v35 = vld [vmem:[#allocation2 + $0x88] sm:$0xff]  ;;  %v11172_v18 = vcombine.low %v519_v41, %v519_v41  ;;  %v549_v12 = vsel %vm546_vm3, %v547_v0, %v548_v1  ;;  %v13036_v24 = vld [vmem:[%s17893_s3 + $0x1b0] sm:$0xff]  }
 0x125   :  { %v13696_v38 = vcombine.high %v13667_v58, %v525_v35  ;;  %v13699_v50 = vcombine.low %v13667_v58, %v525_v35  ;;  %v499_v51 = vrot.slane %v12451_v30, 6  ;;  %v401_v42 = vmax.f32 %v368_v26, %v385_v32  ;;  %v524_v10 = vld [vmem:[#allocation2 + $0x88] sm:$0x33]  ;;  %v13037_v31 = vld [vmem:[%s17893_s3 + $0x370] sm:$0xff]  }
 0x126   :  { %490 = vst [vmem:[#allocation2 + $0x28] sm:$0x33] %v483_v34  ;;  %v632_v40 = vld [vmem:[#allocation2 + $0x40] sm:$0xff]  ;;  %v587_v17 = vsel %vm546_vm3, %v585_v11, %v586_v7  ;;  %v11181_v19 = vcombine.high %v524_v10, %v524_v10  ;;  %v11170_v21 = vcombine.low %v518_v53, %v13652_v27  ;;  %v11179_v22 = vcombine.high %v523_v14, %v13667_v58  ;;  %v13039_v26 = vld [vmem:[%s17893_s3 + $0x1e8] sm:$0xff]   ;;  %v13034_v27 = vld [vmem:[%s17893_s3 + $0x338] sm:$0xff]  }
 0x127   :  { %2090 = vmatprep.mubr.bf16.mxu0 %v13696_v38  ;;  %v13703_v43 = vcombine.high %v632_v40, %v13693_v33  ;;  %v13706_v44 = vcombine.low %v632_v40, %v13693_v33  ;;  %508 = vst [vmem:[#allocation2 + $0x10] sm:$0xcc] %v499_v51  ;;  %v500_v52 = vrot.slane %v499_v51, 4  ;;  %v12452_v54 = vpack.c.bf16 %v401_v42, %v400_v39  ;;  %v13040_v34 = vld [vmem:[%s17893_s3 + $0x1a8] sm:$0xff]   ;;  %v634_v36 = vld [vmem:[#allocation2 + $0x40] sm:$0xcc] }
 0x128   :  { %2091 = vmatmul.mubr.bf16.gmra.mxu0 %v13699_v50  ;;  %v583_v23 = vrot.slane %v11172_v18, 2  ;;  %v621_v25 = vrot.slane %v11181_v19, 2  ;;  %v582_v28 = vrot.slane %v11170_v21, 2  ;;  %v620_v30 = vrot.slane %v11179_v22, 2  ;;  %v13045_v39 = vld [vmem:[%s17893_s3 + $0x1e0] sm:$0xff]   ;;  %v13038_v40 = vld [vmem:[%s17893_s3 + $0x330] sm:$0xff]  }
 0x129   :  { %1968 = vmatprep.mubr.bf16.mxu1 %v13703_v43  ;;  %v501_v60 = vrot.slane %v12452_v54, 6  ;;  %v11180_v35 = vcombine.low %v524_v10, %v524_v10  ;;  %v11178_v41 = vcombine.low %v523_v14, %v13667_v58  ;;  %v13042_v42 = vld [vmem:[%s17893_s3 + $0x368] sm:$0xff]   ;;  %v13046_v54 = vld [vmem:[%s17893_s3 + $0x1a0] sm:$0xff]   ;;  %v13049_v58 = vld [vmem:[%s17893_s3 + $0x1d8] sm:$0xff]  }
 0x12a   :  { %v584_v32 = vsel %vm546_vm3, %v582_v28, %v583_v23  ;;  %v13753_v37 = vsel %vm546_vm3, %v620_v30, %v621_v25  ;;  %v13050_v7 = vld [vmem:[%s17893_s3 + $0x198] sm:$0xff]   ;;  %v13054_v18 = vld [vmem:[%s17893_s3 + $0x1d0] sm:$0xff]   ;;  %v13064_v30 = vld [vmem:[%s17893_s3 + $0x1c0] sm:$0xff]  }
 0x12b   :  { %1969 = vmatmul.mubr.bf16.gmra.mxu1 %v13706_v44  ;;  %v13716_v62 = vsel %vm13644_vm2, %v500_v52, %v501_v60  ;;  %v503_v63 = vrot.slane %v501_v60, 4  ;;  %v11187_v52 = vcombine.high %v634_v36, %v13693_v33  ;;  %v618_v53 = vrot.slane %v11180_v35, 2  ;;  %v13044_v60 = vld [vmem:[%s17893_s3 + $0x328] sm:$0xff]   ;;  %v13052_v14 = vld [vmem:[%s17893_s3 + $0x358] sm:$0xff]   ;;  %v13055_v21 = vld [vmem:[%s17893_s3 + $0x190] sm:$0xff]  }
 0x12c   :  { %2009 = vmatprep.mubr.bf16.mxu1 %v552_v59  ;;  %v617_v59 = vrot.slane %v11178_v41, 2  ;;  %v13053_v23 = vld [vmem:[%s17893_s3 + $0x318] sm:$0xff]   ;;  %v13062_v35 = vld [vmem:[%s17893_s3 + $0x348] sm:$0xff]  }
 0x12d   :  { %v636_v2 = vld [vmem:[#allocation2 + $0x28] sm:$0xff]  ;;  %510 = vst [vmem:[#allocation2 + $0x30] sm:$0x33] %v503_v63  ;;  %v660_v61 = vrot.slane %v11187_v52, 2  ;;  %v13047_v63 = vld [vmem:[%s17893_s3 + $0x360] sm:$0xff]   ;;  %v13069_v52 = vld [vmem:[%s17893_s3 + $0x2b8] sm:$0xff]  }
 0x12e   :  { %v13719_v8 = vcombine.high %v13693_v33, %v636_v2  ;;  %v13722_v9 = vcombine.low %v13693_v33, %v636_v2  ;;  %v635_v29 = vld [vmem:[#allocation2 + $0x28] sm:$0x33]  ;;  %v674_v55 = vld [vmem:[#allocation2 + $0x10] sm:$0xcc]  ;;  %v13782_v2 = vsel %vm546_vm3, %v617_v59, %v618_v53 }
 0x12f   :  { %v11189_v51 = vcombine.high %v635_v29, %v635_v29  ;;  %v11195_v0 = vcombine.high %v674_v55, %v13716_v62  ;;  %v11188_v10 = vcombine.low %v635_v29, %v635_v29  ;;  %v13059_v29 = vld [vmem:[%s17893_s3 + $0x188] sm:$0xff]   ;;  %v13074_v59 = vld [vmem:[%s17893_s3 + $0x470] sm:$0xff]  }
 0x130   :  { %2098 = vmatprep.mubr.bf16.mxu0 %v13719_v8  ;;  %v13063_v41 = vld [vmem:[%s17893_s3 + $0x308] sm:$0xff]  }
 0x131   :  { %2099 = vmatmul.mubr.bf16.gmra.mxu0 %v13722_v9  ;;  %v661_v57 = vrot.slane %v11189_v51, 2  ;;  %v13068_v51 = vld [vmem:[%s17893_s3 + $0x2f8] sm:$0xff]  }
 0x132   :  { %2204 = vmatprep.mubr.bf16.mxu0 %v587_v17 }
 0x133   :  { %2010 = vmatmul.mubr.bf16.vlgmr.msra.gmra.mxu1 %v549_v12  ;;  %v13789_v11 = vsel %vm546_vm3, %v660_v61, %v661_v57  ;;  %v13048_v12 = vld [vmem:[%s17893_s3 + $0x320] sm:$0xff]   ;;  %v13073_v57 = vld [vmem:[%s17893_s3 + $0x2b0] sm:$0xff]   ;;  %v12549_v61 = vpop.f32.mrf.mxu0 }
 0x134   :  { %12574 = vmatpush3.bf16.msra.mxu1 %v13031_v13  ;;  %2017 = vmatprep.mubr.bf16.mxu1 %v587_v17  ;;  %v675_v56 = vld [vmem:[#allocation2 + $0x30] sm:$0x33]  ;;  %v11186_v13 = vcombine.low %v634_v36, %v13693_v33  ;;  %v700_v17 = vrot.slane %v11195_v0, 2  ;;  %v13058_v33 = vld [vmem:[%s17893_s3 + $0x1c8] sm:$0xff]   ;;  %v13065_v36 = vld [vmem:[%s17893_s3 + $0x180] sm:$0xff]  }
 0x135   :  { %12575 = vmatprep.subr.bf16.mxu1 %v13035_v20  ;;  %v11197_v1 = vcombine.high %v675_v56, %v675_v56  ;;  %v658_v20 = vrot.slane %v11188_v10, 2  ;;  %v11196_v25 = vcombine.low %v675_v56, %v675_v56  ;;  %v13070_v56 = vld [vmem:[%s17893_s3 + $0x478] sm:$0xff]   ;;  %v13078_v0 = vld [vmem:[%s17893_s3 + $0x468] sm:$0xff]  }
 0x136   :  { %v657_v22 = vrot.slane %v11186_v13, 2 }
 0x137   :  { %v701_v19 = vrot.slane %v11197_v1, 2  ;;  %v12550_v1 = vpop.f32.mrf.mxu0 }
 0x138   :  { %12576 = vmatpush3.bf16.msra.mxu1 %v13036_v24  ;;  %v11194_v24 = vcombine.low %v674_v55, %v13716_v62  ;;  %v13067_v55 = vld [vmem:[%s17893_s3 + $0x300] sm:$0xff]   ;;  %v13903_v10 = vadd.f32 %v12550_v1, %v12549_v61 }
 0x139   :  { %2205 = vmatmul.mubr.bf16.vlgmr.msra.gmra.mxu0 %v584_v32  ;;  %12577 = vmatprep.subr.bf16.mxu1 %v13039_v26  ;;  %v13056_v26 = vld [vmem:[%s17893_s3 + $0x350] sm:$0xff]   ;;  %v13818_v28 = vsel %vm546_vm3, %v700_v17, %v701_v19  ;;  %v13083_v19 = vld [vmem:[%s17893_s3 + $0x420] sm:$0xff]  }
 0x13a   :  { %2212 = vmatprep.mubr.bf16.mxu0 %v13753_v37  ;;  %12694 = vmatpush3.bf16.msra.mxu0 %v13034_v27  ;;  %v13821_v27 = vsel %vm546_vm3, %v657_v22, %v658_v20  ;;  %v13088_v17 = vld [vmem:[%s17893_s3 + $0x2d0] sm:$0xff]   ;;  %v13086_v20 = vld [vmem:[%s17893_s3 + $0x458] sm:$0xff]  }
 0x13b   :  { %12695 = vmatprep.subr.bf16.mxu0 %v13037_v31  ;;  %2018 = vmatmul.mubr.bf16.gmra.mxu1 %v584_v32  ;;  %v13057_v31 = vld [vmem:[%s17893_s3 + $0x310] sm:$0xff]   ;;  %v697_v32 = vrot.slane %v11194_v24, 2  ;;  %v13093_v24 = vld [vmem:[%s17893_s3 + $0x288] sm:$0xff]  }
 0x13c   :  { %12578 = vmatpush3.bf16.msra.mxu1 %v13040_v34  ;;  %2025 = vmatprep.mubr.bf16.mxu1 %v13753_v37  ;;  %v698_v34 = vrot.slane %v11196_v25, 2  ;;  %v13096_v25 = vld [vmem:[%s17893_s3 + $0x2c0] sm:$0xff]  }
 0x13d   :  { %12579 = vmatprep.subr.bf16.mxu1 %v13045_v39  ;;  %v12469_v39 = vpop.f32.mrf.mxu1 }
 0x13e   :  { %12696 = vmatpush3.bf16.msra.mxu0 %v13038_v40  ;;  %v13846_v40 = vsel %vm546_vm3, %v697_v32, %v698_v34  ;;  %v13095_v32 = vld [vmem:[%s17893_s3 + $0x408] sm:$0xff]   ;;  %v13098_v34 = vld [vmem:[%s17893_s3 + $0x440] sm:$0xff]  }
 0x13f   :  { %12697 = vmatprep.subr.bf16.mxu0 %v13042_v42  ;;  %v12470_v42 = vpop.f32.mrf.mxu1 }
 0x140   :  { %12580 = vmatpush3.bf16.msra.mxu1 %v13046_v54  ;;  %v13857_v53 = vadd.f32 %v12470_v42, %v12469_v39  ;;  %v13072_v54 = vld [vmem:[%s17893_s3 + $0x2f0] sm:$0xff]   ;;  %v13104_v39 = vld [vmem:[%s17893_s3 + $0x3e8] sm:$0xff]   ;;  %v13108_v42 = vld [vmem:[%s17893_s3 + $0x3d8] sm:$0xff]  }
 0x141   :  { %2213 = vmatmul.mubr.bf16.gmra.mxu0 %v13782_v2  ;;  %12581 = vmatprep.subr.bf16.mxu1 %v13049_v58  ;;  %v13076_v58 = vld [vmem:[%s17893_s3 + $0x2e8] sm:$0xff]   ;;  %v12472_v1 = vpop.f32.mrf.mxu1 }
 0x142   :  { %2220 = vmatprep.mubr.bf16.mxu0 %v13789_v11  ;;  %12698 = vmatpush3.bf16.msra.mxu0 %v13044_v60  ;;  %v13080_v60 = vld [vmem:[%s17893_s3 + $0x2e0] sm:$0xff]  }
 0x143   :  { %12699 = vmatprep.subr.bf16.mxu0 %v13047_v63  ;;  %2026 = vmatmul.mubr.bf16.gmra.mxu1 %v13782_v2  ;;  %v13075_v63 = vld [vmem:[%s17893_s3 + $0x430] sm:$0xff]  }
 0x144   :  { %12582 = vmatpush3.bf16.msra.mxu1 %v13050_v7  ;;  %2033 = vmatprep.mubr.bf16.mxu1 %v13789_v11  ;;  %v13081_v7 = vld [vmem:[%s17893_s3 + $0x2a0] sm:$0xff]  }
 0x145   :  { %12583 = vmatprep.subr.bf16.mxu1 %v13054_v18  ;;  %v672_v18 = vld [vmem:[#allocation2 + $0x10] sm:$0xff] }
 0x146   :  { %12700 = vmatpush3.bf16.msra.mxu0 %v13048_v12  ;;  %v13079_v12 = vld [vmem:[%s17893_s3 + $0x428] sm:$0xff]   ;;  %v11193_v13 = vcombine.high %v672_v18, %v13716_v62  ;;  %v11192_v22 = vcombine.low %v672_v18, %v13716_v62  ;;  %v12473_v18 = vpop.f32.mrf.mxu1 }
 0x147   :  { %12701 = vmatprep.subr.bf16.mxu0 %v13052_v14  ;;  %v13085_v14 = vld [vmem:[%s17893_s3 + $0x298] sm:$0xff]  }
 0x148   :  { %12584 = vmatpush3.bf16.msra.mxu1 %v13055_v21  ;;  %v13089_v21 = vld [vmem:[%s17893_s3 + $0x290] sm:$0xff]  }
 0x149   :  { %2221 = vmatmul.mubr.bf16.gmra.mxu0 %v13821_v27  ;;  %12585 = vmatprep.subr.bf16.mxu1 %v13058_v33  ;;  %v13092_v33 = vld [vmem:[%s17893_s3 + $0x2c8] sm:$0xff]  }
 0x14a   :  { %12702 = vmatpush3.bf16.msra.mxu0 %v13053_v23  ;;  %2228 = vmatprep.mubr.bf16.mxu0 %v13818_v28  ;;  %v13090_v23 = vld [vmem:[%s17893_s3 + $0x450] sm:$0xff]  }
 0x14b   :  { %12703 = vmatprep.subr.bf16.mxu0 %v13056_v26  ;;  %2034 = vmatmul.mubr.bf16.gmra.mxu1 %v13821_v27  ;;  %v13091_v26 = vld [vmem:[%s17893_s3 + $0x410] sm:$0xff]  }
 0x14c   :  { %12586 = vmatpush3.bf16.msra.mxu1 %v13059_v29  ;;  %2139 = vmatprep.mubr.bf16.mxu1 %v13658_v45  ;;  %v13066_v45 = vld [vmem:[%s17893_s3 + $0x340] sm:$0xff]   ;;  %v13094_v29 = vld [vmem:[%s17893_s3 + $0x448] sm:$0xff]  }
 0x14d   :  { %12587 = vmatprep.subr.bf16.mxu1 %v13064_v30  ;;  %v13097_v30 = vld [vmem:[%s17893_s3 + $0x280] sm:$0xff]  }
 0x14e   :  { %12704 = vmatpush3.bf16.msra.mxu0 %v13057_v31  ;;  %v13100_v31 = vld [vmem:[%s17893_s3 + $0x3f8] sm:$0xff]  }
 0x14f   :  { %12705 = vmatprep.subr.bf16.mxu0 %v13062_v35  ;;  %v13102_v35 = vld [vmem:[%s17893_s3 + $0x3f0] sm:$0xff]  }
 0x150   :  { %12588 = vmatpush3.bf16.msra.mxu1 %v13065_v36  ;;  %v13099_v36 = vld [vmem:[%s17893_s3 + $0x400] sm:$0xff]  }
 0x151   :  { %2229 = vmatmul.mubr.bf16.gmra.mxu0 %v13846_v40  ;;  %12653 = vmatprep.subr.bf16.mxu1 %v13068_v51  ;;  %v13103_v51 = vld [vmem:[%s17893_s3 + $0x3b0] sm:$0xff]  }
 0x152   :  { %12706 = vmatpush3.bf16.msra.mxu0 %v13063_v41  ;;  %2334 = vmatprep.mubr.bf16.mxu0 %v13680_v15  ;;  %v13105_v41 = vld [vmem:[%s17893_s3 + $0x3a8] sm:$0xff]  }
 0x153   :  { %12707 = vmatprep.subr.bf16.mxu0 %v13066_v45  ;;  %2140 = vmatmul.mubr.bf16.vlgmr.msra.gmra.mxu1 %v13661_v48  ;;  %v13071_v48 = vld [vmem:[%s17893_s3 + $0x438] sm:$0xff]   ;;  %v676_v45 = vld [vmem:[#allocation2 + $0x30] sm:$0xff] }
 0x154   :  { %12654 = vmatpush3.bf16.msra.mxu1 %v13069_v52  ;;  %2147 = vmatprep.mubr.bf16.mxu1 %v13680_v15  ;;  %v13077_v15 = vld [vmem:[%s17893_s3 + $0x2a8] sm:$0xff]   ;;  %v11199_v52 = vcombine.high %v13716_v62, %v676_v45 }
 0x155   :  { %12655 = vmatprep.subr.bf16.mxu1 %v13072_v54  ;;  %v13111_v54 = vld [vmem:[%s17893_s3 + $0x390] sm:$0xff]  }
 0x156   :  { %12708 = vmatpush3.bf16.msra.mxu0 %v13067_v55  ;;  %v13112_v55 = vld [vmem:[%s17893_s3 + $0x3c8] sm:$0xff]  }
 0x157   :  { %12773 = vmatprep.subr.bf16.mxu0 %v13070_v56  ;;  %v11198_v56 = vcombine.low %v13716_v62, %v676_v45  ;;  %v13115_v62 = vld [vmem:[%s17893_s3 + $0x380] sm:$0xff]  }
 0x158   :  { %12656 = vmatpush3.bf16.msra.mxu1 %v13073_v57  ;;  %v13113_v57 = vld [vmem:[%s17893_s3 + $0x388] sm:$0xff]  }
 0x159   :  { %2335 = vmatmul.mubr.bf16.vlgmr.msra.gmra.mxu0 %v13683_v16  ;;  %12657 = vmatprep.subr.bf16.mxu1 %v13076_v58  ;;  %v715_v58 = vld [vmem:[#allocation2 + $0x18] sm:$0xcc] }
 0x15a   :  { %2342 = vmatprep.mubr.bf16.mxu0 %v13703_v43  ;;  %12774 = vmatpush3.bf16.msra.mxu0 %v13071_v48  ;;  %v716_v48 = vld [vmem:[#allocation2 + $0x60] sm:$0x33] }
 0x15b   :  { %12775 = vmatprep.subr.bf16.mxu0 %v13074_v59  ;;  %2148 = vmatmul.mubr.bf16.gmra.mxu1 %v13683_v16  ;;  %v13084_v16 = vld [vmem:[%s17893_s3 + $0x2d8] sm:$0xff]   ;;  %v13204_v59 = vld [vmem:[#allocation2] sm:$0xff] }
 0x15c   :  { %12658 = vmatpush3.bf16.msra.mxu1 %v13077_v15  ;;  %2155 = vmatprep.mubr.bf16.mxu1 %v13703_v43  ;;  %v13082_v43 = vld [vmem:[%s17893_s3 + $0x460] sm:$0xff]   ;;  %v11205_v15 = vcombine.high %v716_v48, %v716_v48  ;;  %v11202_v61 = vcombine.low %v715_v58, %v13204_v59 }
 0x15d   :  { %12659 = vmatprep.subr.bf16.mxu1 %v13080_v60 }
 0x15e   :  { %12776 = vmatpush3.bf16.msra.mxu0 %v13075_v63  ;;  %v742_v60 = vrot.slane %v11205_v15, 2  ;;  %v11204_v63 = vcombine.low %v716_v48, %v716_v48 }
 0x15f   :  { %12777 = vmatprep.subr.bf16.mxu0 %v13078_v0 }
 0x160   :  { %12660 = vmatpush3.bf16.msra.mxu1 %v13081_v7  ;;  %v12552_v7 = vpop.f32.mrf.mxu0 }
 0x161   :  { %2343 = vmatmul.mubr.bf16.gmra.mxu0 %v13706_v44  ;;  %12661 = vmatprep.subr.bf16.mxu1 %v13084_v16 }
 0x162   :  { %12778 = vmatpush3.bf16.msra.mxu0 %v13079_v12  ;;  %2350 = vmatprep.mubr.bf16.mxu0 %v11193_v13  ;;  %v12553_v16 = vpop.f32.mrf.mxu0 }
 0x163   :  { %12779 = vmatprep.subr.bf16.mxu0 %v13082_v43  ;;  %2156 = vmatmul.mubr.bf16.gmra.mxu1 %v13706_v44  ;;  %v13087_v44 = vld [vmem:[%s17893_s3 + $0x418] sm:$0xff]  }
 0x164   :  { %12662 = vmatpush3.bf16.msra.mxu1 %v13085_v14  ;;  %2163 = vmatprep.mubr.bf16.mxu1 %v11193_v13 }
 0x165   :  { %12663 = vmatprep.subr.bf16.mxu1 %v13088_v17 }
 0x166   :  { %12780 = vmatpush3.bf16.msra.mxu0 %v13083_v19 }
 0x167   :  { %12781 = vmatprep.subr.bf16.mxu0 %v13086_v20 }
 0x168   :  { %12664 = vmatpush3.bf16.msra.mxu1 %v13089_v21 }
 0x169   :  { %2351 = vmatmul.mubr.bf16.gmra.mxu0 %v11192_v22  ;;  %12665 = vmatprep.subr.bf16.mxu1 %v13092_v33 }
 0x16a   :  { %12782 = vmatpush3.bf16.msra.mxu0 %v13087_v44  ;;  %2358 = vmatprep.mubr.bf16.mxu0 %v13494_v4 }
 0x16b   :  { %12783 = vmatprep.subr.bf16.mxu0 %v13090_v23  ;;  %2164 = vmatmul.mubr.bf16.gmra.mxu1 %v11192_v22 }
 0x16c   :  { %12666 = vmatpush3.bf16.msra.mxu1 %v13093_v24  ;;  %2269 = vmatprep.mubr.bf16.mxu1 %v13672_v3  ;;  %v13101_v3 = vld [vmem:[%s17893_s3 + $0x3b8] sm:$0xff]  }
 0x16d   :  { %12667 = vmatprep.subr.bf16.mxu1 %v13096_v25 }
 0x16e   :  { %12784 = vmatpush3.bf16.msra.mxu0 %v13091_v26 }
 0x16f   :  { %12785 = vmatprep.subr.bf16.mxu0 %v13094_v29 }
 0x170   :  { %12668 = vmatpush3.bf16.msra.mxu1 %v13097_v30 }
 0x171   :  { %2359 = vmatmul.mubr.bf16.gmra.mxu0 %v13501_v6  ;;  %12733 = vmatprep.subr.bf16.mxu1 %v13100_v31 }
 0x172   :  { %12786 = vmatpush3.bf16.msra.mxu0 %v13095_v32  ;;  %2464 = vmatprep.mubr.bf16.mxu0 %v13696_v38 }
 0x173   :  { %12787 = vmatprep.subr.bf16.mxu0 %v13098_v34  ;;  %2270 = vmatmul.mubr.bf16.vlgmr.msra.gmra.mxu1 %v13675_v5  ;;  %v13106_v5 = vld [vmem:[%s17893_s3 + $0x3e0] sm:$0xff]  }
 0x174   :  { %12734 = vmatpush3.bf16.msra.mxu1 %v13101_v3  ;;  %2277 = vmatprep.mubr.bf16.mxu1 %v13696_v38  ;;  %v13107_v38 = vld [vmem:[%s17893_s3 + $0x3a0] sm:$0xff]  }
 0x175   :  { %12735 = vmatprep.subr.bf16.mxu1 %v13102_v35 }
 0x176   :  { %12788 = vmatpush3.bf16.msra.mxu0 %v13099_v36 }
 0x178   :  { %12736 = vmatpush3.bf16.msra.mxu1 %v13103_v51  ;;  %v14053_v51 = vld [vmem:[%s17895_s4] ss:$0 sm:$0xff] }
 0x179   :  { %2465 = vmatmul.mubr.bf16.vlgmr.msra.gmra.mxu0 %v13699_v50  ;;  %12737 = vmatprep.subr.bf16.mxu1 %v13104_v39 }
 0x17a   :  { %2472 = vmatprep.mubr.bf16.mxu0 %v13719_v8 }
 0x17b   :  { %2278 = vmatmul.mubr.bf16.gmra.mxu1 %v13699_v50  ;;  %v13109_v50 = vld [vmem:[%s17893_s3 + $0x398] sm:$0xff]  }
 0x17c   :  { %12738 = vmatpush3.bf16.msra.mxu1 %v13105_v41  ;;  %2285 = vmatprep.mubr.bf16.mxu1 %v13719_v8  ;;  %v13110_v8 = vld [vmem:[%s17893_s3 + $0x3d0] sm:$0xff]  }
 0x17d   :  { %12739 = vmatprep.subr.bf16.mxu1 %v13106_v5 }
 0x180   :  { %12740 = vmatpush3.bf16.msra.mxu1 %v13107_v38 }
 0x181   :  { %2473 = vmatmul.mubr.bf16.gmra.mxu0 %v13722_v9  ;;  %12741 = vmatprep.subr.bf16.mxu1 %v13108_v42  ;;  %v1947_v42 = vadd.f32 %v13857_v53, %v14053_v51 }
 0x182   :  { %2480 = vmatprep.mubr.bf16.mxu0 %v11199_v52 }
 0x183   :  { %2286 = vmatmul.mubr.bf16.gmra.mxu1 %v13722_v9  ;;  %v13114_v9 = vld [vmem:[%s17893_s3 + $0x3c0] sm:$0xff]  }
 0x184   :  { %12742 = vmatpush3.bf16.msra.mxu1 %v13109_v50  ;;  %2293 = vmatprep.mubr.bf16.mxu1 %v11199_v52  ;;  %v12474_v52 = vadd.f32 %v12473_v18, %v12472_v1 }
 0x185   :  { %12743 = vmatprep.subr.bf16.mxu1 %v13110_v8 }
 0x188   :  { %12744 = vmatpush3.bf16.msra.mxu1 %v13111_v54 }
 0x189   :  { %2481 = vmatmul.mubr.bf16.gmra.mxu0 %v11198_v56  ;;  %12745 = vmatprep.subr.bf16.mxu1 %v13112_v55 }
 0x18a   :  { %2488 = vmatprep.mubr.bf16.mxu0 %v13494_v4  ;;  %v11203_v4 = vcombine.high %v715_v58, %v13204_v59 }
 0x18b   :  { %2294 = vmatmul.mubr.bf16.gmra.mxu1 %v11198_v56 }
 0x18c   :  { %12746 = vmatpush3.bf16.msra.mxu1 %v13113_v57  ;;  %2399 = vmatprep.mubr.bf16.mxu1 %v13753_v37  ;;  %v741_v37 = vrot.slane %v11203_v4, 2  ;;  %v12554_v4 = vadd.f32 %v12553_v16, %v12552_v7 }
 0x18d   :  { %12747 = vmatprep.subr.bf16.mxu1 %v13114_v9  ;;  %v1950_v9 = vadd.f32 %v12474_v52, %v14053_v51 }
 0x18e   :  { %v743_v0 = vsel %vm546_vm3, %v741_v37, %v742_v60 }
 0x190   :  { %12748 = vmatpush3.bf16.msra.mxu1 %v13115_v62 }
 0x191   :  { %2489 = vmatmul.mubr.bf16.gmra.mxu0 %v13501_v6  ;;  %v738_v6 = vrot.slane %v11202_v61, 2 }
 0x193   :  { %2400 = vmatmul.mubr.bf16.vlgmr.msra.gmra.mxu1 %v13782_v2  ;;  %v739_v2 = vrot.slane %v11204_v63, 2 }
 0x194   :  { %2407 = vmatprep.mubr.bf16.mxu1 %v13789_v11 }
 0x195   :  { %v740_v11 = vsel %vm546_vm3, %v738_v6, %v739_v2 }
 0x19b   :  { %2408 = vmatmul.mubr.bf16.gmra.mxu1 %v13821_v27 }
 0x19c   :  { %2415 = vmatprep.mubr.bf16.mxu1 %v13818_v28 }
 0x1a3   :  { %2416 = vmatmul.mubr.bf16.gmra.mxu1 %v13846_v40 }
 0x1a4   :  { %2423 = vmatprep.mubr.bf16.mxu1 %v743_v0 }
 0x1ab   :  { %2424 = vmatmul.mubr.bf16.gmra.mxu1 %v740_v11 }
 0x1db   :  { %v12475_v27 = vpop.f32.mrf.mxu1 }
 0x1dd   :  { %v12476_v28 = vpop.f32.mrf.mxu1 }
 0x1de   :  { %v12477_v12 = vadd.f32 %v12476_v28, %v12475_v27 }
 0x1df   :  { %v12478_v43 = vpop.f32.mrf.mxu1 }
 0x1e0   :  { %v12555_v13 = vpop.f32.mrf.mxu0  ;;  %v1955_v61 = vadd.f32 %v12477_v12, %v14053_v51 }
 0x1e1   :  { %v12479_v14 = vpop.f32.mrf.mxu1 }
 0x1e2   :  { %v12556_v17 = vpop.f32.mrf.mxu0  ;;  %v12480_v63 = vadd.f32 %v12479_v14, %v12478_v43 }
 0x1e3   :  { %v12557_v19 = vadd.f32 %v12556_v17, %v12555_v13  ;;  %v12481_v20 = vpop.f32.mrf.mxu1 }
 0x1e4   :  { %v12558_v40 = vpop.f32.mrf.mxu0  ;;  %v1958_v7 = vadd.f32 %v12480_v63, %v14053_v51 }
 0x1e5   :  { %v12482_v21 = vpop.f32.mrf.mxu1 }
 0x1e6   :  { %v12559_v33 = vpop.f32.mrf.mxu0  ;;  %v12483_v44 = vadd.f32 %v12482_v21, %v12481_v20 }
 0x1e7   :  { %v12484_v22 = vpop.f32.mrf.mxu1  ;;  %v12560_v17 = vadd.f32 %v12559_v33, %v12558_v40  ;;  %v2814_v40 = vld [vmem:[%s17896_s7 + $0x5c0] sm:$0xff] }
 0x1e8   :  { %v12561_v23 = vpop.f32.mrf.mxu0  ;;  %v1963_v43 = vadd.f32 %v12483_v44, %v14053_v51 }
 0x1e9   :  { %v12485_v24 = vpop.f32.mrf.mxu1 }
 0x1ea   :  { %v12562_v25 = vpop.f32.mrf.mxu0  ;;  %v12486_v33 = vadd.f32 %v12485_v24, %v12484_v22  ;;  %v2678_v22 = vld [vmem:[%s17896_s7 + $0x180] sm:$0xff] }
 0x1eb   :  { %v14038_v26 = vadd.f32 %v12562_v25, %v12561_v23  ;;  %v12487_v29 = vpop.f32.mrf.mxu1  ;;  %v2686_v23 = vld [vmem:[%s17896_s7 + $0x1c0] sm:$0xff] }
 0x1ec   :  { %v14040_v30 = vpop.f32.mrf.mxu0  ;;  %v2682_v24 = vld [vmem:[%s17896_s7 + $0x1a0] sm:$0xff] }
 0x1ed   :  { %v12488_v31 = vpop.f32.mrf.mxu1 }
 0x1ee   :  { %v14042_v32 = vpop.f32.mrf.mxu0  ;;  %v14044_v34 = vadd.f32 %v12488_v31, %v12487_v29  ;;  %v2818_v31 = vld [vmem:[%s17896_s7 + $0x5e0] sm:$0xff] }
 0x1ef   :  { %v14046_v3 = vpop.f32.mrf.mxu1  ;;  %v12566_v63 = vadd.f32 %v14042_v32, %v14040_v30  ;;  %v2798_v30 = vld [vmem:[%s17896_s7 + $0x540] sm:$0xff] }
 0x1f1   :  { %v12567_v35 = vpop.f32.mrf.mxu0  ;;  %v14048_v36 = vpop.f32.mrf.mxu1 }
 0x1f2   :  { %v12492_v32 = vadd.f32 %v14048_v36, %v14046_v3  ;;  %v2662_v36 = vld [vmem:[%s17896_s7 + $0x100] sm:$0xff] }
 0x1f3   :  { %v12568_v39 = vpop.f32.mrf.mxu0  ;;  %v12509_v41 = vpop.f32.mrf.mxu1 }
 0x1f4   :  { %v14055_v5 = vadd.f32 %v12568_v39, %v12567_v35 }
 0x1f5   :  { %v14057_v38 = vpop.f32.mrf.mxu0  ;;  %v12510_v45 = vpop.f32.mrf.mxu1 }
 0x1f6   :  { %v12511_v50 = vadd.f32 %v12510_v45, %v12509_v41  ;;  %v11539_v45 = vcombine.low %v2814_v40, %v2818_v31 }
 0x1f7   :  { %v14061_v8 = vpop.f32.mrf.mxu0  ;;  %v12512_v54 = vpop.f32.mrf.mxu1 }
 0x1f8   :  { %v2012_v55 = vadd.f32 %v12511_v50, %v1947_v42  ;;  %v11540_v42 = vcombine.high %v2814_v40, %v2818_v31  ;;  %v2666_v40 = vld [vmem:[%s17896_s7 + $0x120] sm:$0xff] }
 0x1f9   :  { %v12629_v56 = vpop.f32.mrf.mxu0  ;;  %v12513_v57 = vpop.f32.mrf.mxu1 }
 0x1fa   :  { %v12514_v62 = vadd.f32 %v12513_v57, %v12512_v54  ;;  %v14065_v58 = vadd.f32 %v13903_v10, %v2012_v55  ;;  %8857 = vmatprep.subr.bf16.mxu0 %v11540_v42  ;;  %v2806_v55 = vld [vmem:[%s17896_s7 + $0x580] sm:$0xff] }
 0x1fb   :  { %v12630_v48 = vpop.f32.mrf.mxu0  ;;  %v12515_v59 = vpop.f32.mrf.mxu1  ;;  %8858 = vmatpush1.bf16.msra.mxu0 %v11539_v45 }
 0x1fc   :  { %v14067_v15 = vadd.f32 %v12630_v48, %v12629_v56  ;;  %v2015_v53 = vadd.f32 %v12514_v62, %v1950_v9  ;;  %v1966_v56 = vadd.f32 %v12486_v33, %v14053_v51  ;;  %v11404_v62 = vcombine.high %v2678_v22, %v2682_v24  ;;  %v2810_v48 = vld [vmem:[%s17896_s7 + $0x5a0] sm:$0xff] }
 0x1fd   :  { %v14069_v37 = vpop.f32.mrf.mxu0  ;;  %v12516_v60 = vpop.f32.mrf.mxu1  ;;  %v2790_v33 = vld [vmem:[%s17896_s7 + $0x500] sm:$0xff] }
 0x1fe   :  { %v12517_v0 = vadd.f32 %v12516_v60, %v12515_v59  ;;  %v14072_v6 = vadd.f32 %v12554_v4, %v2015_v53  ;;  %v11403_v53 = vcombine.low %v2678_v22, %v2682_v24  ;;  %v11531_v60 = vcombine.low %v2806_v55, %v2810_v48 }
 0x1ff   :  { %v14074_v2 = vpop.f32.mrf.mxu0  ;;  %v12518_v11 = vpop.f32.mrf.mxu1  ;;  %v12572_v24 = vadd.f32 %v14061_v8, %v14057_v38 }
 0x200   :  { %v2020_v10 = vadd.f32 %v12517_v0, %v1955_v61  ;;  %v11532_v61 = vcombine.high %v2806_v55, %v2810_v48 }
 0x201   :  { %v12635_v1 = vpop.f32.mrf.mxu0  ;;  %v12519_v18 = vpop.f32.mrf.mxu1 }
 0x202   :  { %v12520_v27 = vadd.f32 %v12519_v18, %v12518_v11  ;;  %v14077_v16 = vadd.f32 %v12557_v19, %v2020_v10  ;;  %v2690_v19 = vld [vmem:[%s17896_s7 + $0x1e0] sm:$0xff]  ;;  %8859 = vmatprep.subr.bf16.mxu0 %v11532_v61 }
 0x203   :  { %v12636_v28 = vpop.f32.mrf.mxu0  ;;  %v12521_v13 = vpop.f32.mrf.mxu1  ;;  %v11412_v44 = vcombine.high %v2686_v23, %v2690_v19  ;;  %v11411_v41 = vcombine.low %v2686_v23, %v2690_v19  ;;  %v2674_v18 = vld [vmem:[%s17896_s7 + $0x160] sm:$0xff]  ;;  %8860 = vmatpush1.bf16.msra.mxu0 %v11531_v60 }
 0x204   :  { %v14079_v20 = vadd.f32 %v12636_v28, %v12635_v1  ;;  %v2023_v12 = vadd.f32 %v12520_v27, %v1958_v7  ;;  %v2670_v1 = vld [vmem:[%s17896_s7 + $0x140] sm:$0xff] }
 0x205   :  { %v14082_v14 = vpop.f32.mrf.mxu0  ;;  %v12522_v21 = vpop.f32.mrf.mxu1  ;;  %8816 = vmatprep.subr.bf16.mxu1 %v11412_v44  ;;  %v11396_v27 = vcombine.high %v2670_v1, %v2674_v18  ;;  %v2802_v28 = vld [vmem:[%s17896_s7 + $0x560] sm:$0xff] }
 0x206   :  { %v12523_v25 = vadd.f32 %v12522_v21, %v12521_v13  ;;  %v14093_v29 = vadd.f32 %v12560_v17, %v2023_v12  ;;  %8817 = vmatpush1.bf16.msra.mxu1 %v11411_v41  ;;  %v11395_v12 = vcombine.low %v2670_v1, %v2674_v18  ;;  %v11524_v21 = vcombine.high %v2798_v30, %v2802_v28  ;;  %v2794_v41 = vld [vmem:[%s17896_s7 + $0x520] sm:$0xff] }
 0x207   :  { %v14098_v35 = vpop.f32.mrf.mxu0  ;;  %v12524_v39 = vpop.f32.mrf.mxu1  ;;  %8818 = vmatprep.subr.bf16.mxu1 %v11404_v62  ;;  %v11516_v22 = vcombine.high %v2790_v33, %v2794_v41  ;;  %v2782_v62 = vld [vmem:[%s17896_s7 + $0x4c0] sm:$0xff] }
 0x208   :  { %v2028_v52 = vadd.f32 %v12523_v25, %v1963_v43  ;;  %v11523_v43 = vcombine.low %v2798_v30, %v2802_v28  ;;  %8861 = vmatprep.subr.bf16.mxu0 %v11524_v21  ;;  %v1974_v25 = vadd.f32 %v12492_v32, %v14053_v51  ;;  %v2646_v18 = vld [vmem:[%s17896_s7 + $0x80] sm:$0xff] }
 0x209   :  { %v14100_v50 = vpop.f32.mrf.mxu0  ;;  %v12525_v54 = vpop.f32.mrf.mxu1  ;;  %v2650_v30 = vld [vmem:[%s17896_s7 + $0xa0] sm:$0xff] }
 0x20a   :  { %v12526_v57 = vadd.f32 %v12525_v54, %v12524_v39  ;;  %v14113_v9 = vadd.f32 %v14038_v26, %v2028_v52  ;;  %v1971_v26 = vadd.f32 %v14044_v34, %v14053_v51  ;;  %8819 = vmatpush1.bf16.msra.mxu1 %v11403_v53  ;;  %8862 = vmatpush1.bf16.msra.mxu0 %v11523_v43  ;;  %v2774_v32 = vld [vmem:[%s17896_s7 + $0x480] sm:$0xff] }
 0x20b   :  { %v14118_v59 = vpop.f32.mrf.mxu0  ;;  %v12527_v4 = vpop.f32.mrf.mxu1  ;;  %8820 = vmatprep.subr.bf16.mxu1 %v11396_v27  ;;  %v11388_v39 = vcombine.high %v2662_v36, %v2666_v40  ;;  %v11387_v52 = vcombine.low %v2662_v36, %v2666_v40  ;;  %v11515_v54 = vcombine.low %v2790_v33, %v2794_v41  ;;  %8863 = vmatprep.subr.bf16.mxu0 %v11516_v22  ;;  %v2778_v28 = vld [vmem:[%s17896_s7 + $0x4a0] sm:$0xff] }
 0x20c   :  { %v2031_v0 = vadd.f32 %v12526_v57, %v1966_v56  ;;  %v2654_v56 = vld [vmem:[%s17896_s7 + $0xc0] sm:$0xff]  ;;  %v11372_v27 = vcombine.high %v2646_v18, %v2650_v30  ;;  %v11371_v43 = vcombine.low %v2646_v18, %v2650_v30  ;;  %v11499_v21 = vcombine.low %v2774_v32, %v2778_v28 }
 0x20d   :  { %v14124_v11 = vpop.f32.mrf.mxu0  ;;  %v12528_v10 = vpop.f32.mrf.mxu1  ;;  %v2658_v57 = vld [vmem:[%s17896_s7 + $0xe0] sm:$0xff] }
 0x20e   :  { %v12529_v34 = vadd.f32 %v12528_v10, %v12527_v4  ;;  %v14137_v7 = vadd.f32 %v12566_v63, %v2031_v0  ;;  %8821 = vmatpush1.bf16.msra.mxu1 %v11395_v12  ;;  %8864 = vmatpush1.bf16.msra.mxu0 %v11515_v54  ;;  %v11380_v48 = vcombine.high %v2654_v56, %v2658_v57  ;;  %v2786_v4 = vld [vmem:[%s17896_s7 + $0x4e0] sm:$0xff] }
 0x20f   :  { %v14142_v13 = vpop.f32.mrf.mxu0  ;;  %v12530_v17 = vpop.f32.mrf.mxu1  ;;  %8822 = vmatprep.subr.bf16.mxu1 %v11388_v39  ;;  %v11379_v61 = vcombine.low %v2654_v56, %v2658_v57  ;;  %v11507_v63 = vcombine.low %v2782_v62, %v2786_v4  ;;  %v11508_v0 = vcombine.high %v2782_v62, %v2786_v4  ;;  %v2638_v33 = vld [vmem:[%s17896_s7 + $0x40] sm:$0xff] }
 0x210   :  { %v2036_v23 = vadd.f32 %v12529_v34, %v1971_v26  ;;  %v2770_v39 = vld [vmem:[%s17896_s7 + $0x460] sm:$0xff] }
 0x211   :  { %v14144_v19 = vpop.f32.mrf.mxu0  ;;  %v12531_v3 = vpop.f32.mrf.mxu1  ;;  %8865 = vmatprep.subr.bf16.mxu0 %v11508_v0  ;;  %v2630_v56 = vld [vmem:[%s17896_s7] sm:$0xff] }
 0x212   :  { %v12532_v44 = vadd.f32 %v12531_v3, %v12530_v17  ;;  %v14157_v31 = vadd.f32 %v14055_v5, %v2036_v23  ;;  %8823 = vmatpush1.bf16.msra.mxu1 %v11387_v52  ;;  %8866 = vmatpush1.bf16.msra.mxu0 %v11507_v63  ;;  %v11500_v23 = vcombine.high %v2774_v32, %v2778_v28  ;;  %v2634_v57 = vld [vmem:[%s17896_s7 + $0x20] sm:$0xff] }
 0x213   :  { %v14162_v45 = vpop.f32.mrf.mxu0  ;;  %v12589_v42 = vpop.f32.mrf.mxu1  ;;  %8824 = vmatprep.subr.bf16.mxu1 %v11380_v48  ;;  %v12634_v3 = vadd.f32 %v14074_v2, %v14069_v37  ;;  %v2766_v37 = vld [vmem:[%s17896_s7 + $0x440] sm:$0xff]  ;;  %v11356_v48 = vcombine.high %v2630_v56, %v2634_v57  ;;  %v11355_v63 = vcombine.low %v2630_v56, %v2634_v57 }
 0x214   :  { %v2039_v51 = vadd.f32 %v12532_v44, %v1974_v25  ;;  %8867 = vmatprep.subr.bf16.mxu0 %v11500_v23  ;;  %v2642_v25 = vld [vmem:[%s17896_s7 + $0x60] sm:$0xff]  ;;  %v11491_v54 = vcombine.low %v2766_v37, %v2770_v39  ;;  %v11492_v22 = vcombine.high %v2766_v37, %v2770_v39 }
 0x215   :  { %v14166_v55 = vpop.f32.mrf.mxu0  ;;  %v12590_v5 = vpop.f32.mrf.mxu1  ;;  %v11364_v44 = vcombine.high %v2638_v33, %v2642_v25  ;;  %v11363_v52 = vcombine.low %v2638_v33, %v2642_v25  ;;  %v2758_v62 = vld [vmem:[%s17896_s7 + $0x400] sm:$0xff] }
 0x216   :  { %17920 = vst [vmem:[#allocation6_spill] sm:$0xff] %v14166_v55  ;;  %v12591_v38 = vadd.f32 %v12590_v5, %v12589_v42  ;;  %v14177_v8 = vadd.f32 %v12572_v24, %v2039_v51  ;;  %8825 = vmatpush1.bf16.msra.mxu1 %v11379_v61  ;;  %8868 = vmatpush1.bf16.msra.mxu0 %v11499_v21  ;;  %v2762_v4 = vld [vmem:[%s17896_s7 + $0x420] sm:$0xff] }
 0x217   :  { %v14182_v53 = vpop.f32.mrf.mxu0  ;;  %v12592_v60 = vpop.f32.mrf.mxu1  ;;  %8826 = vmatprep.subr.bf16.mxu1 %v11372_v27  ;;  %8869 = vmatprep.subr.bf16.mxu0 %v11492_v22  ;;  %v11483_v0 = vcombine.low %v2758_v62, %v2762_v4  ;;  %v2750_v32 = vld [vmem:[%s17896_s7 + $0x3c0] sm:$0xff] }
 0x218   :  { %17921 = vst [vmem:[#allocation7_spill] sm:$0xff] %v14182_v53  ;;  %v2142_v26 = vadd.f32 %v12591_v38, %v14065_v58  ;;  %v2882_v28 = vld [vmem:[%s17896_s7 + $0x7e0] sm:$0xff] }
 0x219   :  { %v14185_v10 = vpop.f32.mrf.mxu0  ;;  %v12593_v1 = vpop.f32.mrf.mxu1  ;;  %v2742_v37 = vld [vmem:[%s17896_s7 + $0x380] sm:$0xff] }
 0x21a   :  { %v12594_v34 = vadd.f32 %v12593_v1, %v12592_v60  ;;  %v14197_v58 = vadd.f32 %v14067_v15, %v2142_v26  ;;  %8827 = vmatpush1.bf16.msra.mxu1 %v11371_v43  ;;  %8870 = vmatpush1.bf16.msra.mxu0 %v11491_v54  ;;  %v11484_v26 = vcombine.high %v2758_v62, %v2762_v4  ;;  %v2734_v56 = vld [vmem:[%s17896_s7 + $0x340] sm:$0xff] }
 0x21b   :  { %v14202_v17 = vpop.f32.mrf.mxu0  ;;  %v12595_v12 = vpop.f32.mrf.mxu1  ;;  %8828 = vmatprep.subr.bf16.mxu1 %v11364_v44  ;;  %v12640_v1 = vadd.f32 %v14098_v35, %v14082_v14  ;;  %v2878_v14 = vld [vmem:[%s17896_s7 + $0x7c0] sm:$0xff] }
 0x21c   :  { %v2145_v36 = vadd.f32 %v12594_v34, %v14072_v6  ;;  %8871 = vmatprep.subr.bf16.mxu0 %v11484_v26  ;;  %v2754_v34 = vld [vmem:[%s17896_s7 + $0x3e0] sm:$0xff]  ;;  %v11603_v23 = vcombine.low %v2878_v14, %v2882_v28 }
 0x21d   :  { %v14207_v15 = vpop.f32.mrf.mxu0  ;;  %v12596_v40 = vpop.f32.mrf.mxu1  ;;  %v11476_v27 = vcombine.high %v2750_v32, %v2754_v34  ;;  %v11475_v21 = vcombine.low %v2750_v32, %v2754_v34  ;;  %v2874_v44 = vld [vmem:[%s17896_s7 + $0x7a0] sm:$0xff] }
 0x21e   :  { %v12597_v2 = vadd.f32 %v12596_v40, %v12595_v12  ;;  %v14218_v6 = vadd.f32 %v12634_v3, %v2145_v36  ;;  %8829 = vmatpush1.bf16.msra.mxu1 %v11363_v52  ;;  %8872 = vmatpush1.bf16.msra.mxu0 %v11483_v0  ;;  %v11604_v3 = vcombine.high %v2878_v14, %v2882_v28  ;;  %v2738_v57 = vld [vmem:[%s17896_s7 + $0x360] sm:$0xff] }
 0x21f   :  { %v14223_v41 = vpop.f32.mrf.mxu0  ;;  %v12598_v42 = vpop.f32.mrf.mxu1  ;;  %8830 = vmatprep.subr.bf16.mxu1 %v11356_v48  ;;  %v12643_v36 = vadd.f32 %v14118_v59, %v14100_v50  ;;  %v2870_v50 = vld [vmem:[%s17896_s7 + $0x780] sm:$0xff] }
 0x220   :  { %v2150_v24 = vadd.f32 %v12597_v2, %v14077_v16  ;;  %8873 = vmatprep.subr.bf16.mxu0 %v11604_v3  ;;  %v2746_v2 = vld [vmem:[%s17896_s7 + $0x3a0] sm:$0xff]  ;;  %v11595_v54 = vcombine.low %v2870_v50, %v2874_v44  ;;  %v11596_v22 = vcombine.high %v2870_v50, %v2874_v44 }
 0x221   :  { %v14226_v51 = vpop.f32.mrf.mxu0  ;;  %v12599_v5 = vpop.f32.mrf.mxu1  ;;  %v11468_v59 = vcombine.high %v2742_v37, %v2746_v2  ;;  %v11467_v52 = vcombine.low %v2742_v37, %v2746_v2  ;;  %v2862_v62 = vld [vmem:[%s17896_s7 + $0x740] sm:$0xff] }
 0x222   :  { %v12600_v38 = vadd.f32 %v12599_v5, %v12598_v42  ;;  %v14238_v16 = vadd.f32 %v14079_v20, %v2150_v24  ;;  %8831 = vmatpush1.bf16.msra.mxu1 %v11355_v63  ;;  %8874 = vmatpush2.bf16.msra.mxu0 %v11603_v23  ;;  %v2866_v48 = vld [vmem:[%s17896_s7 + $0x760] sm:$0xff]  ;;  %v11459_v63 = vcombine.low %v2734_v56, %v2738_v57 }
 0x223   :  { %v14243_v60 = vpop.f32.mrf.mxu0  ;;  %v12601_v61 = vpop.f32.mrf.mxu1  ;;  %8832 = vmatprep.subr.bf16.mxu1 %v11476_v27  ;;  %8875 = vmatprep.subr.bf16.mxu0 %v11596_v22  ;;  %v11587_v0 = vcombine.low %v2862_v62, %v2866_v48  ;;  %v11588_v26 = vcombine.high %v2862_v62, %v2866_v48  ;;  %v2730_v32 = vld [vmem:[%s17896_s7 + $0x320] sm:$0xff] }
 0x224   :  { %v2153_v18 = vadd.f32 %v12600_v38, %v14093_v29  ;;  %v11460_v38 = vcombine.high %v2734_v56, %v2738_v57  ;;  %v2854_v34 = vld [vmem:[%s17896_s7 + $0x700] sm:$0xff] }
 0x225   :  { %v14248_v20 = vpop.f32.mrf.mxu0  ;;  %v12602_v30 = vpop.f32.mrf.mxu1  ;;  %v2718_v37 = vld [vmem:[%s17896_s7 + $0x2c0] sm:$0xff] }
 0x226   :  { %v12603_v35 = vadd.f32 %v12602_v30, %v12601_v61  ;;  %v14259_v29 = vadd.f32 %v12640_v1, %v2153_v18  ;;  %8833 = vmatpush2.bf16.msra.mxu1 %v11475_v21  ;;  %8876 = vmatpush2.bf16.msra.mxu0 %v11595_v54  ;;  %v2726_v30 = vld [vmem:[%s17896_s7 + $0x300] sm:$0xff] }
 0x227   :  { %v14264_v12 = vpop.f32.mrf.mxu0  ;;  %v14266_v43 = vpop.f32.mrf.mxu1  ;;  %8834 = vmatprep.subr.bf16.mxu1 %v11468_v59  ;;  %8877 = vmatprep.subr.bf16.mxu0 %v11588_v26  ;;  %v11452_v14 = vcombine.high %v2726_v30, %v2730_v32  ;;  %v11451_v21 = vcombine.low %v2726_v30, %v2730_v32  ;;  %v2722_v2 = vld [vmem:[%s17896_s7 + $0x2e0] sm:$0xff] }
 0x228   :  { %v2158_v40 = vadd.f32 %v12603_v35, %v14113_v9  ;;  %v2858_v35 = vld [vmem:[%s17896_s7 + $0x720] sm:$0xff]  ;;  %v11444_v59 = vcombine.high %v2718_v37, %v2722_v2  ;;  %v11443_v22 = vcombine.low %v2718_v37, %v2722_v2 }
 0x229   :  { %v14271_v33 = vpop.f32.mrf.mxu0  ;;  %v14273_v25 = vpop.f32.mrf.mxu1  ;;  %v11579_v23 = vcombine.low %v2854_v34, %v2858_v35  ;;  %v11580_v3 = vcombine.high %v2854_v34, %v2858_v35  ;;  %v2846_v50 = vld [vmem:[%s17896_s7 + $0x6c0] sm:$0xff] }
 0x22a   :  { %v14284_v9 = vadd.f32 %v12643_v36, %v2158_v40  ;;  %8835 = vmatpush2.bf16.msra.mxu1 %v11467_v52  ;;  %8878 = vmatpush2.bf16.msra.mxu0 %v11587_v0  ;;  %v2850_v44 = vld [vmem:[%s17896_s7 + $0x6e0] sm:$0xff] }
 0x22b   :  { %v14289_v39 = vpop.f32.mrf.mxu0  ;;  %v14291_v42 = vpop.f32.mrf.mxu1  ;;  %8836 = vmatprep.subr.bf16.mxu1 %v11460_v38  ;;  %8879 = vmatprep.subr.bf16.mxu0 %v11580_v3  ;;  %v11571_v56 = vcombine.low %v2846_v50, %v2850_v44  ;;  %v11572_v57 = vcombine.high %v2846_v50, %v2850_v44  ;;  %v2710_v48 = vld [vmem:[%s17896_s7 + $0x280] sm:$0xff] }
 0x22c   :  { %v2838_v0 = vld [vmem:[%s17896_s7 + $0x680] sm:$0xff] }
 0x22d   :  { %v14293_v24 = vpop.f32.mrf.mxu0  ;;  %v14295_v5 = vpop.f32.mrf.mxu1  ;;  %v2842_v30 = vld [vmem:[%s17896_s7 + $0x6a0] sm:$0xff] }
 0x22e   :  { %8837 = vmatpush2.bf16.msra.mxu1 %v11459_v63  ;;  %8880 = vmatpush2.bf16.msra.mxu0 %v11579_v23  ;;  %v2714_v63 = vld [vmem:[%s17896_s7 + $0x2a0] sm:$0xff]  ;;  %v11563_v35 = vcombine.low %v2838_v0, %v2842_v30 }
 0x22f   :  { %v14309_v4 = vpop.f32.mrf.mxu0  ;;  %v14311_v61 = vpop.f32.mrf.mxu1  ;;  %8838 = vmatprep.subr.bf16.mxu1 %v11452_v14  ;;  %8881 = vmatprep.subr.bf16.mxu0 %v11572_v57  ;;  %v11436_v26 = vcombine.high %v2710_v48, %v2714_v63  ;;  %v11435_v14 = vcombine.low %v2710_v48, %v2714_v63  ;;  %v2702_v3 = vld [vmem:[%s17896_s7 + $0x240] sm:$0xff] }
 0x230   :  { %v2706_v37 = vld [vmem:[%s17896_s7 + $0x260] sm:$0xff] }
 0x231   :  { %v14313_v1 = vpop.f32.mrf.mxu0  ;;  %v14315_v18 = vpop.f32.mrf.mxu1  ;;  %v2830_v2 = vld [vmem:[%s17896_s7 + $0x640] sm:$0xff]  ;;  %v11428_v50 = vcombine.high %v2702_v3, %v2706_v37 }
 0x232   :  { %17922 = vst [vmem:[#allocation8_spill] sm:$0xff] %v14313_v1  ;;  %8839 = vmatpush2.bf16.msra.mxu1 %v11451_v21  ;;  %8882 = vmatpush2.bf16.msra.mxu0 %v11571_v56  ;;  %v11564_v21 = vcombine.high %v2838_v0, %v2842_v30  ;;  %v11427_v56 = vcombine.low %v2702_v3, %v2706_v37  ;;  %v2694_v0 = vld [vmem:[%s17896_s7 + $0x200] sm:$0xff] }
 0x233   :  { %v14329_v27 = vpop.f32.mrf.mxu0  ;;  %v14331_v28 = vpop.f32.mrf.mxu1  ;;  %8840 = vmatprep.subr.bf16.mxu1 %v11444_v59  ;;  %v2834_v59 = vld [vmem:[%s17896_s7 + $0x660] sm:$0xff] }
 0x234   :  { %17923 = vst [vmem:[#allocation9_spill] sm:$0xff] %v14329_v27  ;;  %8883 = vmatprep.subr.bf16.mxu0 %v11564_v21  ;;  %v11555_v57 = vcombine.low %v2830_v2, %v2834_v59  ;;  %v11556_v48 = vcombine.high %v2830_v2, %v2834_v59  ;;  %v2822_v30 = vld [vmem:[%s17896_s7 + $0x600] sm:$0xff]  ;;  %v12711_v27 = vadd.f32 %v14202_v17, %v14185_v10 }
 0x235   :  { %v14333_v36 = vpop.f32.mrf.mxu0  ;;  %v14335_v40 = vpop.f32.mrf.mxu1  ;;  %v12606_v10 = vadd.f32 %v14273_v25, %v14266_v43  ;;  %v12609_v43 = vadd.f32 %v14295_v5, %v14291_v42 }
 0x236   :  { %17924 = vst [vmem:[#allocation10_spill] sm:$0xff] %v14333_v36  ;;  %8841 = vmatpush2.bf16.msra.mxu1 %v11443_v22  ;;  %8884 = vmatpush2.bf16.msra.mxu0 %v11563_v35  ;;  %v2826_v35 = vld [vmem:[%s17896_s7 + $0x620] sm:$0xff] }
 0x237   :  { %v14349_v52 = vpop.f32.mrf.mxu0  ;;  %v14351_v54 = vpop.f32.mrf.mxu1  ;;  %8842 = vmatprep.subr.bf16.mxu1 %v11436_v26  ;;  %8885 = vmatprep.subr.bf16.mxu0 %v11556_v48  ;;  %v2698_v26 = vld [vmem:[%s17896_s7 + $0x220] sm:$0xff]  ;;  %v11547_v2 = vcombine.low %v2822_v30, %v2826_v35 }
 0x238   :  { %17925 = vst [vmem:[#allocation11_spill] sm:$0xff] %v14349_v52  ;;  %v11419_v37 = vcombine.low %v2694_v0, %v2698_v26  ;;  %v14412_v48 = vld [vmem:[%s17896_s7 + $0xdc0] sm:$0xff] }
 0x239   :  { %v14353_v62 = vpop.f32.mrf.mxu0  ;;  %v14355_v38 = vpop.f32.mrf.mxu1  ;;  %17928 = vst [vmem:[#allocation14_spill] sm:$0xff] %v14412_v48 }
 0x23a   :  { %8843 = vmatpush2.bf16.msra.mxu1 %v11435_v14  ;;  %8886 = vmatpush2.bf16.msra.mxu0 %v11555_v57  ;;  %v11420_v14 = vcombine.high %v2694_v0, %v2698_v26  ;;  %v14407_v57 = vld [vmem:[%s17896_s7 + $0x9e0] sm:$0xff] }
 0x23b   :  { %v14369_v32 = vpop.f32.mrf.mxu0  ;;  %v14371_v34 = vpop.f32.mrf.mxu1  ;;  %8844 = vmatprep.subr.bf16.mxu1 %v11428_v50  ;;  %v11548_v50 = vcombine.high %v2822_v30, %v2826_v35  ;;  %17927 = vst [vmem:[#allocation13_spill] sm:$0xff] %v14407_v57  ;;  %v14419_v26 = vld [vmem:[%s17896_s7 + $0xde0] sm:$0xff]  ;;  %v12671_v35 = vadd.f32 %v14335_v40, %v14331_v28  ;;  %v12714_v40 = vadd.f32 %v14223_v41, %v14207_v15 }
 0x23c   :  { %17929 = vst [vmem:[#allocation15_spill] sm:$0xff] %v14419_v26 }
 0x23d   :  { %v12676_v23 = vpop.f32.mrf.mxu1  ;;  %v14385_v44 = vpop.f32.mrf.mxu0  ;;  %8887 = vmatprep.subr.bf16.mxu0 %v11548_v50  ;;  %v11796_v50 = vcombine.high %v14412_v48, %v14419_v26 }
 0x23e   :  { %8845 = vmatpush2.bf16.msra.mxu1 %v11427_v56  ;;  %v14402_v56 = vld [vmem:[%s17896_s7 + $0x9c0] sm:$0xff]  ;;  %8888 = vmatpush2.bf16.msra.mxu0 %v11547_v2  ;;  %v12677_v48 = vadd.f32 %v12676_v23, %v14371_v34  ;;  %v12717_v23 = vadd.f32 %v14243_v60, %v14226_v51  ;;  %v2161_v60 = vadd.f32 %v12606_v10, %v14137_v7 }
 0x23f   :  { %v12678_v22 = vpop.f32.mrf.mxu1  ;;  %v12793_v21 = vpop.f32.mrf.mxu0  ;;  %8846 = vmatprep.subr.bf16.mxu1 %v11420_v14  ;;  %17926 = vst [vmem:[#allocation12_spill] sm:$0xff] %v14402_v56  ;;  %v11668_v0 = vcombine.high %v14402_v56, %v14407_v57  ;;  %8939 = vmatprep.subr.bf16.mxu0 %v11796_v50  ;;  %v2272_v50 = vadd.f32 %v12671_v35, %v14197_v58 }
 0x240   :  { %v12794_v15 = vadd.f32 %v12793_v21, %v14385_v44  ;;  %v12646_v21 = vadd.f32 %v14142_v13, %v14124_v11 }
 0x241   :  { %v12679_v63 = vpop.f32.mrf.mxu1  ;;  %v12795_v30 = vpop.f32.mrf.mxu0 }
 0x242   :  { %8847 = vmatpush2.bf16.msra.mxu1 %v11419_v37  ;;  %v12674_v37 = vadd.f32 %v14355_v38, %v14351_v54  ;;  %v2280_v54 = vadd.f32 %v12677_v48, %v14238_v16  ;;  %v12680_v38 = vadd.f32 %v12679_v63, %v12678_v22  ;;  %v12723_v48 = vadd.f32 %v14289_v39, %v14271_v33 }
 0x243   :  { %v12681_v3 = vpop.f32.mrf.mxu1  ;;  %8898 = vmatprep.subr.bf16.mxu1 %v11668_v0  ;;  %v12796_v46 = vpop.f32.mrf.mxu0 }
 0x244   :  { %v2275_v1 = vadd.f32 %v12674_v37, %v14218_v6  ;;  %v2283_v16 = vadd.f32 %v12680_v38, %v14259_v29  ;;  %v12797_v44 = vadd.f32 %v12796_v46, %v12795_v30  ;;  %v2166_v46 = vadd.f32 %v12609_v43, %v14157_v31 }
 0x245   :  { %v12682_v59 = vpop.f32.mrf.mxu1  ;;  %v12798_v52 = vpop.f32.mrf.mxu0  ;;  %v12612_v37 = vadd.f32 %v14315_v18, %v14311_v61 }
 0x246   :  { %v2340_v35 = vadd.f32 %v12714_v40, %v2275_v1  ;;  %v12683_v1 = vadd.f32 %v12682_v59, %v12681_v3  ;;  %v12726_v40 = vadd.f32 %v14309_v4, %v14293_v24  ;;  %v17936_v24 = vld [vmem:[#allocation8_spill] sm:$0xff]  ;;  %v17937_v4 = vld [vmem:[#allocation9_spill] sm:$0xff] }
 0x247   :  { %v12684_v14 = vpop.f32.mrf.mxu1  ;;  %v12799_v26 = vpop.f32.mrf.mxu0 }
 0x248   :  { %v2288_v7 = vadd.f32 %v12683_v1, %v14284_v9  ;;  %v12800_v11 = vadd.f32 %v12799_v26, %v12798_v52  ;;  %v12649_v9 = vadd.f32 %v14162_v45, %v14144_v19  ;;  %v2169_v52 = vadd.f32 %v12612_v37, %v14177_v8  ;;  %v17932_v19 = vld [vmem:[#allocation6_spill] sm:$0xff]  ;;  %v17933_v45 = vld [vmem:[#allocation7_spill] sm:$0xff] }
 0x249   :  { %v12685_v2 = vpop.f32.mrf.mxu1  ;;  %v12801_v53 = vpop.f32.mrf.mxu0 }
 0x24a   :  { %v12686_v3 = vadd.f32 %v12685_v2, %v12684_v14  ;;  %v2353_v39 = vadd.f32 %v12723_v48, %v2288_v7  ;;  %v2231_v61 = vadd.f32 %v12649_v9, %v2166_v46 }
 0x24b   :  { %v14427_v49 = vpop.f32.mrf.mxu1  ;;  %v12802_v17 = vpop.f32.mrf.mxu0 }
 0x24c   :  { %v12803_v26 = vadd.f32 %v12802_v17, %v12801_v53 }
 0x24d   :  { %v14429_v47 = vpop.f32.mrf.mxu1  ;;  %v12804_v25 = vpop.f32.mrf.mxu0 }
 0x24e   :  { %v12689_v33 = vadd.f32 %v14429_v47, %v14427_v49 }
 0x24f   :  { %v14431_v36 = vpop.f32.mrf.mxu1 }
 0x250   :  { %17930 = vst [vmem:[#allocation16_spill] sm:$0xff] %v14431_v36  ;;  %v2296_v47 = vadd.f32 %v12689_v33, %v2231_v61 }
 0x251   :  { %v14435_v57 = vpop.f32.mrf.mxu1 }
 0x252   :  { %17931 = vst [vmem:[#allocation17_spill] sm:$0xff] %v14435_v57  ;;  %v2337_v57 = vadd.f32 %v12711_v27, %v2272_v50  ;;  %v2345_v27 = vadd.f32 %v12717_v23, %v2280_v54 }
 0x253   :  { %v12749_v0 = vpop.f32.mrf.mxu1 }
 0x255   :  { %v12750_v56 = vpop.f32.mrf.mxu1 }
 0x256   :  { %v12751_v36 = vadd.f32 %v12750_v56, %v12749_v0  ;;  %v12791_v56 = vadd.f32 %v14369_v32, %v14353_v62  ;;  %v12720_v32 = vadd.f32 %v14264_v12, %v14248_v20  ;;  %v2226_v20 = vadd.f32 %v12646_v21, %v2161_v60  ;;  %v12805_v12 = vpop.f32.mrf.mxu0 }
 0x257   :  { %v12752_v28 = vpop.f32.mrf.mxu1  ;;  %v17934_v49 = vld [vmem:[#allocation16_spill] sm:$0xff]  ;;  %v12806_v8 = vadd.f32 %v12805_v12, %v12804_v25 }
 0x258   :  { %v2402_v58 = vadd.f32 %v12751_v36, %v2337_v57  ;;  %v2348_v42 = vadd.f32 %v12720_v32, %v2283_v16  ;;  %v2291_v2 = vadd.f32 %v12686_v3, %v2226_v20  ;;  %v12807_v50 = vpop.f32.mrf.mxu0 }
 0x259   :  { %v12753_v55 = vpop.f32.mrf.mxu1  ;;  %v17935_v10 = vld [vmem:[#allocation17_spill] sm:$0xff] }
 0x25a   :  { %v12754_v34 = vadd.f32 %v12753_v55, %v12752_v28  ;;  %v14455_v55 = vadd.f32 %v12791_v56, %v2402_v58  ;;  %v12652_v58 = vadd.f32 %v17933_v45, %v17932_v19  ;;  %v12808_v23 = vpop.f32.mrf.mxu0 }
 0x25b   :  { %v12755_v6 = vpop.f32.mrf.mxu1  ;;  %v12809_v3 = vadd.f32 %v12808_v23, %v12807_v50 }
 0x25c   :  { %v2405_v41 = vadd.f32 %v12754_v34, %v2340_v35  ;;  %v2356_v35 = vadd.f32 %v12726_v40, %v2291_v2  ;;  %v2234_v53 = vadd.f32 %v12652_v58, %v2169_v52 }
 0x25d   :  { %v12756_v36 = vpop.f32.mrf.mxu1 }
 0x25e   :  { %v14457_v22 = vadd.f32 %v12794_v15, %v2405_v41  ;;  %v12757_v51 = vadd.f32 %v12756_v36, %v12755_v6  ;;  %v12692_v6 = vadd.f32 %v17935_v10, %v17934_v49  ;;  %v12729_v41 = vadd.f32 %v17937_v4, %v17936_v24  ;;  %v12810_v36 = vpop.f32.mrf.mxu0 }
 0x25f   :  { %v12758_v62 = vpop.f32.mrf.mxu1 }
 0x260   :  { %v2499_v29 = vadd.f32 %v14457_v22, %v14455_v55  ;;  %v2410_v63 = vadd.f32 %v12757_v51, %v2345_v27  ;;  %v2299_v51 = vadd.f32 %v12692_v6, %v2234_v53  ;;  %v2361_v43 = vadd.f32 %v12729_v41, %v2296_v47  ;;  %v12811_v7 = vpop.f32.mrf.mxu0 }
 0x261   :  { %v12759_v59 = vpop.f32.mrf.mxu1  ;;  %v12812_v20 = vadd.f32 %v12811_v7, %v12810_v36 }
 0x262   :  { %v14469_v57 = vadd.f32 %v12797_v44, %v2410_v63  ;;  %v12760_v5 = vadd.f32 %v12759_v59, %v12758_v62  ;;  %v17938_v44 = vld [vmem:[#allocation10_spill] sm:$0xff] }
 0x263   :  { %v12761_v30 = vpop.f32.mrf.mxu1 }
 0x264   :  { %v2500_v13 = vadd.f32 %v2499_v29, %v14469_v57  ;;  %v2413_v14 = vadd.f32 %v12760_v5, %v2348_v42  ;;  %v17939_v29 = vld [vmem:[#allocation11_spill] sm:$0xff] }
 0x265   :  { %v12762_v0 = vpop.f32.mrf.mxu1  ;;  %v12732_v63 = vadd.f32 %v17939_v29, %v17938_v44 }
 0x266   :  { %v2478_v31 = vadd.f32 %v12800_v11, %v2413_v14  ;;  %v12763_v28 = vadd.f32 %v12762_v0, %v12761_v30 }
 0x267   :  { %v12764_v18 = vpop.f32.mrf.mxu1  ;;  %v2364_v25 = vadd.f32 %v12732_v63, %v2299_v51 }
 0x268   :  { %v2501_v54 = vadd.f32 %v2500_v13, %v2478_v31  ;;  %v2418_v38 = vadd.f32 %v12763_v28, %v2353_v39 }
 0x269   :  { %v12765_v34 = vpop.f32.mrf.mxu1 }
 0x26a   :  { %v2483_v56 = vadd.f32 %v12803_v26, %v2418_v38  ;;  %v12766_v15 = vadd.f32 %v12765_v34, %v12764_v18 }
 0x26b   :  { %v12767_v16 = vpop.f32.mrf.mxu1 }
 0x26c   :  { %v2502_v17 = vadd.f32 %v2501_v54, %v2483_v56  ;;  %v2421_v27 = vadd.f32 %v12766_v15, %v2356_v35 }
 0x26d   :  { %v12768_v1 = vpop.f32.mrf.mxu1 }
 0x26e   :  { %v2486_v60 = vadd.f32 %v12806_v8, %v2421_v27  ;;  %v12769_v62 = vadd.f32 %v12768_v1, %v12767_v16 }
 0x26f   :  { %v12770_v32 = vpop.f32.mrf.mxu1 }
 0x270   :  { %v2503_v21 = vadd.f32 %v2502_v17, %v2486_v60  ;;  %v2426_v59 = vadd.f32 %v12769_v62, %v2361_v43  ;;  %v11353_v17 = vld [vmem:[%s17897_s5] ss:$0 sm:$0xff] }
 0x271   :  { %v12771_v42 = vpop.f32.mrf.mxu1 }
 0x272   :  { %v2491_v5 = vadd.f32 %v12809_v3, %v2426_v59  ;;  %v12772_v48 = vadd.f32 %v12771_v42, %v12770_v32 }
 0x274   :  { %v2504_v46 = vadd.f32 %v2503_v21, %v2491_v5  ;;  %v2429_v12 = vadd.f32 %v12772_v48, %v2364_v25 }
 0x276   :  { %v2494_v30 = vadd.f32 %v12812_v20, %v2429_v12 }
 0x278   :  { %v2505_v37 = vadd.f32 %v2504_v46, %v2494_v30 }
 0x27a   :  { %v2506_v11 = vrot.slane %v2505_v37, 4 }
 0x27c   :  { %v2507_v13 = vadd.f32 %v2506_v11, %v2505_v37 }
 0x27e   :  { %v2508_v14 = vrot.slane %v2507_v13, 2 }
 0x280   :  { %v2509_v9 = vadd.f32 %v2508_v14, %v2507_v13 }
 0x282   :  { %v2510_v2 = vrot.slane %v2509_v9, 1 }
 0x284   :  { %v2511_v0 = vadd.f32 %v2510_v2, %v2509_v9 }
 0x286   :  { %v2513_v33 = vmul.f32 0.015625, %v2511_v0 }
 0x288   :  { %v2514_v50 = vsub.f32 %v14455_v55, %v2513_v33  ;;  %v2515_v39 = vsub.f32 %v14457_v22, %v2513_v33  ;;  %v2516_v28 = vsub.f32 %v14469_v57, %v2513_v33  ;;  %v2517_v40 = vsub.f32 %v2478_v31, %v2513_v33 }
 0x289   :  { %v2518_v61 = vsub.f32 %v2483_v56, %v2513_v33  ;;  %v2519_v18 = vsub.f32 %v2486_v60, %v2513_v33  ;;  %v2520_v52 = vsub.f32 %v2491_v5, %v2513_v33  ;;  %v2521_v26 = vsub.f32 %v2494_v30, %v2513_v33  ;;  %v11354_v60 = vld [vmem:[%s17898_s6] ss:$0 sm:$0xff] }
 0x28a   :  { %v2522_v54 = vmul.f32 %v2514_v50, %v2514_v50  ;;  %v2523_v38 = vmul.f32 %v2515_v39, %v2515_v39  ;;  %v2524_v19 = vmul.f32 %v2516_v28, %v2516_v28  ;;  %v2525_v58 = vmul.f32 %v2517_v40, %v2517_v40 }
 0x28b   :  { %v2526_v34 = vmul.f32 %v2518_v61, %v2518_v61  ;;  %v2527_v47 = vmul.f32 %v2519_v18, %v2519_v18  ;;  %v2528_v55 = vmul.f32 %v2520_v52, %v2520_v52  ;;  %v2529_v22 = vmul.f32 %v2521_v26, %v2521_v26 }
 0x28c   :  { %v2530_v45 = vadd.f32 %v2523_v38, %v2522_v54 }
 0x28e   :  { %v2531_v35 = vadd.f32 %v2530_v45, %v2524_v19 }
 0x290   :  { %v2532_v23 = vadd.f32 %v2531_v35, %v2525_v58  ;;  %v2934_v35 = vld [vmem:[%s17896_s7 + $0x980] sm:$0xff] }
 0x292   :  { %v2533_v49 = vadd.f32 %v2532_v23, %v2526_v34  ;;  %v2938_v23 = vld [vmem:[%s17896_s7 + $0x9a0] sm:$0xff] }
 0x294   :  { %v2534_v10 = vadd.f32 %v2533_v49, %v2527_v47  ;;  %v3062_v47 = vld [vmem:[%s17896_s7 + $0xd80] sm:$0xff] }
 0x295   :  { %v3066_v49 = vld [vmem:[%s17896_s7 + $0xda0] sm:$0xff] }
 0x296   :  { %v2535_v6 = vadd.f32 %v2534_v10, %v2528_v55 }
 0x298   :  { %v2536_v57 = vadd.f32 %v2535_v6, %v2529_v22  ;;  %v2926_v6 = vld [vmem:[%s17896_s7 + $0x940] sm:$0xff] }
 0x29a   :  { %v2537_v31 = vrot.slane %v2536_v57, 4 }
 0x29c   :  { %v2538_v56 = vadd.f32 %v2537_v31, %v2536_v57  ;;  %v11660_v57 = vcombine.high %v2934_v35, %v2938_v23  ;;  %v11788_v31 = vcombine.high %v3062_v47, %v3066_v49 }
 0x29e   :  { %v2539_v15 = vrot.slane %v2538_v56, 2 }
 0x2a0   :  { %v2540_v24 = vadd.f32 %v2539_v15, %v2538_v56  ;;  %v2930_v56 = vld [vmem:[%s17896_s7 + $0x960] sm:$0xff] }
 0x2a1   :  { %v3054_v15 = vld [vmem:[%s17896_s7 + $0xd40] sm:$0xff] }
 0x2a2   :  { %v2541_v4 = vrot.slane %v2540_v24, 1 }
 0x2a4   :  { %v2542_v41 = vadd.f32 %v2541_v4, %v2540_v24  ;;  %v3058_v24 = vld [vmem:[%s17896_s7 + $0xd60] sm:$0xff] }
 0x2a6   :  { %v2543_v16 = vmul.f32 0.015625, %v2542_v41 }
 0x2a8   :  { %v2544_v8 = vadd.f32 1e-05, %v2543_v16  ;;  %v17940_v16 = vld [vmem:[#allocation12_spill] sm:$0xff] }
 0x2aa   :  { %13182 = vrsqrt.f32 %v2544_v8  ;;  %v17941_v8 = vld [vmem:[#allocation13_spill] sm:$0xff] }
 0x2b7   :  { %v13183_v53 = vpop.eup %13182 }
 0x2b8   :  { %v2546_v27 = vmul.f32 %v13183_v53, %v2514_v50  ;;  %v2547_v36 = vmul.f32 %v13183_v53, %v2515_v39  ;;  %v2548_v1 = vmul.f32 %v13183_v53, %v2516_v28  ;;  %v2549_v51 = vmul.f32 %v13183_v53, %v2517_v40 }
 0x2b9   :  { %v2550_v43 = vmul.f32 %v13183_v53, %v2518_v61  ;;  %v2551_v62 = vmul.f32 %v13183_v53, %v2519_v18  ;;  %v2552_v32 = vmul.f32 %v13183_v53, %v2520_v52  ;;  %v2553_v44 = vmul.f32 %v13183_v53, %v2521_v26 }
 0x2ba   :  { %v2560_v29 = vmul.f32 %v11353_v17, %v2546_v27  ;;  %v2561_v63 = vmul.f32 %v11353_v17, %v2547_v36  ;;  %v2562_v21 = vmul.f32 %v11353_v17, %v2548_v1  ;;  %v2563_v3 = vmul.f32 %v11353_v17, %v2549_v51  ;;  %v17944_v27 = vld [vmem:[#allocation15_spill] sm:$0xff] }
 0x2bb   :  { %v2564_v59 = vmul.f32 %v11353_v17, %v2550_v43  ;;  %v2565_v7 = vmul.f32 %v11353_v17, %v2551_v62  ;;  %v2566_v42 = vmul.f32 %v11353_v17, %v2552_v32  ;;  %v2567_v5 = vmul.f32 %v11353_v17, %v2553_v44  ;;  %v17943_v17 = vld [vmem:[#allocation14_spill] sm:$0xff]  ;;  %v2918_v62 = vld [vmem:[%s17896_s7 + $0x900] sm:$0xff] }
 0x2bc   :  { %v2574_v25 = vadd.f32 %v11354_v60, %v2560_v29  ;;  %v2575_v48 = vadd.f32 %v11354_v60, %v2561_v63  ;;  %v2576_v46 = vadd.f32 %v11354_v60, %v2562_v21  ;;  %v2577_v20 = vadd.f32 %v11354_v60, %v2563_v3  ;;  %v2922_v32 = vld [vmem:[%s17896_s7 + $0x920] sm:$0xff] }
 0x2bd   :  { %v2578_v12 = vadd.f32 %v11354_v60, %v2564_v59  ;;  %v2579_v30 = vadd.f32 %v11354_v60, %v2565_v7  ;;  %v2580_v37 = vadd.f32 %v11354_v60, %v2566_v42  ;;  %v2581_v11 = vadd.f32 %v11354_v60, %v2567_v5  ;;  %v3046_v44 = vld [vmem:[%s17896_s7 + $0xd00] sm:$0xff] }
 0x2be   :  { %v2582_v13 = vmul.f32 0.2, %v2574_v25  ;;  %v2583_v14 = vmul.f32 0.2, %v2575_v48  ;;  %v2584_v9 = vmul.f32 0.2, %v2576_v46  ;;  %v17942_v53 = vcombine.low %v17940_v16, %v17941_v8 }
 0x2bf   :  { %v2585_v2 = vmul.f32 0.2, %v2577_v20  ;;  %v2586_v0 = vmul.f32 0.2, %v2578_v12  ;;  %v2587_v33 = vmul.f32 0.2, %v2579_v30  ;;  %v17945_v36 = vcombine.low %v17943_v17, %v17944_v27 }
 0x2c0   :  { %v2588_v50 = vmul.f32 0.2, %v2580_v37  ;;  %v2589_v39 = vmul.f32 0.2, %v2581_v11  ;;  %v2592_v28 = vmax.f32 %v2576_v46, %v2584_v9  ;;  %v2590_v40 = vmax.f32 %v2574_v25, %v2582_v13  ;;  %v3050_v29 = vld [vmem:[%s17896_s7 + $0xd20] sm:$0xff] }
 0x2c1   :  { %v2593_v61 = vmax.f32 %v2577_v20, %v2585_v2  ;;  %v2594_v18 = vmax.f32 %v2578_v12, %v2586_v0  ;;  %v2595_v52 = vmax.f32 %v2579_v30, %v2587_v33  ;;  %v2591_v26 = vmax.f32 %v2575_v48, %v2583_v14  ;;  %v2910_v7 = vld [vmem:[%s17896_s7 + $0x8c0] sm:$0xff] }
 0x2c2   :  { %v2596_v54 = vmax.f32 %v2580_v37, %v2588_v50  ;;  %v2597_v38 = vmax.f32 %v2581_v11, %v2589_v39  ;;  %v11659_v1 = vcombine.low %v2934_v35, %v2938_v23  ;;  %v11787_v51 = vcombine.low %v3062_v47, %v3066_v49  ;;  %v2914_v42 = vld [vmem:[%s17896_s7 + $0x8e0] sm:$0xff] }
 0x2c3   :  { %v14501_v19 = vpack.c.bf16 %v2595_v52, %v2594_v18  ;;  %v14503_v45 = vpack.c.bf16 %v2591_v26, %v2590_v40  ;;  %v14505_v58 = vpack.c.bf16 %v2593_v61, %v2592_v28  ;;  %v11652_v60 = vcombine.high %v2926_v6, %v2930_v56  ;;  %v3038_v5 = vld [vmem:[%s17896_s7 + $0xcc0] sm:$0xff] }
 0x2c4   :  { %v14510_v34 = vpack.c.bf16 %v2597_v38, %v2596_v54  ;;  %v11780_v43 = vcombine.high %v3054_v15, %v3058_v24  ;;  %v11651_v63 = vcombine.low %v2926_v6, %v2930_v56  ;;  %v11779_v21 = vcombine.low %v3054_v15, %v3058_v24  ;;  %v3042_v25 = vld [vmem:[%s17896_s7 + $0xce0] sm:$0xff] }
 0x2c5   :  { %v14522_v55 = vrot.slane %v14503_v45, 2  ;;  %v14525_v10 = vrot.slane %v14503_v45, 6  ;;  %v14528_v22 = vrot.slane %v14503_v45, 4  ;;  %v14547_v4 = vrot.slane %v14505_v58, 2  ;;  %v2902_v30 = vld [vmem:[%s17896_s7 + $0x880] sm:$0xff] }
 0x2c6   :  { %v14550_v41 = vrot.slane %v14505_v58, 6  ;;  %v11644_v3 = vcombine.high %v2918_v62, %v2922_v32  ;;  %v11772_v59 = vcombine.high %v3046_v44, %v3050_v29  ;;  %v11643_v48 = vcombine.low %v2918_v62, %v2922_v32  ;;  %v2906_v37 = vld [vmem:[%s17896_s7 + $0x8a0] sm:$0xff] }
 0x2c7   :  { %8848 = vmatprep.mubr.bf16.mxu1 %v14522_v55  ;;  %8889 = vmatprep.mubr.bf16.mxu0 %v14525_v10  ;;  %v11771_v46 = vcombine.low %v3046_v44, %v3050_v29  ;;  %v11636_v20 = vcombine.high %v2910_v7, %v2914_v42  ;;  %v11764_v12 = vcombine.high %v3038_v5, %v3042_v25  ;;  %v3030_v11 = vld [vmem:[%s17896_s7 + $0xc80] sm:$0xff] }
 0x2c8   :  { %8849 = vmatmul.mubr.bf16.vlgmr.msra.gmra.mxu1 %v14503_v45  ;;  %8890 = vmatmul.mubr.bf16.vlgmr.msra.gmra.mxu0 %v14528_v22  ;;  %v3034_v13 = vld [vmem:[%s17896_s7 + $0xca0] sm:$0xff]  ;;  %v11635_v14 = vcombine.low %v2910_v7, %v2914_v42  ;;  %v11763_v9 = vcombine.low %v3038_v5, %v3042_v25  ;;  %v11628_v2 = vcombine.high %v2902_v30, %v2906_v37 }
 0x2c9   :  { %8899 = vmatpush1.bf16.msra.mxu1 %v17942_v53  ;;  %8940 = vmatpush1.bf16.msra.mxu0 %v17945_v36  ;;  %v11756_v0 = vcombine.high %v3030_v11, %v3034_v13  ;;  %v2894_v33 = vld [vmem:[%s17896_s7 + $0x840] sm:$0xff]  ;;  %v11627_v40 = vcombine.low %v2902_v30, %v2906_v37  ;;  %v11755_v61 = vcombine.low %v3030_v11, %v3034_v13 }
 0x2ca   :  { %8930 = vmatprep.mubr.bf16.mxu1 %v14547_v4  ;;  %8971 = vmatprep.mubr.bf16.mxu0 %v14550_v41  ;;  %v2898_v50 = vld [vmem:[%s17896_s7 + $0x860] sm:$0xff] }
 0x2cb   :  { %8900 = vmatprep.subr.bf16.mxu1 %v11660_v57  ;;  %8941 = vmatprep.subr.bf16.mxu0 %v11788_v31  ;;  %v3022_v39 = vld [vmem:[%s17896_s7 + $0xc40] sm:$0xff]  ;;  %v11620_v18 = vcombine.high %v2894_v33, %v2898_v50  ;;  %v11619_v23 = vcombine.low %v2894_v33, %v2898_v50 }
 0x2cc   :  { %v3026_v28 = vld [vmem:[%s17896_s7 + $0xc60] sm:$0xff] }
 0x2cd   :  { %8901 = vmatpush1.bf16.msra.mxu1 %v11659_v1  ;;  %8942 = vmatpush1.bf16.msra.mxu0 %v11787_v51  ;;  %v11748_v52 = vcombine.high %v3022_v39, %v3026_v28  ;;  %v2886_v26 = vld [vmem:[%s17896_s7 + $0x800] sm:$0xff]  ;;  %v11747_v47 = vcombine.low %v3022_v39, %v3026_v28 }
 0x2ce   :  { %8902 = vmatprep.subr.bf16.mxu1 %v11652_v60  ;;  %8943 = vmatprep.subr.bf16.mxu0 %v11780_v43  ;;  %v2890_v54 = vld [vmem:[%s17896_s7 + $0x820] sm:$0xff] }
 0x2cf   :  { %v3014_v38 = vld [vmem:[%s17896_s7 + $0xc00] sm:$0xff]  ;;  %v11612_v49 = vcombine.high %v2886_v26, %v2890_v54  ;;  %v11611_v24 = vcombine.low %v2886_v26, %v2890_v54 }
 0x2d0   :  { %v3018_v35 = vld [vmem:[%s17896_s7 + $0xc20] sm:$0xff] }
 0x2d1   :  { %8903 = vmatpush1.bf16.msra.mxu1 %v11651_v63  ;;  %8944 = vmatpush1.bf16.msra.mxu0 %v11779_v21  ;;  %v11740_v6 = vcombine.high %v3014_v38, %v3018_v35  ;;  %v3006_v57 = vld [vmem:[%s17896_s7 + $0xbc0] sm:$0xff]  ;;  %v11739_v16 = vcombine.low %v3014_v38, %v3018_v35 }
 0x2d2   :  { %8904 = vmatprep.subr.bf16.mxu1 %v11644_v3  ;;  %8945 = vmatprep.subr.bf16.mxu0 %v11772_v59  ;;  %v3010_v31 = vld [vmem:[%s17896_s7 + $0xbe0] sm:$0xff] }
 0x2d3   :  { %v3134_v56 = vld [vmem:[%s17896_s7 + $0xfc0] sm:$0xff]  ;;  %v11732_v8 = vcombine.high %v3006_v57, %v3010_v31  ;;  %v11731_v51 = vcombine.low %v3006_v57, %v3010_v31 }
 0x2d4   :  { %v3138_v15 = vld [vmem:[%s17896_s7 + $0xfe0] sm:$0xff] }
 0x2d5   :  { %8905 = vmatpush1.bf16.msra.mxu1 %v11643_v48  ;;  %8946 = vmatpush1.bf16.msra.mxu0 %v11771_v46  ;;  %v11860_v53 = vcombine.high %v3134_v56, %v3138_v15  ;;  %v2998_v17 = vld [vmem:[%s17896_s7 + $0xb80] sm:$0xff]  ;;  %v11859_v60 = vcombine.low %v3134_v56, %v3138_v15 }
 0x2d6   :  { %8906 = vmatprep.subr.bf16.mxu1 %v11636_v20  ;;  %8947 = vmatprep.subr.bf16.mxu0 %v11764_v12  ;;  %v3002_v27 = vld [vmem:[%s17896_s7 + $0xba0] sm:$0xff] }
 0x2d7   :  { %v3126_v36 = vld [vmem:[%s17896_s7 + $0xf80] sm:$0xff]  ;;  %v11724_v43 = vcombine.high %v2998_v17, %v3002_v27  ;;  %v11723_v21 = vcombine.low %v2998_v17, %v3002_v27 }
 0x2d8   :  { %v3130_v1 = vld [vmem:[%s17896_s7 + $0xfa0] sm:$0xff] }
 0x2d9   :  { %8907 = vmatpush1.bf16.msra.mxu1 %v11635_v14  ;;  %8948 = vmatpush1.bf16.msra.mxu0 %v11763_v9  ;;  %v11852_v62 = vcombine.high %v3126_v36, %v3130_v1  ;;  %v2990_v32 = vld [vmem:[%s17896_s7 + $0xb40] sm:$0xff]  ;;  %v11851_v3 = vcombine.low %v3126_v36, %v3130_v1 }
 0x2da   :  { %8908 = vmatprep.subr.bf16.mxu1 %v11628_v2  ;;  %8949 = vmatprep.subr.bf16.mxu0 %v11756_v0  ;;  %v2994_v44 = vld [vmem:[%s17896_s7 + $0xb60] sm:$0xff] }
 0x2db   :  { %v3118_v29 = vld [vmem:[%s17896_s7 + $0xf40] sm:$0xff]  ;;  %v11716_v59 = vcombine.high %v2990_v32, %v2994_v44  ;;  %v11715_v46 = vcombine.low %v2990_v32, %v2994_v44 }
 0x2dc   :  { %v3122_v63 = vld [vmem:[%s17896_s7 + $0xf60] sm:$0xff] }
 0x2dd   :  { %8909 = vmatpush1.bf16.msra.mxu1 %v11627_v40  ;;  %8950 = vmatpush1.bf16.msra.mxu0 %v11755_v61  ;;  %v11844_v7 = vcombine.high %v3118_v29, %v3122_v63  ;;  %v2982_v42 = vld [vmem:[%s17896_s7 + $0xb00] sm:$0xff]  ;;  %v11843_v20 = vcombine.low %v3118_v29, %v3122_v63 }
 0x2de   :  { %8910 = vmatprep.subr.bf16.mxu1 %v11620_v18  ;;  %8951 = vmatprep.subr.bf16.mxu0 %v11748_v52  ;;  %v2986_v5 = vld [vmem:[%s17896_s7 + $0xb20] sm:$0xff] }
 0x2df   :  { %v3110_v25 = vld [vmem:[%s17896_s7 + $0xf00] sm:$0xff]  ;;  %v11708_v12 = vcombine.high %v2982_v42, %v2986_v5  ;;  %v11707_v9 = vcombine.low %v2982_v42, %v2986_v5  ;;  %v14744_v42 = vrot.slane %v14501_v19, 2 }
 0x2e0   :  { %v3114_v48 = vld [vmem:[%s17896_s7 + $0xf20] sm:$0xff] }
 0x2e1   :  { %8911 = vmatpush1.bf16.msra.mxu1 %v11619_v23  ;;  %8952 = vmatpush1.bf16.msra.mxu0 %v11747_v47  ;;  %v11836_v30 = vcombine.high %v3110_v25, %v3114_v48  ;;  %v2974_v37 = vld [vmem:[%s17896_s7 + $0xac0] sm:$0xff]  ;;  %v11835_v2 = vcombine.low %v3110_v25, %v3114_v48 }
 0x2e2   :  { %8912 = vmatprep.subr.bf16.mxu1 %v11612_v49  ;;  %8953 = vmatprep.subr.bf16.mxu0 %v11740_v6  ;;  %v2978_v11 = vld [vmem:[%s17896_s7 + $0xae0] sm:$0xff] }
 0x2e3   :  { %v3102_v13 = vld [vmem:[%s17896_s7 + $0xec0] sm:$0xff]  ;;  %v11700_v0 = vcombine.high %v2974_v37, %v2978_v11  ;;  %v11699_v61 = vcombine.low %v2974_v37, %v2978_v11 }
 0x2e4   :  { %v3106_v14 = vld [vmem:[%s17896_s7 + $0xee0] sm:$0xff] }
 0x2e5   :  { %8913 = vmatpush1.bf16.msra.mxu1 %v11611_v24  ;;  %8954 = vmatpush1.bf16.msra.mxu0 %v11739_v16  ;;  %v11828_v33 = vcombine.high %v3102_v13, %v3106_v14  ;;  %v2966_v50 = vld [vmem:[%s17896_s7 + $0xa80] sm:$0xff]  ;;  %v11827_v18 = vcombine.low %v3102_v13, %v3106_v14 }
 0x2e6   :  { %8914 = vmatprep.subr.bf16.mxu1 %v11732_v8  ;;  %8955 = vmatprep.subr.bf16.mxu0 %v11860_v53  ;;  %v2970_v39 = vld [vmem:[%s17896_s7 + $0xaa0] sm:$0xff] }
 0x2e7   :  { %v3094_v28 = vld [vmem:[%s17896_s7 + $0xe80] sm:$0xff]  ;;  %v11692_v52 = vcombine.high %v2966_v50, %v2970_v39  ;;  %v11691_v47 = vcombine.low %v2966_v50, %v2970_v39 }
 0x2e8   :  { %v3098_v40 = vld [vmem:[%s17896_s7 + $0xea0] sm:$0xff] }
 0x2e9   :  { %8915 = vmatpush2.bf16.msra.mxu1 %v11731_v51  ;;  %8956 = vmatpush2.bf16.msra.mxu0 %v11859_v60  ;;  %v11820_v26 = vcombine.high %v3094_v28, %v3098_v40  ;;  %v2958_v54 = vld [vmem:[%s17896_s7 + $0xa40] sm:$0xff]  ;;  %v11819_v49 = vcombine.low %v3094_v28, %v3098_v40 }
 0x2ea   :  { %8916 = vmatprep.subr.bf16.mxu1 %v11724_v43  ;;  %8957 = vmatprep.subr.bf16.mxu0 %v11852_v62  ;;  %v2962_v38 = vld [vmem:[%s17896_s7 + $0xa60] sm:$0xff] }
 0x2eb   :  { %v3086_v35 = vld [vmem:[%s17896_s7 + $0xe40] sm:$0xff]  ;;  %v11684_v6 = vcombine.high %v2958_v54, %v2962_v38  ;;  %v11683_v16 = vcombine.low %v2958_v54, %v2962_v38 }
 0x2ec   :  { %v3090_v23 = vld [vmem:[%s17896_s7 + $0xe60] sm:$0xff] }
 0x2ed   :  { %8917 = vmatpush2.bf16.msra.mxu1 %v11723_v21  ;;  %8958 = vmatpush2.bf16.msra.mxu0 %v11851_v3  ;;  %v11812_v57 = vcombine.high %v3086_v35, %v3090_v23  ;;  %v2950_v31 = vld [vmem:[%s17896_s7 + $0xa00] sm:$0xff]  ;;  %v11811_v8 = vcombine.low %v3086_v35, %v3090_v23 }
 0x2ee   :  { %8918 = vmatprep.subr.bf16.mxu1 %v11716_v59  ;;  %8959 = vmatprep.subr.bf16.mxu0 %v11844_v7  ;;  %v2954_v56 = vld [vmem:[%s17896_s7 + $0xa20] sm:$0xff]  ;;  %v14741_v59 = vrot.slane %v14505_v58, 4 }
 0x2ef   :  { %v3078_v15 = vld [vmem:[%s17896_s7 + $0xe00] sm:$0xff]  ;;  %v11676_v53 = vcombine.high %v2950_v31, %v2954_v56  ;;  %v11675_v60 = vcombine.low %v2950_v31, %v2954_v56 }
 0x2f0   :  { %v3082_v24 = vld [vmem:[%s17896_s7 + $0xe20] sm:$0xff] }
 0x2f1   :  { %8919 = vmatpush2.bf16.msra.mxu1 %v11715_v46  ;;  %8960 = vmatpush2.bf16.msra.mxu0 %v11843_v20  ;;  %v11804_v17 = vcombine.high %v3078_v15, %v3082_v24  ;;  %v3198_v27 = vld [vmem:[%s17896_s7 + $0x11c0] sm:$0xff]  ;;  %v11803_v43 = vcombine.low %v3078_v15, %v3082_v24  ;;  %v14755_v20 = vrot.slane %v14501_v19, 6 }
 0x2f2   :  { %8920 = vmatprep.subr.bf16.mxu1 %v11708_v12  ;;  %8961 = vmatprep.subr.bf16.mxu0 %v11836_v30  ;;  %v3202_v36 = vld [vmem:[%s17896_s7 + $0x11e0] sm:$0xff] }
 0x2f3   :  { %v3326_v1 = vld [vmem:[%s17896_s7 + $0x15c0] sm:$0xff]  ;;  %v11924_v62 = vcombine.high %v3198_v27, %v3202_v36  ;;  %v11923_v3 = vcombine.low %v3198_v27, %v3202_v36 }
 0x2f4   :  { %v3330_v51 = vld [vmem:[%s17896_s7 + $0x15e0] sm:$0xff] }
 0x2f5   :  { %8921 = vmatpush2.bf16.msra.mxu1 %v11707_v9  ;;  %8962 = vmatpush2.bf16.msra.mxu0 %v11835_v2  ;;  %v12052_v32 = vcombine.high %v3326_v1, %v3330_v51  ;;  %v3190_v44 = vld [vmem:[%s17896_s7 + $0x1180] sm:$0xff]  ;;  %v12051_v7 = vcombine.low %v3326_v1, %v3330_v51 }
 0x2f6   :  { %8922 = vmatprep.subr.bf16.mxu1 %v11700_v0  ;;  %8963 = vmatprep.subr.bf16.mxu0 %v11828_v33  ;;  %v3194_v29 = vld [vmem:[%s17896_s7 + $0x11a0] sm:$0xff] }
 0x2f7   :  { %v3318_v63 = vld [vmem:[%s17896_s7 + $0x1580] sm:$0xff]  ;;  %v11916_v5 = vcombine.high %v3190_v44, %v3194_v29  ;;  %v11915_v37 = vcombine.low %v3190_v44, %v3194_v29 }
 0x2f8   :  { %v3322_v21 = vld [vmem:[%s17896_s7 + $0x15a0] sm:$0xff] }
 0x2f9   :  { %8923 = vmatpush2.bf16.msra.mxu1 %v11699_v61  ;;  %8964 = vmatpush2.bf16.msra.mxu0 %v11827_v18  ;;  %v12044_v25 = vcombine.high %v3318_v63, %v3322_v21  ;;  %v3182_v48 = vld [vmem:[%s17896_s7 + $0x1140] sm:$0xff]  ;;  %v12043_v11 = vcombine.low %v3318_v63, %v3322_v21 }
 0x2fa   :  { %8924 = vmatprep.subr.bf16.mxu1 %v11692_v52  ;;  %8965 = vmatprep.subr.bf16.mxu0 %v11820_v26  ;;  %v3186_v46 = vld [vmem:[%s17896_s7 + $0x1160] sm:$0xff] }
 0x2fb   :  { %v3310_v12 = vld [vmem:[%s17896_s7 + $0x1540] sm:$0xff]  ;;  %v11908_v13 = vcombine.high %v3182_v48, %v3186_v46  ;;  %v11907_v50 = vcombine.low %v3182_v48, %v3186_v46 }
 0x2fc   :  { %v3314_v30 = vld [vmem:[%s17896_s7 + $0x1560] sm:$0xff] }
 0x2fd   :  { %8925 = vmatpush2.bf16.msra.mxu1 %v11691_v47  ;;  %8966 = vmatpush2.bf16.msra.mxu0 %v11819_v49  ;;  %v12036_v14 = vcombine.high %v3310_v12, %v3314_v30  ;;  %v3174_v9 = vld [vmem:[%s17896_s7 + $0x1100] sm:$0xff]  ;;  %v12035_v39 = vcombine.low %v3310_v12, %v3314_v30 }
 0x2fe   :  { %8926 = vmatprep.subr.bf16.mxu1 %v11684_v6  ;;  %8967 = vmatprep.subr.bf16.mxu0 %v11812_v57  ;;  %v3178_v2 = vld [vmem:[%s17896_s7 + $0x1120] sm:$0xff] }
 0x2ff   :  { %v3302_v0 = vld [vmem:[%s17896_s7 + $0x1500] sm:$0xff]  ;;  %v11900_v28 = vcombine.high %v3174_v9, %v3178_v2  ;;  %v11899_v54 = vcombine.low %v3174_v9, %v3178_v2 }
 0x300   :  { %v3306_v33 = vld [vmem:[%s17896_s7 + $0x1520] sm:$0xff] }
 0x301   :  { %8927 = vmatpush2.bf16.msra.mxu1 %v11683_v16  ;;  %8968 = vmatpush2.bf16.msra.mxu0 %v11811_v8  ;;  %v12028_v40 = vcombine.high %v3302_v0, %v3306_v33  ;;  %v3166_v61 = vld [vmem:[%s17896_s7 + $0x10c0] sm:$0xff]  ;;  %v12027_v38 = vcombine.low %v3302_v0, %v3306_v33 }
 0x302   :  { %8928 = vmatprep.subr.bf16.mxu1 %v11676_v53  ;;  %8969 = vmatprep.subr.bf16.mxu0 %v11804_v17  ;;  %v3170_v18 = vld [vmem:[%s17896_s7 + $0x10e0] sm:$0xff] }
 0x303   :  { %v3294_v52 = vld [vmem:[%s17896_s7 + $0x14c0] sm:$0xff]  ;;  %v11892_v35 = vcombine.high %v3166_v61, %v3170_v18  ;;  %v11891_v31 = vcombine.low %v3166_v61, %v3170_v18 }
 0x304   :  { %v3298_v26 = vld [vmem:[%s17896_s7 + $0x14e0] sm:$0xff] }
 0x305   :  { %8929 = vmatpush2.bf16.msra.mxu1 %v11675_v60  ;;  %8970 = vmatpush2.bf16.msra.mxu0 %v11803_v43  ;;  %v12020_v23 = vcombine.high %v3294_v52, %v3298_v26  ;;  %v3158_v47 = vld [vmem:[%s17896_s7 + $0x1080] sm:$0xff]  ;;  %v12019_v56 = vcombine.low %v3294_v52, %v3298_v26 }
 0x306   :  { %8980 = vmatprep.subr.bf16.mxu1 %v11924_v62  ;;  %9021 = vmatprep.subr.bf16.mxu0 %v12052_v32  ;;  %v3162_v49 = vld [vmem:[%s17896_s7 + $0x10a0] sm:$0xff] }
 0x307   :  { %v3286_v6 = vld [vmem:[%s17896_s7 + $0x1480] sm:$0xff]  ;;  %v11884_v15 = vcombine.high %v3158_v47, %v3162_v49  ;;  %v11883_v27 = vcombine.low %v3158_v47, %v3162_v49 }
 0x308   :  { %8931 = vmatmul.mubr.bf16.vlgmr.msra.gmra.mxu1 %v14505_v58  ;;  %8972 = vmatmul.mubr.bf16.vlgmr.msra.gmra.mxu0 %v14741_v59  ;;  %v3290_v57 = vld [vmem:[%s17896_s7 + $0x14a0] sm:$0xff] }
 0x309   :  { %8981 = vmatpush1.bf16.msra.mxu1 %v11923_v3  ;;  %9012 = vmatprep.mubr.bf16.mxu1 %v14744_v42  ;;  %v12012_v24 = vcombine.high %v3286_v6, %v3290_v57  ;;  %v3150_v16 = vld [vmem:[%s17896_s7 + $0x1040] sm:$0xff]  ;;  %v12011_v36 = vcombine.low %v3286_v6, %v3290_v57 }
 0x30a   :  { %9022 = vmatpush1.bf16.msra.mxu0 %v12051_v7  ;;  %9053 = vmatprep.mubr.bf16.mxu0 %v14755_v20  ;;  %v3154_v8 = vld [vmem:[%s17896_s7 + $0x1060] sm:$0xff] }
 0x30b   :  { %8982 = vmatprep.subr.bf16.mxu1 %v11916_v5  ;;  %9023 = vmatprep.subr.bf16.mxu0 %v12044_v25  ;;  %v3278_v53 = vld [vmem:[%s17896_s7 + $0x1440] sm:$0xff]  ;;  %v11876_v1 = vcombine.high %v3150_v16, %v3154_v8  ;;  %v11875_v44 = vcombine.low %v3150_v16, %v3154_v8 }
 0x30c   :  { %v3282_v17 = vld [vmem:[%s17896_s7 + $0x1460] sm:$0xff] }
 0x30d   :  { %8983 = vmatpush1.bf16.msra.mxu1 %v11915_v37  ;;  %v12004_v51 = vcombine.high %v3278_v53, %v3282_v17  ;;  %v3142_v60 = vld [vmem:[%s17896_s7 + $0x1000] sm:$0xff]  ;;  %v12003_v29 = vcombine.low %v3278_v53, %v3282_v17 }
 0x30e   :  { %9024 = vmatpush1.bf16.msra.mxu0 %v12043_v11  ;;  %8984 = vmatprep.subr.bf16.mxu1 %v11908_v13  ;;  %v3146_v43 = vld [vmem:[%s17896_s7 + $0x1020] sm:$0xff] }
 0x30f   :  { %9025 = vmatprep.subr.bf16.mxu0 %v12036_v14  ;;  %v3270_v62 = vld [vmem:[%s17896_s7 + $0x1400] sm:$0xff]  ;;  %v11868_v63 = vcombine.high %v3142_v60, %v3146_v43  ;;  %v11867_v48 = vcombine.low %v3142_v60, %v3146_v43 }
 0x310   :  { %v3274_v32 = vld [vmem:[%s17896_s7 + $0x1420] sm:$0xff] }
 0x311   :  { %8985 = vmatpush1.bf16.msra.mxu1 %v11907_v50  ;;  %v11996_v21 = vcombine.high %v3270_v62, %v3274_v32  ;;  %v3262_v3 = vld [vmem:[%s17896_s7 + $0x13c0] sm:$0xff]  ;;  %v11995_v46 = vcombine.low %v3270_v62, %v3274_v32 }
 0x312   :  { %9026 = vmatpush1.bf16.msra.mxu0 %v12035_v39  ;;  %8986 = vmatprep.subr.bf16.mxu1 %v11900_v28  ;;  %v3266_v7 = vld [vmem:[%s17896_s7 + $0x13e0] sm:$0xff] }
 0x313   :  { %9027 = vmatprep.subr.bf16.mxu0 %v12028_v40  ;;  %v3390_v5 = vld [vmem:[%s17896_s7 + $0x17c0] sm:$0xff]  ;;  %v11988_v12 = vcombine.high %v3262_v3, %v3266_v7  ;;  %v11987_v9 = vcombine.low %v3262_v3, %v3266_v7 }
 0x314   :  { %v3394_v25 = vld [vmem:[%s17896_s7 + $0x17e0] sm:$0xff] }
 0x315   :  { %8987 = vmatpush1.bf16.msra.mxu1 %v11899_v54  ;;  %v12116_v30 = vcombine.high %v3390_v5, %v3394_v25  ;;  %v3254_v37 = vld [vmem:[%s17896_s7 + $0x1380] sm:$0xff]  ;;  %v12115_v2 = vcombine.low %v3390_v5, %v3394_v25 }
 0x316   :  { %9028 = vmatpush1.bf16.msra.mxu0 %v12027_v38  ;;  %8988 = vmatprep.subr.bf16.mxu1 %v11892_v35  ;;  %v3258_v11 = vld [vmem:[%s17896_s7 + $0x13a0] sm:$0xff] }
 0x317   :  { %9029 = vmatprep.subr.bf16.mxu0 %v12020_v23  ;;  %v3382_v13 = vld [vmem:[%s17896_s7 + $0x1780] sm:$0xff]  ;;  %v11980_v0 = vcombine.high %v3254_v37, %v3258_v11  ;;  %v11979_v61 = vcombine.low %v3254_v37, %v3258_v11 }
 0x318   :  { %v3386_v14 = vld [vmem:[%s17896_s7 + $0x17a0] sm:$0xff] }
 0x319   :  { %8989 = vmatpush1.bf16.msra.mxu1 %v11891_v31  ;;  %v12108_v33 = vcombine.high %v3382_v13, %v3386_v14  ;;  %v3246_v50 = vld [vmem:[%s17896_s7 + $0x1340] sm:$0xff]  ;;  %v12107_v18 = vcombine.low %v3382_v13, %v3386_v14 }
 0x31a   :  { %9030 = vmatpush1.bf16.msra.mxu0 %v12019_v56  ;;  %8990 = vmatprep.subr.bf16.mxu1 %v11884_v15  ;;  %v3250_v39 = vld [vmem:[%s17896_s7 + $0x1360] sm:$0xff] }
 0x31b   :  { %9031 = vmatprep.subr.bf16.mxu0 %v12012_v24  ;;  %v3374_v28 = vld [vmem:[%s17896_s7 + $0x1740] sm:$0xff]  ;;  %v11972_v52 = vcombine.high %v3246_v50, %v3250_v39  ;;  %v11971_v47 = vcombine.low %v3246_v50, %v3250_v39 }
 0x31c   :  { %v3378_v40 = vld [vmem:[%s17896_s7 + $0x1760] sm:$0xff] }
 0x31d   :  { %8991 = vmatpush1.bf16.msra.mxu1 %v11883_v27  ;;  %v12100_v26 = vcombine.high %v3374_v28, %v3378_v40  ;;  %v3238_v54 = vld [vmem:[%s17896_s7 + $0x1300] sm:$0xff]  ;;  %v12099_v49 = vcombine.low %v3374_v28, %v3378_v40 }
 0x31e   :  { %9032 = vmatpush1.bf16.msra.mxu0 %v12011_v36  ;;  %8992 = vmatprep.subr.bf16.mxu1 %v11876_v1  ;;  %v3242_v38 = vld [vmem:[%s17896_s7 + $0x1320] sm:$0xff] }
 0x31f   :  { %9033 = vmatprep.subr.bf16.mxu0 %v12004_v51  ;;  %v3366_v35 = vld [vmem:[%s17896_s7 + $0x1700] sm:$0xff]  ;;  %v11964_v6 = vcombine.high %v3238_v54, %v3242_v38  ;;  %v11963_v16 = vcombine.low %v3238_v54, %v3242_v38 }
 0x320   :  { %v3370_v23 = vld [vmem:[%s17896_s7 + $0x1720] sm:$0xff] }
 0x321   :  { %8993 = vmatpush1.bf16.msra.mxu1 %v11875_v44  ;;  %v12092_v57 = vcombine.high %v3366_v35, %v3370_v23  ;;  %v3230_v31 = vld [vmem:[%s17896_s7 + $0x12c0] sm:$0xff]  ;;  %v12091_v8 = vcombine.low %v3366_v35, %v3370_v23  ;;  %v14946_v35 = vrot.slane %v14501_v19, 4 }
 0x322   :  { %9034 = vmatpush1.bf16.msra.mxu0 %v12003_v29  ;;  %8994 = vmatprep.subr.bf16.mxu1 %v11868_v63  ;;  %v3234_v56 = vld [vmem:[%s17896_s7 + $0x12e0] sm:$0xff] }
 0x323   :  { %9035 = vmatprep.subr.bf16.mxu0 %v11996_v21  ;;  %v3358_v15 = vld [vmem:[%s17896_s7 + $0x16c0] sm:$0xff]  ;;  %v11956_v53 = vcombine.high %v3230_v31, %v3234_v56  ;;  %v11955_v60 = vcombine.low %v3230_v31, %v3234_v56 }
 0x324   :  { %v3362_v24 = vld [vmem:[%s17896_s7 + $0x16e0] sm:$0xff] }
 0x325   :  { %8995 = vmatpush1.bf16.msra.mxu1 %v11867_v48  ;;  %v12084_v17 = vcombine.high %v3358_v15, %v3362_v24  ;;  %v3222_v27 = vld [vmem:[%s17896_s7 + $0x1280] sm:$0xff]  ;;  %v12083_v43 = vcombine.low %v3358_v15, %v3362_v24  ;;  %v14966_v15 = vrot.slane %v14510_v34, 6 }
 0x326   :  { %9036 = vmatpush1.bf16.msra.mxu0 %v11995_v46  ;;  %8996 = vmatprep.subr.bf16.mxu1 %v11988_v12  ;;  %v3226_v36 = vld [vmem:[%s17896_s7 + $0x12a0] sm:$0xff] }
 0x327   :  { %9037 = vmatprep.subr.bf16.mxu0 %v12116_v30  ;;  %v3350_v1 = vld [vmem:[%s17896_s7 + $0x1680] sm:$0xff]  ;;  %v11948_v62 = vcombine.high %v3222_v27, %v3226_v36  ;;  %v11947_v3 = vcombine.low %v3222_v27, %v3226_v36 }
 0x328   :  { %v3354_v51 = vld [vmem:[%s17896_s7 + $0x16a0] sm:$0xff] }
 0x329   :  { %8997 = vmatpush2.bf16.msra.mxu1 %v11987_v9  ;;  %v12076_v32 = vcombine.high %v3350_v1, %v3354_v51  ;;  %v3214_v44 = vld [vmem:[%s17896_s7 + $0x1240] sm:$0xff]  ;;  %v12075_v7 = vcombine.low %v3350_v1, %v3354_v51 }
 0x32a   :  { %9038 = vmatpush2.bf16.msra.mxu0 %v12115_v2  ;;  %8998 = vmatprep.subr.bf16.mxu1 %v11980_v0  ;;  %v3218_v29 = vld [vmem:[%s17896_s7 + $0x1260] sm:$0xff] }
 0x32b   :  { %9039 = vmatprep.subr.bf16.mxu0 %v12108_v33  ;;  %v3342_v63 = vld [vmem:[%s17896_s7 + $0x1640] sm:$0xff]  ;;  %v11940_v5 = vcombine.high %v3214_v44, %v3218_v29  ;;  %v11939_v37 = vcombine.low %v3214_v44, %v3218_v29 }
 0x32c   :  { %v3346_v21 = vld [vmem:[%s17896_s7 + $0x1660] sm:$0xff] }
 0x32d   :  { %8999 = vmatpush2.bf16.msra.mxu1 %v11979_v61  ;;  %v12068_v25 = vcombine.high %v3342_v63, %v3346_v21  ;;  %v3206_v48 = vld [vmem:[%s17896_s7 + $0x1200] sm:$0xff]  ;;  %v12067_v11 = vcombine.low %v3342_v63, %v3346_v21 }
 0x32e   :  { %9040 = vmatpush2.bf16.msra.mxu0 %v12107_v18  ;;  %9000 = vmatprep.subr.bf16.mxu1 %v11972_v52  ;;  %v3210_v46 = vld [vmem:[%s17896_s7 + $0x1220] sm:$0xff] }
 0x32f   :  { %9041 = vmatprep.subr.bf16.mxu0 %v12100_v26  ;;  %v3334_v12 = vld [vmem:[%s17896_s7 + $0x1600] sm:$0xff]  ;;  %v11932_v13 = vcombine.high %v3206_v48, %v3210_v46  ;;  %v11931_v50 = vcombine.low %v3206_v48, %v3210_v46 }
 0x330   :  { %v3338_v30 = vld [vmem:[%s17896_s7 + $0x1620] sm:$0xff] }
 0x331   :  { %9001 = vmatpush2.bf16.msra.mxu1 %v11971_v47  ;;  %v12060_v14 = vcombine.high %v3334_v12, %v3338_v30  ;;  %v3454_v9 = vld [vmem:[%s17896_s7 + $0x19c0] sm:$0xff]  ;;  %v12059_v39 = vcombine.low %v3334_v12, %v3338_v30 }
 0x332   :  { %9042 = vmatpush2.bf16.msra.mxu0 %v12099_v49  ;;  %9002 = vmatprep.subr.bf16.mxu1 %v11964_v6  ;;  %v3458_v2 = vld [vmem:[%s17896_s7 + $0x19e0] sm:$0xff]  ;;  %v14956_v6 = vrot.slane %v14510_v34, 2 }
 0x333   :  { %9043 = vmatprep.subr.bf16.mxu0 %v12092_v57  ;;  %v3582_v0 = vld [vmem:[%s17896_s7 + $0x1dc0] sm:$0xff]  ;;  %v12180_v28 = vcombine.high %v3454_v9, %v3458_v2  ;;  %v12179_v52 = vcombine.low %v3454_v9, %v3458_v2 }
 0x334   :  { %v3586_v33 = vld [vmem:[%s17896_s7 + $0x1de0] sm:$0xff] }
 0x335   :  { %9003 = vmatpush2.bf16.msra.mxu1 %v11963_v16  ;;  %v12308_v40 = vcombine.high %v3582_v0, %v3586_v33  ;;  %v3446_v61 = vld [vmem:[%s17896_s7 + $0x1980] sm:$0xff]  ;;  %v12307_v38 = vcombine.low %v3582_v0, %v3586_v33 }
 0x336   :  { %9044 = vmatpush2.bf16.msra.mxu0 %v12091_v8  ;;  %9004 = vmatprep.subr.bf16.mxu1 %v11956_v53  ;;  %v3450_v18 = vld [vmem:[%s17896_s7 + $0x19a0] sm:$0xff] }
 0x337   :  { %9045 = vmatprep.subr.bf16.mxu0 %v12084_v17  ;;  %v3574_v26 = vld [vmem:[%s17896_s7 + $0x1d80] sm:$0xff]  ;;  %v12172_v23 = vcombine.high %v3446_v61, %v3450_v18  ;;  %v12171_v24 = vcombine.low %v3446_v61, %v3450_v18 }
 0x338   :  { %v3578_v54 = vld [vmem:[%s17896_s7 + $0x1da0] sm:$0xff] }
 0x339   :  { %9005 = vmatpush2.bf16.msra.mxu1 %v11955_v60  ;;  %v3438_v47 = vld [vmem:[%s17896_s7 + $0x1940] sm:$0xff]  ;;  %v12300_v57 = vcombine.high %v3574_v26, %v3578_v54  ;;  %v12299_v16 = vcombine.low %v3574_v26, %v3578_v54 }
 0x33a   :  { %9046 = vmatpush2.bf16.msra.mxu0 %v12083_v43  ;;  %9006 = vmatprep.subr.bf16.mxu1 %v11948_v62  ;;  %v3442_v49 = vld [vmem:[%s17896_s7 + $0x1960] sm:$0xff] }
 0x33b   :  { %9047 = vmatprep.subr.bf16.mxu0 %v12076_v32  ;;  %v3566_v31 = vld [vmem:[%s17896_s7 + $0x1d40] sm:$0xff]  ;;  %v12164_v8 = vcombine.high %v3438_v47, %v3442_v49  ;;  %v12163_v51 = vcombine.low %v3438_v47, %v3442_v49 }
 0x33c   :  { %v3570_v56 = vld [vmem:[%s17896_s7 + $0x1d60] sm:$0xff] }
 0x33d   :  { %9007 = vmatpush2.bf16.msra.mxu1 %v11947_v3  ;;  %v12292_v53 = vcombine.high %v3566_v31, %v3570_v56  ;;  %v3430_v17 = vld [vmem:[%s17896_s7 + $0x1900] sm:$0xff]  ;;  %v12291_v60 = vcombine.low %v3566_v31, %v3570_v56 }
 0x33e   :  { %9048 = vmatpush2.bf16.msra.mxu0 %v12075_v7  ;;  %9008 = vmatprep.subr.bf16.mxu1 %v11940_v5  ;;  %v3434_v27 = vld [vmem:[%s17896_s7 + $0x1920] sm:$0xff] }
 0x33f   :  { %9049 = vmatprep.subr.bf16.mxu0 %v12068_v25  ;;  %v3558_v36 = vld [vmem:[%s17896_s7 + $0x1d00] sm:$0xff]  ;;  %v12156_v43 = vcombine.high %v3430_v17, %v3434_v27  ;;  %v12155_v21 = vcombine.low %v3430_v17, %v3434_v27 }
 0x340   :  { %v3562_v1 = vld [vmem:[%s17896_s7 + $0x1d20] sm:$0xff] }
 0x341   :  { %9009 = vmatpush2.bf16.msra.mxu1 %v11939_v37  ;;  %v12284_v62 = vcombine.high %v3558_v36, %v3562_v1  ;;  %v3422_v32 = vld [vmem:[%s17896_s7 + $0x18c0] sm:$0xff]  ;;  %v12283_v3 = vcombine.low %v3558_v36, %v3562_v1 }
 0x342   :  { %9050 = vmatpush2.bf16.msra.mxu0 %v12067_v11  ;;  %9010 = vmatprep.subr.bf16.mxu1 %v11932_v13  ;;  %v3426_v44 = vld [vmem:[%s17896_s7 + $0x18e0] sm:$0xff] }
 0x343   :  { %9051 = vmatprep.subr.bf16.mxu0 %v12060_v14  ;;  %v3550_v29 = vld [vmem:[%s17896_s7 + $0x1cc0] sm:$0xff]  ;;  %v12148_v7 = vcombine.high %v3422_v32, %v3426_v44  ;;  %v12147_v30 = vcombine.low %v3422_v32, %v3426_v44 }
 0x344   :  { %v3554_v63 = vld [vmem:[%s17896_s7 + $0x1ce0] sm:$0xff] }
 0x345   :  { %9011 = vmatpush2.bf16.msra.mxu1 %v11931_v50  ;;  %v12276_v5 = vcombine.high %v3550_v29, %v3554_v63  ;;  %v3414_v25 = vld [vmem:[%s17896_s7 + $0x1880] sm:$0xff]  ;;  %v12275_v37 = vcombine.low %v3550_v29, %v3554_v63 }
 0x346   :  { %9052 = vmatpush2.bf16.msra.mxu0 %v12059_v39  ;;  %9062 = vmatprep.subr.bf16.mxu1 %v12180_v28  ;;  %v3418_v48 = vld [vmem:[%s17896_s7 + $0x18a0] sm:$0xff] }
 0x347   :  { %9103 = vmatprep.subr.bf16.mxu0 %v12308_v40  ;;  %v3542_v46 = vld [vmem:[%s17896_s7 + $0x1c80] sm:$0xff]  ;;  %v12140_v11 = vcombine.high %v3414_v25, %v3418_v48  ;;  %v12139_v33 = vcombine.low %v3414_v25, %v3418_v48 }
 0x348   :  { %9013 = vmatmul.mubr.bf16.vlgmr.msra.gmra.mxu1 %v14501_v19  ;;  %v3546_v12 = vld [vmem:[%s17896_s7 + $0x1ca0] sm:$0xff] }
 0x349   :  { %9054 = vmatmul.mubr.bf16.vlgmr.msra.gmra.mxu0 %v14946_v35  ;;  %9063 = vmatpush1.bf16.msra.mxu1 %v12179_v52  ;;  %v12268_v13 = vcombine.high %v3542_v46, %v3546_v12  ;;  %v3406_v14 = vld [vmem:[%s17896_s7 + $0x1840] sm:$0xff]  ;;  %v12267_v50 = vcombine.low %v3542_v46, %v3546_v12 }
 0x34a   :  { %9094 = vmatprep.mubr.bf16.mxu1 %v14956_v6  ;;  %9104 = vmatpush1.bf16.msra.mxu0 %v12307_v38  ;;  %v3410_v9 = vld [vmem:[%s17896_s7 + $0x1860] sm:$0xff] }
 0x34b   :  { %9135 = vmatprep.mubr.bf16.mxu0 %v14966_v15  ;;  %9064 = vmatprep.subr.bf16.mxu1 %v12172_v23  ;;  %v3534_v2 = vld [vmem:[%s17896_s7 + $0x1c40] sm:$0xff]  ;;  %v12132_v39 = vcombine.high %v3406_v14, %v3410_v9  ;;  %v12131_v26 = vcombine.low %v3406_v14, %v3410_v9 }
 0x34c   :  { %9105 = vmatprep.subr.bf16.mxu0 %v12300_v57  ;;  %v3538_v0 = vld [vmem:[%s17896_s7 + $0x1c60] sm:$0xff] }
 0x34d   :  { %9065 = vmatpush1.bf16.msra.mxu1 %v12171_v24  ;;  %v12260_v28 = vcombine.high %v3534_v2, %v3538_v0  ;;  %v3398_v40 = vld [vmem:[%s17896_s7 + $0x1800] sm:$0xff]  ;;  %v12259_v54 = vcombine.low %v3534_v2, %v3538_v0 }
 0x34e   :  { %9106 = vmatpush1.bf16.msra.mxu0 %v12299_v16  ;;  %9066 = vmatprep.subr.bf16.mxu1 %v12164_v8  ;;  %v3402_v61 = vld [vmem:[%s17896_s7 + $0x1820] sm:$0xff] }
 0x34f   :  { %9107 = vmatprep.subr.bf16.mxu0 %v12292_v53  ;;  %v3526_v18 = vld [vmem:[%s17896_s7 + $0x1c00] sm:$0xff]  ;;  %v12124_v38 = vcombine.high %v3398_v40, %v3402_v61  ;;  %v12123_v56 = vcombine.low %v3398_v40, %v3402_v61 }
 0x350   :  { %v3530_v52 = vld [vmem:[%s17896_s7 + $0x1c20] sm:$0xff] }
 0x351   :  { %9067 = vmatpush1.bf16.msra.mxu1 %v12163_v51  ;;  %v12252_v23 = vcombine.high %v3526_v18, %v3530_v52  ;;  %v3518_v47 = vld [vmem:[%s17896_s7 + $0x1bc0] sm:$0xff]  ;;  %v12251_v24 = vcombine.low %v3526_v18, %v3530_v52 }
 0x352   :  { %9108 = vmatpush1.bf16.msra.mxu0 %v12291_v60  ;;  %9068 = vmatprep.subr.bf16.mxu1 %v12156_v43  ;;  %v3522_v49 = vld [vmem:[%s17896_s7 + $0x1be0] sm:$0xff] }
 0x353   :  { %9109 = vmatprep.subr.bf16.mxu0 %v12284_v62  ;;  %v3646_v57 = vld [vmem:[%s17896_s7 + $0x1fc0] sm:$0xff]  ;;  %v12244_v16 = vcombine.high %v3518_v47, %v3522_v49  ;;  %v12243_v1 = vcombine.low %v3518_v47, %v3522_v49 }
 0x354   :  { %v3650_v31 = vld [vmem:[%s17896_s7 + $0x1fe0] sm:$0xff] }
 0x355   :  { %9069 = vmatpush1.bf16.msra.mxu1 %v12155_v21  ;;  %v12372_v8 = vcombine.high %v3646_v57, %v3650_v31  ;;  %v3510_v53 = vld [vmem:[%s17896_s7 + $0x1b80] sm:$0xff]  ;;  %v12371_v51 = vcombine.low %v3646_v57, %v3650_v31 }
 0x356   :  { %9110 = vmatpush1.bf16.msra.mxu0 %v12283_v3  ;;  %9070 = vmatprep.subr.bf16.mxu1 %v12148_v7  ;;  %v3514_v17 = vld [vmem:[%s17896_s7 + $0x1ba0] sm:$0xff] }
 0x357   :  { %9111 = vmatprep.subr.bf16.mxu0 %v12276_v5  ;;  %v3638_v27 = vld [vmem:[%s17896_s7 + $0x1f80] sm:$0xff]  ;;  %v12236_v60 = vcombine.high %v3510_v53, %v3514_v17  ;;  %v12235_v63 = vcombine.low %v3510_v53, %v3514_v17 }
 0x358   :  { %v3642_v36 = vld [vmem:[%s17896_s7 + $0x1fa0] sm:$0xff] }
 0x359   :  { %9071 = vmatpush1.bf16.msra.mxu1 %v12147_v30  ;;  %v12364_v43 = vcombine.high %v3638_v27, %v3642_v36  ;;  %v3502_v62 = vld [vmem:[%s17896_s7 + $0x1b40] sm:$0xff]  ;;  %v12363_v21 = vcombine.low %v3638_v27, %v3642_v36 }
 0x35a   :  { %9112 = vmatpush1.bf16.msra.mxu0 %v12275_v37  ;;  %9072 = vmatprep.subr.bf16.mxu1 %v12140_v11  ;;  %v3506_v32 = vld [vmem:[%s17896_s7 + $0x1b60] sm:$0xff] }
 0x35b   :  { %9113 = vmatprep.subr.bf16.mxu0 %v12268_v13  ;;  %v3630_v44 = vld [vmem:[%s17896_s7 + $0x1f40] sm:$0xff]  ;;  %v12228_v3 = vcombine.high %v3502_v62, %v3506_v32  ;;  %v12227_v12 = vcombine.low %v3502_v62, %v3506_v32  ;;  %v2691_v62 = vld [vmem:[%s17896_s7 + $0x1e8] sm:$0xff] }
 0x35c   :  { %v3634_v29 = vld [vmem:[%s17896_s7 + $0x1f60] sm:$0xff]  ;;  %v2815_v32 = vld [vmem:[%s17896_s7 + $0x5c8] sm:$0xff] }
 0x35d   :  { %9073 = vmatpush1.bf16.msra.mxu1 %v12139_v33  ;;  %v12356_v7 = vcombine.high %v3630_v44, %v3634_v29  ;;  %v3494_v5 = vld [vmem:[%s17896_s7 + $0x1b00] sm:$0xff]  ;;  %v12355_v30 = vcombine.low %v3630_v44, %v3634_v29  ;;  %v2819_v44 = vld [vmem:[%s17896_s7 + $0x5e8] sm:$0xff] }
 0x35e   :  { %9114 = vmatpush1.bf16.msra.mxu0 %v12267_v50  ;;  %9074 = vmatprep.subr.bf16.mxu1 %v12132_v39  ;;  %v3498_v25 = vld [vmem:[%s17896_s7 + $0x1b20] sm:$0xff] }
 0x35f   :  { %9115 = vmatprep.subr.bf16.mxu0 %v12260_v28  ;;  %v3622_v48 = vld [vmem:[%s17896_s7 + $0x1f00] sm:$0xff]  ;;  %v12220_v37 = vcombine.high %v3494_v5, %v3498_v25  ;;  %v12219_v0 = vcombine.low %v3494_v5, %v3498_v25  ;;  %v2679_v5 = vld [vmem:[%s17896_s7 + $0x188] sm:$0xff] }
 0x360   :  { %v3626_v46 = vld [vmem:[%s17896_s7 + $0x1f20] sm:$0xff]  ;;  %v2683_v25 = vld [vmem:[%s17896_s7 + $0x1a8] sm:$0xff] }
 0x361   :  { %9075 = vmatpush1.bf16.msra.mxu1 %v12131_v26  ;;  %v12348_v11 = vcombine.high %v3622_v48, %v3626_v46  ;;  %v3486_v13 = vld [vmem:[%s17896_s7 + $0x1ac0] sm:$0xff]  ;;  %v12347_v33 = vcombine.low %v3622_v48, %v3626_v46  ;;  %v17946_v46 = vld [vmem:[#allocation4_spill] sm:$0xff] }
 0x362   :  { %9116 = vmatpush1.bf16.msra.mxu0 %v12259_v54  ;;  %9076 = vmatprep.subr.bf16.mxu1 %v12124_v38  ;;  %v3490_v14 = vld [vmem:[%s17896_s7 + $0x1ae0] sm:$0xff] }
 0x363   :  { %9117 = vmatprep.subr.bf16.mxu0 %v12252_v23  ;;  %v3614_v9 = vld [vmem:[%s17896_s7 + $0x1ec0] sm:$0xff]  ;;  %v12212_v50 = vcombine.high %v3486_v13, %v3490_v14  ;;  %v12211_v52 = vcombine.low %v3486_v13, %v3490_v14  ;;  %v15155_v13 = vrot.slane %v14510_v34, 4 }
 0x364   :  { %v3618_v2 = vld [vmem:[%s17896_s7 + $0x1ee0] sm:$0xff] }
 0x365   :  { %9077 = vmatpush1.bf16.msra.mxu1 %v12123_v56  ;;  %v12340_v39 = vcombine.high %v3614_v9, %v3618_v2  ;;  %v3478_v28 = vld [vmem:[%s17896_s7 + $0x1a80] sm:$0xff]  ;;  %v12339_v26 = vcombine.low %v3614_v9, %v3618_v2  ;;  %v11406_v2 = vcombine.high %v2679_v5, %v2683_v25 }
 0x366   :  { %9118 = vmatpush1.bf16.msra.mxu0 %v12251_v24  ;;  %9078 = vmatprep.subr.bf16.mxu1 %v12244_v16  ;;  %v3482_v40 = vld [vmem:[%s17896_s7 + $0x1aa0] sm:$0xff] }
 0x367   :  { %9119 = vmatprep.subr.bf16.mxu0 %v12372_v8  ;;  %v3606_v61 = vld [vmem:[%s17896_s7 + $0x1e80] sm:$0xff]  ;;  %v12204_v54 = vcombine.high %v3478_v28, %v3482_v40  ;;  %v12203_v31 = vcombine.low %v3478_v28, %v3482_v40  ;;  %v2799_v40 = vld [vmem:[%s17896_s7 + $0x548] sm:$0xff] }
 0x368   :  { %v3610_v18 = vld [vmem:[%s17896_s7 + $0x1ea0] sm:$0xff] }
 0x369   :  { %9079 = vmatpush2.bf16.msra.mxu1 %v12243_v1  ;;  %v12332_v38 = vcombine.high %v3606_v61, %v3610_v18  ;;  %v3470_v23 = vld [vmem:[%s17896_s7 + $0x1a40] sm:$0xff]  ;;  %v12331_v56 = vcombine.low %v3606_v61, %v3610_v18  ;;  %v2803_v61 = vld [vmem:[%s17896_s7 + $0x568] sm:$0xff] }
 0x36a   :  { %9120 = vmatpush2.bf16.msra.mxu0 %v12371_v51  ;;  %9080 = vmatprep.subr.bf16.mxu1 %v12236_v60  ;;  %v3474_v47 = vld [vmem:[%s17896_s7 + $0x1a60] sm:$0xff] }
 0x36b   :  { %9121 = vmatprep.subr.bf16.mxu0 %v12364_v43  ;;  %v3598_v49 = vld [vmem:[%s17896_s7 + $0x1e40] sm:$0xff]  ;;  %v12196_v24 = vcombine.high %v3470_v23, %v3474_v47  ;;  %v12195_v36 = vcombine.low %v3470_v23, %v3474_v47  ;;  %v2687_v43 = vld [vmem:[%s17896_s7 + $0x1c8] sm:$0xff] }
 0x36c   :  { %v3602_v57 = vld [vmem:[%s17896_s7 + $0x1e60] sm:$0xff]  ;;  %v11413_v48 = vcombine.low %v2687_v43, %v2691_v62 }
 0x36d   :  { %9081 = vmatpush2.bf16.msra.mxu1 %v12235_v63  ;;  %v12324_v16 = vcombine.high %v3598_v49, %v3602_v57  ;;  %v3462_v8 = vld [vmem:[%s17896_s7 + $0x1a00] sm:$0xff]  ;;  %v12323_v1 = vcombine.low %v3598_v49, %v3602_v57  ;;  %v11526_v57 = vcombine.high %v2799_v40, %v2803_v61 }
 0x36e   :  { %9122 = vmatpush2.bf16.msra.mxu0 %v12363_v21  ;;  %9082 = vmatprep.subr.bf16.mxu1 %v12228_v3  ;;  %v3466_v53 = vld [vmem:[%s17896_s7 + $0x1a20] sm:$0xff]  ;;  %v11414_v21 = vcombine.high %v2687_v43, %v2691_v62  ;;  %v2655_v62 = vld [vmem:[%s17896_s7 + $0xc8] sm:$0xff] }
 0x36f   :  { %9123 = vmatprep.subr.bf16.mxu0 %v12356_v7  ;;  %v3590_v17 = vld [vmem:[%s17896_s7 + $0x1e00] sm:$0xff]  ;;  %v12188_v51 = vcombine.high %v3462_v8, %v3466_v53  ;;  %v12187_v29 = vcombine.low %v3462_v8, %v3466_v53  ;;  %v11542_v7 = vcombine.high %v2815_v32, %v2819_v44  ;;  %v2791_v8 = vld [vmem:[%s17896_s7 + $0x508] sm:$0xff] }
 0x370   :  { %v3594_v27 = vld [vmem:[%s17896_s7 + $0x1e20] sm:$0xff]  ;;  %v2795_v53 = vld [vmem:[%s17896_s7 + $0x528] sm:$0xff] }
 0x371   :  { %9083 = vmatpush2.bf16.msra.mxu1 %v12227_v12  ;;  %v12316_v60 = vcombine.high %v3590_v17, %v3594_v27  ;;  %v12315_v63 = vcombine.low %v3590_v17, %v3594_v27  ;;  %v3654_v3 = vld [vmem:[%s17899_s8] sm:$0xff]  ;;  %v11518_v43 = vcombine.high %v2791_v8, %v2795_v53 }
 0x372   :  { %9124 = vmatpush2.bf16.msra.mxu0 %v12355_v30  ;;  %9084 = vmatprep.subr.bf16.mxu1 %v12220_v37  ;;  %v3659_v12 = vrot.slane %v3654_v3, %v17946_v46  ;;  %v2807_v30 = vld [vmem:[%s17896_s7 + $0x588] sm:$0xff]  ;;  %v17947_v14 = vld [vmem:[#allocation5_spill] sm:$0xff] }
 0x373   :  { %9125 = vmatprep.subr.bf16.mxu0 %v12348_v11  ;;  %v2811_v37 = vld [vmem:[%s17896_s7 + $0x5a8] sm:$0xff]  ;;  %v11541_v11 = vcombine.low %v2815_v32, %v2819_v44  ;;  %v3663_v9 = vrot.slane %v3654_v3, %v17947_v14 }
 0x374   :  { %v11534_v28 = vcombine.high %v2807_v30, %v2811_v37  ;;  %v2659_v32 = vld [vmem:[%s17896_s7 + $0xe8] sm:$0xff] }
 0x375   :  { %9085 = vmatpush2.bf16.msra.mxu1 %v12219_v0  ;;  %v2671_v0 = vld [vmem:[%s17896_s7 + $0x148] sm:$0xff]  ;;  %v11382_v3 = vcombine.high %v2655_v62, %v2659_v32 }
 0x376   :  { %9126 = vmatpush2.bf16.msra.mxu0 %v12347_v33  ;;  %9086 = vmatprep.subr.bf16.mxu1 %v12212_v50  ;;  %v2675_v33 = vld [vmem:[%s17896_s7 + $0x168] sm:$0xff] }
 0x377   :  { %9127 = vmatprep.subr.bf16.mxu0 %v12340_v39  ;;  %v11398_v23 = vcombine.high %v2671_v0, %v2675_v33  ;;  %v11397_v27 = vcombine.low %v2671_v0, %v2675_v33  ;;  %v2783_v44 = vld [vmem:[%s17896_s7 + $0x4c8] sm:$0xff] }
 0x378   :  { %v2643_v0 = vld [vmem:[%s17896_s7 + $0x68] sm:$0xff] }
 0x379   :  { %9087 = vmatpush2.bf16.msra.mxu1 %v12211_v52  ;;  %v11405_v52 = vcombine.low %v2679_v5, %v2683_v25  ;;  %v2647_v5 = vld [vmem:[%s17896_s7 + $0x88] sm:$0xff] }
 0x37a   :  { %9128 = vmatpush2.bf16.msra.mxu0 %v12339_v26  ;;  %9088 = vmatprep.subr.bf16.mxu1 %v12204_v54  ;;  %v2651_v25 = vld [vmem:[%s17896_s7 + $0xa8] sm:$0xff] }
 0x37b   :  { %9129 = vmatprep.subr.bf16.mxu0 %v12332_v38  ;;  %v11533_v38 = vcombine.low %v2807_v30, %v2811_v37  ;;  %v11381_v30 = vcombine.low %v2655_v62, %v2659_v32  ;;  %v2767_v33 = vld [vmem:[%s17896_s7 + $0x448] sm:$0xff] }
 0x37d   :  { %9089 = vmatpush2.bf16.msra.mxu1 %v12203_v31  ;;  %v2663_v31 = vld [vmem:[%s17896_s7 + $0x108] sm:$0xff] }
 0x37e   :  { %9130 = vmatpush2.bf16.msra.mxu0 %v12331_v56  ;;  %9090 = vmatprep.subr.bf16.mxu1 %v12196_v24  ;;  %v2667_v56 = vld [vmem:[%s17896_s7 + $0x128] sm:$0xff] }
 0x37f   :  { %9131 = vmatprep.subr.bf16.mxu0 %v12324_v16 }
 0x381   :  { %9091 = vmatpush2.bf16.msra.mxu1 %v12195_v36 }
 0x382   :  { %9132 = vmatpush2.bf16.msra.mxu0 %v12323_v1  ;;  %9092 = vmatprep.subr.bf16.mxu1 %v12188_v51  ;;  %v11525_v51 = vcombine.low %v2799_v40, %v2803_v61 }
 0x383   :  { %9133 = vmatprep.subr.bf16.mxu0 %v12316_v60  ;;  %v11390_v60 = vcombine.high %v2663_v31, %v2667_v56 }
 0x385   :  { %9093 = vmatpush2.bf16.msra.mxu1 %v12187_v29  ;;  %v2787_v29 = vld [vmem:[%s17896_s7 + $0x4e8] sm:$0xff] }
 0x386   :  { %9134 = vmatpush2.bf16.msra.mxu0 %v12315_v63  ;;  %9144 = vmatprep.subr.bf16.mxu1 %v11414_v21  ;;  %v11389_v63 = vcombine.low %v2663_v31, %v2667_v56  ;;  %v11517_v21 = vcombine.low %v2791_v8, %v2795_v53  ;;  %v11509_v37 = vcombine.low %v2783_v44, %v2787_v29  ;;  %v2751_v31 = vld [vmem:[%s17896_s7 + $0x3c8] sm:$0xff] }
 0x387   :  { %9185 = vmatprep.subr.bf16.mxu0 %v11542_v7  ;;  %v11510_v7 = vcombine.high %v2783_v44, %v2787_v29  ;;  %v2755_v56 = vld [vmem:[%s17896_s7 + $0x3e8] sm:$0xff] }
 0x388   :  { %9095 = vmatmul.mubr.bf16.vlgmr.msra.gmra.mxu1 %v14510_v34  ;;  %v8850_v50 = vpop.f32.mrf.mxu1  ;;  %v8891_v39 = vpop.f32.mrf.mxu0  ;;  %v11477_v62 = vcombine.low %v2751_v31, %v2755_v56 }
 0x389   :  { %9136 = vmatmul.mubr.bf16.vlgmr.msra.gmra.mxu0 %v15155_v13  ;;  %v8851_v18 = vadd.f32 %v8850_v50, %v3659_v12  ;;  %9145 = vmatpush1.bf16.msra.mxu1 %v11413_v48  ;;  %v2775_v48 = vld [vmem:[%s17896_s7 + $0x488] sm:$0xff] }
 0x38a   :  { %9176 = vmatprep.mubr.bf16.mxu1 %v14522_v55  ;;  %9186 = vmatpush1.bf16.msra.mxu0 %v11541_v11  ;;  %v8852_v26 = vpop.f32.mrf.mxu1  ;;  %v8893_v54 = vpop.f32.mrf.mxu0  ;;  %v2779_v12 = vld [vmem:[%s17896_s7 + $0x4a8] sm:$0xff]  ;;  %v11374_v11 = vcombine.high %v2647_v5, %v2651_v25 }
 0x38b   :  { %v15173_v47 = vadd.f32 %v8891_v39, %v8851_v18  ;;  %9217 = vmatprep.mubr.bf16.mxu0 %v14525_v10  ;;  %v8853_v49 = vadd.f32 %v8852_v26, %v3663_v9  ;;  %9146 = vmatprep.subr.bf16.mxu1 %v11406_v2  ;;  %v11502_v9 = vcombine.high %v2775_v48, %v2779_v12  ;;  %v2639_v2 = vld [vmem:[%s17896_s7 + $0x48] sm:$0xff] }
 0x38c   :  { %9187 = vmatprep.subr.bf16.mxu0 %v11534_v28  ;;  %v8854_v24 = vpop.f32.mrf.mxu1  ;;  %v8895_v16 = vpop.f32.mrf.mxu0  ;;  %v2771_v50 = vld [vmem:[%s17896_s7 + $0x468] sm:$0xff]  ;;  %v11373_v39 = vcombine.low %v2647_v5, %v2651_v25  ;;  %v11501_v28 = vcombine.low %v2775_v48, %v2779_v12  ;;  %v11366_v40 = vcombine.high %v2639_v2, %v2643_v0 }
 0x38d   :  { %v15188_v17 = vadd.f32 %v8893_v54, %v8853_v49  ;;  %9147 = vmatpush1.bf16.msra.mxu1 %v11405_v52  ;;  %v11494_v61 = vcombine.high %v2767_v33, %v2771_v50  ;;  %v2631_v18 = vld [vmem:[%s17896_s7 + $0x8] sm:$0xff] }
 0x38e   :  { %9188 = vmatpush1.bf16.msra.mxu0 %v11533_v38  ;;  %v8855_v36 = vpop.f32.mrf.mxu1  ;;  %v8896_v1 = vpop.f32.mrf.mxu0  ;;  %9148 = vmatprep.subr.bf16.mxu1 %v11398_v23  ;;  %v2635_v52 = vld [vmem:[%s17896_s7 + $0x28] sm:$0xff]  ;;  %v11365_v38 = vcombine.low %v2639_v2, %v2643_v0  ;;  %v11493_v23 = vcombine.low %v2767_v33, %v2771_v50 }
 0x38f   :  { %9189 = vmatprep.subr.bf16.mxu0 %v11526_v57  ;;  %v2759_v26 = vld [vmem:[%s17896_s7 + $0x408] sm:$0xff]  ;;  %v11358_v49 = vcombine.high %v2631_v18, %v2635_v52  ;;  %v11357_v8 = vcombine.low %v2631_v18, %v2635_v52 }
 0x390   :  { %v2763_v54 = vld [vmem:[%s17896_s7 + $0x428] sm:$0xff] }
 0x391   :  { %9149 = vmatpush1.bf16.msra.mxu1 %v11397_v27  ;;  %v11486_v57 = vcombine.high %v2759_v26, %v2763_v54  ;;  %v2879_v24 = vld [vmem:[%s17896_s7 + $0x7c8] sm:$0xff]  ;;  %v11485_v53 = vcombine.low %v2759_v26, %v2763_v54  ;;  %v11478_v27 = vcombine.high %v2751_v31, %v2755_v56 }
 0x392   :  { %9190 = vmatpush1.bf16.msra.mxu0 %v11525_v51  ;;  %9150 = vmatprep.subr.bf16.mxu1 %v11390_v60  ;;  %v2883_v16 = vld [vmem:[%s17896_s7 + $0x7e8] sm:$0xff] }
 0x393   :  { %9191 = vmatprep.subr.bf16.mxu0 %v11518_v43  ;;  %v11606_v36 = vcombine.high %v2879_v24, %v2883_v16  ;;  %v2743_v1 = vld [vmem:[%s17896_s7 + $0x388] sm:$0xff]  ;;  %v11605_v32 = vcombine.low %v2879_v24, %v2883_v16 }
 0x394   :  { %v2747_v51 = vld [vmem:[%s17896_s7 + $0x3a8] sm:$0xff] }
 0x395   :  { %9151 = vmatpush1.bf16.msra.mxu1 %v11389_v63  ;;  %v2871_v60 = vld [vmem:[%s17896_s7 + $0x788] sm:$0xff]  ;;  %v11470_v44 = vcombine.high %v2743_v1, %v2747_v51  ;;  %v11469_v5 = vcombine.low %v2743_v1, %v2747_v51 }
 0x396   :  { %9192 = vmatpush1.bf16.msra.mxu0 %v11517_v21  ;;  %9152 = vmatprep.subr.bf16.mxu1 %v11382_v3  ;;  %v2875_v43 = vld [vmem:[%s17896_s7 + $0x7a8] sm:$0xff] }
 0x397   :  { %9193 = vmatprep.subr.bf16.mxu0 %v11510_v7  ;;  %v11598_v29 = vcombine.high %v2871_v60, %v2875_v43  ;;  %v2735_v63 = vld [vmem:[%s17896_s7 + $0x348] sm:$0xff]  ;;  %v11597_v25 = vcombine.low %v2871_v60, %v2875_v43 }
 0x398   :  { %v2739_v21 = vld [vmem:[%s17896_s7 + $0x368] sm:$0xff] }
 0x399   :  { %9153 = vmatpush1.bf16.msra.mxu1 %v11381_v30  ;;  %v2863_v3 = vld [vmem:[%s17896_s7 + $0x748] sm:$0xff]  ;;  %v11462_v48 = vcombine.high %v2735_v63, %v2739_v21  ;;  %v11461_v2 = vcombine.low %v2735_v63, %v2739_v21 }
 0x39a   :  { %9194 = vmatpush1.bf16.msra.mxu0 %v11509_v37  ;;  %9154 = vmatprep.subr.bf16.mxu1 %v11374_v11  ;;  %v2867_v7 = vld [vmem:[%s17896_s7 + $0x768] sm:$0xff] }
 0x39b   :  { %9195 = vmatprep.subr.bf16.mxu0 %v11502_v9  ;;  %v11590_v12 = vcombine.high %v2863_v3, %v2867_v7  ;;  %v2727_v30 = vld [vmem:[%s17896_s7 + $0x308] sm:$0xff]  ;;  %v11589_v0 = vcombine.low %v2863_v3, %v2867_v7 }
 0x39c   :  { %v2731_v37 = vld [vmem:[%s17896_s7 + $0x328] sm:$0xff] }
 0x39d   :  { %9155 = vmatpush1.bf16.msra.mxu1 %v11373_v39  ;;  %v2855_v11 = vld [vmem:[%s17896_s7 + $0x708] sm:$0xff]  ;;  %v11454_v33 = vcombine.high %v2727_v30, %v2731_v37  ;;  %v11453_v18 = vcombine.low %v2727_v30, %v2731_v37 }
 0x39e   :  { %9196 = vmatpush1.bf16.msra.mxu0 %v11501_v28  ;;  %9156 = vmatprep.subr.bf16.mxu1 %v11366_v40  ;;  %v2859_v9 = vld [vmem:[%s17896_s7 + $0x728] sm:$0xff] }
 0x39f   :  { %9197 = vmatprep.subr.bf16.mxu0 %v11494_v61  ;;  %v11582_v50 = vcombine.high %v2855_v11, %v2859_v9  ;;  %v2719_v39 = vld [vmem:[%s17896_s7 + $0x2c8] sm:$0xff]  ;;  %v11581_v52 = vcombine.low %v2855_v11, %v2859_v9 }
 0x3a0   :  { %v2723_v28 = vld [vmem:[%s17896_s7 + $0x2e8] sm:$0xff] }
 0x3a1   :  { %9157 = vmatpush1.bf16.msra.mxu1 %v11365_v38  ;;  %v2847_v40 = vld [vmem:[%s17896_s7 + $0x6c8] sm:$0xff]  ;;  %v11446_v26 = vcombine.high %v2719_v39, %v2723_v28  ;;  %v11445_v31 = vcombine.low %v2719_v39, %v2723_v28 }
 0x3a2   :  { %9198 = vmatpush1.bf16.msra.mxu0 %v11493_v23  ;;  %9158 = vmatprep.subr.bf16.mxu1 %v11358_v49  ;;  %v2851_v61 = vld [vmem:[%s17896_s7 + $0x6e8] sm:$0xff] }
 0x3a3   :  { %9199 = vmatprep.subr.bf16.mxu0 %v11486_v57  ;;  %v11574_v54 = vcombine.high %v2847_v40, %v2851_v61  ;;  %v2711_v38 = vld [vmem:[%s17896_s7 + $0x288] sm:$0xff]  ;;  %v11573_v56 = vcombine.low %v2847_v40, %v2851_v61 }
 0x3a4   :  { %v2715_v23 = vld [vmem:[%s17896_s7 + $0x2a8] sm:$0xff] }
 0x3a5   :  { %9159 = vmatpush1.bf16.msra.mxu1 %v11357_v8  ;;  %v2839_v49 = vld [vmem:[%s17896_s7 + $0x688] sm:$0xff]  ;;  %v11438_v24 = vcombine.high %v2711_v38, %v2715_v23  ;;  %v11437_v1 = vcombine.low %v2711_v38, %v2715_v23 }
 0x3a6   :  { %9200 = vmatpush1.bf16.msra.mxu0 %v11485_v53  ;;  %9160 = vmatprep.subr.bf16.mxu1 %v11478_v27  ;;  %v2843_v57 = vld [vmem:[%s17896_s7 + $0x6a8] sm:$0xff] }
 0x3a7   :  { %9201 = vmatprep.subr.bf16.mxu0 %v11606_v36  ;;  %v11566_v16 = vcombine.high %v2839_v49, %v2843_v57  ;;  %v2703_v8 = vld [vmem:[%s17896_s7 + $0x248] sm:$0xff]  ;;  %v11565_v51 = vcombine.low %v2839_v49, %v2843_v57 }
 0x3a8   :  { %v2707_v53 = vld [vmem:[%s17896_s7 + $0x268] sm:$0xff] }
 0x3a9   :  { %9161 = vmatpush2.bf16.msra.mxu1 %v11477_v62  ;;  %v2831_v27 = vld [vmem:[%s17896_s7 + $0x648] sm:$0xff]  ;;  %v11430_v60 = vcombine.high %v2703_v8, %v2707_v53  ;;  %v11429_v63 = vcombine.low %v2703_v8, %v2707_v53 }
 0x3aa   :  { %9202 = vmatpush2.bf16.msra.mxu0 %v11605_v32  ;;  %9162 = vmatprep.subr.bf16.mxu1 %v11470_v44  ;;  %v2835_v36 = vld [vmem:[%s17896_s7 + $0x668] sm:$0xff] }
 0x3ab   :  { %9203 = vmatprep.subr.bf16.mxu0 %v11598_v29  ;;  %v11558_v43 = vcombine.high %v2831_v27, %v2835_v36  ;;  %v2695_v62 = vld [vmem:[%s17896_s7 + $0x208] sm:$0xff]  ;;  %v11557_v21 = vcombine.low %v2831_v27, %v2835_v36 }
 0x3ac   :  { %v2699_v32 = vld [vmem:[%s17896_s7 + $0x228] sm:$0xff] }
 0x3ad   :  { %9163 = vmatpush2.bf16.msra.mxu1 %v11469_v5  ;;  %v2823_v44 = vld [vmem:[%s17896_s7 + $0x608] sm:$0xff]  ;;  %v11422_v3 = vcombine.high %v2695_v62, %v2699_v32  ;;  %v11421_v30 = vcombine.low %v2695_v62, %v2699_v32 }
 0x3ae   :  { %9204 = vmatpush2.bf16.msra.mxu0 %v11597_v25  ;;  %9164 = vmatprep.subr.bf16.mxu1 %v11462_v48  ;;  %v2827_v29 = vld [vmem:[%s17896_s7 + $0x628] sm:$0xff] }
 0x3af   :  { %9205 = vmatprep.subr.bf16.mxu0 %v11590_v12  ;;  %v11550_v7 = vcombine.high %v2823_v44, %v2827_v29  ;;  %v2943_v5 = vld [vmem:[%s17896_s7 + $0x9c8] sm:$0xff]  ;;  %v11549_v37 = vcombine.low %v2823_v44, %v2827_v29 }
 0x3b0   :  { %v2947_v25 = vld [vmem:[%s17896_s7 + $0x9e8] sm:$0xff] }
 0x3b1   :  { %9165 = vmatpush2.bf16.msra.mxu1 %v11461_v2  ;;  %v3071_v48 = vld [vmem:[%s17896_s7 + $0xdc8] sm:$0xff]  ;;  %v11670_v11 = vcombine.high %v2943_v5, %v2947_v25 }
 0x3b2   :  { %9206 = vmatpush2.bf16.msra.mxu0 %v11589_v0  ;;  %9166 = vmatprep.subr.bf16.mxu1 %v11454_v33  ;;  %v3075_v12 = vld [vmem:[%s17896_s7 + $0xde8] sm:$0xff]  ;;  %v11669_v33 = vcombine.low %v2943_v5, %v2947_v25 }
 0x3b3   :  { %9207 = vmatprep.subr.bf16.mxu0 %v11582_v50  ;;  %v11798_v9 = vcombine.high %v3071_v48, %v3075_v12  ;;  %v2935_v2 = vld [vmem:[%s17896_s7 + $0x988] sm:$0xff]  ;;  %v11797_v28 = vcombine.low %v3071_v48, %v3075_v12 }
 0x3b4   :  { %v2939_v0 = vld [vmem:[%s17896_s7 + $0x9a8] sm:$0xff] }
 0x3b5   :  { %9167 = vmatpush2.bf16.msra.mxu1 %v11453_v18  ;;  %v3063_v50 = vld [vmem:[%s17896_s7 + $0xd88] sm:$0xff]  ;;  %v11662_v40 = vcombine.high %v2935_v2, %v2939_v0  ;;  %v11661_v57 = vcombine.low %v2935_v2, %v2939_v0 }
 0x3b6   :  { %9208 = vmatpush2.bf16.msra.mxu0 %v11581_v52  ;;  %9168 = vmatprep.subr.bf16.mxu1 %v11446_v26  ;;  %v3067_v39 = vld [vmem:[%s17896_s7 + $0xda8] sm:$0xff] }
 0x3b7   :  { %9209 = vmatprep.subr.bf16.mxu0 %v11574_v54  ;;  %v2927_v61 = vld [vmem:[%s17896_s7 + $0x948] sm:$0xff]  ;;  %v11790_v54 = vcombine.high %v3063_v50, %v3067_v39 }
 0x3b8   :  { %v2931_v18 = vld [vmem:[%s17896_s7 + $0x968] sm:$0xff] }
 0x3b9   :  { %9169 = vmatpush2.bf16.msra.mxu1 %v11445_v31  ;;  %v3055_v38 = vld [vmem:[%s17896_s7 + $0xd48] sm:$0xff]  ;;  %v11653_v62 = vcombine.low %v2927_v61, %v2931_v18 }
 0x3ba   :  { %9210 = vmatpush2.bf16.msra.mxu0 %v11573_v56  ;;  %9170 = vmatprep.subr.bf16.mxu1 %v11438_v24  ;;  %v3059_v23 = vld [vmem:[%s17896_s7 + $0xd68] sm:$0xff]  ;;  %v11789_v24 = vcombine.low %v3063_v50, %v3067_v39 }
 0x3bb   :  { %9211 = vmatprep.subr.bf16.mxu0 %v11566_v16  ;;  %v11654_v16 = vcombine.high %v2927_v61, %v2931_v18  ;;  %v11782_v27 = vcombine.high %v3055_v38, %v3059_v23  ;;  %v2923_v36 = vld [vmem:[%s17896_s7 + $0x928] sm:$0xff]  ;;  %v11781_v29 = vcombine.low %v3055_v38, %v3059_v23 }
 0x3bc   :  { %v3039_v5 = vld [vmem:[%s17896_s7 + $0xcc8] sm:$0xff] }
 0x3bd   :  { %9171 = vmatpush2.bf16.msra.mxu1 %v11437_v1  ;;  %v3043_v25 = vld [vmem:[%s17896_s7 + $0xce8] sm:$0xff] }
 0x3be   :  { %9212 = vmatpush2.bf16.msra.mxu0 %v11565_v51  ;;  %9172 = vmatprep.subr.bf16.mxu1 %v11430_v60  ;;  %v3047_v60 = vld [vmem:[%s17896_s7 + $0xd08] sm:$0xff]  ;;  %v11765_v50 = vcombine.low %v3039_v5, %v3043_v25 }
 0x3bf   :  { %9213 = vmatprep.subr.bf16.mxu0 %v11558_v43  ;;  %v3031_v2 = vld [vmem:[%s17896_s7 + $0xc88] sm:$0xff] }
 0x3c0   :  { %v3035_v0 = vld [vmem:[%s17896_s7 + $0xca8] sm:$0xff] }
 0x3c1   :  { %9173 = vmatpush2.bf16.msra.mxu1 %v11429_v63  ;;  %v2899_v61 = vld [vmem:[%s17896_s7 + $0x868] sm:$0xff] }
 0x3c2   :  { %9214 = vmatpush2.bf16.msra.mxu0 %v11557_v21  ;;  %9174 = vmatprep.subr.bf16.mxu1 %v11422_v3  ;;  %v2911_v3 = vld [vmem:[%s17896_s7 + $0x8c8] sm:$0xff] }
 0x3c3   :  { %9215 = vmatprep.subr.bf16.mxu0 %v11550_v7  ;;  %v2915_v7 = vld [vmem:[%s17896_s7 + $0x8e8] sm:$0xff] }
 0x3c4   :  { %v3023_v18 = vld [vmem:[%s17896_s7 + $0xc48] sm:$0xff] }
 0x3c5   :  { %9175 = vmatpush2.bf16.msra.mxu1 %v11421_v30  ;;  %v11638_v30 = vcombine.high %v2911_v3, %v2915_v7 }
 0x3c6   :  { %9216 = vmatpush2.bf16.msra.mxu0 %v11549_v37  ;;  %9226 = vmatprep.subr.bf16.mxu1 %v11670_v11  ;;  %v11766_v37 = vcombine.high %v3039_v5, %v3043_v25  ;;  %v2903_v11 = vld [vmem:[%s17896_s7 + $0x888] sm:$0xff] }
 0x3c7   :  { %9267 = vmatprep.subr.bf16.mxu0 %v11798_v9  ;;  %v2907_v9 = vld [vmem:[%s17896_s7 + $0x8a8] sm:$0xff] }
 0x3c8   :  { %v8932_v52 = vpop.f32.mrf.mxu1  ;;  %v8973_v26 = vpop.f32.mrf.mxu0  ;;  %9177 = vmatmul.mubr.bf16.vlgmr.msra.gmra.mxu1 %v14503_v45  ;;  %v11630_v39 = vcombine.high %v2903_v11, %v2907_v9 }
 0x3c9   :  { %v8933_v49 = vadd.f32 %v8932_v52, %v15173_v47  ;;  %9218 = vmatmul.mubr.bf16.vlgmr.msra.gmra.mxu0 %v14528_v22  ;;  %9227 = vmatpush1.bf16.msra.mxu1 %v11669_v33  ;;  %v2919_v47 = vld [vmem:[%s17896_s7 + $0x908] sm:$0xff]  ;;  %v11637_v33 = vcombine.low %v2911_v3, %v2915_v7 }
 0x3ca   :  { %9258 = vmatprep.mubr.bf16.mxu1 %v14547_v4  ;;  %9268 = vmatpush1.bf16.msra.mxu0 %v11797_v28  ;;  %v8934_v31 = vpop.f32.mrf.mxu1  ;;  %v8975_v56 = vpop.f32.mrf.mxu0  ;;  %v11646_v63 = vcombine.high %v2919_v47, %v2923_v36  ;;  %v11645_v48 = vcombine.low %v2919_v47, %v2923_v36  ;;  %v11758_v28 = vcombine.high %v3031_v2, %v3035_v0  ;;  %v3027_v52 = vld [vmem:[%s17896_s7 + $0xc68] sm:$0xff] }
 0x3cb   :  { %v15374_v8 = vadd.f32 %v8973_v26, %v8933_v49  ;;  %9299 = vmatprep.mubr.bf16.mxu0 %v14550_v41  ;;  %v8935_v53 = vadd.f32 %v8934_v31, %v15188_v17  ;;  %9228 = vmatprep.subr.bf16.mxu1 %v11662_v40  ;;  %v3051_v17 = vld [vmem:[%s17896_s7 + $0xd28] sm:$0xff]  ;;  %v11629_v26 = vcombine.low %v2903_v11, %v2907_v9 }
 0x3cc   :  { %v8936_v1 = vpop.f32.mrf.mxu1  ;;  %v8977_v51 = vpop.f32.mrf.mxu0  ;;  %9269 = vmatprep.subr.bf16.mxu0 %v11790_v54  ;;  %v11774_v21 = vcombine.high %v3047_v60, %v3051_v17  ;;  %v11773_v12 = vcombine.low %v3047_v60, %v3051_v17  ;;  %v2895_v40 = vld [vmem:[%s17896_s7 + $0x848] sm:$0xff]  ;;  %v11757_v54 = vcombine.low %v3031_v2, %v3035_v0  ;;  %v11750_v23 = vcombine.high %v3023_v18, %v3027_v52 }
 0x3cd   :  { %v15390_v43 = vadd.f32 %v8975_v56, %v8935_v53  ;;  %9229 = vmatpush1.bf16.msra.mxu1 %v11661_v57  ;;  %v11622_v38 = vcombine.high %v2895_v40, %v2899_v61  ;;  %v2887_v49 = vld [vmem:[%s17896_s7 + $0x808] sm:$0xff] }
 0x3ce   :  { %9270 = vmatpush1.bf16.msra.mxu0 %v11789_v24  ;;  %v8937_v32 = vpop.f32.mrf.mxu1  ;;  %v8978_v44 = vpop.f32.mrf.mxu0  ;;  %9230 = vmatprep.subr.bf16.mxu1 %v11654_v16  ;;  %v2891_v57 = vld [vmem:[%s17896_s7 + $0x828] sm:$0xff]  ;;  %v11621_v24 = vcombine.low %v2895_v40, %v2899_v61  ;;  %v11749_v16 = vcombine.low %v3023_v18, %v3027_v52 }
 0x3cf   :  { %9271 = vmatprep.subr.bf16.mxu0 %v11782_v27  ;;  %v3015_v31 = vld [vmem:[%s17896_s7 + $0xc08] sm:$0xff]  ;;  %v11614_v53 = vcombine.high %v2887_v49, %v2891_v57  ;;  %v11613_v60 = vcombine.low %v2887_v49, %v2891_v57 }
 0x3d0   :  { %v3019_v56 = vld [vmem:[%s17896_s7 + $0xc28] sm:$0xff] }
 0x3d1   :  { %9231 = vmatpush1.bf16.msra.mxu1 %v11653_v62  ;;  %v11742_v27 = vcombine.high %v3015_v31, %v3019_v56  ;;  %v3007_v47 = vld [vmem:[%s17896_s7 + $0xbc8] sm:$0xff]  ;;  %v11741_v17 = vcombine.low %v3015_v31, %v3019_v56 }
 0x3d2   :  { %9272 = vmatpush1.bf16.msra.mxu0 %v11781_v29  ;;  %9232 = vmatprep.subr.bf16.mxu1 %v11646_v63  ;;  %v3011_v36 = vld [vmem:[%s17896_s7 + $0xbe8] sm:$0xff] }
 0x3d3   :  { %9273 = vmatprep.subr.bf16.mxu0 %v11774_v21  ;;  %v3135_v1 = vld [vmem:[%s17896_s7 + $0xfc8] sm:$0xff]  ;;  %v11734_v62 = vcombine.high %v3007_v47, %v3011_v36  ;;  %v11733_v3 = vcombine.low %v3007_v47, %v3011_v36 }
 0x3d4   :  { %v3139_v51 = vld [vmem:[%s17896_s7 + $0xfe8] sm:$0xff] }
 0x3d5   :  { %9233 = vmatpush1.bf16.msra.mxu1 %v11645_v48  ;;  %v11862_v32 = vcombine.high %v3135_v1, %v3139_v51  ;;  %v2999_v44 = vld [vmem:[%s17896_s7 + $0xb88] sm:$0xff]  ;;  %v11861_v7 = vcombine.low %v3135_v1, %v3139_v51 }
 0x3d6   :  { %9274 = vmatpush1.bf16.msra.mxu0 %v11773_v12  ;;  %9234 = vmatprep.subr.bf16.mxu1 %v11638_v30  ;;  %v3003_v29 = vld [vmem:[%s17896_s7 + $0xba8] sm:$0xff] }
 0x3d7   :  { %9275 = vmatprep.subr.bf16.mxu0 %v11766_v37  ;;  %v3127_v63 = vld [vmem:[%s17896_s7 + $0xf88] sm:$0xff]  ;;  %v11726_v5 = vcombine.high %v2999_v44, %v3003_v29  ;;  %v11725_v11 = vcombine.low %v2999_v44, %v3003_v29 }
 0x3d8   :  { %v3131_v21 = vld [vmem:[%s17896_s7 + $0xfa8] sm:$0xff] }
 0x3d9   :  { %9235 = vmatpush1.bf16.msra.mxu1 %v11637_v33  ;;  %v11854_v25 = vcombine.high %v3127_v63, %v3131_v21  ;;  %v2991_v48 = vld [vmem:[%s17896_s7 + $0xb48] sm:$0xff]  ;;  %v11853_v9 = vcombine.low %v3127_v63, %v3131_v21 }
 0x3da   :  { %9276 = vmatpush1.bf16.msra.mxu0 %v11765_v50  ;;  %9236 = vmatprep.subr.bf16.mxu1 %v11630_v39  ;;  %v2995_v12 = vld [vmem:[%s17896_s7 + $0xb68] sm:$0xff] }
 0x3db   :  { %9277 = vmatprep.subr.bf16.mxu0 %v11758_v28  ;;  %v3119_v30 = vld [vmem:[%s17896_s7 + $0xf48] sm:$0xff]  ;;  %v11718_v2 = vcombine.high %v2991_v48, %v2995_v12  ;;  %v11717_v40 = vcombine.low %v2991_v48, %v2995_v12 }
 0x3dc   :  { %v3123_v37 = vld [vmem:[%s17896_s7 + $0xf68] sm:$0xff] }
 0x3dd   :  { %9237 = vmatpush1.bf16.msra.mxu1 %v11629_v26  ;;  %v11846_v0 = vcombine.high %v3119_v30, %v3123_v37  ;;  %v2983_v33 = vld [vmem:[%s17896_s7 + $0xb08] sm:$0xff]  ;;  %v11845_v61 = vcombine.low %v3119_v30, %v3123_v37 }
 0x3de   :  { %9278 = vmatpush1.bf16.msra.mxu0 %v11757_v54  ;;  %9238 = vmatprep.subr.bf16.mxu1 %v11622_v38  ;;  %v2987_v50 = vld [vmem:[%s17896_s7 + $0xb28] sm:$0xff] }
 0x3df   :  { %9279 = vmatprep.subr.bf16.mxu0 %v11750_v23  ;;  %v3111_v39 = vld [vmem:[%s17896_s7 + $0xf08] sm:$0xff]  ;;  %v11710_v18 = vcombine.high %v2983_v33, %v2987_v50  ;;  %v11709_v49 = vcombine.low %v2983_v33, %v2987_v50 }
 0x3e0   :  { %v3115_v28 = vld [vmem:[%s17896_s7 + $0xf28] sm:$0xff] }
 0x3e1   :  { %9239 = vmatpush1.bf16.msra.mxu1 %v11621_v24  ;;  %v11838_v52 = vcombine.high %v3111_v39, %v3115_v28  ;;  %v2975_v26 = vld [vmem:[%s17896_s7 + $0xac8] sm:$0xff]  ;;  %v11837_v57 = vcombine.low %v3111_v39, %v3115_v28 }
 0x3e2   :  { %9280 = vmatpush1.bf16.msra.mxu0 %v11749_v16  ;;  %9240 = vmatprep.subr.bf16.mxu1 %v11614_v53  ;;  %v2979_v54 = vld [vmem:[%s17896_s7 + $0xae8] sm:$0xff] }
 0x3e3   :  { %9281 = vmatprep.subr.bf16.mxu0 %v11742_v27  ;;  %v3103_v38 = vld [vmem:[%s17896_s7 + $0xec8] sm:$0xff]  ;;  %v11702_v31 = vcombine.high %v2975_v26, %v2979_v54  ;;  %v11701_v47 = vcombine.low %v2975_v26, %v2979_v54 }
 0x3e4   :  { %v3107_v23 = vld [vmem:[%s17896_s7 + $0xee8] sm:$0xff] }
 0x3e5   :  { %9241 = vmatpush1.bf16.msra.mxu1 %v11613_v60  ;;  %v11830_v56 = vcombine.high %v3103_v38, %v3107_v23  ;;  %v2967_v24 = vld [vmem:[%s17896_s7 + $0xa88] sm:$0xff]  ;;  %v11829_v36 = vcombine.low %v3103_v38, %v3107_v23 }
 0x3e6   :  { %9282 = vmatpush1.bf16.msra.mxu0 %v11741_v17  ;;  %9242 = vmatprep.subr.bf16.mxu1 %v11734_v62  ;;  %v2971_v16 = vld [vmem:[%s17896_s7 + $0xaa8] sm:$0xff] }
 0x3e7   :  { %9283 = vmatprep.subr.bf16.mxu0 %v11862_v32  ;;  %v3095_v53 = vld [vmem:[%s17896_s7 + $0xe88] sm:$0xff]  ;;  %v11694_v1 = vcombine.high %v2967_v24, %v2971_v16  ;;  %v11693_v44 = vcombine.low %v2967_v24, %v2971_v16 }
 0x3e8   :  { %v3099_v27 = vld [vmem:[%s17896_s7 + $0xea8] sm:$0xff] }
 0x3e9   :  { %9243 = vmatpush2.bf16.msra.mxu1 %v11733_v3  ;;  %v11822_v51 = vcombine.high %v3095_v53, %v3099_v27  ;;  %v2959_v60 = vld [vmem:[%s17896_s7 + $0xa48] sm:$0xff]  ;;  %v11821_v29 = vcombine.low %v3095_v53, %v3099_v27 }
 0x3ea   :  { %9284 = vmatpush2.bf16.msra.mxu0 %v11861_v7  ;;  %9244 = vmatprep.subr.bf16.mxu1 %v11726_v5  ;;  %v2963_v17 = vld [vmem:[%s17896_s7 + $0xa68] sm:$0xff] }
 0x3eb   :  { %9285 = vmatprep.subr.bf16.mxu0 %v11854_v25  ;;  %v3087_v62 = vld [vmem:[%s17896_s7 + $0xe48] sm:$0xff]  ;;  %v11686_v63 = vcombine.high %v2959_v60, %v2963_v17  ;;  %v11685_v48 = vcombine.low %v2959_v60, %v2963_v17 }
 0x3ec   :  { %v3091_v32 = vld [vmem:[%s17896_s7 + $0xe68] sm:$0xff] }
 0x3ed   :  { %9245 = vmatpush2.bf16.msra.mxu1 %v11725_v11  ;;  %v11814_v21 = vcombine.high %v3087_v62, %v3091_v32  ;;  %v2951_v3 = vld [vmem:[%s17896_s7 + $0xa08] sm:$0xff]  ;;  %v11813_v12 = vcombine.low %v3087_v62, %v3091_v32 }
 0x3ee   :  { %9286 = vmatpush2.bf16.msra.mxu0 %v11853_v9  ;;  %9246 = vmatprep.subr.bf16.mxu1 %v11718_v2  ;;  %v2955_v7 = vld [vmem:[%s17896_s7 + $0xa28] sm:$0xff] }
 0x3ef   :  { %9287 = vmatprep.subr.bf16.mxu0 %v11846_v0  ;;  %v3079_v5 = vld [vmem:[%s17896_s7 + $0xe08] sm:$0xff]  ;;  %v11678_v30 = vcombine.high %v2951_v3, %v2955_v7  ;;  %v11677_v33 = vcombine.low %v2951_v3, %v2955_v7 }
 0x3f0   :  { %v3083_v25 = vld [vmem:[%s17896_s7 + $0xe28] sm:$0xff] }
 0x3f1   :  { %9247 = vmatpush2.bf16.msra.mxu1 %v11717_v40  ;;  %v11806_v37 = vcombine.high %v3079_v5, %v3083_v25  ;;  %v3199_v11 = vld [vmem:[%s17896_s7 + $0x11c8] sm:$0xff]  ;;  %v11805_v50 = vcombine.low %v3079_v5, %v3083_v25 }
 0x3f2   :  { %9288 = vmatpush2.bf16.msra.mxu0 %v11845_v61  ;;  %9248 = vmatprep.subr.bf16.mxu1 %v11710_v18  ;;  %v3203_v9 = vld [vmem:[%s17896_s7 + $0x11e8] sm:$0xff] }
 0x3f3   :  { %9289 = vmatprep.subr.bf16.mxu0 %v11838_v52  ;;  %v3327_v2 = vld [vmem:[%s17896_s7 + $0x15c8] sm:$0xff]  ;;  %v11926_v39 = vcombine.high %v3199_v11, %v3203_v9  ;;  %v11925_v18 = vcombine.low %v3199_v11, %v3203_v9 }
 0x3f4   :  { %v3331_v0 = vld [vmem:[%s17896_s7 + $0x15e8] sm:$0xff] }
 0x3f5   :  { %9249 = vmatpush2.bf16.msra.mxu1 %v11709_v49  ;;  %v12054_v28 = vcombine.high %v3327_v2, %v3331_v0  ;;  %v3191_v40 = vld [vmem:[%s17896_s7 + $0x1188] sm:$0xff]  ;;  %v12053_v54 = vcombine.low %v3327_v2, %v3331_v0 }
 0x3f6   :  { %9290 = vmatpush2.bf16.msra.mxu0 %v11837_v57  ;;  %9250 = vmatprep.subr.bf16.mxu1 %v11702_v31  ;;  %v3195_v61 = vld [vmem:[%s17896_s7 + $0x11a8] sm:$0xff] }
 0x3f7   :  { %9291 = vmatprep.subr.bf16.mxu0 %v11830_v56  ;;  %v3319_v52 = vld [vmem:[%s17896_s7 + $0x1588] sm:$0xff]  ;;  %v11918_v38 = vcombine.high %v3191_v40, %v3195_v61  ;;  %v11917_v27 = vcombine.low %v3191_v40, %v3195_v61 }
 0x3f8   :  { %v3323_v26 = vld [vmem:[%s17896_s7 + $0x15a8] sm:$0xff] }
 0x3f9   :  { %9251 = vmatpush2.bf16.msra.mxu1 %v11701_v47  ;;  %v3183_v23 = vld [vmem:[%s17896_s7 + $0x1148] sm:$0xff]  ;;  %v12046_v31 = vcombine.high %v3319_v52, %v3323_v26 }
 0x3fa   :  { %9292 = vmatpush2.bf16.msra.mxu0 %v11829_v36  ;;  %9252 = vmatprep.subr.bf16.mxu1 %v11694_v1  ;;  %v3187_v49 = vld [vmem:[%s17896_s7 + $0x1168] sm:$0xff]  ;;  %v12045_v36 = vcombine.low %v3319_v52, %v3323_v26 }
 0x3fb   :  { %9293 = vmatprep.subr.bf16.mxu0 %v11822_v51  ;;  %v3311_v56 = vld [vmem:[%s17896_s7 + $0x1548] sm:$0xff]  ;;  %v11910_v1 = vcombine.high %v3183_v23, %v3187_v49  ;;  %v11909_v3 = vcombine.low %v3183_v23, %v3187_v49 }
 0x3fc   :  { %v3315_v24 = vld [vmem:[%s17896_s7 + $0x1568] sm:$0xff] }
 0x3fd   :  { %9253 = vmatpush2.bf16.msra.mxu1 %v11693_v44  ;;  %v3175_v62 = vld [vmem:[%s17896_s7 + $0x1108] sm:$0xff]  ;;  %v12037_v5 = vcombine.low %v3311_v56, %v3315_v24 }
 0x3fe   :  { %9294 = vmatpush2.bf16.msra.mxu0 %v11821_v29  ;;  %9254 = vmatprep.subr.bf16.mxu1 %v11686_v63  ;;  %v3179_v32 = vld [vmem:[%s17896_s7 + $0x1128] sm:$0xff] }
 0x3ff   :  { %9295 = vmatprep.subr.bf16.mxu0 %v11814_v21  ;;  %v3303_v29 = vld [vmem:[%s17896_s7 + $0x1508] sm:$0xff]  ;;  %v11902_v25 = vcombine.high %v3175_v62, %v3179_v32  ;;  %v11901_v2 = vcombine.low %v3175_v62, %v3179_v32 }
 0x400   :  { %v3295_v11 = vld [vmem:[%s17896_s7 + $0x14c8] sm:$0xff] }
 0x401   :  { %9255 = vmatpush2.bf16.msra.mxu1 %v11685_v48  ;;  %v3299_v9 = vld [vmem:[%s17896_s7 + $0x14e8] sm:$0xff] }
 0x402   :  { %9296 = vmatpush2.bf16.msra.mxu0 %v11813_v12  ;;  %9256 = vmatprep.subr.bf16.mxu1 %v11678_v30  ;;  %v3167_v30 = vld [vmem:[%s17896_s7 + $0x10c8] sm:$0xff]  ;;  %v12021_v52 = vcombine.low %v3295_v11, %v3299_v9 }
 0x403   :  { %9297 = vmatprep.subr.bf16.mxu0 %v11806_v37  ;;  %v3171_v37 = vld [vmem:[%s17896_s7 + $0x10e8] sm:$0xff] }
 0x404   :  { %v3287_v40 = vld [vmem:[%s17896_s7 + $0x1488] sm:$0xff] }
 0x405   :  { %9257 = vmatpush2.bf16.msra.mxu1 %v11677_v33  ;;  %v11894_v33 = vcombine.high %v3167_v30, %v3171_v37  ;;  %v3291_v61 = vld [vmem:[%s17896_s7 + $0x14a8] sm:$0xff] }
 0x406   :  { %9298 = vmatpush2.bf16.msra.mxu0 %v11805_v50  ;;  %9308 = vmatprep.subr.bf16.mxu1 %v11926_v39  ;;  %v12022_v50 = vcombine.high %v3295_v11, %v3299_v9  ;;  %v3159_v39 = vld [vmem:[%s17896_s7 + $0x1088] sm:$0xff] }
 0x407   :  { %9349 = vmatprep.subr.bf16.mxu0 %v12054_v28  ;;  %v3163_v28 = vld [vmem:[%s17896_s7 + $0x10a8] sm:$0xff] }
 0x408   :  { %v9014_v57 = vpop.f32.mrf.mxu1  ;;  %9259 = vmatmul.mubr.bf16.vlgmr.msra.gmra.mxu1 %v14505_v58  ;;  %v11886_v26 = vcombine.high %v3159_v39, %v3163_v28  ;;  %v3155_v23 = vld [vmem:[%s17896_s7 + $0x1068] sm:$0xff] }
 0x409   :  { %v9015_v16 = vadd.f32 %v9014_v57, %v15374_v8  ;;  %v9055_v53 = vpop.f32.mrf.mxu0  ;;  %9300 = vmatmul.mubr.bf16.vlgmr.msra.gmra.mxu0 %v14741_v59  ;;  %9309 = vmatpush1.bf16.msra.mxu1 %v11925_v18  ;;  %v12038_v8 = vcombine.high %v3311_v56, %v3315_v24  ;;  %v11893_v18 = vcombine.low %v3167_v30, %v3171_v37  ;;  %v3279_v49 = vld [vmem:[%s17896_s7 + $0x1448] sm:$0xff] }
 0x40a   :  { %9340 = vmatprep.mubr.bf16.mxu1 %v14744_v42  ;;  %9350 = vmatpush1.bf16.msra.mxu0 %v12053_v54  ;;  %v9016_v47 = vpop.f32.mrf.mxu1  ;;  %v12014_v54 = vcombine.high %v3287_v40, %v3291_v61  ;;  %v3283_v57 = vld [vmem:[%s17896_s7 + $0x1468] sm:$0xff]  ;;  %v12013_v56 = vcombine.low %v3287_v40, %v3291_v61 }
 0x40b   :  { %v15576_v51 = vadd.f32 %v9055_v53, %v9015_v16  ;;  %9381 = vmatprep.mubr.bf16.mxu0 %v14755_v20  ;;  %v9017_v60 = vadd.f32 %v9016_v47, %v15390_v43  ;;  %v9057_v17 = vpop.f32.mrf.mxu0  ;;  %9310 = vmatprep.subr.bf16.mxu1 %v11918_v38  ;;  %v3307_v43 = vld [vmem:[%s17896_s7 + $0x1528] sm:$0xff]  ;;  %v12006_v16 = vcombine.high %v3279_v49, %v3283_v57 }
 0x40c   :  { %v9018_v44 = vpop.f32.mrf.mxu1  ;;  %9351 = vmatprep.subr.bf16.mxu0 %v12046_v31  ;;  %v12030_v12 = vcombine.high %v3303_v29, %v3307_v43  ;;  %v12029_v0 = vcombine.low %v3303_v29, %v3307_v43  ;;  %v3151_v38 = vld [vmem:[%s17896_s7 + $0x1048] sm:$0xff]  ;;  %v11885_v31 = vcombine.low %v3159_v39, %v3163_v28 }
 0x40d   :  { %v15592_v63 = vadd.f32 %v9057_v17, %v9017_v60  ;;  %v9059_v21 = vpop.f32.mrf.mxu0  ;;  %9311 = vmatpush1.bf16.msra.mxu1 %v11917_v27  ;;  %v11878_v24 = vcombine.high %v3151_v38, %v3155_v23  ;;  %v3143_v53 = vld [vmem:[%s17896_s7 + $0x1008] sm:$0xff]  ;;  %v12005_v60 = vcombine.low %v3279_v49, %v3283_v57 }
 0x40e   :  { %9352 = vmatpush1.bf16.msra.mxu0 %v12045_v36  ;;  %v9019_v7 = vpop.f32.mrf.mxu1  ;;  %9312 = vmatprep.subr.bf16.mxu1 %v11910_v1  ;;  %v3147_v27 = vld [vmem:[%s17896_s7 + $0x1028] sm:$0xff]  ;;  %v11877_v1 = vcombine.low %v3151_v38, %v3155_v23 }
 0x40f   :  { %v9060_v48 = vpop.f32.mrf.mxu0  ;;  %9353 = vmatprep.subr.bf16.mxu0 %v12038_v8  ;;  %v3271_v47 = vld [vmem:[%s17896_s7 + $0x1408] sm:$0xff]  ;;  %v11870_v17 = vcombine.high %v3143_v53, %v3147_v27  ;;  %v11869_v43 = vcombine.low %v3143_v53, %v3147_v27 }
 0x410   :  { %v3275_v36 = vld [vmem:[%s17896_s7 + $0x1428] sm:$0xff] }
 0x411   :  { %9313 = vmatpush1.bf16.msra.mxu1 %v11909_v3  ;;  %v11998_v8 = vcombine.high %v3271_v47, %v3275_v36  ;;  %v3263_v62 = vld [vmem:[%s17896_s7 + $0x13c8] sm:$0xff]  ;;  %v11997_v21 = vcombine.low %v3271_v47, %v3275_v36 }
 0x412   :  { %9354 = vmatpush1.bf16.msra.mxu0 %v12037_v5  ;;  %9314 = vmatprep.subr.bf16.mxu1 %v11902_v25  ;;  %v3267_v32 = vld [vmem:[%s17896_s7 + $0x13e8] sm:$0xff] }
 0x413   :  { %9355 = vmatprep.subr.bf16.mxu0 %v12030_v12  ;;  %v3391_v44 = vld [vmem:[%s17896_s7 + $0x17c8] sm:$0xff]  ;;  %v11990_v3 = vcombine.high %v3263_v62, %v3267_v32  ;;  %v11989_v30 = vcombine.low %v3263_v62, %v3267_v32 }
 0x414   :  { %v3395_v29 = vld [vmem:[%s17896_s7 + $0x17e8] sm:$0xff] }
 0x415   :  { %9315 = vmatpush1.bf16.msra.mxu1 %v11901_v2  ;;  %v12118_v7 = vcombine.high %v3391_v44, %v3395_v29  ;;  %v3255_v5 = vld [vmem:[%s17896_s7 + $0x1388] sm:$0xff]  ;;  %v12117_v37 = vcombine.low %v3391_v44, %v3395_v29 }
 0x416   :  { %9356 = vmatpush1.bf16.msra.mxu0 %v12029_v0  ;;  %9316 = vmatprep.subr.bf16.mxu1 %v11894_v33  ;;  %v3259_v25 = vld [vmem:[%s17896_s7 + $0x13a8] sm:$0xff] }
 0x417   :  { %9357 = vmatprep.subr.bf16.mxu0 %v12022_v50  ;;  %v3383_v48 = vld [vmem:[%s17896_s7 + $0x1788] sm:$0xff]  ;;  %v11982_v11 = vcombine.high %v3255_v5, %v3259_v25  ;;  %v11981_v39 = vcombine.low %v3255_v5, %v3259_v25 }
 0x418   :  { %v3387_v12 = vld [vmem:[%s17896_s7 + $0x17a8] sm:$0xff] }
 0x419   :  { %9317 = vmatpush1.bf16.msra.mxu1 %v11893_v18  ;;  %v12110_v9 = vcombine.high %v3383_v48, %v3387_v12  ;;  %v3247_v2 = vld [vmem:[%s17896_s7 + $0x1348] sm:$0xff]  ;;  %v12109_v28 = vcombine.low %v3383_v48, %v3387_v12 }
 0x41a   :  { %9358 = vmatpush1.bf16.msra.mxu0 %v12021_v52  ;;  %9318 = vmatprep.subr.bf16.mxu1 %v11886_v26  ;;  %v3251_v0 = vld [vmem:[%s17896_s7 + $0x1368] sm:$0xff] }
 0x41b   :  { %9359 = vmatprep.subr.bf16.mxu0 %v12014_v54  ;;  %v3375_v33 = vld [vmem:[%s17896_s7 + $0x1748] sm:$0xff]  ;;  %v11974_v40 = vcombine.high %v3247_v2, %v3251_v0  ;;  %v11973_v38 = vcombine.low %v3247_v2, %v3251_v0 }
 0x41c   :  { %v3379_v50 = vld [vmem:[%s17896_s7 + $0x1768] sm:$0xff] }
 0x41d   :  { %9319 = vmatpush1.bf16.msra.mxu1 %v11885_v31  ;;  %v12102_v61 = vcombine.high %v3375_v33, %v3379_v50  ;;  %v3239_v18 = vld [vmem:[%s17896_s7 + $0x1308] sm:$0xff]  ;;  %v12101_v23 = vcombine.low %v3375_v33, %v3379_v50 }
 0x41e   :  { %9360 = vmatpush1.bf16.msra.mxu0 %v12013_v56  ;;  %9320 = vmatprep.subr.bf16.mxu1 %v11878_v24  ;;  %v3243_v52 = vld [vmem:[%s17896_s7 + $0x1328] sm:$0xff] }
 0x41f   :  { %9361 = vmatprep.subr.bf16.mxu0 %v12006_v16  ;;  %v3367_v26 = vld [vmem:[%s17896_s7 + $0x1708] sm:$0xff]  ;;  %v11966_v49 = vcombine.high %v3239_v18, %v3243_v52  ;;  %v11965_v53 = vcombine.low %v3239_v18, %v3243_v52 }
 0x420   :  { %v3371_v54 = vld [vmem:[%s17896_s7 + $0x1728] sm:$0xff] }
 0x421   :  { %9321 = vmatpush1.bf16.msra.mxu1 %v11877_v1  ;;  %v12094_v57 = vcombine.high %v3367_v26, %v3371_v54  ;;  %v3231_v31 = vld [vmem:[%s17896_s7 + $0x12c8] sm:$0xff]  ;;  %v12093_v27 = vcombine.low %v3367_v26, %v3371_v54 }
 0x422   :  { %9362 = vmatpush1.bf16.msra.mxu0 %v12005_v60  ;;  %9322 = vmatprep.subr.bf16.mxu1 %v11870_v17  ;;  %v3235_v56 = vld [vmem:[%s17896_s7 + $0x12e8] sm:$0xff] }
 0x423   :  { %9363 = vmatprep.subr.bf16.mxu0 %v11998_v8  ;;  %v3359_v24 = vld [vmem:[%s17896_s7 + $0x16c8] sm:$0xff]  ;;  %v11958_v47 = vcombine.high %v3231_v31, %v3235_v56  ;;  %v11957_v62 = vcombine.low %v3231_v31, %v3235_v56 }
 0x424   :  { %v3363_v16 = vld [vmem:[%s17896_s7 + $0x16e8] sm:$0xff] }
 0x425   :  { %9323 = vmatpush1.bf16.msra.mxu1 %v11869_v43  ;;  %v12086_v36 = vcombine.high %v3359_v24, %v3363_v16  ;;  %v3223_v1 = vld [vmem:[%s17896_s7 + $0x1288] sm:$0xff]  ;;  %v12085_v32 = vcombine.low %v3359_v24, %v3363_v16 }
 0x426   :  { %9364 = vmatpush1.bf16.msra.mxu0 %v11997_v21  ;;  %9324 = vmatprep.subr.bf16.mxu1 %v11990_v3  ;;  %v3227_v60 = vld [vmem:[%s17896_s7 + $0x12a8] sm:$0xff] }
 0x427   :  { %9365 = vmatprep.subr.bf16.mxu0 %v12118_v7  ;;  %v3351_v17 = vld [vmem:[%s17896_s7 + $0x1688] sm:$0xff]  ;;  %v11950_v44 = vcombine.high %v3223_v1, %v3227_v60  ;;  %v11949_v5 = vcombine.low %v3223_v1, %v3227_v60 }
 0x428   :  { %v3355_v8 = vld [vmem:[%s17896_s7 + $0x16a8] sm:$0xff] }
 0x429   :  { %9325 = vmatpush2.bf16.msra.mxu1 %v11989_v30  ;;  %v12078_v29 = vcombine.high %v3351_v17, %v3355_v8  ;;  %v3215_v43 = vld [vmem:[%s17896_s7 + $0x1248] sm:$0xff]  ;;  %v12077_v25 = vcombine.low %v3351_v17, %v3355_v8 }
 0x42a   :  { %9366 = vmatpush2.bf16.msra.mxu0 %v12117_v37  ;;  %9326 = vmatprep.subr.bf16.mxu1 %v11982_v11  ;;  %v3219_v21 = vld [vmem:[%s17896_s7 + $0x1268] sm:$0xff] }
 0x42b   :  { %9367 = vmatprep.subr.bf16.mxu0 %v12110_v9  ;;  %v3343_v3 = vld [vmem:[%s17896_s7 + $0x1648] sm:$0xff]  ;;  %v11942_v48 = vcombine.high %v3215_v43, %v3219_v21  ;;  %v11941_v2 = vcombine.low %v3215_v43, %v3219_v21 }
 0x42c   :  { %v3347_v7 = vld [vmem:[%s17896_s7 + $0x1668] sm:$0xff] }
 0x42d   :  { %9327 = vmatpush2.bf16.msra.mxu1 %v11981_v39  ;;  %v12070_v12 = vcombine.high %v3343_v3, %v3347_v7  ;;  %v3207_v30 = vld [vmem:[%s17896_s7 + $0x1208] sm:$0xff]  ;;  %v12069_v0 = vcombine.low %v3343_v3, %v3347_v7 }
 0x42e   :  { %9368 = vmatpush2.bf16.msra.mxu0 %v12109_v28  ;;  %9328 = vmatprep.subr.bf16.mxu1 %v11974_v40  ;;  %v3211_v37 = vld [vmem:[%s17896_s7 + $0x1228] sm:$0xff] }
 0x42f   :  { %9369 = vmatprep.subr.bf16.mxu0 %v12102_v61  ;;  %v3335_v11 = vld [vmem:[%s17896_s7 + $0x1608] sm:$0xff]  ;;  %v11934_v33 = vcombine.high %v3207_v30, %v3211_v37  ;;  %v11933_v18 = vcombine.low %v3207_v30, %v3211_v37 }
 0x430   :  { %v3339_v9 = vld [vmem:[%s17896_s7 + $0x1628] sm:$0xff] }
 0x431   :  { %9329 = vmatpush2.bf16.msra.mxu1 %v11973_v38  ;;  %v12062_v50 = vcombine.high %v3335_v11, %v3339_v9  ;;  %v3455_v39 = vld [vmem:[%s17896_s7 + $0x19c8] sm:$0xff]  ;;  %v12061_v52 = vcombine.low %v3335_v11, %v3339_v9 }
 0x432   :  { %9370 = vmatpush2.bf16.msra.mxu0 %v12101_v23  ;;  %9330 = vmatprep.subr.bf16.mxu1 %v11966_v49  ;;  %v3459_v28 = vld [vmem:[%s17896_s7 + $0x19e8] sm:$0xff] }
 0x433   :  { %9371 = vmatprep.subr.bf16.mxu0 %v12094_v57  ;;  %v3583_v40 = vld [vmem:[%s17896_s7 + $0x1dc8] sm:$0xff]  ;;  %v12182_v26 = vcombine.high %v3455_v39, %v3459_v28  ;;  %v12181_v49 = vcombine.low %v3455_v39, %v3459_v28 }
 0x434   :  { %v3587_v61 = vld [vmem:[%s17896_s7 + $0x1de8] sm:$0xff] }
 0x435   :  { %9331 = vmatpush2.bf16.msra.mxu1 %v11965_v53  ;;  %v12310_v54 = vcombine.high %v3583_v40, %v3587_v61  ;;  %v3447_v38 = vld [vmem:[%s17896_s7 + $0x1988] sm:$0xff]  ;;  %v12309_v56 = vcombine.low %v3583_v40, %v3587_v61 }
 0x436   :  { %9372 = vmatpush2.bf16.msra.mxu0 %v12093_v27  ;;  %9332 = vmatprep.subr.bf16.mxu1 %v11958_v47  ;;  %v3451_v23 = vld [vmem:[%s17896_s7 + $0x19a8] sm:$0xff] }
 0x437   :  { %9373 = vmatprep.subr.bf16.mxu0 %v12086_v36  ;;  %v3575_v57 = vld [vmem:[%s17896_s7 + $0x1d88] sm:$0xff]  ;;  %v12174_v24 = vcombine.high %v3447_v38, %v3451_v23  ;;  %v12173_v8 = vcombine.low %v3447_v38, %v3451_v23 }
 0x438   :  { %v3579_v31 = vld [vmem:[%s17896_s7 + $0x1da8] sm:$0xff] }
 0x439   :  { %9333 = vmatpush2.bf16.msra.mxu1 %v11957_v62  ;;  %v3439_v16 = vld [vmem:[%s17896_s7 + $0x1948] sm:$0xff]  ;;  %v12302_v47 = vcombine.high %v3575_v57, %v3579_v31 }
 0x43a   :  { %9374 = vmatpush2.bf16.msra.mxu0 %v12085_v32  ;;  %9334 = vmatprep.subr.bf16.mxu1 %v11950_v44  ;;  %v3443_v53 = vld [vmem:[%s17896_s7 + $0x1968] sm:$0xff]  ;;  %v12301_v32 = vcombine.low %v3575_v57, %v3579_v31 }
 0x43b   :  { %9375 = vmatprep.subr.bf16.mxu0 %v12078_v29  ;;  %v3567_v36 = vld [vmem:[%s17896_s7 + $0x1d48] sm:$0xff]  ;;  %v12166_v44 = vcombine.high %v3439_v16, %v3443_v53  ;;  %v12165_v30 = vcombine.low %v3439_v16, %v3443_v53 }
 0x43c   :  { %v3571_v1 = vld [vmem:[%s17896_s7 + $0x1d68] sm:$0xff] }
 0x43d   :  { %9335 = vmatpush2.bf16.msra.mxu1 %v11949_v5  ;;  %v3431_v3 = vld [vmem:[%s17896_s7 + $0x1908] sm:$0xff]  ;;  %v12293_v11 = vcombine.low %v3567_v36, %v3571_v1 }
 0x43e   :  { %9376 = vmatpush2.bf16.msra.mxu0 %v12077_v25  ;;  %9336 = vmatprep.subr.bf16.mxu1 %v11942_v48  ;;  %v3435_v7 = vld [vmem:[%s17896_s7 + $0x1928] sm:$0xff] }
 0x43f   :  { %9377 = vmatprep.subr.bf16.mxu0 %v12070_v12  ;;  %v3559_v25 = vld [vmem:[%s17896_s7 + $0x1d08] sm:$0xff]  ;;  %v12158_v9 = vcombine.high %v3431_v3, %v3435_v7  ;;  %v12157_v40 = vcombine.low %v3431_v3, %v3435_v7 }
 0x440   :  { %v3551_v39 = vld [vmem:[%s17896_s7 + $0x1cc8] sm:$0xff] }
 0x441   :  { %9337 = vmatpush2.bf16.msra.mxu1 %v11941_v2  ;;  %v3555_v28 = vld [vmem:[%s17896_s7 + $0x1ce8] sm:$0xff] }
 0x442   :  { %9378 = vmatpush2.bf16.msra.mxu0 %v12069_v0  ;;  %9338 = vmatprep.subr.bf16.mxu1 %v11934_v33  ;;  %v3423_v33 = vld [vmem:[%s17896_s7 + $0x18c8] sm:$0xff]  ;;  %v12277_v57 = vcombine.low %v3551_v39, %v3555_v28 }
 0x443   :  { %9379 = vmatprep.subr.bf16.mxu0 %v12062_v50  ;;  %v3427_v50 = vld [vmem:[%s17896_s7 + $0x18e8] sm:$0xff] }
 0x444   :  { %v3543_v38 = vld [vmem:[%s17896_s7 + $0x1c88] sm:$0xff] }
 0x445   :  { %9339 = vmatpush2.bf16.msra.mxu1 %v11933_v18  ;;  %v12150_v18 = vcombine.high %v3423_v33, %v3427_v50  ;;  %v3547_v23 = vld [vmem:[%s17896_s7 + $0x1ca8] sm:$0xff] }
 0x446   :  { %9380 = vmatpush2.bf16.msra.mxu0 %v12061_v52  ;;  %9390 = vmatprep.subr.bf16.mxu1 %v12182_v26  ;;  %v12278_v52 = vcombine.high %v3551_v39, %v3555_v28  ;;  %v3415_v26 = vld [vmem:[%s17896_s7 + $0x1888] sm:$0xff] }
 0x447   :  { %9431 = vmatprep.subr.bf16.mxu0 %v12310_v54  ;;  %v3419_v54 = vld [vmem:[%s17896_s7 + $0x18a8] sm:$0xff] }
 0x448   :  { %v9096_v27 = vpop.f32.mrf.mxu1  ;;  %9341 = vmatmul.mubr.bf16.vlgmr.msra.gmra.mxu1 %v14501_v19  ;;  %v12142_v31 = vcombine.high %v3415_v26, %v3419_v54  ;;  %v3411_v16 = vld [vmem:[%s17896_s7 + $0x1868] sm:$0xff] }
 0x449   :  { %v9097_v60 = vadd.f32 %v9096_v27, %v15576_v51  ;;  %v9137_v17 = vpop.f32.mrf.mxu0  ;;  %9382 = vmatmul.mubr.bf16.vlgmr.msra.gmra.mxu0 %v14946_v35  ;;  %9391 = vmatpush1.bf16.msra.mxu1 %v12181_v49  ;;  %v12294_v51 = vcombine.high %v3567_v36, %v3571_v1  ;;  %v12149_v49 = vcombine.low %v3423_v33, %v3427_v50  ;;  %v3535_v53 = vld [vmem:[%s17896_s7 + $0x1c48] sm:$0xff] }
 0x44a   :  { %9422 = vmatprep.mubr.bf16.mxu1 %v14956_v6  ;;  %9432 = vmatpush1.bf16.msra.mxu0 %v12309_v56  ;;  %v9098_v62 = vpop.f32.mrf.mxu1  ;;  %v12270_v56 = vcombine.high %v3543_v38, %v3547_v23  ;;  %v3539_v27 = vld [vmem:[%s17896_s7 + $0x1c68] sm:$0xff]  ;;  %v12269_v36 = vcombine.low %v3543_v38, %v3547_v23 }
 0x44b   :  { %v15778_v29 = vadd.f32 %v9137_v17, %v9097_v60  ;;  %9463 = vmatprep.mubr.bf16.mxu0 %v14966_v15  ;;  %v9099_v43 = vadd.f32 %v9098_v62, %v15592_v63  ;;  %v9139_v21 = vpop.f32.mrf.mxu0  ;;  %9392 = vmatprep.subr.bf16.mxu1 %v12174_v24  ;;  %v3563_v63 = vld [vmem:[%s17896_s7 + $0x1d28] sm:$0xff]  ;;  %v12262_v60 = vcombine.high %v3535_v53, %v3539_v27 }
 0x44c   :  { %v9100_v5 = vpop.f32.mrf.mxu1  ;;  %9433 = vmatprep.subr.bf16.mxu0 %v12302_v47  ;;  %v12286_v0 = vcombine.high %v3559_v25, %v3563_v63  ;;  %v12285_v61 = vcombine.low %v3559_v25, %v3563_v63  ;;  %v3407_v24 = vld [vmem:[%s17896_s7 + $0x1848] sm:$0xff]  ;;  %v12141_v47 = vcombine.low %v3415_v26, %v3419_v54 }
 0x44d   :  { %v15794_v48 = vadd.f32 %v9139_v21, %v9099_v43  ;;  %v9141_v12 = vpop.f32.mrf.mxu0  ;;  %9393 = vmatpush1.bf16.msra.mxu1 %v12173_v8  ;;  %v12134_v1 = vcombine.high %v3407_v24, %v3411_v16  ;;  %v3399_v17 = vld [vmem:[%s17896_s7 + $0x1808] sm:$0xff]  ;;  %v12261_v43 = vcombine.low %v3535_v53, %v3539_v27 }
 0x44e   :  { %9434 = vmatpush1.bf16.msra.mxu0 %v12301_v32  ;;  %v9101_v37 = vpop.f32.mrf.mxu1  ;;  %9394 = vmatprep.subr.bf16.mxu1 %v12166_v44  ;;  %v3403_v8 = vld [vmem:[%s17896_s7 + $0x1828] sm:$0xff]  ;;  %v12133_v44 = vcombine.low %v3407_v24, %v3411_v16 }
 0x44f   :  { %v9142_v2 = vpop.f32.mrf.mxu0  ;;  %9435 = vmatprep.subr.bf16.mxu0 %v12294_v51  ;;  %v3527_v62 = vld [vmem:[%s17896_s7 + $0x1c08] sm:$0xff]  ;;  %v12126_v21 = vcombine.high %v3399_v17, %v3403_v8  ;;  %v12125_v63 = vcombine.low %v3399_v17, %v3403_v8 }
 0x450   :  { %v3531_v32 = vld [vmem:[%s17896_s7 + $0x1c28] sm:$0xff] }
 0x451   :  { %9395 = vmatpush1.bf16.msra.mxu1 %v12165_v30  ;;  %v12254_v51 = vcombine.high %v3527_v62, %v3531_v32  ;;  %v3519_v3 = vld [vmem:[%s17896_s7 + $0x1bc8] sm:$0xff]  ;;  %v12253_v12 = vcombine.low %v3527_v62, %v3531_v32 }
 0x452   :  { %9436 = vmatpush1.bf16.msra.mxu0 %v12293_v11  ;;  %9396 = vmatprep.subr.bf16.mxu1 %v12158_v9  ;;  %v3523_v7 = vld [vmem:[%s17896_s7 + $0x1be8] sm:$0xff] }
 0x453   :  { %9437 = vmatprep.subr.bf16.mxu0 %v12286_v0  ;;  %v3647_v5 = vld [vmem:[%s17896_s7 + $0x1fc8] sm:$0xff]  ;;  %v12246_v30 = vcombine.high %v3519_v3, %v3523_v7  ;;  %v12245_v33 = vcombine.low %v3519_v3, %v3523_v7 }
 0x454   :  { %v3651_v25 = vld [vmem:[%s17896_s7 + $0x1fe8] sm:$0xff] }
 0x455   :  { %9397 = vmatpush1.bf16.msra.mxu1 %v12157_v40  ;;  %v12374_v37 = vcombine.high %v3647_v5, %v3651_v25  ;;  %v3511_v11 = vld [vmem:[%s17896_s7 + $0x1b88] sm:$0xff]  ;;  %v12373_v50 = vcombine.low %v3647_v5, %v3651_v25 }
 0x456   :  { %9438 = vmatpush1.bf16.msra.mxu0 %v12285_v61  ;;  %9398 = vmatprep.subr.bf16.mxu1 %v12150_v18  ;;  %v3515_v9 = vld [vmem:[%s17896_s7 + $0x1ba8] sm:$0xff] }
 0x457   :  { %9439 = vmatprep.subr.bf16.mxu0 %v12278_v52  ;;  %v3639_v2 = vld [vmem:[%s17896_s7 + $0x1f88] sm:$0xff]  ;;  %v12238_v39 = vcombine.high %v3511_v11, %v3515_v9  ;;  %v12237_v26 = vcombine.low %v3511_v11, %v3515_v9 }
 0x458   :  { %v3643_v0 = vld [vmem:[%s17896_s7 + $0x1fa8] sm:$0xff] }
 0x459   :  { %9399 = vmatpush1.bf16.msra.mxu1 %v12149_v49  ;;  %v12366_v28 = vcombine.high %v3639_v2, %v3643_v0  ;;  %v3503_v40 = vld [vmem:[%s17896_s7 + $0x1b48] sm:$0xff]  ;;  %v12365_v54 = vcombine.low %v3639_v2, %v3643_v0 }
 0x45a   :  { %9440 = vmatpush1.bf16.msra.mxu0 %v12277_v57  ;;  %9400 = vmatprep.subr.bf16.mxu1 %v12142_v31  ;;  %v3507_v61 = vld [vmem:[%s17896_s7 + $0x1b68] sm:$0xff] }
 0x45b   :  { %9441 = vmatprep.subr.bf16.mxu0 %v12270_v56  ;;  %v3631_v18 = vld [vmem:[%s17896_s7 + $0x1f48] sm:$0xff]  ;;  %v12230_v38 = vcombine.high %v3503_v40, %v3507_v61  ;;  %v12229_v24 = vcombine.low %v3503_v40, %v3507_v61 }
 0x45c   :  { %v3635_v52 = vld [vmem:[%s17896_s7 + $0x1f68] sm:$0xff] }
 0x45d   :  { %9401 = vmatpush1.bf16.msra.mxu1 %v12141_v47  ;;  %v12358_v23 = vcombine.high %v3631_v18, %v3635_v52  ;;  %v3495_v49 = vld [vmem:[%s17896_s7 + $0x1b08] sm:$0xff]  ;;  %v12357_v16 = vcombine.low %v3631_v18, %v3635_v52 }
 0x45e   :  { %9442 = vmatpush1.bf16.msra.mxu0 %v12269_v36  ;;  %9402 = vmatprep.subr.bf16.mxu1 %v12134_v1  ;;  %v3499_v57 = vld [vmem:[%s17896_s7 + $0x1b28] sm:$0xff] }
 0x45f   :  { %9443 = vmatprep.subr.bf16.mxu0 %v12262_v60  ;;  %v3623_v31 = vld [vmem:[%s17896_s7 + $0x1f08] sm:$0xff]  ;;  %v12222_v53 = vcombine.high %v3495_v49, %v3499_v57  ;;  %v12221_v17 = vcombine.low %v3495_v49, %v3499_v57  ;;  %v17948_v57 = vld [vmem:[#allocation3_spill] sm:$0xff] }
 0x460   :  { %v3627_v56 = vld [vmem:[%s17896_s7 + $0x1f28] sm:$0xff] }
 0x461   :  { %9403 = vmatpush1.bf16.msra.mxu1 %v12133_v44  ;;  %v12350_v27 = vcombine.high %v3623_v31, %v3627_v56  ;;  %v3487_v47 = vld [vmem:[%s17896_s7 + $0x1ac8] sm:$0xff]  ;;  %v12349_v8 = vcombine.low %v3623_v31, %v3627_v56  ;;  %v15953_v31 = vsub.s32 2, %v17948_v57 }
 0x462   :  { %9444 = vmatpush1.bf16.msra.mxu0 %v12261_v43  ;;  %9404 = vmatprep.subr.bf16.mxu1 %v12126_v21  ;;  %v3491_v36 = vld [vmem:[%s17896_s7 + $0x1ae8] sm:$0xff] }
 0x463   :  { %9445 = vmatprep.subr.bf16.mxu0 %v12254_v51  ;;  %v3615_v1 = vld [vmem:[%s17896_s7 + $0x1ec8] sm:$0xff]  ;;  %v12214_v62 = vcombine.high %v3487_v47, %v3491_v36  ;;  %v12213_v3 = vcombine.low %v3487_v47, %v3491_v36  ;;  %v2684_v47 = vld [vmem:[%s17896_s7 + $0x1b0] sm:$0xff]  ;;  %v13205_v36 = vld [vmem:[%s17899_s8] sm:$0xff] }
 0x464   :  { %v3619_v60 = vld [vmem:[%s17896_s7 + $0x1ee8] sm:$0xff] }
 0x465   :  { %9405 = vmatpush1.bf16.msra.mxu1 %v12125_v63  ;;  %v12342_v32 = vcombine.high %v3615_v1, %v3619_v60  ;;  %v3479_v44 = vld [vmem:[%s17896_s7 + $0x1a88] sm:$0xff]  ;;  %v12341_v7 = vcombine.low %v3615_v1, %v3619_v60  ;;  %v3667_v1 = vrot.slane %v13205_v36, %v15953_v31 }
 0x466   :  { %9446 = vmatpush1.bf16.msra.mxu0 %v12253_v12  ;;  %9406 = vmatprep.subr.bf16.mxu1 %v12246_v30  ;;  %v3483_v43 = vld [vmem:[%s17896_s7 + $0x1aa8] sm:$0xff] }
 0x467   :  { %9447 = vmatprep.subr.bf16.mxu0 %v12374_v37  ;;  %v3607_v21 = vld [vmem:[%s17896_s7 + $0x1e88] sm:$0xff]  ;;  %v12206_v5 = vcombine.high %v3479_v44, %v3483_v43  ;;  %v12205_v11 = vcombine.low %v3479_v44, %v3483_v43  ;;  %v2672_v43 = vld [vmem:[%s17896_s7 + $0x150] sm:$0xff] }
 0x468   :  { %v3611_v51 = vld [vmem:[%s17896_s7 + $0x1ea8] sm:$0xff] }
 0x469   :  { %9407 = vmatpush2.bf16.msra.mxu1 %v12245_v33  ;;  %v12334_v25 = vcombine.high %v3607_v21, %v3611_v51  ;;  %v3471_v63 = vld [vmem:[%s17896_s7 + $0x1a48] sm:$0xff]  ;;  %v12333_v9 = vcombine.low %v3607_v21, %v3611_v51  ;;  %v2676_v21 = vld [vmem:[%s17896_s7 + $0x170] sm:$0xff] }
 0x46a   :  { %9448 = vmatpush2.bf16.msra.mxu0 %v12373_v50  ;;  %9408 = vmatprep.subr.bf16.mxu1 %v12238_v39  ;;  %v3475_v12 = vld [vmem:[%s17896_s7 + $0x1a68] sm:$0xff] }
 0x46b   :  { %9449 = vmatprep.subr.bf16.mxu0 %v12366_v28  ;;  %v3599_v30 = vld [vmem:[%s17896_s7 + $0x1e48] sm:$0xff]  ;;  %v12198_v2 = vcombine.high %v3471_v63, %v3475_v12  ;;  %v12197_v40 = vcombine.low %v3471_v63, %v3475_v12 }
 0x46c   :  { %v3603_v37 = vld [vmem:[%s17896_s7 + $0x1e68] sm:$0xff] }
 0x46d   :  { %9409 = vmatpush2.bf16.msra.mxu1 %v12237_v26  ;;  %v12326_v0 = vcombine.high %v3599_v30, %v3603_v37  ;;  %v3463_v33 = vld [vmem:[%s17896_s7 + $0x1a08] sm:$0xff]  ;;  %v12325_v61 = vcombine.low %v3599_v30, %v3603_v37  ;;  %v2688_v26 = vld [vmem:[%s17896_s7 + $0x1d0] sm:$0xff] }
 0x46e   :  { %9450 = vmatpush2.bf16.msra.mxu0 %v12365_v54  ;;  %9410 = vmatprep.subr.bf16.mxu1 %v12230_v38  ;;  %v3467_v50 = vld [vmem:[%s17896_s7 + $0x1a28] sm:$0xff]  ;;  %v2692_v54 = vld [vmem:[%s17896_s7 + $0x1f0] sm:$0xff] }
 0x46f   :  { %9451 = vmatprep.subr.bf16.mxu0 %v12358_v23  ;;  %v3591_v39 = vld [vmem:[%s17896_s7 + $0x1e08] sm:$0xff]  ;;  %v12190_v18 = vcombine.high %v3463_v33, %v3467_v50  ;;  %v2816_v38 = vld [vmem:[%s17896_s7 + $0x5d0] sm:$0xff]  ;;  %v12189_v49 = vcombine.low %v3463_v33, %v3467_v50  ;;  %v11415_v60 = vcombine.low %v2688_v26, %v2692_v54 }
 0x470   :  { %v3595_v28 = vld [vmem:[%s17896_s7 + $0x1e28] sm:$0xff]  ;;  %v2820_v23 = vld [vmem:[%s17896_s7 + $0x5f0] sm:$0xff] }
 0x471   :  { %9411 = vmatpush2.bf16.msra.mxu1 %v12229_v24  ;;  %v12318_v52 = vcombine.high %v3591_v39, %v3595_v28  ;;  %v12317_v56 = vcombine.low %v3591_v39, %v3595_v28  ;;  %v11416_v24 = vcombine.high %v2688_v26, %v2692_v54  ;;  %v2664_v50 = vld [vmem:[%s17896_s7 + $0x110] sm:$0xff]  ;;  %v11399_v26 = vcombine.low %v2672_v43, %v2676_v21 }
 0x472   :  { %9452 = vmatpush2.bf16.msra.mxu0 %v12357_v16  ;;  %9412 = vmatprep.subr.bf16.mxu1 %v12222_v53  ;;  %v11544_v16 = vcombine.high %v2816_v38, %v2820_v23  ;;  %v15956_v53 = vsub.s32 3, %v17948_v57  ;;  %v2668_v39 = vld [vmem:[%s17896_s7 + $0x130] sm:$0xff] }
 0x473   :  { %9453 = vmatprep.subr.bf16.mxu0 %v12350_v27  ;;  %v2680_v27 = vld [vmem:[%s17896_s7 + $0x190] sm:$0xff] }
 0x474   :  { %v11408_v44 = vcombine.high %v2680_v27, %v2684_v47  ;;  %v11407_v12 = vcombine.low %v2680_v27, %v2684_v47  ;;  %v2784_v27 = vld [vmem:[%s17896_s7 + $0x4d0] sm:$0xff] }
 0x475   :  { %9413 = vmatpush2.bf16.msra.mxu1 %v12221_v17  ;;  %v2808_v17 = vld [vmem:[%s17896_s7 + $0x590] sm:$0xff] }
 0x476   :  { %9454 = vmatpush2.bf16.msra.mxu0 %v12349_v8  ;;  %9414 = vmatprep.subr.bf16.mxu1 %v12214_v62  ;;  %v2812_v8 = vld [vmem:[%s17896_s7 + $0x5b0] sm:$0xff]  ;;  %v11543_v62 = vcombine.low %v2816_v38, %v2820_v23  ;;  %v11392_v23 = vcombine.high %v2664_v50, %v2668_v39 }
 0x477   :  { %9455 = vmatprep.subr.bf16.mxu0 %v12342_v32  ;;  %v3671_v32 = vrot.slane %v13205_v36, %v15956_v53  ;;  %v11535_v37 = vcombine.low %v2808_v17, %v2812_v8  ;;  %v2788_v47 = vld [vmem:[%s17896_s7 + $0x4f0] sm:$0xff]  ;;  %v11391_v36 = vcombine.low %v2664_v50, %v2668_v39 }
 0x478   :  { %v2764_v50 = vld [vmem:[%s17896_s7 + $0x430] sm:$0xff] }
 0x479   :  { %9415 = vmatpush2.bf16.msra.mxu1 %v12213_v3  ;;  %v11536_v3 = vcombine.high %v2808_v17, %v2812_v8  ;;  %v11512_v17 = vcombine.high %v2784_v27, %v2788_v47  ;;  %v2648_v8 = vld [vmem:[%s17896_s7 + $0x90] sm:$0xff] }
 0x47a   :  { %9456 = vmatpush2.bf16.msra.mxu0 %v12341_v7  ;;  %9416 = vmatprep.subr.bf16.mxu1 %v12206_v5  ;;  %v2800_v7 = vld [vmem:[%s17896_s7 + $0x550] sm:$0xff] }
 0x47b   :  { %9457 = vmatprep.subr.bf16.mxu0 %v12334_v25  ;;  %v2804_v5 = vld [vmem:[%s17896_s7 + $0x570] sm:$0xff] }
 0x47c   :  { %v11528_v33 = vcombine.high %v2800_v7, %v2804_v5  ;;  %v11527_v38 = vcombine.low %v2800_v7, %v2804_v5  ;;  %v2640_v7 = vld [vmem:[%s17896_s7 + $0x50] sm:$0xff] }
 0x47d   :  { %9417 = vmatpush2.bf16.msra.mxu1 %v12205_v11  ;;  %v11400_v11 = vcombine.high %v2672_v43, %v2676_v21  ;;  %v11511_v21 = vcombine.low %v2784_v27, %v2788_v47  ;;  %v2644_v5 = vld [vmem:[%s17896_s7 + $0x70] sm:$0xff] }
 0x47e   :  { %9458 = vmatpush2.bf16.msra.mxu0 %v12333_v9  ;;  %9418 = vmatprep.subr.bf16.mxu1 %v12198_v2  ;;  %v11367_v39 = vcombine.low %v2640_v7, %v2644_v5  ;;  %v2748_v27 = vld [vmem:[%s17896_s7 + $0x3b0] sm:$0xff] }
 0x47f   :  { %9459 = vmatprep.subr.bf16.mxu0 %v12326_v0  ;;  %v2872_v47 = vld [vmem:[%s17896_s7 + $0x790] sm:$0xff] }
 0x481   :  { %9419 = vmatpush2.bf16.msra.mxu1 %v12197_v40  ;;  %v2792_v40 = vld [vmem:[%s17896_s7 + $0x510] sm:$0xff] }
 0x482   :  { %9460 = vmatpush2.bf16.msra.mxu0 %v12325_v61  ;;  %9420 = vmatprep.subr.bf16.mxu1 %v12190_v18  ;;  %v2796_v61 = vld [vmem:[%s17896_s7 + $0x530] sm:$0xff] }
 0x483   :  { %9461 = vmatprep.subr.bf16.mxu0 %v12318_v52 }
 0x485   :  { %9421 = vmatpush2.bf16.msra.mxu1 %v12189_v49 }
 0x486   :  { %9462 = vmatpush2.bf16.msra.mxu0 %v12317_v56  ;;  %9472 = vmatprep.subr.bf16.mxu1 %v11416_v24  ;;  %v11520_v56 = vcombine.high %v2792_v40, %v2796_v61  ;;  %v2656_v24 = vld [vmem:[%s17896_s7 + $0xd0] sm:$0xff] }
 0x487   :  { %9513 = vmatprep.subr.bf16.mxu0 %v11544_v16  ;;  %v2660_v16 = vld [vmem:[%s17896_s7 + $0xf0] sm:$0xff] }
 0x488   :  { %v9178_v51 = vpop.f32.mrf.mxu1  ;;  %9423 = vmatmul.mubr.bf16.vlgmr.msra.gmra.mxu1 %v14510_v34  ;;  %v11383_v43 = vcombine.low %v2656_v24, %v2660_v16 }
 0x489   :  { %v9179_v25 = vadd.f32 %v9178_v51, %v3667_v1  ;;  %v9219_v63 = vpop.f32.mrf.mxu0  ;;  %9464 = vmatmul.mubr.bf16.vlgmr.msra.gmra.mxu0 %v15155_v13  ;;  %9473 = vmatpush1.bf16.msra.mxu1 %v11415_v60  ;;  %v11519_v1 = vcombine.low %v2792_v40, %v2796_v61  ;;  %v11384_v60 = vcombine.high %v2656_v24, %v2660_v16  ;;  %v2744_v16 = vld [vmem:[%s17896_s7 + $0x390] sm:$0xff] }
 0x48a   :  { %9504 = vmatprep.mubr.bf16.mxu1 %v14522_v55  ;;  %9514 = vmatpush1.bf16.msra.mxu0 %v11543_v62  ;;  %v9180_v30 = vpop.f32.mrf.mxu1  ;;  %v2652_v62 = vld [vmem:[%s17896_s7 + $0xb0] sm:$0xff] }
 0x48b   :  { %v15990_v9 = vadd.f32 %v9219_v63, %v9179_v25  ;;  %9545 = vmatprep.mubr.bf16.mxu0 %v14525_v10  ;;  %v9181_v2 = vadd.f32 %v9180_v30, %v3671_v32  ;;  %v9221_v0 = vpop.f32.mrf.mxu0  ;;  %9474 = vmatprep.subr.bf16.mxu1 %v11408_v44  ;;  %v2776_v32 = vld [vmem:[%s17896_s7 + $0x490] sm:$0xff]  ;;  %v11376_v51 = vcombine.high %v2648_v8, %v2652_v62 }
 0x48c   :  { %v9182_v28 = vpop.f32.mrf.mxu1  ;;  %9515 = vmatprep.subr.bf16.mxu0 %v11536_v3  ;;  %v2780_v44 = vld [vmem:[%s17896_s7 + $0x4b0] sm:$0xff] }
 0x48d   :  { %v16005_v18 = vadd.f32 %v9221_v0, %v9181_v2  ;;  %v9223_v52 = vpop.f32.mrf.mxu0  ;;  %9475 = vmatpush1.bf16.msra.mxu1 %v11407_v12  ;;  %v11504_v3 = vcombine.high %v2776_v32, %v2780_v44  ;;  %v2768_v25 = vld [vmem:[%s17896_s7 + $0x450] sm:$0xff]  ;;  %v11375_v12 = vcombine.low %v2648_v8, %v2652_v62  ;;  %v11503_v30 = vcombine.low %v2776_v32, %v2780_v44 }
 0x48e   :  { %9516 = vmatpush1.bf16.msra.mxu0 %v11535_v37  ;;  %v9183_v54 = vpop.f32.mrf.mxu1  ;;  %9476 = vmatprep.subr.bf16.mxu1 %v11400_v11  ;;  %v2772_v63 = vld [vmem:[%s17896_s7 + $0x470] sm:$0xff]  ;;  %v11368_v37 = vcombine.high %v2640_v7, %v2644_v5 }
 0x48f   :  { %v9224_v49 = vpop.f32.mrf.mxu0  ;;  %9517 = vmatprep.subr.bf16.mxu0 %v11528_v33  ;;  %v11496_v11 = vcombine.high %v2768_v25, %v2772_v63  ;;  %v2632_v2 = vld [vmem:[%s17896_s7 + $0x10] sm:$0xff]  ;;  %v11495_v28 = vcombine.low %v2768_v25, %v2772_v63 }
 0x490   :  { %v2636_v0 = vld [vmem:[%s17896_s7 + $0x30] sm:$0xff] }
 0x491   :  { %9477 = vmatpush1.bf16.msra.mxu1 %v11399_v26  ;;  %v2760_v33 = vld [vmem:[%s17896_s7 + $0x410] sm:$0xff]  ;;  %v11360_v40 = vcombine.high %v2632_v2, %v2636_v0 }
 0x492   :  { %9518 = vmatpush1.bf16.msra.mxu0 %v11527_v38  ;;  %9478 = vmatprep.subr.bf16.mxu1 %v11392_v23  ;;  %v11488_v61 = vcombine.high %v2760_v33, %v2764_v50  ;;  %v2752_v52 = vld [vmem:[%s17896_s7 + $0x3d0] sm:$0xff]  ;;  %v11359_v23 = vcombine.low %v2632_v2, %v2636_v0  ;;  %v11487_v49 = vcombine.low %v2760_v33, %v2764_v50 }
 0x493   :  { %9519 = vmatprep.subr.bf16.mxu0 %v11520_v56  ;;  %v2756_v26 = vld [vmem:[%s17896_s7 + $0x3f0] sm:$0xff] }
 0x494   :  { %v2880_v54 = vld [vmem:[%s17896_s7 + $0x7d0] sm:$0xff]  ;;  %v11480_v56 = vcombine.high %v2752_v52, %v2756_v26 }
 0x495   :  { %9479 = vmatpush1.bf16.msra.mxu1 %v11391_v36  ;;  %v2884_v38 = vld [vmem:[%s17896_s7 + $0x7f0] sm:$0xff] }
 0x496   :  { %9520 = vmatpush1.bf16.msra.mxu0 %v11519_v1  ;;  %9480 = vmatprep.subr.bf16.mxu1 %v11384_v60  ;;  %v11608_v24 = vcombine.high %v2880_v54, %v2884_v38  ;;  %v2876_v36 = vld [vmem:[%s17896_s7 + $0x7b0] sm:$0xff]  ;;  %v11479_v1 = vcombine.low %v2752_v52, %v2756_v26  ;;  %v11607_v60 = vcombine.low %v2880_v54, %v2884_v38 }
 0x497   :  { %9521 = vmatprep.subr.bf16.mxu0 %v11512_v17  ;;  %v11472_v17 = vcombine.high %v2744_v16, %v2748_v27  ;;  %v11600_v8 = vcombine.high %v2872_v47, %v2876_v36  ;;  %v2736_v62 = vld [vmem:[%s17896_s7 + $0x350] sm:$0xff] }
 0x498   :  { %v2740_v32 = vld [vmem:[%s17896_s7 + $0x370] sm:$0xff] }
 0x499   :  { %9481 = vmatpush1.bf16.msra.mxu1 %v11383_v43  ;;  %v2864_v44 = vld [vmem:[%s17896_s7 + $0x750] sm:$0xff] }
 0x49a   :  { %9522 = vmatpush1.bf16.msra.mxu0 %v11511_v21  ;;  %9482 = vmatprep.subr.bf16.mxu1 %v11376_v51  ;;  %v2868_v43 = vld [vmem:[%s17896_s7 + $0x770] sm:$0xff]  ;;  %v11471_v21 = vcombine.low %v2744_v16, %v2748_v27  ;;  %v11599_v51 = vcombine.low %v2872_v47, %v2876_v36 }
 0x49b   :  { %9523 = vmatprep.subr.bf16.mxu0 %v11504_v3  ;;  %v11464_v3 = vcombine.high %v2736_v62, %v2740_v32  ;;  %v11592_v7 = vcombine.high %v2864_v44, %v2868_v43  ;;  %v2728_v5 = vld [vmem:[%s17896_s7 + $0x310] sm:$0xff] }
 0x49c   :  { %v2732_v25 = vld [vmem:[%s17896_s7 + $0x330] sm:$0xff] }
 0x49d   :  { %9483 = vmatpush1.bf16.msra.mxu1 %v11375_v12  ;;  %v2856_v63 = vld [vmem:[%s17896_s7 + $0x710] sm:$0xff] }
 0x49e   :  { %9524 = vmatpush1.bf16.msra.mxu0 %v11503_v30  ;;  %9484 = vmatprep.subr.bf16.mxu1 %v11368_v37  ;;  %v2860_v12 = vld [vmem:[%s17896_s7 + $0x730] sm:$0xff]  ;;  %v11463_v30 = vcombine.low %v2736_v62, %v2740_v32  ;;  %v11591_v37 = vcombine.low %v2864_v44, %v2868_v43 }
 0x49f   :  { %9525 = vmatprep.subr.bf16.mxu0 %v11496_v11  ;;  %v11456_v11 = vcombine.high %v2728_v5, %v2732_v25  ;;  %v11584_v2 = vcombine.high %v2856_v63, %v2860_v12  ;;  %v2720_v0 = vld [vmem:[%s17896_s7 + $0x2d0] sm:$0xff] }
 0x4a0   :  { %v2724_v33 = vld [vmem:[%s17896_s7 + $0x2f0] sm:$0xff] }
 0x4a1   :  { %9485 = vmatpush1.bf16.msra.mxu1 %v11367_v39  ;;  %v2848_v50 = vld [vmem:[%s17896_s7 + $0x6d0] sm:$0xff] }
 0x4a2   :  { %9526 = vmatpush1.bf16.msra.mxu0 %v11495_v28  ;;  %9486 = vmatprep.subr.bf16.mxu1 %v11360_v40  ;;  %v2852_v39 = vld [vmem:[%s17896_s7 + $0x6f0] sm:$0xff]  ;;  %v11455_v28 = vcombine.low %v2728_v5, %v2732_v25  ;;  %v11583_v40 = vcombine.low %v2856_v63, %v2860_v12 }
 0x4a3   :  { %9527 = vmatprep.subr.bf16.mxu0 %v11488_v61  ;;  %v11448_v61 = vcombine.high %v2720_v0, %v2724_v33  ;;  %v11576_v52 = vcombine.high %v2848_v50, %v2852_v39  ;;  %v2712_v26 = vld [vmem:[%s17896_s7 + $0x290] sm:$0xff] }
 0x4a4   :  { %v2716_v54 = vld [vmem:[%s17896_s7 + $0x2b0] sm:$0xff] }
 0x4a5   :  { %9487 = vmatpush1.bf16.msra.mxu1 %v11359_v23  ;;  %v2840_v38 = vld [vmem:[%s17896_s7 + $0x690] sm:$0xff] }
 0x4a6   :  { %9528 = vmatpush1.bf16.msra.mxu0 %v11487_v49  ;;  %9488 = vmatprep.subr.bf16.mxu1 %v11480_v56  ;;  %v2844_v23 = vld [vmem:[%s17896_s7 + $0x6b0] sm:$0xff]  ;;  %v11447_v49 = vcombine.low %v2720_v0, %v2724_v33  ;;  %v11575_v56 = vcombine.low %v2848_v50, %v2852_v39 }
 0x4a7   :  { %9529 = vmatprep.subr.bf16.mxu0 %v11608_v24  ;;  %v11440_v24 = vcombine.high %v2712_v26, %v2716_v54  ;;  %v11568_v16 = vcombine.high %v2840_v38, %v2844_v23  ;;  %v2704_v27 = vld [vmem:[%s17896_s7 + $0x250] sm:$0xff] }
 0x4a8   :  { %v2708_v47 = vld [vmem:[%s17896_s7 + $0x270] sm:$0xff] }
 0x4a9   :  { %9489 = vmatpush2.bf16.msra.mxu1 %v11479_v1  ;;  %v2832_v36 = vld [vmem:[%s17896_s7 + $0x650] sm:$0xff] }
 0x4aa   :  { %9530 = vmatpush2.bf16.msra.mxu0 %v11607_v60  ;;  %9490 = vmatprep.subr.bf16.mxu1 %v11472_v17  ;;  %v2836_v1 = vld [vmem:[%s17896_s7 + $0x670] sm:$0xff]  ;;  %v11439_v60 = vcombine.low %v2712_v26, %v2716_v54  ;;  %v11567_v17 = vcombine.low %v2840_v38, %v2844_v23 }
 0x4ab   :  { %9531 = vmatprep.subr.bf16.mxu0 %v11600_v8  ;;  %v11432_v8 = vcombine.high %v2704_v27, %v2708_v47  ;;  %v11560_v62 = vcombine.high %v2832_v36, %v2836_v1  ;;  %v2696_v32 = vld [vmem:[%s17896_s7 + $0x210] sm:$0xff] }
 0x4ac   :  { %v2700_v44 = vld [vmem:[%s17896_s7 + $0x230] sm:$0xff] }
 0x4ad   :  { %9491 = vmatpush2.bf16.msra.mxu1 %v11471_v21  ;;  %v2824_v43 = vld [vmem:[%s17896_s7 + $0x610] sm:$0xff] }
 0x4ae   :  { %9532 = vmatpush2.bf16.msra.mxu0 %v11599_v51  ;;  %9492 = vmatprep.subr.bf16.mxu1 %v11464_v3  ;;  %v2828_v21 = vld [vmem:[%s17896_s7 + $0x630] sm:$0xff]  ;;  %v11431_v51 = vcombine.low %v2704_v27, %v2708_v47  ;;  %v11559_v3 = vcombine.low %v2832_v36, %v2836_v1 }
 0x4af   :  { %9533 = vmatprep.subr.bf16.mxu0 %v11592_v7  ;;  %v11424_v7 = vcombine.high %v2696_v32, %v2700_v44  ;;  %v11552_v5 = vcombine.high %v2824_v43, %v2828_v21  ;;  %v2944_v25 = vld [vmem:[%s17896_s7 + $0x9d0] sm:$0xff] }
 0x4b0   :  { %v2948_v63 = vld [vmem:[%s17896_s7 + $0x9f0] sm:$0xff] }
 0x4b1   :  { %9493 = vmatpush2.bf16.msra.mxu1 %v11463_v30  ;;  %v3072_v12 = vld [vmem:[%s17896_s7 + $0xdd0] sm:$0xff]  ;;  %v11671_v39 = vcombine.low %v2944_v25, %v2948_v63 }
 0x4b2   :  { %9534 = vmatpush2.bf16.msra.mxu0 %v11591_v37  ;;  %9494 = vmatprep.subr.bf16.mxu1 %v11456_v11  ;;  %v3076_v30 = vld [vmem:[%s17896_s7 + $0xdf0] sm:$0xff]  ;;  %v11423_v37 = vcombine.low %v2696_v32, %v2700_v44  ;;  %v11551_v11 = vcombine.low %v2824_v43, %v2828_v21 }
 0x4b3   :  { %9535 = vmatprep.subr.bf16.mxu0 %v11584_v2  ;;  %v11672_v2 = vcombine.high %v2944_v25, %v2948_v63  ;;  %v11800_v0 = vcombine.high %v3072_v12, %v3076_v30  ;;  %v2936_v33 = vld [vmem:[%s17896_s7 + $0x990] sm:$0xff] }
 0x4b4   :  { %v2940_v50 = vld [vmem:[%s17896_s7 + $0x9b0] sm:$0xff] }
 0x4b5   :  { %9495 = vmatpush2.bf16.msra.mxu1 %v11455_v28  ;;  %v3064_v28 = vld [vmem:[%s17896_s7 + $0xd90] sm:$0xff]  ;;  %v11663_v27 = vcombine.low %v2936_v33, %v2940_v50 }
 0x4b6   :  { %9536 = vmatpush2.bf16.msra.mxu0 %v11583_v40  ;;  %9496 = vmatprep.subr.bf16.mxu1 %v11448_v61  ;;  %v3068_v40 = vld [vmem:[%s17896_s7 + $0xdb0] sm:$0xff]  ;;  %v11799_v61 = vcombine.low %v3072_v12, %v3076_v30 }
 0x4b7   :  { %9537 = vmatprep.subr.bf16.mxu0 %v11576_v52  ;;  %v11664_v52 = vcombine.high %v2936_v33, %v2940_v50  ;;  %v2928_v26 = vld [vmem:[%s17896_s7 + $0x950] sm:$0xff]  ;;  %v11792_v23 = vcombine.high %v3064_v28, %v3068_v40  ;;  %v11791_v36 = vcombine.low %v3064_v28, %v3068_v40 }
 0x4b8   :  { %v2932_v54 = vld [vmem:[%s17896_s7 + $0x970] sm:$0xff] }
 0x4b9   :  { %9497 = vmatpush2.bf16.msra.mxu1 %v11447_v49  ;;  %v3056_v49 = vld [vmem:[%s17896_s7 + $0xd50] sm:$0xff]  ;;  %v11656_v1 = vcombine.high %v2928_v26, %v2932_v54 }
 0x4ba   :  { %9538 = vmatpush2.bf16.msra.mxu0 %v11575_v56  ;;  %9498 = vmatprep.subr.bf16.mxu1 %v11440_v24  ;;  %v3060_v56 = vld [vmem:[%s17896_s7 + $0xd70] sm:$0xff] }
 0x4bb   :  { %9539 = vmatprep.subr.bf16.mxu0 %v11568_v16  ;;  %v2924_v32 = vld [vmem:[%s17896_s7 + $0x930] sm:$0xff] }
 0x4bc   :  { %v3048_v43 = vld [vmem:[%s17896_s7 + $0xd10] sm:$0xff] }
 0x4bd   :  { %9499 = vmatpush2.bf16.msra.mxu1 %v11439_v60  ;;  %v2912_v30 = vld [vmem:[%s17896_s7 + $0x8d0] sm:$0xff] }
 0x4be   :  { %9540 = vmatpush2.bf16.msra.mxu0 %v11567_v17  ;;  %9500 = vmatprep.subr.bf16.mxu1 %v11432_v8  ;;  %v2904_v28 = vld [vmem:[%s17896_s7 + $0x890] sm:$0xff] }
 0x4bf   :  { %9541 = vmatprep.subr.bf16.mxu0 %v11560_v62  ;;  %v2920_v62 = vld [vmem:[%s17896_s7 + $0x910] sm:$0xff] }
 0x4c0   :  { %v11648_v25 = vcombine.high %v2920_v62, %v2924_v32  ;;  %v2908_v40 = vld [vmem:[%s17896_s7 + $0x8b0] sm:$0xff] }
 0x4c1   :  { %9501 = vmatpush2.bf16.msra.mxu1 %v11431_v51 }
 0x4c2   :  { %9542 = vmatpush2.bf16.msra.mxu0 %v11559_v3  ;;  %9502 = vmatprep.subr.bf16.mxu1 %v11424_v7  ;;  %v11655_v3 = vcombine.low %v2928_v26, %v2932_v54 }
 0x4c3   :  { %9543 = vmatprep.subr.bf16.mxu0 %v11552_v5  ;;  %v11783_v5 = vcombine.low %v3056_v49, %v3060_v56 }
 0x4c5   :  { %9503 = vmatpush2.bf16.msra.mxu1 %v11423_v37  ;;  %v2916_v37 = vld [vmem:[%s17896_s7 + $0x8f0] sm:$0xff] }
 0x4c6   :  { %9544 = vmatpush2.bf16.msra.mxu0 %v11551_v11  ;;  %9554 = vmatprep.subr.bf16.mxu1 %v11672_v2  ;;  %v3040_v11 = vld [vmem:[%s17896_s7 + $0xcd0] sm:$0xff]  ;;  %v11640_v50 = vcombine.high %v2912_v30, %v2916_v37  ;;  %v11639_v26 = vcombine.low %v2912_v30, %v2916_v37 }
 0x4c7   :  { %9595 = vmatprep.subr.bf16.mxu0 %v11800_v0  ;;  %v3044_v2 = vld [vmem:[%s17896_s7 + $0xcf0] sm:$0xff]  ;;  %v11647_v0 = vcombine.low %v2920_v62, %v2924_v32 }
 0x4c8   :  { %v9260_v38 = vpop.f32.mrf.mxu1  ;;  %9505 = vmatmul.mubr.bf16.vlgmr.msra.gmra.mxu1 %v14503_v45  ;;  %v11767_v54 = vcombine.low %v3040_v11, %v3044_v2  ;;  %v3020_v62 = vld [vmem:[%s17896_s7 + $0xc30] sm:$0xff] }
 0x4c9   :  { %v9261_v24 = vadd.f32 %v9260_v38, %v15990_v9  ;;  %v9301_v16 = vpop.f32.mrf.mxu0  ;;  %9546 = vmatmul.mubr.bf16.vlgmr.msra.gmra.mxu0 %v14528_v22  ;;  %9555 = vmatpush1.bf16.msra.mxu1 %v11671_v39  ;;  %v11784_v9 = vcombine.high %v3056_v49, %v3060_v56  ;;  %v11768_v39 = vcombine.high %v3040_v11, %v3044_v2  ;;  %v2896_v49 = vld [vmem:[%s17896_s7 + $0x850] sm:$0xff] }
 0x4ca   :  { %9586 = vmatprep.mubr.bf16.mxu1 %v14547_v4  ;;  %9596 = vmatpush1.bf16.msra.mxu0 %v11799_v61  ;;  %v9262_v47 = vpop.f32.mrf.mxu1  ;;  %v3032_v61 = vld [vmem:[%s17896_s7 + $0xc90] sm:$0xff]  ;;  %v11632_v38 = vcombine.high %v2904_v28, %v2908_v40 }
 0x4cb   :  { %v16191_v60 = vadd.f32 %v9301_v16, %v9261_v24  ;;  %9627 = vmatprep.mubr.bf16.mxu0 %v14550_v41  ;;  %v9263_v17 = vadd.f32 %v9262_v47, %v16005_v18  ;;  %v9303_v8 = vpop.f32.mrf.mxu0  ;;  %9556 = vmatprep.subr.bf16.mxu1 %v11664_v52  ;;  %v3052_v18 = vld [vmem:[%s17896_s7 + $0xd30] sm:$0xff] }
 0x4cc   :  { %v9264_v44 = vpop.f32.mrf.mxu1  ;;  %9597 = vmatprep.subr.bf16.mxu0 %v11792_v23  ;;  %v11776_v12 = vcombine.high %v3048_v43, %v3052_v18  ;;  %v11775_v33 = vcombine.low %v3048_v43, %v3052_v18  ;;  %v3036_v52 = vld [vmem:[%s17896_s7 + $0xcb0] sm:$0xff] }
 0x4cd   :  { %v16207_v21 = vadd.f32 %v9303_v8, %v9263_v17  ;;  %v9305_v51 = vpop.f32.mrf.mxu0  ;;  %9557 = vmatpush1.bf16.msra.mxu1 %v11663_v27  ;;  %v11760_v23 = vcombine.high %v3032_v61, %v3036_v52  ;;  %v2900_v56 = vld [vmem:[%s17896_s7 + $0x870] sm:$0xff]  ;;  %v11631_v27 = vcombine.low %v2904_v28, %v2908_v40  ;;  %v11759_v47 = vcombine.low %v3032_v61, %v3036_v52 }
 0x4ce   :  { %9598 = vmatpush1.bf16.msra.mxu0 %v11791_v36  ;;  %v9265_v7 = vpop.f32.mrf.mxu1  ;;  %9558 = vmatprep.subr.bf16.mxu1 %v11656_v1  ;;  %v3024_v24 = vld [vmem:[%s17896_s7 + $0xc50] sm:$0xff]  ;;  %v11624_v36 = vcombine.high %v2896_v49, %v2900_v56  ;;  %v11623_v32 = vcombine.low %v2896_v49, %v2900_v56 }
 0x4cf   :  { %v9306_v63 = vpop.f32.mrf.mxu0  ;;  %9599 = vmatprep.subr.bf16.mxu0 %v11784_v9  ;;  %v3028_v16 = vld [vmem:[%s17896_s7 + $0xc70] sm:$0xff] }
 0x4d0   :  { %v11752_v1 = vcombine.high %v3024_v24, %v3028_v16  ;;  %v2888_v17 = vld [vmem:[%s17896_s7 + $0x810] sm:$0xff]  ;;  %v11751_v44 = vcombine.low %v3024_v24, %v3028_v16 }
 0x4d1   :  { %9559 = vmatpush1.bf16.msra.mxu1 %v11655_v3  ;;  %v2892_v8 = vld [vmem:[%s17896_s7 + $0x830] sm:$0xff] }
 0x4d2   :  { %9600 = vmatpush1.bf16.msra.mxu0 %v11783_v5  ;;  %9560 = vmatprep.subr.bf16.mxu1 %v11648_v25  ;;  %v3016_v9 = vld [vmem:[%s17896_s7 + $0xc10] sm:$0xff]  ;;  %v11616_v43 = vcombine.high %v2888_v17, %v2892_v8  ;;  %v11615_v25 = vcombine.low %v2888_v17, %v2892_v8 }
 0x4d3   :  { %9601 = vmatprep.subr.bf16.mxu0 %v11776_v12  ;;  %v11744_v18 = vcombine.high %v3016_v9, %v3020_v62  ;;  %v3008_v51 = vld [vmem:[%s17896_s7 + $0xbd0] sm:$0xff]  ;;  %v11743_v63 = vcombine.low %v3016_v9, %v3020_v62 }
 0x4d4   :  { %v3012_v3 = vld [vmem:[%s17896_s7 + $0xbf0] sm:$0xff] }
 0x4d5   :  { %9561 = vmatpush1.bf16.msra.mxu1 %v11647_v0  ;;  %v3136_v7 = vld [vmem:[%s17896_s7 + $0xfd0] sm:$0xff]  ;;  %v11736_v12 = vcombine.high %v3008_v51, %v3012_v3 }
 0x4d6   :  { %9602 = vmatpush1.bf16.msra.mxu0 %v11775_v33  ;;  %9562 = vmatprep.subr.bf16.mxu1 %v11640_v50  ;;  %v3140_v5 = vld [vmem:[%s17896_s7 + $0xff0] sm:$0xff]  ;;  %v11735_v33 = vcombine.low %v3008_v51, %v3012_v3 }
 0x4d7   :  { %9603 = vmatprep.subr.bf16.mxu0 %v11768_v39  ;;  %v11864_v30 = vcombine.high %v3136_v7, %v3140_v5  ;;  %v3000_v37 = vld [vmem:[%s17896_s7 + $0xb90] sm:$0xff]  ;;  %v11863_v50 = vcombine.low %v3136_v7, %v3140_v5 }
 0x4d8   :  { %v3004_v11 = vld [vmem:[%s17896_s7 + $0xbb0] sm:$0xff] }
 0x4d9   :  { %9563 = vmatpush1.bf16.msra.mxu1 %v11639_v26  ;;  %v3128_v2 = vld [vmem:[%s17896_s7 + $0xf90] sm:$0xff]  ;;  %v11728_v39 = vcombine.high %v3000_v37, %v3004_v11 }
 0x4da   :  { %9604 = vmatpush1.bf16.msra.mxu0 %v11767_v54  ;;  %9564 = vmatprep.subr.bf16.mxu1 %v11632_v38  ;;  %v3132_v0 = vld [vmem:[%s17896_s7 + $0xfb0] sm:$0xff]  ;;  %v11727_v54 = vcombine.low %v3000_v37, %v3004_v11 }
 0x4db   :  { %9605 = vmatprep.subr.bf16.mxu0 %v11760_v23  ;;  %v11856_v28 = vcombine.high %v3128_v2, %v3132_v0  ;;  %v2992_v40 = vld [vmem:[%s17896_s7 + $0xb50] sm:$0xff]  ;;  %v11855_v38 = vcombine.low %v3128_v2, %v3132_v0 }
 0x4dc   :  { %v2996_v61 = vld [vmem:[%s17896_s7 + $0xb70] sm:$0xff] }
 0x4dd   :  { %9565 = vmatpush1.bf16.msra.mxu1 %v11631_v27  ;;  %v3120_v52 = vld [vmem:[%s17896_s7 + $0xf50] sm:$0xff]  ;;  %v11720_v23 = vcombine.high %v2992_v40, %v2996_v61 }
 0x4de   :  { %9606 = vmatpush1.bf16.msra.mxu0 %v11759_v47  ;;  %9566 = vmatprep.subr.bf16.mxu1 %v11624_v36  ;;  %v3124_v26 = vld [vmem:[%s17896_s7 + $0xf70] sm:$0xff]  ;;  %v11719_v47 = vcombine.low %v2992_v40, %v2996_v61 }
 0x4df   :  { %9607 = vmatprep.subr.bf16.mxu0 %v11752_v1  ;;  %v11848_v49 = vcombine.high %v3120_v52, %v3124_v26  ;;  %v2984_v56 = vld [vmem:[%s17896_s7 + $0xb10] sm:$0xff]  ;;  %v11847_v36 = vcombine.low %v3120_v52, %v3124_v26 }
 0x4e0   :  { %v2988_v24 = vld [vmem:[%s17896_s7 + $0xb30] sm:$0xff] }
 0x4e1   :  { %9567 = vmatpush1.bf16.msra.mxu1 %v11623_v32  ;;  %v3112_v16 = vld [vmem:[%s17896_s7 + $0xf10] sm:$0xff]  ;;  %v11712_v1 = vcombine.high %v2984_v56, %v2988_v24 }
 0x4e2   :  { %9608 = vmatpush1.bf16.msra.mxu0 %v11751_v44  ;;  %9568 = vmatprep.subr.bf16.mxu1 %v11616_v43  ;;  %v3116_v27 = vld [vmem:[%s17896_s7 + $0xf30] sm:$0xff]  ;;  %v11711_v44 = vcombine.low %v2984_v56, %v2988_v24 }
 0x4e3   :  { %9609 = vmatprep.subr.bf16.mxu0 %v11744_v18  ;;  %v11840_v17 = vcombine.high %v3112_v16, %v3116_v27  ;;  %v2976_v8 = vld [vmem:[%s17896_s7 + $0xad0] sm:$0xff]  ;;  %v11839_v43 = vcombine.low %v3112_v16, %v3116_v27 }
 0x4e4   :  { %v2980_v9 = vld [vmem:[%s17896_s7 + $0xaf0] sm:$0xff] }
 0x4e5   :  { %9569 = vmatpush1.bf16.msra.mxu1 %v11615_v25  ;;  %v3104_v62 = vld [vmem:[%s17896_s7 + $0xed0] sm:$0xff]  ;;  %v11704_v18 = vcombine.high %v2976_v8, %v2980_v9 }
 0x4e6   :  { %9610 = vmatpush1.bf16.msra.mxu0 %v11743_v63  ;;  %9570 = vmatprep.subr.bf16.mxu1 %v11736_v12  ;;  %v3108_v32 = vld [vmem:[%s17896_s7 + $0xef0] sm:$0xff]  ;;  %v11703_v63 = vcombine.low %v2976_v8, %v2980_v9 }
 0x4e7   :  { %9611 = vmatprep.subr.bf16.mxu0 %v11864_v30  ;;  %v11832_v51 = vcombine.high %v3104_v62, %v3108_v32  ;;  %v2968_v3 = vld [vmem:[%s17896_s7 + $0xa90] sm:$0xff]  ;;  %v11831_v12 = vcombine.low %v3104_v62, %v3108_v32 }
 0x4e8   :  { %v2972_v7 = vld [vmem:[%s17896_s7 + $0xab0] sm:$0xff] }
 0x4e9   :  { %9571 = vmatpush2.bf16.msra.mxu1 %v11735_v33  ;;  %v3096_v5 = vld [vmem:[%s17896_s7 + $0xe90] sm:$0xff]  ;;  %v11696_v30 = vcombine.high %v2968_v3, %v2972_v7 }
 0x4ea   :  { %9612 = vmatpush2.bf16.msra.mxu0 %v11863_v50  ;;  %9572 = vmatprep.subr.bf16.mxu1 %v11728_v39  ;;  %v3100_v25 = vld [vmem:[%s17896_s7 + $0xeb0] sm:$0xff]  ;;  %v11695_v50 = vcombine.low %v2968_v3, %v2972_v7 }
 0x4eb   :  { %9613 = vmatprep.subr.bf16.mxu0 %v11856_v28  ;;  %v11824_v37 = vcombine.high %v3096_v5, %v3100_v25  ;;  %v2960_v11 = vld [vmem:[%s17896_s7 + $0xa50] sm:$0xff]  ;;  %v11823_v39 = vcombine.low %v3096_v5, %v3100_v25 }
 0x4ec   :  { %v2964_v2 = vld [vmem:[%s17896_s7 + $0xa70] sm:$0xff] }
 0x4ed   :  { %9573 = vmatpush2.bf16.msra.mxu1 %v11727_v54  ;;  %v3088_v0 = vld [vmem:[%s17896_s7 + $0xe50] sm:$0xff]  ;;  %v11688_v28 = vcombine.high %v2960_v11, %v2964_v2 }
 0x4ee   :  { %9614 = vmatpush2.bf16.msra.mxu0 %v11855_v38  ;;  %9574 = vmatprep.subr.bf16.mxu1 %v11720_v23  ;;  %v3092_v33 = vld [vmem:[%s17896_s7 + $0xe70] sm:$0xff]  ;;  %v11687_v38 = vcombine.low %v2960_v11, %v2964_v2 }
 0x4ef   :  { %9615 = vmatprep.subr.bf16.mxu0 %v11848_v49  ;;  %v11816_v40 = vcombine.high %v3088_v0, %v3092_v33  ;;  %v2952_v61 = vld [vmem:[%s17896_s7 + $0xa10] sm:$0xff]  ;;  %v11815_v23 = vcombine.low %v3088_v0, %v3092_v33 }
 0x4f0   :  { %v2956_v52 = vld [vmem:[%s17896_s7 + $0xa30] sm:$0xff] }
 0x4f1   :  { %9575 = vmatpush2.bf16.msra.mxu1 %v11719_v47  ;;  %v3080_v26 = vld [vmem:[%s17896_s7 + $0xe10] sm:$0xff]  ;;  %v11680_v49 = vcombine.high %v2952_v61, %v2956_v52 }
 0x4f2   :  { %9616 = vmatpush2.bf16.msra.mxu0 %v11847_v36  ;;  %9576 = vmatprep.subr.bf16.mxu1 %v11712_v1  ;;  %v3084_v54 = vld [vmem:[%s17896_s7 + $0xe30] sm:$0xff]  ;;  %v11679_v36 = vcombine.low %v2952_v61, %v2956_v52 }
 0x4f3   :  { %9617 = vmatprep.subr.bf16.mxu0 %v11840_v17  ;;  %v11808_v56 = vcombine.high %v3080_v26, %v3084_v54  ;;  %v3200_v24 = vld [vmem:[%s17896_s7 + $0x11d0] sm:$0xff]  ;;  %v11807_v1 = vcombine.low %v3080_v26, %v3084_v54 }
 0x4f4   :  { %v3204_v16 = vld [vmem:[%s17896_s7 + $0x11f0] sm:$0xff] }
 0x4f5   :  { %9577 = vmatpush2.bf16.msra.mxu1 %v11711_v44  ;;  %v3328_v27 = vld [vmem:[%s17896_s7 + $0x15d0] sm:$0xff]  ;;  %v11928_v17 = vcombine.high %v3200_v24, %v3204_v16  ;;  %v11927_v32 = vcombine.low %v3200_v24, %v3204_v16 }
 0x4f6   :  { %9618 = vmatpush2.bf16.msra.mxu0 %v11839_v43  ;;  %9578 = vmatprep.subr.bf16.mxu1 %v11704_v18  ;;  %v3332_v47 = vld [vmem:[%s17896_s7 + $0x15f0] sm:$0xff] }
 0x4f7   :  { %9619 = vmatprep.subr.bf16.mxu0 %v11832_v51  ;;  %v12056_v8 = vcombine.high %v3328_v27, %v3332_v47  ;;  %v3192_v9 = vld [vmem:[%s17896_s7 + $0x1190] sm:$0xff]  ;;  %v12055_v18 = vcombine.low %v3328_v27, %v3332_v47 }
 0x4f8   :  { %v3196_v62 = vld [vmem:[%s17896_s7 + $0x11b0] sm:$0xff] }
 0x4f9   :  { %9579 = vmatpush2.bf16.msra.mxu1 %v11703_v63  ;;  %v3320_v44 = vld [vmem:[%s17896_s7 + $0x1590] sm:$0xff]  ;;  %v11920_v51 = vcombine.high %v3192_v9, %v3196_v62  ;;  %v11919_v11 = vcombine.low %v3192_v9, %v3196_v62 }
 0x4fa   :  { %9620 = vmatpush2.bf16.msra.mxu0 %v11831_v12  ;;  %9580 = vmatprep.subr.bf16.mxu1 %v11696_v30  ;;  %v3324_v43 = vld [vmem:[%s17896_s7 + $0x15b0] sm:$0xff] }
 0x4fb   :  { %9621 = vmatprep.subr.bf16.mxu0 %v11824_v37  ;;  %v3184_v3 = vld [vmem:[%s17896_s7 + $0x1150] sm:$0xff]  ;;  %v12048_v25 = vcombine.high %v3320_v44, %v3324_v43  ;;  %v12047_v0 = vcombine.low %v3320_v44, %v3324_v43 }
 0x4fc   :  { %v3188_v7 = vld [vmem:[%s17896_s7 + $0x1170] sm:$0xff] }
 0x4fd   :  { %9581 = vmatpush2.bf16.msra.mxu1 %v11695_v50  ;;  %v3312_v63 = vld [vmem:[%s17896_s7 + $0x1550] sm:$0xff]  ;;  %v11912_v33 = vcombine.high %v3184_v3, %v3188_v7 }
 0x4fe   :  { %9622 = vmatpush2.bf16.msra.mxu0 %v11823_v39  ;;  %9582 = vmatprep.subr.bf16.mxu1 %v11688_v28  ;;  %v3316_v12 = vld [vmem:[%s17896_s7 + $0x1570] sm:$0xff] }
 0x4ff   :  { %9623 = vmatprep.subr.bf16.mxu0 %v11816_v40  ;;  %v3176_v40 = vld [vmem:[%s17896_s7 + $0x1110] sm:$0xff] }
 0x500   :  { %v3180_v61 = vld [vmem:[%s17896_s7 + $0x1130] sm:$0xff] }
 0x501   :  { %9583 = vmatpush2.bf16.msra.mxu1 %v11687_v38  ;;  %v3304_v26 = vld [vmem:[%s17896_s7 + $0x1510] sm:$0xff]  ;;  %v11904_v24 = vcombine.high %v3176_v40, %v3180_v61 }
 0x502   :  { %9624 = vmatpush2.bf16.msra.mxu0 %v11815_v23  ;;  %9584 = vmatprep.subr.bf16.mxu1 %v11680_v49  ;;  %v11911_v23 = vcombine.low %v3184_v3, %v3188_v7  ;;  %v3168_v47 = vld [vmem:[%s17896_s7 + $0x10d0] sm:$0xff] }
 0x503   :  { %9625 = vmatprep.subr.bf16.mxu0 %v11808_v56  ;;  %v12039_v56 = vcombine.low %v3312_v63, %v3316_v12  ;;  %v3160_v44 = vld [vmem:[%s17896_s7 + $0x1090] sm:$0xff] }
 0x504   :  { %v3164_v43 = vld [vmem:[%s17896_s7 + $0x10b0] sm:$0xff] }
 0x505   :  { %9585 = vmatpush2.bf16.msra.mxu1 %v11679_v36  ;;  %v3172_v36 = vld [vmem:[%s17896_s7 + $0x10f0] sm:$0xff] }
 0x506   :  { %9626 = vmatpush2.bf16.msra.mxu0 %v11807_v1  ;;  %9636 = vmatprep.subr.bf16.mxu1 %v11928_v17  ;;  %v3296_v1 = vld [vmem:[%s17896_s7 + $0x14d0] sm:$0xff]  ;;  %v11896_v62 = vcombine.high %v3168_v47, %v3172_v36  ;;  %v11895_v3 = vcombine.low %v3168_v47, %v3172_v36 }
 0x507   :  { %9677 = vmatprep.subr.bf16.mxu0 %v12056_v8  ;;  %v3300_v17 = vld [vmem:[%s17896_s7 + $0x14f0] sm:$0xff]  ;;  %v11903_v8 = vcombine.low %v3176_v40, %v3180_v61 }
 0x508   :  { %v9342_v5 = vpop.f32.mrf.mxu1  ;;  %9587 = vmatmul.mubr.bf16.vlgmr.msra.gmra.mxu1 %v14505_v58  ;;  %v12023_v7 = vcombine.low %v3296_v1, %v3300_v17  ;;  %v3276_v40 = vld [vmem:[%s17896_s7 + $0x1430] sm:$0xff] }
 0x509   :  { %v9343_v30 = vadd.f32 %v9342_v5, %v16191_v60  ;;  %v9383_v37 = vpop.f32.mrf.mxu0  ;;  %9628 = vmatmul.mubr.bf16.vlgmr.msra.gmra.mxu0 %v14741_v59  ;;  %9637 = vmatpush1.bf16.msra.mxu1 %v11927_v32  ;;  %v12040_v60 = vcombine.high %v3312_v63, %v3316_v12  ;;  %v12024_v32 = vcombine.high %v3296_v1, %v3300_v17  ;;  %v3152_v63 = vld [vmem:[%s17896_s7 + $0x1050] sm:$0xff] }
 0x50a   :  { %9668 = vmatprep.mubr.bf16.mxu1 %v14744_v42  ;;  %9678 = vmatpush1.bf16.msra.mxu0 %v12055_v18  ;;  %v9344_v2 = vpop.f32.mrf.mxu1  ;;  %v3288_v18 = vld [vmem:[%s17896_s7 + $0x1490] sm:$0xff]  ;;  %v11888_v5 = vcombine.high %v3160_v44, %v3164_v43 }
 0x50b   :  { %v16393_v50 = vadd.f32 %v9383_v37, %v9343_v30  ;;  %9709 = vmatprep.mubr.bf16.mxu0 %v14755_v20  ;;  %v9345_v39 = vadd.f32 %v9344_v2, %v16207_v21  ;;  %v9385_v28 = vpop.f32.mrf.mxu0  ;;  %9638 = vmatprep.subr.bf16.mxu1 %v11920_v51  ;;  %v3308_v21 = vld [vmem:[%s17896_s7 + $0x1530] sm:$0xff] }
 0x50c   :  { %v9346_v52 = vpop.f32.mrf.mxu1  ;;  %9679 = vmatprep.subr.bf16.mxu0 %v12048_v25  ;;  %v12032_v27 = vcombine.high %v3304_v26, %v3308_v21  ;;  %v12031_v9 = vcombine.low %v3304_v26, %v3308_v21  ;;  %v3292_v51 = vld [vmem:[%s17896_s7 + $0x14b0] sm:$0xff] }
 0x50d   :  { %v16409_v54 = vadd.f32 %v9385_v28, %v9345_v39  ;;  %v9387_v38 = vpop.f32.mrf.mxu0  ;;  %9639 = vmatpush1.bf16.msra.mxu1 %v11919_v11  ;;  %v12016_v25 = vcombine.high %v3288_v18, %v3292_v51  ;;  %v3156_v12 = vld [vmem:[%s17896_s7 + $0x1070] sm:$0xff]  ;;  %v11887_v11 = vcombine.low %v3160_v44, %v3164_v43  ;;  %v12015_v2 = vcombine.low %v3288_v18, %v3292_v51 }
 0x50e   :  { %9680 = vmatpush1.bf16.msra.mxu0 %v12047_v0  ;;  %v9347_v49 = vpop.f32.mrf.mxu1  ;;  %9640 = vmatprep.subr.bf16.mxu1 %v11912_v33  ;;  %v3280_v30 = vld [vmem:[%s17896_s7 + $0x1450] sm:$0xff]  ;;  %v11880_v0 = vcombine.high %v3152_v63, %v3156_v12  ;;  %v11879_v61 = vcombine.low %v3152_v63, %v3156_v12 }
 0x50f   :  { %v9388_v16 = vpop.f32.mrf.mxu0  ;;  %9681 = vmatprep.subr.bf16.mxu0 %v12040_v60  ;;  %v3284_v37 = vld [vmem:[%s17896_s7 + $0x1470] sm:$0xff] }
 0x510   :  { %v12008_v33 = vcombine.high %v3280_v30, %v3284_v37  ;;  %v3144_v39 = vld [vmem:[%s17896_s7 + $0x1010] sm:$0xff]  ;;  %v12007_v52 = vcombine.low %v3280_v30, %v3284_v37 }
 0x511   :  { %9641 = vmatpush1.bf16.msra.mxu1 %v11911_v23  ;;  %v3148_v28 = vld [vmem:[%s17896_s7 + $0x1030] sm:$0xff] }
 0x512   :  { %9682 = vmatpush1.bf16.msra.mxu0 %v12039_v56  ;;  %9642 = vmatprep.subr.bf16.mxu1 %v11904_v24  ;;  %v3272_v60 = vld [vmem:[%s17896_s7 + $0x1410] sm:$0xff]  ;;  %v11872_v26 = vcombine.high %v3144_v39, %v3148_v28  ;;  %v11871_v24 = vcombine.low %v3144_v39, %v3148_v28 }
 0x513   :  { %9683 = vmatprep.subr.bf16.mxu0 %v12032_v27  ;;  %v12000_v21 = vcombine.high %v3272_v60, %v3276_v40  ;;  %v3264_v38 = vld [vmem:[%s17896_s7 + $0x13d0] sm:$0xff]  ;;  %v11999_v16 = vcombine.low %v3272_v60, %v3276_v40 }
 0x514   :  { %v3268_v23 = vld [vmem:[%s17896_s7 + $0x13f0] sm:$0xff] }
 0x515   :  { %9643 = vmatpush1.bf16.msra.mxu1 %v11903_v8  ;;  %v3392_v49 = vld [vmem:[%s17896_s7 + $0x17d0] sm:$0xff]  ;;  %v11992_v27 = vcombine.high %v3264_v38, %v3268_v23 }
 0x516   :  { %9684 = vmatpush1.bf16.msra.mxu0 %v12031_v9  ;;  %9644 = vmatprep.subr.bf16.mxu1 %v11896_v62  ;;  %v3396_v56 = vld [vmem:[%s17896_s7 + $0x17f0] sm:$0xff]  ;;  %v11991_v9 = vcombine.low %v3264_v38, %v3268_v23 }
 0x517   :  { %9685 = vmatprep.subr.bf16.mxu0 %v12024_v32  ;;  %v12120_v47 = vcombine.high %v3392_v49, %v3396_v56  ;;  %v3256_v36 = vld [vmem:[%s17896_s7 + $0x1390] sm:$0xff]  ;;  %v12119_v62 = vcombine.low %v3392_v49, %v3396_v56 }
 0x518   :  { %v3260_v1 = vld [vmem:[%s17896_s7 + $0x13b0] sm:$0xff] }
 0x519   :  { %9645 = vmatpush1.bf16.msra.mxu1 %v11895_v3  ;;  %v3384_v17 = vld [vmem:[%s17896_s7 + $0x1790] sm:$0xff]  ;;  %v11984_v32 = vcombine.high %v3256_v36, %v3260_v1 }
 0x51a   :  { %9686 = vmatpush1.bf16.msra.mxu0 %v12023_v7  ;;  %9646 = vmatprep.subr.bf16.mxu1 %v11888_v5  ;;  %v3388_v8 = vld [vmem:[%s17896_s7 + $0x17b0] sm:$0xff]  ;;  %v11983_v7 = vcombine.low %v3256_v36, %v3260_v1 }
 0x51b   :  { %9687 = vmatprep.subr.bf16.mxu0 %v12016_v25  ;;  %v12112_v44 = vcombine.high %v3384_v17, %v3388_v8  ;;  %v3248_v43 = vld [vmem:[%s17896_s7 + $0x1350] sm:$0xff]  ;;  %v12111_v5 = vcombine.low %v3384_v17, %v3388_v8 }
 0x51c   :  { %v3252_v18 = vld [vmem:[%s17896_s7 + $0x1370] sm:$0xff] }
 0x51d   :  { %9647 = vmatpush1.bf16.msra.mxu1 %v11887_v11  ;;  %v3376_v51 = vld [vmem:[%s17896_s7 + $0x1750] sm:$0xff]  ;;  %v11976_v25 = vcombine.high %v3248_v43, %v3252_v18 }
 0x51e   :  { %9688 = vmatpush1.bf16.msra.mxu0 %v12015_v2  ;;  %9648 = vmatprep.subr.bf16.mxu1 %v11880_v0  ;;  %v3380_v3 = vld [vmem:[%s17896_s7 + $0x1770] sm:$0xff]  ;;  %v11975_v2 = vcombine.low %v3248_v43, %v3252_v18 }
 0x51f   :  { %9689 = vmatprep.subr.bf16.mxu0 %v12008_v33  ;;  %v12104_v63 = vcombine.high %v3376_v51, %v3380_v3  ;;  %v3240_v12 = vld [vmem:[%s17896_s7 + $0x1310] sm:$0xff]  ;;  %v12103_v0 = vcombine.low %v3376_v51, %v3380_v3 }
 0x520   :  { %v3244_v30 = vld [vmem:[%s17896_s7 + $0x1330] sm:$0xff] }
 0x521   :  { %9649 = vmatpush1.bf16.msra.mxu1 %v11879_v61  ;;  %v3368_v37 = vld [vmem:[%s17896_s7 + $0x1710] sm:$0xff]  ;;  %v11968_v33 = vcombine.high %v3240_v12, %v3244_v30 }
 0x522   :  { %9690 = vmatpush1.bf16.msra.mxu0 %v12007_v52  ;;  %9650 = vmatprep.subr.bf16.mxu1 %v11872_v26  ;;  %v3372_v11 = vld [vmem:[%s17896_s7 + $0x1730] sm:$0xff]  ;;  %v11967_v52 = vcombine.low %v3240_v12, %v3244_v30 }
 0x523   :  { %9691 = vmatprep.subr.bf16.mxu0 %v12000_v21  ;;  %v12096_v39 = vcombine.high %v3368_v37, %v3372_v11  ;;  %v3232_v28 = vld [vmem:[%s17896_s7 + $0x12d0] sm:$0xff]  ;;  %v12095_v26 = vcombine.low %v3368_v37, %v3372_v11 }
 0x524   :  { %v3236_v60 = vld [vmem:[%s17896_s7 + $0x12f0] sm:$0xff] }
 0x525   :  { %9651 = vmatpush1.bf16.msra.mxu1 %v11871_v24  ;;  %v3360_v40 = vld [vmem:[%s17896_s7 + $0x16d0] sm:$0xff]  ;;  %v11960_v21 = vcombine.high %v3232_v28, %v3236_v60 }
 0x526   :  { %9692 = vmatpush1.bf16.msra.mxu0 %v11999_v16  ;;  %9652 = vmatprep.subr.bf16.mxu1 %v11992_v27  ;;  %v3364_v61 = vld [vmem:[%s17896_s7 + $0x16f0] sm:$0xff]  ;;  %v11959_v16 = vcombine.low %v3232_v28, %v3236_v60 }
 0x527   :  { %9693 = vmatprep.subr.bf16.mxu0 %v12120_v47  ;;  %v12088_v38 = vcombine.high %v3360_v40, %v3364_v61  ;;  %v3224_v23 = vld [vmem:[%s17896_s7 + $0x1290] sm:$0xff]  ;;  %v12087_v27 = vcombine.low %v3360_v40, %v3364_v61 }
 0x528   :  { %v3228_v49 = vld [vmem:[%s17896_s7 + $0x12b0] sm:$0xff] }
 0x529   :  { %9653 = vmatpush2.bf16.msra.mxu1 %v11991_v9  ;;  %v3352_v56 = vld [vmem:[%s17896_s7 + $0x1690] sm:$0xff]  ;;  %v11952_v47 = vcombine.high %v3224_v23, %v3228_v49 }
 0x52a   :  { %9694 = vmatpush2.bf16.msra.mxu0 %v12119_v62  ;;  %9654 = vmatprep.subr.bf16.mxu1 %v11984_v32  ;;  %v3356_v24 = vld [vmem:[%s17896_s7 + $0x16b0] sm:$0xff]  ;;  %v11951_v62 = vcombine.low %v3224_v23, %v3228_v49 }
 0x52b   :  { %9695 = vmatprep.subr.bf16.mxu0 %v12112_v44  ;;  %v12080_v36 = vcombine.high %v3352_v56, %v3356_v24  ;;  %v3216_v1 = vld [vmem:[%s17896_s7 + $0x1250] sm:$0xff]  ;;  %v12079_v32 = vcombine.low %v3352_v56, %v3356_v24 }
 0x52c   :  { %v3220_v17 = vld [vmem:[%s17896_s7 + $0x1270] sm:$0xff] }
 0x52d   :  { %9655 = vmatpush2.bf16.msra.mxu1 %v11983_v7  ;;  %v3344_v8 = vld [vmem:[%s17896_s7 + $0x1650] sm:$0xff]  ;;  %v11944_v44 = vcombine.high %v3216_v1, %v3220_v17 }
 0x52e   :  { %9696 = vmatpush2.bf16.msra.mxu0 %v12111_v5  ;;  %9656 = vmatprep.subr.bf16.mxu1 %v11976_v25  ;;  %v3348_v9 = vld [vmem:[%s17896_s7 + $0x1670] sm:$0xff]  ;;  %v11943_v5 = vcombine.low %v3216_v1, %v3220_v17 }
 0x52f   :  { %9697 = vmatprep.subr.bf16.mxu0 %v12104_v63  ;;  %v12072_v43 = vcombine.high %v3344_v8, %v3348_v9  ;;  %v3208_v18 = vld [vmem:[%s17896_s7 + $0x1210] sm:$0xff]  ;;  %v12071_v25 = vcombine.low %v3344_v8, %v3348_v9 }
 0x530   :  { %v3212_v51 = vld [vmem:[%s17896_s7 + $0x1230] sm:$0xff] }
 0x531   :  { %9657 = vmatpush2.bf16.msra.mxu1 %v11975_v2  ;;  %v3336_v3 = vld [vmem:[%s17896_s7 + $0x1610] sm:$0xff]  ;;  %v11936_v63 = vcombine.high %v3208_v18, %v3212_v51 }
 0x532   :  { %9698 = vmatpush2.bf16.msra.mxu0 %v12103_v0  ;;  %9658 = vmatprep.subr.bf16.mxu1 %v11968_v33  ;;  %v3340_v7 = vld [vmem:[%s17896_s7 + $0x1630] sm:$0xff]  ;;  %v11935_v0 = vcombine.low %v3208_v18, %v3212_v51 }
 0x533   :  { %9699 = vmatprep.subr.bf16.mxu0 %v12096_v39  ;;  %v12064_v12 = vcombine.high %v3336_v3, %v3340_v7  ;;  %v3456_v30 = vld [vmem:[%s17896_s7 + $0x19d0] sm:$0xff]  ;;  %v12063_v33 = vcombine.low %v3336_v3, %v3340_v7 }
 0x534   :  { %v3460_v37 = vld [vmem:[%s17896_s7 + $0x19f0] sm:$0xff] }
 0x535   :  { %9659 = vmatpush2.bf16.msra.mxu1 %v11967_v52  ;;  %v3584_v11 = vld [vmem:[%s17896_s7 + $0x1dd0] sm:$0xff]  ;;  %v12184_v39 = vcombine.high %v3456_v30, %v3460_v37  ;;  %v12183_v61 = vcombine.low %v3456_v30, %v3460_v37 }
 0x536   :  { %9700 = vmatpush2.bf16.msra.mxu0 %v12095_v26  ;;  %9660 = vmatprep.subr.bf16.mxu1 %v11960_v21  ;;  %v3588_v2 = vld [vmem:[%s17896_s7 + $0x1df0] sm:$0xff] }
 0x537   :  { %9701 = vmatprep.subr.bf16.mxu0 %v12088_v38  ;;  %v12312_v28 = vcombine.high %v3584_v11, %v3588_v2  ;;  %v3448_v60 = vld [vmem:[%s17896_s7 + $0x1990] sm:$0xff]  ;;  %v12311_v21 = vcombine.low %v3584_v11, %v3588_v2 }
 0x538   :  { %v3452_v40 = vld [vmem:[%s17896_s7 + $0x19b0] sm:$0xff] }
 0x539   :  { %9661 = vmatpush2.bf16.msra.mxu1 %v11959_v16  ;;  %v3576_v52 = vld [vmem:[%s17896_s7 + $0x1d90] sm:$0xff]  ;;  %v12176_v38 = vcombine.high %v3448_v60, %v3452_v40  ;;  %v12175_v1 = vcombine.low %v3448_v60, %v3452_v40 }
 0x53a   :  { %9702 = vmatpush2.bf16.msra.mxu0 %v12087_v27  ;;  %9662 = vmatprep.subr.bf16.mxu1 %v11952_v47  ;;  %v3580_v26 = vld [vmem:[%s17896_s7 + $0x1db0] sm:$0xff] }
 0x53b   :  { %9703 = vmatprep.subr.bf16.mxu0 %v12080_v36  ;;  %v3440_v23 = vld [vmem:[%s17896_s7 + $0x1950] sm:$0xff]  ;;  %v12304_v24 = vcombine.high %v3576_v52, %v3580_v26  ;;  %v12303_v8 = vcombine.low %v3576_v52, %v3580_v26 }
 0x53c   :  { %v3444_v49 = vld [vmem:[%s17896_s7 + $0x1970] sm:$0xff] }
 0x53d   :  { %9663 = vmatpush2.bf16.msra.mxu1 %v11951_v62  ;;  %v3568_v16 = vld [vmem:[%s17896_s7 + $0x1d50] sm:$0xff]  ;;  %v12168_v9 = vcombine.high %v3440_v23, %v3444_v49 }
 0x53e   :  { %9704 = vmatpush2.bf16.msra.mxu0 %v12079_v32  ;;  %9664 = vmatprep.subr.bf16.mxu1 %v11944_v44  ;;  %v3572_v27 = vld [vmem:[%s17896_s7 + $0x1d70] sm:$0xff] }
 0x53f   :  { %9705 = vmatprep.subr.bf16.mxu0 %v12072_v43  ;;  %v3432_v43 = vld [vmem:[%s17896_s7 + $0x1910] sm:$0xff] }
 0x540   :  { %v3436_v18 = vld [vmem:[%s17896_s7 + $0x1930] sm:$0xff] }
 0x541   :  { %9665 = vmatpush2.bf16.msra.mxu1 %v11943_v5  ;;  %v3560_v3 = vld [vmem:[%s17896_s7 + $0x1d10] sm:$0xff]  ;;  %v12160_v30 = vcombine.high %v3432_v43, %v3436_v18 }
 0x542   :  { %9706 = vmatpush2.bf16.msra.mxu0 %v12071_v25  ;;  %9666 = vmatprep.subr.bf16.mxu1 %v11936_v63  ;;  %v12167_v25 = vcombine.low %v3440_v23, %v3444_v49  ;;  %v3424_v2 = vld [vmem:[%s17896_s7 + $0x18d0] sm:$0xff] }
 0x543   :  { %9707 = vmatprep.subr.bf16.mxu0 %v12064_v12  ;;  %v12295_v12 = vcombine.low %v3568_v16, %v3572_v27  ;;  %v3416_v52 = vld [vmem:[%s17896_s7 + $0x1890] sm:$0xff] }
 0x544   :  { %v3420_v26 = vld [vmem:[%s17896_s7 + $0x18b0] sm:$0xff] }
 0x545   :  { %9667 = vmatpush2.bf16.msra.mxu1 %v11935_v0  ;;  %v3428_v0 = vld [vmem:[%s17896_s7 + $0x18f0] sm:$0xff] }
 0x546   :  { %9708 = vmatpush2.bf16.msra.mxu0 %v12063_v33  ;;  %9718 = vmatprep.subr.bf16.mxu1 %v12184_v39  ;;  %v3552_v33 = vld [vmem:[%s17896_s7 + $0x1cd0] sm:$0xff]  ;;  %v12152_v40 = vcombine.high %v3424_v2, %v3428_v0  ;;  %v12151_v23 = vcombine.low %v3424_v2, %v3428_v0 }
 0x547   :  { %9759 = vmatprep.subr.bf16.mxu0 %v12312_v28  ;;  %v3556_v39 = vld [vmem:[%s17896_s7 + $0x1cf0] sm:$0xff]  ;;  %v12159_v28 = vcombine.low %v3432_v43, %v3436_v18 }
 0x548   :  { %v9424_v56 = vpop.f32.mrf.mxu1  ;;  %9669 = vmatmul.mubr.bf16.vlgmr.msra.gmra.mxu1 %v14501_v19  ;;  %v12279_v49 = vcombine.low %v3552_v33, %v3556_v39  ;;  %v3532_v43 = vld [vmem:[%s17896_s7 + $0x1c30] sm:$0xff] }
 0x549   :  { %v9425_v47 = vadd.f32 %v9424_v56, %v16393_v50  ;;  %v9465_v36 = vpop.f32.mrf.mxu0  ;;  %9710 = vmatmul.mubr.bf16.vlgmr.msra.gmra.mxu0 %v14946_v35  ;;  %9719 = vmatpush1.bf16.msra.mxu1 %v12183_v61  ;;  %v12296_v50 = vcombine.high %v3568_v16, %v3572_v27  ;;  %v12280_v61 = vcombine.high %v3552_v33, %v3556_v39  ;;  %v3408_v16 = vld [vmem:[%s17896_s7 + $0x1850] sm:$0xff] }
 0x54a   :  { %9750 = vmatprep.mubr.bf16.mxu1 %v14956_v6  ;;  %9760 = vmatpush1.bf16.msra.mxu0 %v12311_v21  ;;  %v9426_v17 = vpop.f32.mrf.mxu1  ;;  %v3544_v21 = vld [vmem:[%s17896_s7 + $0x1c90] sm:$0xff]  ;;  %v12144_v56 = vcombine.high %v3416_v52, %v3420_v26 }
 0x54b   :  { %v16595_v62 = vadd.f32 %v9465_v36, %v9425_v47  ;;  %9791 = vmatprep.mubr.bf16.mxu0 %v14966_v15  ;;  %v9427_v32 = vadd.f32 %v9426_v17, %v16409_v54  ;;  %v9467_v44 = vpop.f32.mrf.mxu0  ;;  %9720 = vmatprep.subr.bf16.mxu1 %v12176_v38  ;;  %v3564_v54 = vld [vmem:[%s17896_s7 + $0x1d30] sm:$0xff] }
 0x54c   :  { %v9428_v51 = vpop.f32.mrf.mxu1  ;;  %9761 = vmatprep.subr.bf16.mxu0 %v12304_v24  ;;  %v12288_v11 = vcombine.high %v3560_v3, %v3564_v54  ;;  %v12287_v60 = vcombine.low %v3560_v3, %v3564_v54  ;;  %v3548_v38 = vld [vmem:[%s17896_s7 + $0x1cb0] sm:$0xff] }
 0x54d   :  { %v16611_v7 = vadd.f32 %v9467_v44, %v9427_v32  ;;  %v9469_v5 = vpop.f32.mrf.mxu0  ;;  %9721 = vmatpush1.bf16.msra.mxu1 %v12175_v1  ;;  %v12272_v24 = vcombine.high %v3544_v21, %v3548_v38  ;;  %v3412_v27 = vld [vmem:[%s17896_s7 + $0x1870] sm:$0xff]  ;;  %v12143_v1 = vcombine.low %v3416_v52, %v3420_v26  ;;  %v12271_v17 = vcombine.low %v3544_v21, %v3548_v38 }
 0x54e   :  { %9762 = vmatpush1.bf16.msra.mxu0 %v12303_v8  ;;  %v9429_v63 = vpop.f32.mrf.mxu1  ;;  %9722 = vmatprep.subr.bf16.mxu1 %v12168_v9  ;;  %v3536_v47 = vld [vmem:[%s17896_s7 + $0x1c50] sm:$0xff]  ;;  %v12136_v8 = vcombine.high %v3408_v16, %v3412_v27  ;;  %v12135_v18 = vcombine.low %v3408_v16, %v3412_v27 }
 0x54f   :  { %v9470_v37 = vpop.f32.mrf.mxu0  ;;  %9763 = vmatprep.subr.bf16.mxu0 %v12296_v50  ;;  %v3540_v36 = vld [vmem:[%s17896_s7 + $0x1c70] sm:$0xff] }
 0x550   :  { %v12264_v9 = vcombine.high %v3536_v47, %v3540_v36  ;;  %v3400_v32 = vld [vmem:[%s17896_s7 + $0x1810] sm:$0xff]  ;;  %v12263_v51 = vcombine.low %v3536_v47, %v3540_v36 }
 0x551   :  { %9723 = vmatpush1.bf16.msra.mxu1 %v12167_v25  ;;  %v3404_v44 = vld [vmem:[%s17896_s7 + $0x1830] sm:$0xff] }
 0x552   :  { %9764 = vmatpush1.bf16.msra.mxu0 %v12295_v12  ;;  %9724 = vmatprep.subr.bf16.mxu1 %v12160_v30  ;;  %v3528_v50 = vld [vmem:[%s17896_s7 + $0x1c10] sm:$0xff]  ;;  %v12128_v3 = vcombine.high %v3400_v32, %v3404_v44  ;;  %v12127_v30 = vcombine.low %v3400_v32, %v3404_v44 }
 0x553   :  { %9765 = vmatprep.subr.bf16.mxu0 %v12288_v11  ;;  %v12256_v54 = vcombine.high %v3528_v50, %v3532_v43  ;;  %v3520_v5 = vld [vmem:[%s17896_s7 + $0x1bd0] sm:$0xff]  ;;  %v12255_v37 = vcombine.low %v3528_v50, %v3532_v43 }
 0x554   :  { %v3524_v25 = vld [vmem:[%s17896_s7 + $0x1bf0] sm:$0xff] }
 0x555   :  { %9725 = vmatpush1.bf16.msra.mxu1 %v12159_v28  ;;  %v3648_v63 = vld [vmem:[%s17896_s7 + $0x1fd0] sm:$0xff]  ;;  %v12248_v11 = vcombine.high %v3520_v5, %v3524_v25 }
 0x556   :  { %9766 = vmatpush1.bf16.msra.mxu0 %v12287_v60  ;;  %9726 = vmatprep.subr.bf16.mxu1 %v12152_v40  ;;  %v3652_v12 = vld [vmem:[%s17896_s7 + $0x1ff0] sm:$0xff]  ;;  %v12247_v60 = vcombine.low %v3520_v5, %v3524_v25 }
 0x557   :  { %9767 = vmatprep.subr.bf16.mxu0 %v12280_v61  ;;  %v12376_v2 = vcombine.high %v3648_v63, %v3652_v12  ;;  %v3512_v0 = vld [vmem:[%s17896_s7 + $0x1b90] sm:$0xff]  ;;  %v12375_v40 = vcombine.low %v3648_v63, %v3652_v12 }
 0x558   :  { %v3516_v33 = vld [vmem:[%s17896_s7 + $0x1bb0] sm:$0xff] }
 0x559   :  { %9727 = vmatpush1.bf16.msra.mxu1 %v12151_v23  ;;  %v3640_v39 = vld [vmem:[%s17896_s7 + $0x1f90] sm:$0xff]  ;;  %v12240_v61 = vcombine.high %v3512_v0, %v3516_v33 }
 0x55a   :  { %9768 = vmatpush1.bf16.msra.mxu0 %v12279_v49  ;;  %9728 = vmatprep.subr.bf16.mxu1 %v12144_v56  ;;  %v3644_v28 = vld [vmem:[%s17896_s7 + $0x1fb0] sm:$0xff]  ;;  %v12239_v49 = vcombine.low %v3512_v0, %v3516_v33 }
 0x55b   :  { %9769 = vmatprep.subr.bf16.mxu0 %v12272_v24  ;;  %v12368_v52 = vcombine.high %v3640_v39, %v3644_v28  ;;  %v3504_v26 = vld [vmem:[%s17896_s7 + $0x1b50] sm:$0xff]  ;;  %v12367_v56 = vcombine.low %v3640_v39, %v3644_v28 }
 0x55c   :  { %v3508_v21 = vld [vmem:[%s17896_s7 + $0x1b70] sm:$0xff] }
 0x55d   :  { %9729 = vmatpush1.bf16.msra.mxu1 %v12143_v1  ;;  %v3632_v38 = vld [vmem:[%s17896_s7 + $0x1f50] sm:$0xff]  ;;  %v12232_v24 = vcombine.high %v3504_v26, %v3508_v21 }
 0x55e   :  { %9770 = vmatpush1.bf16.msra.mxu0 %v12271_v17  ;;  %9730 = vmatprep.subr.bf16.mxu1 %v12136_v8  ;;  %v3636_v23 = vld [vmem:[%s17896_s7 + $0x1f70] sm:$0xff]  ;;  %v12231_v17 = vcombine.low %v3504_v26, %v3508_v21 }
 0x55f   :  { %9771 = vmatprep.subr.bf16.mxu0 %v12264_v9  ;;  %v12360_v16 = vcombine.high %v3632_v38, %v3636_v23  ;;  %v3496_v27 = vld [vmem:[%s17896_s7 + $0x1b10] sm:$0xff]  ;;  %v12359_v8 = vcombine.low %v3632_v38, %v3636_v23 }
 0x560   :  { %v3500_v47 = vld [vmem:[%s17896_s7 + $0x1b30] sm:$0xff] }
 0x561   :  { %9731 = vmatpush1.bf16.msra.mxu1 %v12135_v18  ;;  %v3624_v36 = vld [vmem:[%s17896_s7 + $0x1f10] sm:$0xff]  ;;  %v12224_v9 = vcombine.high %v3496_v27, %v3500_v47 }
 0x562   :  { %9772 = vmatpush1.bf16.msra.mxu0 %v12263_v51  ;;  %9732 = vmatprep.subr.bf16.mxu1 %v12128_v3  ;;  %v3628_v1 = vld [vmem:[%s17896_s7 + $0x1f30] sm:$0xff]  ;;  %v12223_v51 = vcombine.low %v3496_v27, %v3500_v47  ;;  %v2689_v47 = vld [vmem:[%s17896_s7 + $0x1d8] sm:$0xff] }
 0x563   :  { %9773 = vmatprep.subr.bf16.mxu0 %v12256_v54  ;;  %v12352_v32 = vcombine.high %v3624_v36, %v3628_v1  ;;  %v3488_v44 = vld [vmem:[%s17896_s7 + $0x1ad0] sm:$0xff]  ;;  %v12351_v3 = vcombine.low %v3624_v36, %v3628_v1  ;;  %v2693_v36 = vld [vmem:[%s17896_s7 + $0x1f8] sm:$0xff] }
 0x564   :  { %v3492_v50 = vld [vmem:[%s17896_s7 + $0x1af0] sm:$0xff]  ;;  %v2817_v1 = vld [vmem:[%s17896_s7 + $0x5d8] sm:$0xff] }
 0x565   :  { %9733 = vmatpush1.bf16.msra.mxu1 %v12127_v30  ;;  %v3616_v43 = vld [vmem:[%s17896_s7 + $0x1ed0] sm:$0xff]  ;;  %v12216_v54 = vcombine.high %v3488_v44, %v3492_v50 }
 0x566   :  { %9774 = vmatpush1.bf16.msra.mxu0 %v12255_v37  ;;  %9734 = vmatprep.subr.bf16.mxu1 %v12248_v11  ;;  %v3620_v18 = vld [vmem:[%s17896_s7 + $0x1ef0] sm:$0xff]  ;;  %v12215_v37 = vcombine.low %v3488_v44, %v3492_v50  ;;  %v11418_v44 = vcombine.high %v2689_v47, %v2693_v36 }
 0x567   :  { %9775 = vmatprep.subr.bf16.mxu0 %v12376_v2  ;;  %v12344_v5 = vcombine.high %v3616_v43, %v3620_v18  ;;  %v3480_v25 = vld [vmem:[%s17896_s7 + $0x1a90] sm:$0xff]  ;;  %v12343_v11 = vcombine.low %v3616_v43, %v3620_v18  ;;  %v16773_v43 = vsub.s32 5, %v17948_v57  ;;  %v2681_v18 = vld [vmem:[%s17896_s7 + $0x198] sm:$0xff] }
 0x568   :  { %v3484_v63 = vld [vmem:[%s17896_s7 + $0x1ab0] sm:$0xff] }
 0x569   :  { %9735 = vmatpush2.bf16.msra.mxu1 %v12247_v60  ;;  %v3608_v12 = vld [vmem:[%s17896_s7 + $0x1e90] sm:$0xff]  ;;  %v12208_v2 = vcombine.high %v3480_v25, %v3484_v63 }
 0x56a   :  { %9776 = vmatpush2.bf16.msra.mxu0 %v12375_v40  ;;  %9736 = vmatprep.subr.bf16.mxu1 %v12240_v61  ;;  %v3612_v30 = vld [vmem:[%s17896_s7 + $0x1eb0] sm:$0xff]  ;;  %v12207_v40 = vcombine.low %v3480_v25, %v3484_v63  ;;  %v2809_v25 = vld [vmem:[%s17896_s7 + $0x598] sm:$0xff] }
 0x56b   :  { %9777 = vmatprep.subr.bf16.mxu0 %v12368_v52  ;;  %v12336_v0 = vcombine.high %v3608_v12, %v3612_v30  ;;  %v3472_v33 = vld [vmem:[%s17896_s7 + $0x1a50] sm:$0xff]  ;;  %v12335_v61 = vcombine.low %v3608_v12, %v3612_v30  ;;  %v2813_v63 = vld [vmem:[%s17896_s7 + $0x5b8] sm:$0xff] }
 0x56c   :  { %v3476_v39 = vld [vmem:[%s17896_s7 + $0x1a70] sm:$0xff] }
 0x56d   :  { %9737 = vmatpush2.bf16.msra.mxu1 %v12239_v49  ;;  %v3600_v28 = vld [vmem:[%s17896_s7 + $0x1e50] sm:$0xff]  ;;  %v12200_v52 = vcombine.high %v3472_v33, %v3476_v39 }
 0x56e   :  { %9778 = vmatpush2.bf16.msra.mxu0 %v12367_v56  ;;  %9738 = vmatprep.subr.bf16.mxu1 %v12232_v24  ;;  %v3604_v60 = vld [vmem:[%s17896_s7 + $0x1e70] sm:$0xff]  ;;  %v12199_v56 = vcombine.low %v3472_v33, %v3476_v39  ;;  %v11538_v33 = vcombine.high %v2809_v25, %v2813_v63  ;;  %v2801_v39 = vld [vmem:[%s17896_s7 + $0x558] sm:$0xff] }
 0x56f   :  { %9779 = vmatprep.subr.bf16.mxu0 %v12360_v16  ;;  %v12328_v26 = vcombine.high %v3600_v28, %v3604_v60  ;;  %v3464_v21 = vld [vmem:[%s17896_s7 + $0x1a10] sm:$0xff]  ;;  %v12327_v24 = vcombine.low %v3600_v28, %v3604_v60  ;;  %v2805_v28 = vld [vmem:[%s17896_s7 + $0x578] sm:$0xff] }
 0x570   :  { %v3468_v38 = vld [vmem:[%s17896_s7 + $0x1a30] sm:$0xff] }
 0x571   :  { %9739 = vmatpush2.bf16.msra.mxu1 %v12231_v17  ;;  %v3592_v23 = vld [vmem:[%s17896_s7 + $0x1e10] sm:$0xff]  ;;  %v12192_v16 = vcombine.high %v3464_v21, %v3468_v38  ;;  %v2821_v17 = vld [vmem:[%s17896_s7 + $0x5f8] sm:$0xff] }
 0x572   :  { %9780 = vmatpush2.bf16.msra.mxu0 %v12359_v8  ;;  %9740 = vmatprep.subr.bf16.mxu1 %v12224_v9  ;;  %v3596_v49 = vld [vmem:[%s17896_s7 + $0x1e30] sm:$0xff]  ;;  %v12191_v8 = vcombine.low %v3464_v21, %v3468_v38  ;;  %v16770_v9 = vsub.s32 4, %v17948_v57  ;;  %v11546_v50 = vcombine.high %v2817_v1, %v2821_v17  ;;  %v11545_v12 = vcombine.low %v2817_v1, %v2821_v17 }
 0x573   :  { %9781 = vmatprep.subr.bf16.mxu0 %v12352_v32  ;;  %v12320_v27 = vcombine.high %v3592_v23, %v3596_v49  ;;  %v12319_v32 = vcombine.low %v3592_v23, %v3596_v49 }
 0x575   :  { %9741 = vmatpush2.bf16.msra.mxu1 %v12223_v51  ;;  %v2685_v51 = vld [vmem:[%s17896_s7 + $0x1b8] sm:$0xff] }
 0x576   :  { %9782 = vmatpush2.bf16.msra.mxu0 %v12351_v3  ;;  %9742 = vmatprep.subr.bf16.mxu1 %v12216_v54  ;;  %v13206_v3 = vld [vmem:[%s17899_s8] sm:$0xff] }
 0x577   :  { %9783 = vmatprep.subr.bf16.mxu0 %v12344_v5  ;;  %v3675_v54 = vrot.slane %v13206_v3, %v16770_v9  ;;  %v11417_v5 = vcombine.low %v2689_v47, %v2693_v36  ;;  %v3679_v30 = vrot.slane %v13206_v3, %v16773_v43  ;;  %v2785_v3 = vld [vmem:[%s17896_s7 + $0x4d8] sm:$0xff] }
 0x579   :  { %9743 = vmatpush2.bf16.msra.mxu1 %v12215_v37  ;;  %v11410_v37 = vcombine.high %v2681_v18, %v2685_v51 }
 0x57a   :  { %9784 = vmatpush2.bf16.msra.mxu0 %v12343_v11  ;;  %9744 = vmatprep.subr.bf16.mxu1 %v12208_v2  ;;  %v2673_v11 = vld [vmem:[%s17896_s7 + $0x158] sm:$0xff] }
 0x57b   :  { %9785 = vmatprep.subr.bf16.mxu0 %v12336_v0  ;;  %v2677_v2 = vld [vmem:[%s17896_s7 + $0x178] sm:$0xff] }
 0x57c   :  { %v11402_v21 = vcombine.high %v2673_v11, %v2677_v2  ;;  %v11401_v1 = vcombine.low %v2673_v11, %v2677_v2  ;;  %v2777_v11 = vld [vmem:[%s17896_s7 + $0x498] sm:$0xff] }
 0x57d   :  { %9745 = vmatpush2.bf16.msra.mxu1 %v12207_v40  ;;  %v2781_v2 = vld [vmem:[%s17896_s7 + $0x4b8] sm:$0xff] }
 0x57e   :  { %9786 = vmatpush2.bf16.msra.mxu0 %v12335_v61  ;;  %9746 = vmatprep.subr.bf16.mxu1 %v12200_v52  ;;  %v11409_v61 = vcombine.low %v2681_v18, %v2685_v51  ;;  %v2657_v18 = vld [vmem:[%s17896_s7 + $0xd8] sm:$0xff] }
 0x57f   :  { %9787 = vmatprep.subr.bf16.mxu0 %v12328_v26  ;;  %v11537_v26 = vcombine.low %v2809_v25, %v2813_v63  ;;  %v2661_v51 = vld [vmem:[%s17896_s7 + $0xf8] sm:$0xff] }
 0x580   :  { %v11386_v63 = vcombine.high %v2657_v18, %v2661_v51 }
 0x581   :  { %9747 = vmatpush2.bf16.msra.mxu1 %v12199_v56  ;;  %v11530_v56 = vcombine.high %v2801_v39, %v2805_v28 }
 0x582   :  { %9788 = vmatpush2.bf16.msra.mxu0 %v12327_v24  ;;  %9748 = vmatprep.subr.bf16.mxu1 %v12192_v16  ;;  %v2665_v24 = vld [vmem:[%s17896_s7 + $0x118] sm:$0xff] }
 0x583   :  { %9789 = vmatprep.subr.bf16.mxu0 %v12320_v27  ;;  %v2793_v27 = vld [vmem:[%s17896_s7 + $0x518] sm:$0xff] }
 0x585   :  { %9749 = vmatpush2.bf16.msra.mxu1 %v12191_v8  ;;  %v11529_v8 = vcombine.low %v2801_v39, %v2805_v28  ;;  %v11506_v28 = vcombine.high %v2777_v11, %v2781_v2 }
 0x586   :  { %9790 = vmatpush2.bf16.msra.mxu0 %v12319_v32  ;;  %9800 = vmatprep.subr.bf16.mxu1 %v11418_v44 }
 0x587   :  { %9841 = vmatprep.subr.bf16.mxu0 %v11546_v50 }
 0x588   :  { %v9506_v0 = vpop.f32.mrf.mxu1  ;;  %9751 = vmatmul.mubr.bf16.vlgmr.msra.gmra.mxu1 %v14510_v34 }
 0x589   :  { %v9507_v60 = vadd.f32 %v9506_v0, %v3675_v54  ;;  %v9547_v40 = vpop.f32.mrf.mxu0  ;;  %9792 = vmatmul.mubr.bf16.vlgmr.msra.gmra.mxu0 %v15155_v13  ;;  %9801 = vmatpush1.bf16.msra.mxu1 %v11417_v5  ;;  %v2789_v54 = vld [vmem:[%s17896_s7 + $0x4f8] sm:$0xff]  ;;  %v11385_v0 = vcombine.low %v2657_v18, %v2661_v51 }
 0x58a   :  { %9832 = vmatprep.mubr.bf16.mxu1 %v14522_v55  ;;  %9842 = vmatpush1.bf16.msra.mxu0 %v11545_v12  ;;  %v9508_v52 = vpop.f32.mrf.mxu1  ;;  %v2669_v55 = vld [vmem:[%s17896_s7 + $0x138] sm:$0xff]  ;;  %v11514_v12 = vcombine.high %v2785_v3, %v2789_v54 }
 0x58b   :  { %v16807_v38 = vadd.f32 %v9547_v40, %v9507_v60  ;;  %9873 = vmatprep.mubr.bf16.mxu0 %v14525_v10  ;;  %v9509_v23 = vadd.f32 %v9508_v52, %v3679_v30  ;;  %v9549_v49 = vpop.f32.mrf.mxu0  ;;  %9802 = vmatprep.subr.bf16.mxu1 %v11410_v37  ;;  %v2797_v10 = vld [vmem:[%s17896_s7 + $0x538] sm:$0xff]  ;;  %v11394_v32 = vcombine.high %v2665_v24, %v2669_v55 }
 0x58c   :  { %v9510_v16 = vpop.f32.mrf.mxu1  ;;  %9843 = vmatprep.subr.bf16.mxu0 %v11538_v33  ;;  %v11522_v50 = vcombine.high %v2793_v27, %v2797_v10  ;;  %v11393_v5 = vcombine.low %v2665_v24, %v2669_v55  ;;  %v11521_v25 = vcombine.low %v2793_v27, %v2797_v10  ;;  %v2649_v30 = vld [vmem:[%s17896_s7 + $0x98] sm:$0xff]  ;;  %v11513_v33 = vcombine.low %v2785_v3, %v2789_v54 }
 0x58d   :  { %v16822_v47 = vadd.f32 %v9549_v49, %v9509_v23  ;;  %v9551_v36 = vpop.f32.mrf.mxu0  ;;  %9803 = vmatpush1.bf16.msra.mxu1 %v11409_v61  ;;  %v2653_v37 = vld [vmem:[%s17896_s7 + $0xb8] sm:$0xff] }
 0x58e   :  { %9844 = vmatpush1.bf16.msra.mxu0 %v11537_v26  ;;  %v9511_v17 = vpop.f32.mrf.mxu1  ;;  %9804 = vmatprep.subr.bf16.mxu1 %v11402_v21  ;;  %v11378_v39 = vcombine.high %v2649_v30, %v2653_v37  ;;  %v2641_v60 = vld [vmem:[%s17896_s7 + $0x58] sm:$0xff]  ;;  %v11377_v26 = vcombine.low %v2649_v30, %v2653_v37  ;;  %v11505_v21 = vcombine.low %v2777_v11, %v2781_v2 }
 0x58f   :  { %v9552_v44 = vpop.f32.mrf.mxu0  ;;  %9845 = vmatprep.subr.bf16.mxu0 %v11530_v56  ;;  %v2645_v40 = vld [vmem:[%s17896_s7 + $0x78] sm:$0xff] }
 0x590   :  { %v2769_v61 = vld [vmem:[%s17896_s7 + $0x458] sm:$0xff]  ;;  %v11370_v23 = vcombine.high %v2641_v60, %v2645_v40  ;;  %v11369_v27 = vcombine.low %v2641_v60, %v2645_v40 }
 0x591   :  { %9805 = vmatpush1.bf16.msra.mxu1 %v11401_v1  ;;  %v2773_v52 = vld [vmem:[%s17896_s7 + $0x478] sm:$0xff] }
 0x592   :  { %9846 = vmatpush1.bf16.msra.mxu0 %v11529_v8  ;;  %9806 = vmatprep.subr.bf16.mxu1 %v11394_v32  ;;  %v11498_v49 = vcombine.high %v2769_v61, %v2773_v52  ;;  %v2633_v56 = vld [vmem:[%s17896_s7 + $0x18] sm:$0xff]  ;;  %v11497_v10 = vcombine.low %v2769_v61, %v2773_v52 }
 0x593   :  { %9847 = vmatprep.subr.bf16.mxu0 %v11522_v50  ;;  %v2637_v24 = vld [vmem:[%s17896_s7 + $0x38] sm:$0xff] }
 0x594   :  { %v2761_v55 = vld [vmem:[%s17896_s7 + $0x418] sm:$0xff]  ;;  %v11362_v36 = vcombine.high %v2633_v56, %v2637_v24  ;;  %v11361_v50 = vcombine.low %v2633_v56, %v2637_v24 }
 0x595   :  { %9807 = vmatpush1.bf16.msra.mxu1 %v11393_v5  ;;  %v2765_v16 = vld [vmem:[%s17896_s7 + $0x438] sm:$0xff] }
 0x596   :  { %9848 = vmatpush1.bf16.msra.mxu0 %v11521_v25  ;;  %9808 = vmatprep.subr.bf16.mxu1 %v11386_v63  ;;  %v11490_v1 = vcombine.high %v2761_v55, %v2765_v16  ;;  %v2753_v17 = vld [vmem:[%s17896_s7 + $0x3d8] sm:$0xff]  ;;  %v11489_v18 = vcombine.low %v2761_v55, %v2765_v16 }
 0x597   :  { %9849 = vmatprep.subr.bf16.mxu0 %v11514_v12  ;;  %v2757_v8 = vld [vmem:[%s17896_s7 + $0x3f8] sm:$0xff] }
 0x598   :  { %v2881_v32 = vld [vmem:[%s17896_s7 + $0x7d8] sm:$0xff]  ;;  %v11482_v51 = vcombine.high %v2753_v17, %v2757_v8  ;;  %v11481_v12 = vcombine.low %v2753_v17, %v2757_v8 }
 0x599   :  { %9809 = vmatpush1.bf16.msra.mxu1 %v11385_v0  ;;  %v2885_v44 = vld [vmem:[%s17896_s7 + $0x7f8] sm:$0xff] }
 0x59a   :  { %9850 = vmatpush1.bf16.msra.mxu0 %v11513_v33  ;;  %9810 = vmatprep.subr.bf16.mxu1 %v11378_v39  ;;  %v11610_v3 = vcombine.high %v2881_v32, %v2885_v44  ;;  %v2745_v54 = vld [vmem:[%s17896_s7 + $0x398] sm:$0xff]  ;;  %v11609_v30 = vcombine.low %v2881_v32, %v2885_v44 }
 0x59b   :  { %9851 = vmatprep.subr.bf16.mxu0 %v11506_v28  ;;  %v2749_v5 = vld [vmem:[%s17896_s7 + $0x3b8] sm:$0xff] }
 0x59c   :  { %v2873_v25 = vld [vmem:[%s17896_s7 + $0x798] sm:$0xff]  ;;  %v11474_v37 = vcombine.high %v2745_v54, %v2749_v5  ;;  %v11473_v28 = vcombine.low %v2745_v54, %v2749_v5 }
 0x59d   :  { %9811 = vmatpush1.bf16.msra.mxu1 %v11377_v26  ;;  %v2877_v63 = vld [vmem:[%s17896_s7 + $0x7b8] sm:$0xff] }
 0x59e   :  { %9852 = vmatpush1.bf16.msra.mxu0 %v11505_v21  ;;  %9812 = vmatprep.subr.bf16.mxu1 %v11370_v23  ;;  %v11602_v11 = vcombine.high %v2873_v25, %v2877_v63  ;;  %v2737_v2 = vld [vmem:[%s17896_s7 + $0x358] sm:$0xff]  ;;  %v11601_v60 = vcombine.low %v2873_v25, %v2877_v63 }
 0x59f   :  { %9853 = vmatprep.subr.bf16.mxu0 %v11498_v49  ;;  %v2741_v0 = vld [vmem:[%s17896_s7 + $0x378] sm:$0xff] }
 0x5a0   :  { %v2865_v33 = vld [vmem:[%s17896_s7 + $0x758] sm:$0xff]  ;;  %v11466_v40 = vcombine.high %v2737_v2, %v2741_v0  ;;  %v11465_v49 = vcombine.low %v2737_v2, %v2741_v0 }
 0x5a1   :  { %9813 = vmatpush1.bf16.msra.mxu1 %v11369_v27  ;;  %v2869_v39 = vld [vmem:[%s17896_s7 + $0x778] sm:$0xff] }
 0x5a2   :  { %9854 = vmatpush1.bf16.msra.mxu0 %v11497_v10  ;;  %9814 = vmatprep.subr.bf16.mxu1 %v11362_v36  ;;  %v11594_v61 = vcombine.high %v2865_v33, %v2869_v39  ;;  %v2729_v52 = vld [vmem:[%s17896_s7 + $0x318] sm:$0xff]  ;;  %v11593_v56 = vcombine.low %v2865_v33, %v2869_v39 }
 0x5a3   :  { %9855 = vmatprep.subr.bf16.mxu0 %v11490_v1  ;;  %v2733_v26 = vld [vmem:[%s17896_s7 + $0x338] sm:$0xff] }
 0x5a4   :  { %v2857_v21 = vld [vmem:[%s17896_s7 + $0x718] sm:$0xff]  ;;  %v11458_v24 = vcombine.high %v2729_v52, %v2733_v26  ;;  %v11457_v1 = vcombine.low %v2729_v52, %v2733_v26 }
 0x5a5   :  { %9815 = vmatpush1.bf16.msra.mxu1 %v11361_v50  ;;  %v2861_v23 = vld [vmem:[%s17896_s7 + $0x738] sm:$0xff] }
 0x5a6   :  { %9856 = vmatpush1.bf16.msra.mxu0 %v11489_v18  ;;  %9816 = vmatprep.subr.bf16.mxu1 %v11482_v51  ;;  %v11586_v55 = vcombine.high %v2857_v21, %v2861_v23  ;;  %v2721_v16 = vld [vmem:[%s17896_s7 + $0x2d8] sm:$0xff]  ;;  %v11585_v17 = vcombine.low %v2857_v21, %v2861_v23 }
 0x5a7   :  { %9857 = vmatprep.subr.bf16.mxu0 %v11610_v3  ;;  %v2725_v27 = vld [vmem:[%s17896_s7 + $0x2f8] sm:$0xff] }
 0x5a8   :  { %v2849_v10 = vld [vmem:[%s17896_s7 + $0x6d8] sm:$0xff]  ;;  %v11450_v8 = vcombine.high %v2721_v16, %v2725_v27  ;;  %v11449_v3 = vcombine.low %v2721_v16, %v2725_v27 }
 0x5a9   :  { %9817 = vmatpush2.bf16.msra.mxu1 %v11481_v12  ;;  %v2853_v36 = vld [vmem:[%s17896_s7 + $0x6f8] sm:$0xff] }
 0x5aa   :  { %9858 = vmatpush2.bf16.msra.mxu0 %v11609_v30  ;;  %9818 = vmatprep.subr.bf16.mxu1 %v11474_v37  ;;  %v11578_v32 = vcombine.high %v2849_v10, %v2853_v36  ;;  %v2713_v44 = vld [vmem:[%s17896_s7 + $0x298] sm:$0xff]  ;;  %v11577_v54 = vcombine.low %v2849_v10, %v2853_v36 }
 0x5ab   :  { %9859 = vmatprep.subr.bf16.mxu0 %v11602_v11  ;;  %v2717_v50 = vld [vmem:[%s17896_s7 + $0x2b8] sm:$0xff] }
 0x5ac   :  { %v2841_v18 = vld [vmem:[%s17896_s7 + $0x698] sm:$0xff]  ;;  %v11442_v5 = vcombine.high %v2713_v44, %v2717_v50  ;;  %v11441_v11 = vcombine.low %v2713_v44, %v2717_v50 }
 0x5ad   :  { %9819 = vmatpush2.bf16.msra.mxu1 %v11473_v28  ;;  %v2845_v51 = vld [vmem:[%s17896_s7 + $0x6b8] sm:$0xff] }
 0x5ae   :  { %9860 = vmatpush2.bf16.msra.mxu0 %v11601_v60  ;;  %9820 = vmatprep.subr.bf16.mxu1 %v11466_v40  ;;  %v11570_v25 = vcombine.high %v2841_v18, %v2845_v51  ;;  %v2705_v63 = vld [vmem:[%s17896_s7 + $0x258] sm:$0xff]  ;;  %v11569_v2 = vcombine.low %v2841_v18, %v2845_v51 }
 0x5af   :  { %9861 = vmatprep.subr.bf16.mxu0 %v11594_v61  ;;  %v2709_v12 = vld [vmem:[%s17896_s7 + $0x278] sm:$0xff] }
 0x5b0   :  { %v2833_v30 = vld [vmem:[%s17896_s7 + $0x658] sm:$0xff]  ;;  %v11434_v0 = vcombine.high %v2705_v63, %v2709_v12  ;;  %v11433_v61 = vcombine.low %v2705_v63, %v2709_v12 }
 0x5b1   :  { %9821 = vmatpush2.bf16.msra.mxu1 %v11465_v49  ;;  %v2837_v37 = vld [vmem:[%s17896_s7 + $0x678] sm:$0xff] }
 0x5b2   :  { %9862 = vmatpush2.bf16.msra.mxu0 %v11593_v56  ;;  %9822 = vmatprep.subr.bf16.mxu1 %v11458_v24  ;;  %v11562_v33 = vcombine.high %v2833_v30, %v2837_v37  ;;  %v2697_v39 = vld [vmem:[%s17896_s7 + $0x218] sm:$0xff]  ;;  %v11561_v52 = vcombine.low %v2833_v30, %v2837_v37 }
 0x5b3   :  { %9863 = vmatprep.subr.bf16.mxu0 %v11586_v55  ;;  %v2701_v28 = vld [vmem:[%s17896_s7 + $0x238] sm:$0xff] }
 0x5b4   :  { %v2825_v60 = vld [vmem:[%s17896_s7 + $0x618] sm:$0xff]  ;;  %v11426_v26 = vcombine.high %v2697_v39, %v2701_v28  ;;  %v11425_v55 = vcombine.low %v2697_v39, %v2701_v28 }
 0x5b5   :  { %9823 = vmatpush2.bf16.msra.mxu1 %v11457_v1  ;;  %v2829_v40 = vld [vmem:[%s17896_s7 + $0x638] sm:$0xff] }
 0x5b6   :  { %9864 = vmatpush2.bf16.msra.mxu0 %v11585_v17  ;;  %9824 = vmatprep.subr.bf16.mxu1 %v11450_v8  ;;  %v11554_v21 = vcombine.high %v2825_v60, %v2829_v40  ;;  %v2945_v23 = vld [vmem:[%s17896_s7 + $0x9d8] sm:$0xff]  ;;  %v11553_v16 = vcombine.low %v2825_v60, %v2829_v40 }
 0x5b7   :  { %9865 = vmatprep.subr.bf16.mxu0 %v11578_v32  ;;  %v2949_v49 = vld [vmem:[%s17896_s7 + $0x9f8] sm:$0xff] }
 0x5b8   :  { %v3073_v56 = vld [vmem:[%s17896_s7 + $0xdd8] sm:$0xff]  ;;  %v11674_v27 = vcombine.high %v2945_v23, %v2949_v49  ;;  %v11673_v17 = vcombine.low %v2945_v23, %v2949_v49 }
 0x5b9   :  { %9825 = vmatpush2.bf16.msra.mxu1 %v11449_v3  ;;  %v3077_v24 = vld [vmem:[%s17896_s7 + $0xdf8] sm:$0xff] }
 0x5ba   :  { %9866 = vmatpush2.bf16.msra.mxu0 %v11577_v54  ;;  %9826 = vmatprep.subr.bf16.mxu1 %v11442_v5  ;;  %v11802_v10 = vcombine.high %v3073_v56, %v3077_v24  ;;  %v2937_v36 = vld [vmem:[%s17896_s7 + $0x998] sm:$0xff]  ;;  %v11801_v44 = vcombine.low %v3073_v56, %v3077_v24 }
 0x5bb   :  { %9867 = vmatprep.subr.bf16.mxu0 %v11570_v25  ;;  %v2941_v1 = vld [vmem:[%s17896_s7 + $0x9b8] sm:$0xff] }
 0x5bc   :  { %v3065_v8 = vld [vmem:[%s17896_s7 + $0xd98] sm:$0xff]  ;;  %v11666_v50 = vcombine.high %v2937_v36, %v2941_v1  ;;  %v11665_v30 = vcombine.low %v2937_v36, %v2941_v1 }
 0x5bd   :  { %9827 = vmatpush2.bf16.msra.mxu1 %v11441_v11  ;;  %v3069_v32 = vld [vmem:[%s17896_s7 + $0xdb8] sm:$0xff] }
 0x5be   :  { %9868 = vmatpush2.bf16.msra.mxu0 %v11569_v2  ;;  %9828 = vmatprep.subr.bf16.mxu1 %v11434_v0  ;;  %v2929_v18 = vld [vmem:[%s17896_s7 + $0x958] sm:$0xff]  ;;  %v11794_v54 = vcombine.high %v3065_v8, %v3069_v32  ;;  %v11793_v37 = vcombine.low %v3065_v8, %v3069_v32 }
 0x5bf   :  { %9869 = vmatprep.subr.bf16.mxu0 %v11562_v33  ;;  %v2933_v51 = vld [vmem:[%s17896_s7 + $0x978] sm:$0xff] }
 0x5c0   :  { %v3057_v5 = vld [vmem:[%s17896_s7 + $0xd58] sm:$0xff]  ;;  %v11658_v11 = vcombine.high %v2929_v18, %v2933_v51  ;;  %v11657_v40 = vcombine.low %v2929_v18, %v2933_v51 }
 0x5c1   :  { %9829 = vmatpush2.bf16.msra.mxu1 %v11433_v61  ;;  %v3061_v25 = vld [vmem:[%s17896_s7 + $0xd78] sm:$0xff] }
 0x5c2   :  { %9870 = vmatpush2.bf16.msra.mxu0 %v11561_v52  ;;  %9830 = vmatprep.subr.bf16.mxu1 %v11426_v26  ;;  %v3049_v28 = vld [vmem:[%s17896_s7 + $0xd18] sm:$0xff]  ;;  %v11785_v52 = vcombine.low %v3057_v5, %v3061_v25 }
 0x5c3   :  { %9871 = vmatprep.subr.bf16.mxu0 %v11554_v21  ;;  %v2913_v49 = vld [vmem:[%s17896_s7 + $0x8d8] sm:$0xff] }
 0x5c4   :  { %v2917_v56 = vld [vmem:[%s17896_s7 + $0x8f8] sm:$0xff] }
 0x5c5   :  { %9831 = vmatpush2.bf16.msra.mxu1 %v11425_v55  ;;  %v3041_v24 = vld [vmem:[%s17896_s7 + $0xcd8] sm:$0xff] }
 0x5c6   :  { %9872 = vmatpush2.bf16.msra.mxu0 %v11553_v16  ;;  %9882 = vmatprep.subr.bf16.mxu1 %v11674_v27  ;;  %v3045_v55 = vld [vmem:[%s17896_s7 + $0xcf8] sm:$0xff] }
 0x5c7   :  { %9923 = vmatprep.subr.bf16.mxu0 %v11802_v10  ;;  %v11642_v10 = vcombine.high %v2913_v49, %v2917_v56  ;;  %v11770_v36 = vcombine.high %v3041_v24, %v3045_v55  ;;  %v2905_v1 = vld [vmem:[%s17896_s7 + $0x898] sm:$0xff] }
 0x5c8   :  { %v9588_v3 = vpop.f32.mrf.mxu1  ;;  %9833 = vmatmul.mubr.bf16.vlgmr.msra.gmra.mxu1 %v14503_v45  ;;  %v3033_v8 = vld [vmem:[%s17896_s7 + $0xc98] sm:$0xff] }
 0x5c9   :  { %v9589_v63 = vadd.f32 %v9588_v3, %v16807_v38  ;;  %v9629_v12 = vpop.f32.mrf.mxu0  ;;  %9874 = vmatmul.mubr.bf16.vlgmr.msra.gmra.mxu0 %v14528_v22  ;;  %9883 = vmatpush1.bf16.msra.mxu1 %v11673_v17  ;;  %v11786_v38 = vcombine.high %v3057_v5, %v3061_v25  ;;  %v2921_v22 = vld [vmem:[%s17896_s7 + $0x918] sm:$0xff] }
 0x5ca   :  { %9914 = vmatprep.mubr.bf16.mxu1 %v14547_v4  ;;  %9924 = vmatpush1.bf16.msra.mxu0 %v11801_v44  ;;  %v9590_v45 = vpop.f32.mrf.mxu1  ;;  %v2925_v4 = vld [vmem:[%s17896_s7 + $0x938] sm:$0xff]  ;;  %v11641_v44 = vcombine.low %v2913_v49, %v2917_v56 }
 0x5cb   :  { %v17008_v2 = vadd.f32 %v9629_v12, %v9589_v63  ;;  %9955 = vmatprep.mubr.bf16.mxu0 %v14550_v41  ;;  %v9591_v0 = vadd.f32 %v9590_v45, %v16822_v47  ;;  %v9631_v33 = vpop.f32.mrf.mxu0  ;;  %9884 = vmatprep.subr.bf16.mxu1 %v11666_v50  ;;  %v3053_v41 = vld [vmem:[%s17896_s7 + $0xd38] sm:$0xff]  ;;  %v11650_v26 = vcombine.high %v2921_v22, %v2925_v4 }
 0x5cc   :  { %v9592_v39 = vpop.f32.mrf.mxu1  ;;  %9925 = vmatprep.subr.bf16.mxu0 %v11794_v54  ;;  %v11778_v23 = vcombine.high %v3049_v28, %v3053_v41  ;;  %v11649_v16 = vcombine.low %v2921_v22, %v2925_v4  ;;  %v11777_v27 = vcombine.low %v3049_v28, %v3053_v41  ;;  %v2909_v17 = vld [vmem:[%s17896_s7 + $0x8b8] sm:$0xff]  ;;  %v11769_v50 = vcombine.low %v3041_v24, %v3045_v55 }
 0x5cd   :  { %v17024_v47 = vadd.f32 %v9631_v33, %v9591_v0  ;;  %v9633_v60 = vpop.f32.mrf.mxu0  ;;  %9885 = vmatpush1.bf16.msra.mxu1 %v11665_v30  ;;  %v3037_v32 = vld [vmem:[%s17896_s7 + $0xcb8] sm:$0xff]  ;;  %v11634_v18 = vcombine.high %v2905_v1, %v2909_v17  ;;  %v11633_v63 = vcombine.low %v2905_v1, %v2909_v17 }
 0x5ce   :  { %9926 = vmatpush1.bf16.msra.mxu0 %v11793_v37  ;;  %v9593_v61 = vpop.f32.mrf.mxu1  ;;  %9886 = vmatprep.subr.bf16.mxu1 %v11658_v11  ;;  %v11762_v51 = vcombine.high %v3033_v8, %v3037_v32  ;;  %v2897_v3 = vld [vmem:[%s17896_s7 + $0x858] sm:$0xff]  ;;  %v11761_v12 = vcombine.low %v3033_v8, %v3037_v32 }
 0x5cf   :  { %v9634_v21 = vpop.f32.mrf.mxu0  ;;  %9927 = vmatprep.subr.bf16.mxu0 %v11786_v38  ;;  %v2901_v54 = vld [vmem:[%s17896_s7 + $0x878] sm:$0xff] }
 0x5d0   :  { %v3025_v5 = vld [vmem:[%s17896_s7 + $0xc58] sm:$0xff]  ;;  %v11626_v30 = vcombine.high %v2897_v3, %v2901_v54  ;;  %v11625_v38 = vcombine.low %v2897_v3, %v2901_v54 }
 0x5d1   :  { %9887 = vmatpush1.bf16.msra.mxu1 %v11657_v40  ;;  %v3029_v25 = vld [vmem:[%s17896_s7 + $0xc78] sm:$0xff] }
 0x5d2   :  { %9928 = vmatpush1.bf16.msra.mxu0 %v11785_v52  ;;  %9888 = vmatprep.subr.bf16.mxu1 %v11650_v26  ;;  %v11754_v45 = vcombine.high %v3025_v5, %v3029_v25  ;;  %v2889_v37 = vld [vmem:[%s17896_s7 + $0x818] sm:$0xff]  ;;  %v11753_v22 = vcombine.low %v3025_v5, %v3029_v25 }
 0x5d3   :  { %9929 = vmatprep.subr.bf16.mxu0 %v11778_v23  ;;  %v2893_v11 = vld [vmem:[%s17896_s7 + $0x838] sm:$0xff] }
 0x5d4   :  { %v3017_v0 = vld [vmem:[%s17896_s7 + $0xc18] sm:$0xff]  ;;  %v11618_v4 = vcombine.high %v2889_v37, %v2893_v11  ;;  %v11617_v61 = vcombine.low %v2889_v37, %v2893_v11 }
 0x5d5   :  { %9889 = vmatpush1.bf16.msra.mxu1 %v11649_v16  ;;  %v3021_v33 = vld [vmem:[%s17896_s7 + $0xc38] sm:$0xff] }
 0x5d6   :  { %9930 = vmatpush1.bf16.msra.mxu0 %v11777_v27  ;;  %9890 = vmatprep.subr.bf16.mxu1 %v11642_v10  ;;  %v11746_v39 = vcombine.high %v3017_v0, %v3021_v33  ;;  %v3009_v28 = vld [vmem:[%s17896_s7 + $0xbd8] sm:$0xff]  ;;  %v11745_v52 = vcombine.low %v3017_v0, %v3021_v33 }
 0x5d7   :  { %9931 = vmatprep.subr.bf16.mxu0 %v11770_v36  ;;  %v3013_v41 = vld [vmem:[%s17896_s7 + $0xbf8] sm:$0xff] }
 0x5d8   :  { %v3137_v60 = vld [vmem:[%s17896_s7 + $0xfd8] sm:$0xff]  ;;  %v11738_v26 = vcombine.high %v3009_v28, %v3013_v41  ;;  %v11737_v55 = vcombine.low %v3009_v28, %v3013_v41 }
 0x5d9   :  { %9891 = vmatpush1.bf16.msra.mxu1 %v11641_v44  ;;  %v3141_v40 = vld [vmem:[%s17896_s7 + $0xff8] sm:$0xff] }
 0x5da   :  { %9932 = vmatpush1.bf16.msra.mxu0 %v11769_v50  ;;  %9892 = vmatprep.subr.bf16.mxu1 %v11634_v18  ;;  %v11866_v21 = vcombine.high %v3137_v60, %v3141_v40  ;;  %v3001_v23 = vld [vmem:[%s17896_s7 + $0xb98] sm:$0xff]  ;;  %v11865_v16 = vcombine.low %v3137_v60, %v3141_v40 }
 0x5db   :  { %9933 = vmatprep.subr.bf16.mxu0 %v11762_v51  ;;  %v3005_v49 = vld [vmem:[%s17896_s7 + $0xbb8] sm:$0xff] }
 0x5dc   :  { %v3129_v56 = vld [vmem:[%s17896_s7 + $0xf98] sm:$0xff]  ;;  %v11730_v27 = vcombine.high %v3001_v23, %v3005_v49  ;;  %v11729_v32 = vcombine.low %v3001_v23, %v3005_v49 }
 0x5dd   :  { %9893 = vmatpush1.bf16.msra.mxu1 %v11633_v63  ;;  %v3133_v24 = vld [vmem:[%s17896_s7 + $0xfb8] sm:$0xff] }
 0x5de   :  { %9934 = vmatpush1.bf16.msra.mxu0 %v11761_v12  ;;  %9894 = vmatprep.subr.bf16.mxu1 %v11626_v30  ;;  %v11858_v10 = vcombine.high %v3129_v56, %v3133_v24  ;;  %v2993_v36 = vld [vmem:[%s17896_s7 + $0xb58] sm:$0xff]  ;;  %v11857_v44 = vcombine.low %v3129_v56, %v3133_v24 }
 0x5df   :  { %9935 = vmatprep.subr.bf16.mxu0 %v11754_v45  ;;  %v2997_v1 = vld [vmem:[%s17896_s7 + $0xb78] sm:$0xff] }
 0x5e0   :  { %v3121_v17 = vld [vmem:[%s17896_s7 + $0xf58] sm:$0xff]  ;;  %v11722_v50 = vcombine.high %v2993_v36, %v2997_v1  ;;  %v11721_v25 = vcombine.low %v2993_v36, %v2997_v1 }
 0x5e1   :  { %9895 = vmatpush1.bf16.msra.mxu1 %v11625_v38  ;;  %v3125_v8 = vld [vmem:[%s17896_s7 + $0xf78] sm:$0xff] }
 0x5e2   :  { %9936 = vmatpush1.bf16.msra.mxu0 %v11753_v22  ;;  %9896 = vmatprep.subr.bf16.mxu1 %v11618_v4  ;;  %v11850_v18 = vcombine.high %v3121_v17, %v3125_v8  ;;  %v2985_v51 = vld [vmem:[%s17896_s7 + $0xb18] sm:$0xff]  ;;  %v11849_v63 = vcombine.low %v3121_v17, %v3125_v8 }
 0x5e3   :  { %9937 = vmatprep.subr.bf16.mxu0 %v11746_v39  ;;  %v2989_v3 = vld [vmem:[%s17896_s7 + $0xb38] sm:$0xff] }
 0x5e4   :  { %v3113_v54 = vld [vmem:[%s17896_s7 + $0xf18] sm:$0xff]  ;;  %v11714_v12 = vcombine.high %v2985_v51, %v2989_v3  ;;  %v11713_v33 = vcombine.low %v2985_v51, %v2989_v3 }
 0x5e5   :  { %9897 = vmatpush1.bf16.msra.mxu1 %v11617_v61  ;;  %v3117_v5 = vld [vmem:[%s17896_s7 + $0xf38] sm:$0xff] }
 0x5e6   :  { %9938 = vmatpush1.bf16.msra.mxu0 %v11745_v52  ;;  %9898 = vmatprep.subr.bf16.mxu1 %v11738_v26  ;;  %v11842_v30 = vcombine.high %v3113_v54, %v3117_v5  ;;  %v2977_v45 = vld [vmem:[%s17896_s7 + $0xad8] sm:$0xff]  ;;  %v11841_v38 = vcombine.low %v3113_v54, %v3117_v5 }
 0x5e7   :  { %9939 = vmatprep.subr.bf16.mxu0 %v11866_v21  ;;  %v2981_v37 = vld [vmem:[%s17896_s7 + $0xaf8] sm:$0xff] }
 0x5e8   :  { %v3105_v11 = vld [vmem:[%s17896_s7 + $0xed8] sm:$0xff]  ;;  %v11706_v22 = vcombine.high %v2977_v45, %v2981_v37  ;;  %v11705_v40 = vcombine.low %v2977_v45, %v2981_v37 }
 0x5e9   :  { %9899 = vmatpush2.bf16.msra.mxu1 %v11737_v55  ;;  %v3109_v0 = vld [vmem:[%s17896_s7 + $0xef8] sm:$0xff] }
 0x5ea   :  { %9940 = vmatpush2.bf16.msra.mxu0 %v11865_v16  ;;  %9900 = vmatprep.subr.bf16.mxu1 %v11730_v27  ;;  %v11834_v4 = vcombine.high %v3105_v11, %v3109_v0  ;;  %v2969_v39 = vld [vmem:[%s17896_s7 + $0xa98] sm:$0xff]  ;;  %v11833_v61 = vcombine.low %v3105_v11, %v3109_v0 }
 0x5eb   :  { %9941 = vmatprep.subr.bf16.mxu0 %v11858_v10  ;;  %v2973_v28 = vld [vmem:[%s17896_s7 + $0xab8] sm:$0xff] }
 0x5ec   :  { %v3097_v41 = vld [vmem:[%s17896_s7 + $0xe98] sm:$0xff]  ;;  %v11698_v52 = vcombine.high %v2969_v39, %v2973_v28  ;;  %v11697_v24 = vcombine.low %v2969_v39, %v2973_v28 }
 0x5ed   :  { %9901 = vmatpush2.bf16.msra.mxu1 %v11729_v32  ;;  %v3101_v60 = vld [vmem:[%s17896_s7 + $0xeb8] sm:$0xff] }
 0x5ee   :  { %9942 = vmatpush2.bf16.msra.mxu0 %v11857_v44  ;;  %9902 = vmatprep.subr.bf16.mxu1 %v11722_v50  ;;  %v11826_v26 = vcombine.high %v3097_v41, %v3101_v60  ;;  %v2961_v21 = vld [vmem:[%s17896_s7 + $0xa58] sm:$0xff]  ;;  %v11825_v55 = vcombine.low %v3097_v41, %v3101_v60 }
 0x5ef   :  { %9943 = vmatprep.subr.bf16.mxu0 %v11850_v18  ;;  %v2965_v23 = vld [vmem:[%s17896_s7 + $0xa78] sm:$0xff] }
 0x5f0   :  { %v3089_v49 = vld [vmem:[%s17896_s7 + $0xe58] sm:$0xff]  ;;  %v11690_v16 = vcombine.high %v2961_v21, %v2965_v23  ;;  %v11689_v8 = vcombine.low %v2961_v21, %v2965_v23 }
 0x5f1   :  { %9903 = vmatpush2.bf16.msra.mxu1 %v11721_v25  ;;  %v3093_v56 = vld [vmem:[%s17896_s7 + $0xe78] sm:$0xff] }
 0x5f2   :  { %9944 = vmatpush2.bf16.msra.mxu0 %v11849_v63  ;;  %9904 = vmatprep.subr.bf16.mxu1 %v11714_v12  ;;  %v11818_v27 = vcombine.high %v3089_v49, %v3093_v56  ;;  %v2953_v10 = vld [vmem:[%s17896_s7 + $0xa18] sm:$0xff]  ;;  %v11817_v32 = vcombine.low %v3089_v49, %v3093_v56 }
 0x5f3   :  { %9945 = vmatprep.subr.bf16.mxu0 %v11842_v30  ;;  %v2957_v36 = vld [vmem:[%s17896_s7 + $0xa38] sm:$0xff] }
 0x5f4   :  { %v3081_v1 = vld [vmem:[%s17896_s7 + $0xe18] sm:$0xff]  ;;  %v11682_v44 = vcombine.high %v2953_v10, %v2957_v36  ;;  %v11681_v5 = vcombine.low %v2953_v10, %v2957_v36 }
 0x5f5   :  { %9905 = vmatpush2.bf16.msra.mxu1 %v11713_v33  ;;  %v3085_v17 = vld [vmem:[%s17896_s7 + $0xe38] sm:$0xff] }
 0x5f6   :  { %9946 = vmatpush2.bf16.msra.mxu0 %v11841_v38  ;;  %9906 = vmatprep.subr.bf16.mxu1 %v11706_v22  ;;  %v11810_v50 = vcombine.high %v3081_v1, %v3085_v17  ;;  %v3201_v18 = vld [vmem:[%s17896_s7 + $0x11d8] sm:$0xff]  ;;  %v11809_v25 = vcombine.low %v3081_v1, %v3085_v17 }
 0x5f7   :  { %9947 = vmatprep.subr.bf16.mxu0 %v11834_v4  ;;  %v3205_v51 = vld [vmem:[%s17896_s7 + $0x11f8] sm:$0xff] }
 0x5f8   :  { %v3329_v3 = vld [vmem:[%s17896_s7 + $0x15d8] sm:$0xff]  ;;  %v11930_v63 = vcombine.high %v3201_v18, %v3205_v51  ;;  %v11929_v37 = vcombine.low %v3201_v18, %v3205_v51 }
 0x5f9   :  { %9907 = vmatpush2.bf16.msra.mxu1 %v11705_v40  ;;  %v3333_v54 = vld [vmem:[%s17896_s7 + $0x15f8] sm:$0xff] }
 0x5fa   :  { %9948 = vmatpush2.bf16.msra.mxu0 %v11833_v61  ;;  %9908 = vmatprep.subr.bf16.mxu1 %v11698_v52  ;;  %v12058_v12 = vcombine.high %v3329_v3, %v3333_v54  ;;  %v3193_v30 = vld [vmem:[%s17896_s7 + $0x1198] sm:$0xff]  ;;  %v12057_v33 = vcombine.low %v3329_v3, %v3333_v54 }
 0x5fb   :  { %9949 = vmatprep.subr.bf16.mxu0 %v11826_v26  ;;  %v3197_v45 = vld [vmem:[%s17896_s7 + $0x11b8] sm:$0xff] }
 0x5fc   :  { %v3321_v11 = vld [vmem:[%s17896_s7 + $0x1598] sm:$0xff]  ;;  %v11922_v38 = vcombine.high %v3193_v30, %v3197_v45  ;;  %v11921_v52 = vcombine.low %v3193_v30, %v3197_v45 }
 0x5fd   :  { %9909 = vmatpush2.bf16.msra.mxu1 %v11697_v24  ;;  %v3325_v0 = vld [vmem:[%s17896_s7 + $0x15b8] sm:$0xff] }
 0x5fe   :  { %9950 = vmatpush2.bf16.msra.mxu0 %v11825_v55  ;;  %9910 = vmatprep.subr.bf16.mxu1 %v11690_v16  ;;  %v3185_v22 = vld [vmem:[%s17896_s7 + $0x1158] sm:$0xff]  ;;  %v12050_v28 = vcombine.high %v3321_v11, %v3325_v0  ;;  %v12049_v21 = vcombine.low %v3321_v11, %v3325_v0  ;;  %v10138_v11 = vsel %vm10130_vm4, %v15794_v48, 0.0 }
 0x5ff   :  { %9951 = vmatprep.subr.bf16.mxu0 %v11818_v27  ;;  %v3189_v4 = vld [vmem:[%s17896_s7 + $0x1178] sm:$0xff] }
 0x600   :  { %v3313_v41 = vld [vmem:[%s17896_s7 + $0x1558] sm:$0xff]  ;;  %v11914_v23 = vcombine.high %v3185_v22, %v3189_v4 }
 0x601   :  { %9911 = vmatpush2.bf16.msra.mxu1 %v11689_v8  ;;  %v3317_v60 = vld [vmem:[%s17896_s7 + $0x1578] sm:$0xff] }
 0x602   :  { %9952 = vmatpush2.bf16.msra.mxu0 %v11817_v32  ;;  %9912 = vmatprep.subr.bf16.mxu1 %v11682_v44  ;;  %v3181_v49 = vld [vmem:[%s17896_s7 + $0x1138] sm:$0xff]  ;;  %v12042_v24 = vcombine.high %v3313_v41, %v3317_v60  ;;  %v12041_v1 = vcombine.low %v3313_v41, %v3317_v60 }
 0x603   :  { %9953 = vmatprep.subr.bf16.mxu0 %v11810_v50  ;;  %v3309_v16 = vld [vmem:[%s17896_s7 + $0x1538] sm:$0xff] }
 0x604   :  { %v3173_v8 = vld [vmem:[%s17896_s7 + $0x10f8] sm:$0xff] }
 0x605   :  { %9913 = vmatpush2.bf16.msra.mxu1 %v11681_v5  ;;  %v3297_v50 = vld [vmem:[%s17896_s7 + $0x14d8] sm:$0xff] }
 0x606   :  { %9954 = vmatpush2.bf16.msra.mxu0 %v11809_v25  ;;  %9964 = vmatprep.subr.bf16.mxu1 %v11930_v63  ;;  %v3301_v18 = vld [vmem:[%s17896_s7 + $0x14f8] sm:$0xff] }
 0x607   :  { %10005 = vmatprep.subr.bf16.mxu0 %v12058_v12  ;;  %v3161_v3 = vld [vmem:[%s17896_s7 + $0x1098] sm:$0xff]  ;;  %v12026_v63 = vcombine.high %v3297_v50, %v3301_v18  ;;  %v12025_v0 = vcombine.low %v3297_v50, %v3301_v18 }
 0x608   :  { %v9670_v39 = vpop.f32.mrf.mxu1  ;;  %9915 = vmatmul.mubr.bf16.vlgmr.msra.gmra.mxu1 %v14505_v58  ;;  %v3177_v58 = vld [vmem:[%s17896_s7 + $0x1118] sm:$0xff] }
 0x609   :  { %v9671_v40 = vadd.f32 %v9670_v39, %v17008_v2  ;;  %v9711_v61 = vpop.f32.mrf.mxu0  ;;  %9956 = vmatmul.mubr.bf16.vlgmr.msra.gmra.mxu0 %v14741_v59  ;;  %9965 = vmatpush1.bf16.msra.mxu1 %v11929_v37  ;;  %v11906_v17 = vcombine.high %v3177_v58, %v3181_v49  ;;  %v11905_v51 = vcombine.low %v3177_v58, %v3181_v49  ;;  %v3165_v25 = vld [vmem:[%s17896_s7 + $0x10b8] sm:$0xff]  ;;  %v10152_v58 = vsel %vm10130_vm4, %v16611_v7, 0.0 }
 0x60a   :  { %9996 = vmatprep.mubr.bf16.mxu1 %v14744_v42  ;;  %10006 = vmatpush1.bf16.msra.mxu0 %v12057_v33  ;;  %v9672_v26 = vpop.f32.mrf.mxu1  ;;  %v3305_v42 = vld [vmem:[%s17896_s7 + $0x1518] sm:$0xff]  ;;  %v11890_v33 = vcombine.high %v3161_v3, %v3165_v25  ;;  %v11889_v41 = vcombine.low %v3161_v3, %v3165_v25 }
 0x60b   :  { %v17216_v2 = vadd.f32 %v9711_v61, %v9671_v40  ;;  %10037 = vmatprep.mubr.bf16.mxu0 %v14755_v20  ;;  %v9673_v59 = vadd.f32 %v9672_v26, %v17024_v47  ;;  %v9713_v56 = vpop.f32.mrf.mxu0  ;;  %9966 = vmatprep.subr.bf16.mxu1 %v11922_v38  ;;  %v11913_v20 = vcombine.low %v3185_v22, %v3189_v4  ;;  %v3169_v47 = vld [vmem:[%s17896_s7 + $0x10d8] sm:$0xff] }
 0x60c   :  { %v9674_v55 = vpop.f32.mrf.mxu1  ;;  %10007 = vmatprep.subr.bf16.mxu0 %v12050_v28  ;;  %v12034_v44 = vcombine.high %v3305_v42, %v3309_v16  ;;  %v12033_v54 = vcombine.low %v3305_v42, %v3309_v16  ;;  %v11898_v5 = vcombine.high %v3169_v47, %v3173_v8  ;;  %v3289_v12 = vld [vmem:[%s17896_s7 + $0x1498] sm:$0xff]  ;;  %v11897_v45 = vcombine.low %v3169_v47, %v3173_v8 }
 0x60d   :  { %v17226_v27 = vadd.f32 %v9713_v56, %v9673_v59  ;;  %v9715_v10 = vpop.f32.mrf.mxu0  ;;  %9967 = vmatpush1.bf16.msra.mxu1 %v11921_v52  ;;  %v3293_v30 = vld [vmem:[%s17896_s7 + $0x14b8] sm:$0xff]  ;;  %v10139_v28 = vrot.slane %v10138_v11, 4 }
 0x60e   :  { %10008 = vmatpush1.bf16.msra.mxu0 %v12049_v21  ;;  %v9675_v36 = vpop.f32.mrf.mxu1  ;;  %9968 = vmatprep.subr.bf16.mxu1 %v11914_v23  ;;  %v3153_v37 = vld [vmem:[%s17896_s7 + $0x1058] sm:$0xff]  ;;  %v12018_v22 = vcombine.high %v3289_v12, %v3293_v30  ;;  %v12017_v40 = vcombine.low %v3289_v12, %v3293_v30 }
 0x60f   :  { %v9716_v32 = vpop.f32.mrf.mxu0  ;;  %10009 = vmatprep.subr.bf16.mxu0 %v12042_v24  ;;  %v3157_v38 = vld [vmem:[%s17896_s7 + $0x1078] sm:$0xff]  ;;  %v10140_v49 = vadd.f32 %v10139_v28, %v10138_v11  ;;  %v10153_v24 = vrot.slane %v10152_v58, 4 }
 0x610   :  { %v3281_v4 = vld [vmem:[%s17896_s7 + $0x1458] sm:$0xff]  ;;  %v11882_v61 = vcombine.high %v3153_v37, %v3157_v38  ;;  %v11881_v59 = vcombine.low %v3153_v37, %v3157_v38 }
 0x611   :  { %9969 = vmatpush1.bf16.msra.mxu1 %v11913_v20  ;;  %v3285_v39 = vld [vmem:[%s17896_s7 + $0x1478] sm:$0xff]  ;;  %v10141_v36 = vrot.slane %v10140_v49, 2  ;;  %v10154_v8 = vadd.f32 %v10153_v24, %v10152_v58 }
 0x612   :  { %10010 = vmatpush1.bf16.msra.mxu0 %v12041_v1  ;;  %9970 = vmatprep.subr.bf16.mxu1 %v11906_v17  ;;  %v3145_v60 = vld [vmem:[%s17896_s7 + $0x1018] sm:$0xff]  ;;  %v12010_v26 = vcombine.high %v3281_v4, %v3285_v39  ;;  %v12009_v42 = vcombine.low %v3281_v4, %v3285_v39 }
 0x613   :  { %10011 = vmatprep.subr.bf16.mxu0 %v12034_v44  ;;  %v3149_v52 = vld [vmem:[%s17896_s7 + $0x1038] sm:$0xff] }
 0x614   :  { %v3273_v21 = vld [vmem:[%s17896_s7 + $0x1418] sm:$0xff]  ;;  %v11874_v55 = vcombine.high %v3145_v60, %v3149_v52  ;;  %v11873_v1 = vcombine.low %v3145_v60, %v3149_v52 }
 0x615   :  { %9971 = vmatpush1.bf16.msra.mxu1 %v11905_v51  ;;  %v3277_v23 = vld [vmem:[%s17896_s7 + $0x1438] sm:$0xff] }
 0x616   :  { %10012 = vmatpush1.bf16.msra.mxu0 %v12033_v54  ;;  %9972 = vmatprep.subr.bf16.mxu1 %v11898_v5  ;;  %v3265_v56 = vld [vmem:[%s17896_s7 + $0x13d8] sm:$0xff]  ;;  %v12002_v10 = vcombine.high %v3273_v21, %v3277_v23  ;;  %v12001_v32 = vcombine.low %v3273_v21, %v3277_v23  ;;  %v10142_v54 = vadd.f32 %v10141_v36, %v10140_v49 }
 0x617   :  { %10013 = vmatprep.subr.bf16.mxu0 %v12026_v63  ;;  %v3269_v16 = vld [vmem:[%s17896_s7 + $0x13f8] sm:$0xff]  ;;  %v10155_v63 = vrot.slane %v10154_v8, 2 }
 0x618   :  { %v3393_v20 = vld [vmem:[%s17896_s7 + $0x17d8] sm:$0xff]  ;;  %v11994_v44 = vcombine.high %v3265_v56, %v3269_v16  ;;  %v11993_v5 = vcombine.low %v3265_v56, %v3269_v16 }
 0x619   :  { %9973 = vmatpush1.bf16.msra.mxu1 %v11897_v45  ;;  %v3397_v47 = vld [vmem:[%s17896_s7 + $0x17f8] sm:$0xff]  ;;  %v10156_v4 = vadd.f32 %v10155_v63, %v10154_v8 }
 0x61a   :  { %10014 = vmatpush1.bf16.msra.mxu0 %v12025_v0  ;;  %9974 = vmatprep.subr.bf16.mxu1 %v11890_v33  ;;  %v3257_v17 = vld [vmem:[%s17896_s7 + $0x1398] sm:$0xff]  ;;  %v12122_v18 = vcombine.high %v3393_v20, %v3397_v47  ;;  %v12121_v12 = vcombine.low %v3393_v20, %v3397_v47  ;;  %v10143_v33 = vrot.slane %v10142_v54, 1  ;;  %v10131_v47 = vsel %vm10130_vm4, %v15778_v29, 0.0 }
 0x61b   :  { %10015 = vmatprep.subr.bf16.mxu0 %v12018_v22  ;;  %v3261_v50 = vld [vmem:[%s17896_s7 + $0x13b8] sm:$0xff]  ;;  %v10157_v23 = vrot.slane %v10156_v4, 1 }
 0x61c   :  { %v3385_v51 = vld [vmem:[%s17896_s7 + $0x1798] sm:$0xff]  ;;  %v11986_v30 = vcombine.high %v3257_v17, %v3261_v50  ;;  %v11985_v38 = vcombine.low %v3257_v17, %v3261_v50  ;;  %v10144_v52 = vadd.f32 %v10143_v33, %v10142_v54 }
 0x61d   :  { %9975 = vmatpush1.bf16.msra.mxu1 %v11889_v41  ;;  %v3389_v3 = vld [vmem:[%s17896_s7 + $0x17b8] sm:$0xff]  ;;  %v10158_v36 = vadd.f32 %v10157_v23, %v10156_v4 }
 0x61e   :  { %10016 = vmatpush1.bf16.msra.mxu0 %v12017_v40  ;;  %9976 = vmatprep.subr.bf16.mxu1 %v11882_v61  ;;  %v3249_v25 = vld [vmem:[%s17896_s7 + $0x1358] sm:$0xff]  ;;  %v12114_v37 = vcombine.high %v3385_v51, %v3389_v3  ;;  %v12113_v39 = vcombine.low %v3385_v51, %v3389_v3 }
 0x61f   :  { %10017 = vmatprep.subr.bf16.mxu0 %v12010_v26  ;;  %v3253_v45 = vld [vmem:[%s17896_s7 + $0x1378] sm:$0xff] }
 0x620   :  { %v3377_v11 = vld [vmem:[%s17896_s7 + $0x1758] sm:$0xff]  ;;  %v11978_v28 = vcombine.high %v3249_v25, %v3253_v45  ;;  %v11977_v58 = vcombine.low %v3249_v25, %v3253_v45  ;;  %v10132_v45 = vrot.slane %v10131_v47, 4 }
 0x621   :  { %9977 = vmatpush1.bf16.msra.mxu1 %v11881_v59  ;;  %v3381_v0 = vld [vmem:[%s17896_s7 + $0x1778] sm:$0xff] }
 0x622   :  { %10018 = vmatpush1.bf16.msra.mxu0 %v12009_v42  ;;  %9978 = vmatprep.subr.bf16.mxu1 %v11874_v55  ;;  %v3241_v22 = vld [vmem:[%s17896_s7 + $0x1318] sm:$0xff]  ;;  %v12106_v60 = vcombine.high %v3377_v11, %v3381_v0  ;;  %v12105_v49 = vcombine.low %v3377_v11, %v3381_v0  ;;  %v10189_v55 = vmul.f32 0.25, %v10144_v52 }
 0x623   :  { %10019 = vmatprep.subr.bf16.mxu0 %v12002_v10  ;;  %v3245_v41 = vld [vmem:[%s17896_s7 + $0x1338] sm:$0xff] }
 0x624   :  { %v3369_v40 = vld [vmem:[%s17896_s7 + $0x1718] sm:$0xff]  ;;  %v11970_v59 = vcombine.high %v3241_v22, %v3245_v41  ;;  %v11969_v16 = vcombine.low %v3241_v22, %v3245_v41  ;;  %v17355_v50 = vsub.f32 %v15794_v48, %v10189_v55 }
 0x625   :  { %9979 = vmatpush1.bf16.msra.mxu1 %v11873_v1  ;;  %v3373_v61 = vld [vmem:[%s17896_s7 + $0x1738] sm:$0xff] }
 0x626   :  { %10020 = vmatpush1.bf16.msra.mxu0 %v12001_v32  ;;  %9980 = vmatprep.subr.bf16.mxu1 %v11994_v44  ;;  %v3233_v26 = vld [vmem:[%s17896_s7 + $0x12d8] sm:$0xff]  ;;  %v12098_v24 = vcombine.high %v3369_v40, %v3373_v61  ;;  %v12097_v1 = vcombine.low %v3369_v40, %v3373_v61  ;;  %v10133_v40 = vadd.f32 %v10132_v45, %v10131_v47 }
 0x627   :  { %10021 = vmatprep.subr.bf16.mxu0 %v12122_v18  ;;  %v3237_v21 = vld [vmem:[%s17896_s7 + $0x12f8] sm:$0xff]  ;;  %v10145_v18 = vsel %vm10130_vm4, %v16595_v62, 0.0 }
 0x628   :  { %v3361_v56 = vld [vmem:[%s17896_s7 + $0x16d8] sm:$0xff]  ;;  %v11962_v17 = vcombine.high %v3233_v26, %v3237_v21  ;;  %v11961_v51 = vcombine.low %v3233_v26, %v3237_v21 }
 0x629   :  { %9981 = vmatpush2.bf16.msra.mxu1 %v11993_v5  ;;  %v3365_v42 = vld [vmem:[%s17896_s7 + $0x16f8] sm:$0xff]  ;;  %v10191_v5 = vmul.f32 0.25, %v10158_v36 }
 0x62a   :  { %10022 = vmatpush2.bf16.msra.mxu0 %v12121_v12  ;;  %9982 = vmatprep.subr.bf16.mxu1 %v11986_v30  ;;  %v3225_v10 = vld [vmem:[%s17896_s7 + $0x1298] sm:$0xff]  ;;  %v12090_v44 = vcombine.high %v3361_v56, %v3365_v42  ;;  %v12089_v25 = vcombine.low %v3361_v56, %v3365_v42  ;;  %v10134_v42 = vrot.slane %v10133_v40, 2 }
 0x62b   :  { %10023 = vmatprep.subr.bf16.mxu0 %v12114_v37  ;;  %v3229_v20 = vld [vmem:[%s17896_s7 + $0x12b8] sm:$0xff]  ;;  %v10205_v37 = vmul.f32 %v17355_v50, %v17355_v50  ;;  %v17380_v22 = vsub.f32 %v16611_v7, %v10191_v5 }
 0x62c   :  { %v3353_v8 = vld [vmem:[%s17896_s7 + $0x1698] sm:$0xff]  ;;  %v11954_v63 = vcombine.high %v3225_v10, %v3229_v20  ;;  %v11953_v11 = vcombine.low %v3225_v10, %v3229_v20 }
 0x62d   :  { %9983 = vmatpush2.bf16.msra.mxu1 %v11985_v38  ;;  %v3357_v32 = vld [vmem:[%s17896_s7 + $0x16b8] sm:$0xff]  ;;  %v10146_v38 = vrot.slane %v10145_v18, 4  ;;  %v10207_v26 = vmul.f32 %v17380_v22, %v17380_v22 }
 0x62e   :  { %10024 = vmatpush2.bf16.msra.mxu0 %v12113_v39  ;;  %9984 = vmatprep.subr.bf16.mxu1 %v11978_v28  ;;  %v3217_v3 = vld [vmem:[%s17896_s7 + $0x1258] sm:$0xff]  ;;  %v12082_v30 = vcombine.high %v3353_v8, %v3357_v32  ;;  %v12081_v4 = vcombine.low %v3353_v8, %v3357_v32 }
 0x62f   :  { %10025 = vmatprep.subr.bf16.mxu0 %v12106_v60  ;;  %v3221_v54 = vld [vmem:[%s17896_s7 + $0x1278] sm:$0xff]  ;;  %v10233_v10 = vsel %vm10130_vm4, %v10207_v26, 0.0 }
 0x630   :  { %v3345_v48 = vld [vmem:[%s17896_s7 + $0x1658] sm:$0xff]  ;;  %v11946_v39 = vcombine.high %v3217_v3, %v3221_v54  ;;  %v11945_v61 = vcombine.low %v3217_v3, %v3221_v54  ;;  %v10234_v32 = vrot.slane %v10233_v10, 4  ;;  %v10135_v54 = vadd.f32 %v10134_v42, %v10133_v40 }
 0x631   :  { %9985 = vmatpush2.bf16.msra.mxu1 %v11977_v58  ;;  %v3349_v12 = vld [vmem:[%s17896_s7 + $0x1678] sm:$0xff]  ;;  %v10219_v58 = vsel %vm10130_vm4, %v10205_v37, 0.0 }
 0x632   :  { %10026 = vmatpush2.bf16.msra.mxu0 %v12105_v49  ;;  %9986 = vmatprep.subr.bf16.mxu1 %v11970_v59  ;;  %v3209_v0 = vld [vmem:[%s17896_s7 + $0x1218] sm:$0xff]  ;;  %v12074_v60 = vcombine.high %v3345_v48, %v3349_v12  ;;  %v12073_v21 = vcombine.low %v3345_v48, %v3349_v12  ;;  %v10220_v55 = vrot.slane %v10219_v58, 4 }
 0x633   :  { %10027 = vmatprep.subr.bf16.mxu0 %v12098_v24  ;;  %v3213_v33 = vld [vmem:[%s17896_s7 + $0x1238] sm:$0xff]  ;;  %v10147_v24 = vadd.f32 %v10146_v38, %v10145_v18 }
 0x634   :  { %v3337_v28 = vld [vmem:[%s17896_s7 + $0x1618] sm:$0xff]  ;;  %v11938_v23 = vcombine.high %v3209_v0, %v3213_v33  ;;  %v10221_v48 = vadd.f32 %v10220_v55, %v10219_v58 }
 0x635   :  { %9987 = vmatpush2.bf16.msra.mxu1 %v11969_v16  ;;  %v3341_v41 = vld [vmem:[%s17896_s7 + $0x1638] sm:$0xff]  ;;  %v11937_v16 = vcombine.low %v3209_v0, %v3213_v33  ;;  %v10235_v0 = vadd.f32 %v10234_v32, %v10233_v10 }
 0x636   :  { %10028 = vmatpush2.bf16.msra.mxu0 %v12097_v1  ;;  %9988 = vmatprep.subr.bf16.mxu1 %v11962_v17  ;;  %v3457_v7 = vld [vmem:[%s17896_s7 + $0x19d8] sm:$0xff]  ;;  %v12066_v56 = vcombine.high %v3337_v28, %v3341_v41  ;;  %v12065_v20 = vcombine.low %v3337_v28, %v3341_v41  ;;  %v10148_v17 = vrot.slane %v10147_v24, 2  ;;  %v10136_v28 = vrot.slane %v10135_v54, 1 }
 0x637   :  { %10029 = vmatprep.subr.bf16.mxu0 %v12090_v44  ;;  %v3461_v52 = vld [vmem:[%s17896_s7 + $0x19f8] sm:$0xff]  ;;  %v10236_v58 = vrot.slane %v10235_v0, 2 }
 0x638   :  { %v3585_v49 = vld [vmem:[%s17896_s7 + $0x1dd8] sm:$0xff]  ;;  %v12186_v47 = vcombine.high %v3457_v7, %v3461_v52  ;;  %v12185_v44 = vcombine.low %v3457_v7, %v3461_v52  ;;  %v10149_v12 = vadd.f32 %v10148_v17, %v10147_v24  ;;  %v10137_v24 = vadd.f32 %v10136_v28, %v10135_v54 }
 0x639   :  { %9989 = vmatpush2.bf16.msra.mxu1 %v11961_v51  ;;  %v3589_v59 = vld [vmem:[%s17896_s7 + $0x1df8] sm:$0xff] }
 0x63a   :  { %10030 = vmatpush2.bf16.msra.mxu0 %v12089_v25  ;;  %9990 = vmatprep.subr.bf16.mxu1 %v11954_v63  ;;  %v3449_v36 = vld [vmem:[%s17896_s7 + $0x1998] sm:$0xff]  ;;  %v12314_v1 = vcombine.high %v3585_v49, %v3589_v59  ;;  %v12313_v3 = vcombine.low %v3585_v49, %v3589_v59  ;;  %v10150_v7 = vrot.slane %v10149_v12, 1 }
 0x63b   :  { %10031 = vmatprep.subr.bf16.mxu0 %v12082_v30  ;;  %v3453_v8 = vld [vmem:[%s17896_s7 + $0x19b8] sm:$0xff] }
 0x63c   :  { %v3577_v18 = vld [vmem:[%s17896_s7 + $0x1d98] sm:$0xff]  ;;  %v12178_v5 = vcombine.high %v3449_v36, %v3453_v8  ;;  %v12177_v38 = vcombine.low %v3449_v36, %v3453_v8  ;;  %v10151_v36 = vadd.f32 %v10150_v7, %v10149_v12 }
 0x63d   :  { %9991 = vmatpush2.bf16.msra.mxu1 %v11953_v11  ;;  %v3581_v51 = vld [vmem:[%s17896_s7 + $0x1db8] sm:$0xff] }
 0x63e   :  { %10032 = vmatpush2.bf16.msra.mxu0 %v12081_v4  ;;  %9992 = vmatprep.subr.bf16.mxu1 %v11946_v39  ;;  %v3441_v25 = vld [vmem:[%s17896_s7 + $0x1958] sm:$0xff]  ;;  %v12306_v45 = vcombine.high %v3577_v18, %v3581_v51  ;;  %v10190_v12 = vmul.f32 0.25, %v10151_v36 }
 0x63f   :  { %10033 = vmatprep.subr.bf16.mxu0 %v12074_v60  ;;  %v3445_v63 = vld [vmem:[%s17896_s7 + $0x1978] sm:$0xff] }
 0x640   :  { %v3569_v37 = vld [vmem:[%s17896_s7 + $0x1d58] sm:$0xff]  ;;  %v12170_v39 = vcombine.high %v3441_v25, %v3445_v63 }
 0x641   :  { %9993 = vmatpush2.bf16.msra.mxu1 %v11945_v61  ;;  %v3573_v11 = vld [vmem:[%s17896_s7 + $0x1d78] sm:$0xff]  ;;  %v10222_v61 = vrot.slane %v10221_v48, 2 }
 0x642   :  { %10034 = vmatpush2.bf16.msra.mxu0 %v12073_v21  ;;  %9994 = vmatprep.subr.bf16.mxu1 %v11938_v23  ;;  %v12298_v40 = vcombine.high %v3569_v37, %v3573_v11  ;;  %v12169_v23 = vcombine.low %v3441_v25, %v3445_v63  ;;  %v12297_v59 = vcombine.low %v3569_v37, %v3573_v11  ;;  %v3425_v10 = vld [vmem:[%s17896_s7 + $0x18d8] sm:$0xff] }
 0x643   :  { %10035 = vmatprep.subr.bf16.mxu0 %v12066_v56  ;;  %v3553_v8 = vld [vmem:[%s17896_s7 + $0x1cd8] sm:$0xff] }
 0x644   :  { %v3557_v32 = vld [vmem:[%s17896_s7 + $0x1cf8] sm:$0xff] }
 0x645   :  { %9995 = vmatpush2.bf16.msra.mxu1 %v11937_v16  ;;  %v3417_v25 = vld [vmem:[%s17896_s7 + $0x1898] sm:$0xff] }
 0x646   :  { %10036 = vmatpush2.bf16.msra.mxu0 %v12065_v20  ;;  %10046 = vmatprep.subr.bf16.mxu1 %v12186_v47  ;;  %v3429_v20 = vld [vmem:[%s17896_s7 + $0x18f8] sm:$0xff]  ;;  %v10223_v47 = vadd.f32 %v10222_v61, %v10221_v48 }
 0x647   :  { %10087 = vmatprep.subr.bf16.mxu0 %v12314_v1  ;;  %v12154_v54 = vcombine.high %v3425_v10, %v3429_v20  ;;  %v3421_v63 = vld [vmem:[%s17896_s7 + $0x18b8] sm:$0xff] }
 0x648   :  { %v9752_v30 = vpop.f32.mrf.mxu1  ;;  %9997 = vmatmul.mubr.bf16.vlgmr.msra.gmra.mxu1 %v14501_v19  ;;  %v12305_v19 = vcombine.low %v3577_v18, %v3581_v51  ;;  %v10224_v48 = vrot.slane %v10223_v47, 1  ;;  %v3545_v37 = vld [vmem:[%s17896_s7 + $0x1c98] sm:$0xff] }
 0x649   :  { %v9793_v33 = vpop.f32.mrf.mxu0  ;;  %10038 = vmatmul.mubr.bf16.vlgmr.msra.gmra.mxu0 %v14946_v35  ;;  %10047 = vmatpush1.bf16.msra.mxu1 %v12185_v44  ;;  %v3433_v35 = vld [vmem:[%s17896_s7 + $0x1918] sm:$0xff]  ;;  %v9753_v1 = vadd.f32 %v9752_v30, %v17216_v2  ;;  %v10237_v44 = vadd.f32 %v10236_v58, %v10235_v0  ;;  %v12282_v2 = vcombine.high %v3553_v8, %v3557_v32 }
 0x64a   :  { %10078 = vmatprep.mubr.bf16.mxu1 %v14956_v6  ;;  %10088 = vmatpush1.bf16.msra.mxu0 %v12313_v3  ;;  %v9754_v4 = vpop.f32.mrf.mxu1  ;;  %v3437_v6 = vld [vmem:[%s17896_s7 + $0x1938] sm:$0xff] }
 0x64b   :  { %10119 = vmatprep.mubr.bf16.mxu0 %v14966_v15  ;;  %v9755_v41 = vadd.f32 %v9754_v4, %v17226_v27  ;;  %v9795_v60 = vpop.f32.mrf.mxu0  ;;  %10048 = vmatprep.subr.bf16.mxu1 %v12178_v5  ;;  %v3561_v15 = vld [vmem:[%s17896_s7 + $0x1d18] sm:$0xff]  ;;  %v12162_v56 = vcombine.high %v3433_v35, %v3437_v6  ;;  %v12161_v18 = vcombine.low %v3433_v35, %v3437_v6  ;;  %v10188_v5 = vmul.f32 0.25, %v10137_v24 }
 0x64c   :  { %v9756_v52 = vpop.f32.mrf.mxu1  ;;  %10089 = vmatprep.subr.bf16.mxu0 %v12306_v45  ;;  %v3565_v27 = vld [vmem:[%s17896_s7 + $0x1d38] sm:$0xff]  ;;  %v17468_v30 = vadd.f32 %v9793_v33, %v9753_v1  ;;  %v10238_v0 = vrot.slane %v10237_v44, 1  ;;  %v17486_v35 = vsub.f32 %v16595_v62, %v10190_v12 }
 0x64d   :  { %v17445_v26 = vadd.f32 %v9795_v60, %v9755_v41  ;;  %v9797_v21 = vpop.f32.mrf.mxu0  ;;  %10049 = vmatpush1.bf16.msra.mxu1 %v12177_v38  ;;  %v12290_v16 = vcombine.high %v3561_v15, %v3565_v27  ;;  %v12289_v3 = vcombine.low %v3561_v15, %v3565_v27  ;;  %v3549_v11 = vld [vmem:[%s17896_s7 + $0x1cb8] sm:$0xff]  ;;  %v12153_v38 = vcombine.low %v3425_v10, %v3429_v20 }
 0x64e   :  { %10090 = vmatpush1.bf16.msra.mxu0 %v12305_v19  ;;  %v9757_v49 = vpop.f32.mrf.mxu1  ;;  %10050 = vmatprep.subr.bf16.mxu1 %v12170_v39  ;;  %v12281_v19 = vcombine.low %v3553_v8, %v3557_v32  ;;  %v12146_v39 = vcombine.high %v3417_v25, %v3421_v63  ;;  %v17477_v33 = vsub.f32 %v15778_v29, %v10188_v5  ;;  %v3409_v41 = vld [vmem:[%s17896_s7 + $0x1858] sm:$0xff]  ;;  %v10159_v6 = vsel %vm10130_vm4, %v17468_v30, 0.0 }
 0x64f   :  { %v10166_v42 = vsel %vm10130_vm4, %v17445_v26, 0.0  ;;  %v9798_v55 = vpop.f32.mrf.mxu0  ;;  %10091 = vmatprep.subr.bf16.mxu0 %v12298_v40  ;;  %v12274_v28 = vcombine.high %v3545_v37, %v3549_v11  ;;  %v3413_v60 = vld [vmem:[%s17896_s7 + $0x1878] sm:$0xff]  ;;  %v10225_v40 = vadd.f32 %v10224_v48, %v10223_v47  ;;  %v10239_v52 = vadd.f32 %v10238_v0, %v10237_v44 }
 0x650   :  { %v10167_v17 = vrot.slane %v10166_v42, 4  ;;  %v3537_v29 = vld [vmem:[%s17896_s7 + $0x1c58] sm:$0xff]  ;;  %v12145_v15 = vcombine.low %v3417_v25, %v3421_v63  ;;  %v12273_v62 = vcombine.low %v3545_v37, %v3549_v11  ;;  %v12138_v58 = vcombine.high %v3409_v41, %v3413_v60 }
 0x651   :  { %10051 = vmatpush1.bf16.msra.mxu1 %v12169_v23  ;;  %v3541_v7 = vld [vmem:[%s17896_s7 + $0x1c78] sm:$0xff]  ;;  %v10204_v21 = vmul.f32 %v17477_v33, %v17477_v33  ;;  %v10160_v23 = vrot.slane %v10159_v6, 4  ;;  %v10269_v24 = vmul.f32 0.25, %v10225_v40  ;;  %v10271_v20 = vmul.f32 0.25, %v10239_v52 }
 0x652   :  { %v10168_v51 = vadd.f32 %v10167_v17, %v10166_v42  ;;  %10092 = vmatpush1.bf16.msra.mxu0 %v12297_v59  ;;  %10052 = vmatprep.subr.bf16.mxu1 %v12162_v56  ;;  %v12266_v49 = vcombine.high %v3537_v29, %v3541_v7  ;;  %v3401_v59 = vld [vmem:[%s17896_s7 + $0x1818] sm:$0xff]  ;;  %v10206_v42 = vmul.f32 %v17486_v35, %v17486_v35 }
 0x653   :  { %10093 = vmatprep.subr.bf16.mxu0 %v12290_v16  ;;  %v3405_v56 = vld [vmem:[%s17896_s7 + $0x1838] sm:$0xff]  ;;  %v12137_v47 = vcombine.low %v3409_v41, %v3413_v60  ;;  %v12265_v1 = vcombine.low %v3537_v29, %v3541_v7  ;;  %v10212_v8 = vsel %vm10130_vm4, %v10204_v21, 0.0  ;;  %v10161_v32 = vadd.f32 %v10160_v23, %v10159_v6 }
 0x654   :  { %v10169_v45 = vrot.slane %v10168_v51, 2  ;;  %v3529_v16 = vld [vmem:[%s17896_s7 + $0x1c18] sm:$0xff]  ;;  %v12130_v17 = vcombine.high %v3401_v59, %v3405_v56  ;;  %v10279_v25 = vadd.f32 1e-05, %v10271_v20  ;;  %v12129_v63 = vcombine.low %v3401_v59, %v3405_v56 }
 0x655   :  { %10053 = vmatpush1.bf16.msra.mxu1 %v12161_v18  ;;  %v3533_v10 = vld [vmem:[%s17896_s7 + $0x1c38] sm:$0xff]  ;;  %v10213_v48 = vrot.slane %v10212_v8, 4  ;;  %v10162_v0 = vrot.slane %v10161_v32, 2 }
 0x656   :  { %v10170_v4 = vadd.f32 %v10169_v45, %v10168_v51  ;;  %10094 = vmatpush1.bf16.msra.mxu0 %v12289_v3  ;;  %10054 = vmatprep.subr.bf16.mxu1 %v12154_v54  ;;  %v12258_v44 = vcombine.high %v3529_v16, %v3533_v10  ;;  %v3521_v18 = vld [vmem:[%s17896_s7 + $0x1bd8] sm:$0xff]  ;;  %v10277_v3 = vadd.f32 1e-05, %v10269_v24  ;;  %v12257_v45 = vcombine.low %v3529_v16, %v3533_v10 }
 0x657   :  { %10095 = vmatprep.subr.bf16.mxu0 %v12282_v2  ;;  %v3525_v51 = vld [vmem:[%s17896_s7 + $0x1bf8] sm:$0xff]  ;;  %v10214_v40 = vadd.f32 %v10213_v48, %v10212_v8  ;;  %v10163_v7 = vadd.f32 %v10162_v0, %v10161_v32  ;;  %v17583_v0 = vld [vmem:[%s17901_s9] sm:$0xff] }
 0x658   :  { %v10171_v61 = vrot.slane %v10170_v4, 1  ;;  %v3649_v5 = vld [vmem:[%s17896_s7 + $0x1fd8] sm:$0xff]  ;;  %v12250_v37 = vcombine.high %v3521_v18, %v3525_v51  ;;  %13184 = vrsqrt.f32 %v10277_v3  ;;  %v12249_v60 = vcombine.low %v3521_v18, %v3525_v51 }
 0x659   :  { %10055 = vmatpush1.bf16.msra.mxu1 %v12153_v38  ;;  %v3653_v2 = vld [vmem:[%s17896_s7 + $0x1ff8] sm:$0xff]  ;;  %13186 = vrsqrt.f32 %v10279_v25 }
 0x65a   :  { %v10172_v27 = vadd.f32 %v10171_v61, %v10170_v4  ;;  %10096 = vmatpush1.bf16.msra.mxu0 %v12281_v19  ;;  %10056 = vmatprep.subr.bf16.mxu1 %v12146_v39  ;;  %v12378_v38 = vcombine.high %v3649_v5, %v3653_v2  ;;  %v3513_v4 = vld [vmem:[%s17896_s7 + $0x1b98] sm:$0xff]  ;;  %v12377_v6 = vcombine.low %v3649_v5, %v3653_v2 }
 0x65b   :  { %10097 = vmatprep.subr.bf16.mxu0 %v12274_v28  ;;  %v3517_v19 = vld [vmem:[%s17896_s7 + $0x1bb8] sm:$0xff] }
 0x65c   :  { %v10193_v55 = vmul.f32 0.25, %v10172_v27  ;;  %v3641_v28 = vld [vmem:[%s17896_s7 + $0x1f98] sm:$0xff]  ;;  %v12242_v61 = vcombine.high %v3513_v4, %v3517_v19  ;;  %v12241_v23 = vcombine.low %v3513_v4, %v3517_v19 }
 0x65d   :  { %10057 = vmatpush1.bf16.msra.mxu1 %v12145_v15  ;;  %v3645_v41 = vld [vmem:[%s17896_s7 + $0x1fb8] sm:$0xff] }
 0x65e   :  { %v17513_v36 = vsub.f32 %v17445_v26, %v10193_v55  ;;  %10098 = vmatpush1.bf16.msra.mxu0 %v12273_v62  ;;  %10058 = vmatprep.subr.bf16.mxu1 %v12138_v58  ;;  %v10226_v26 = vsel %vm10130_vm4, %v10206_v42, 0.0  ;;  %v12370_v52 = vcombine.high %v3641_v28, %v3645_v41  ;;  %v3505_v15 = vld [vmem:[%s17896_s7 + $0x1b58] sm:$0xff]  ;;  %v12369_v59 = vcombine.low %v3641_v28, %v3645_v41 }
 0x65f   :  { %10099 = vmatprep.subr.bf16.mxu0 %v12266_v49  ;;  %v10227_v11 = vrot.slane %v10226_v26, 4  ;;  %v3509_v27 = vld [vmem:[%s17896_s7 + $0x1b78] sm:$0xff]  ;;  %v10215_v49 = vrot.slane %v10214_v40, 2  ;;  %v10164_v42 = vrot.slane %v10163_v7, 1 }
 0x660   :  { %v10209_v54 = vmul.f32 %v17513_v36, %v17513_v36  ;;  %v3633_v58 = vld [vmem:[%s17896_s7 + $0x1f58] sm:$0xff]  ;;  %v12234_v56 = vcombine.high %v3505_v15, %v3509_v27 }
 0x661   :  { %10059 = vmatpush1.bf16.msra.mxu1 %v12137_v47  ;;  %v10228_v29 = vadd.f32 %v10227_v11, %v10226_v26  ;;  %v3637_v21 = vld [vmem:[%s17896_s7 + $0x1f78] sm:$0xff]  ;;  %v10216_v8 = vadd.f32 %v10215_v49, %v10214_v40  ;;  %v10165_v51 = vadd.f32 %v10164_v42, %v10163_v7  ;;  %v10316_v7 = vrot.slane %v17583_v0, %v15956_v53 }
 0x662   :  { %v10247_v12 = vsel %vm10130_vm4, %v10209_v54, 0.0  ;;  %10100 = vmatpush1.bf16.msra.mxu0 %v12265_v1  ;;  %10060 = vmatprep.subr.bf16.mxu1 %v12130_v17  ;;  %v12362_v55 = vcombine.high %v3633_v58, %v3637_v21  ;;  %v3497_v16 = vld [vmem:[%s17896_s7 + $0x1b18] sm:$0xff]  ;;  %v12233_v17 = vcombine.low %v3505_v15, %v3509_v27  ;;  %v12361_v32 = vcombine.low %v3633_v58, %v3637_v21 }
 0x663   :  { %10101 = vmatprep.subr.bf16.mxu0 %v12258_v44  ;;  %v10248_v39 = vrot.slane %v10247_v12, 4  ;;  %v10229_v24 = vrot.slane %v10228_v29, 2  ;;  %v3501_v10 = vld [vmem:[%s17896_s7 + $0x1b38] sm:$0xff]  ;;  %v10192_v4 = vmul.f32 0.25, %v10165_v51 }
 0x664   :  { %v3625_v47 = vld [vmem:[%s17896_s7 + $0x1f18] sm:$0xff]  ;;  %v12226_v44 = vcombine.high %v3497_v16, %v3501_v10  ;;  %v12225_v48 = vcombine.low %v3497_v16, %v3501_v10 }
 0x665   :  { %10061 = vmatpush1.bf16.msra.mxu1 %v12129_v63  ;;  %v10249_v62 = vadd.f32 %v10248_v39, %v10247_v12  ;;  %v3629_v1 = vld [vmem:[%s17896_s7 + $0x1f38] sm:$0xff]  ;;  %v10230_v18 = vadd.f32 %v10229_v24, %v10228_v29  ;;  %v13185_v63 = vpop.eup %13184  ;;  %v17609_v21 = vsub.f32 %v17468_v30, %v10192_v4 }
 0x666   :  { %10102 = vmatpush1.bf16.msra.mxu0 %v12257_v45  ;;  %10062 = vmatprep.subr.bf16.mxu1 %v12250_v37  ;;  %v12354_v3 = vcombine.high %v3625_v47, %v3629_v1  ;;  %v3489_v26 = vld [vmem:[%s17896_s7 + $0x1ad8] sm:$0xff]  ;;  %v13187_v12 = vpop.eup %13186  ;;  %v10217_v45 = vrot.slane %v10216_v8, 1  ;;  %v12353_v37 = vcombine.low %v3625_v47, %v3629_v1  ;;  %v10293_v41 = vmul.f32 %v13185_v63, %v17355_v50 }
 0x667   :  { %10103 = vmatprep.subr.bf16.mxu0 %v12378_v38  ;;  %v10250_v20 = vrot.slane %v10249_v62, 2  ;;  %v3493_v54 = vld [vmem:[%s17896_s7 + $0x1af8] sm:$0xff]  ;;  %v10231_v38 = vrot.slane %v10230_v18, 1  ;;  %v10295_v29 = vmul.f32 %v13187_v12, %v17380_v22 }
 0x668   :  { %v3617_v2 = vld [vmem:[%s17896_s7 + $0x1ed8] sm:$0xff]  ;;  %v12218_v11 = vcombine.high %v3489_v26, %v3493_v54  ;;  %v10218_v50 = vadd.f32 %v10217_v45, %v10216_v8  ;;  %v10208_v8 = vmul.f32 %v17609_v21, %v17609_v21 }
 0x669   :  { %10063 = vmatpush2.bf16.msra.mxu1 %v12249_v60  ;;  %v10251_v5 = vadd.f32 %v10250_v20, %v10249_v62  ;;  %v3621_v25 = vld [vmem:[%s17896_s7 + $0x1ef8] sm:$0xff]  ;;  %v10308_v60 = vrot.slane %v17583_v0, %v17947_v14  ;;  %v17606_v62 = vld [vmem:[%s17902_s10] sm:$0xff]  ;;  %v10232_v58 = vadd.f32 %v10231_v38, %v10230_v18  ;;  %v17643_v38 = vsub.s32 6, %v17948_v57 }
 0x66a   :  { %10104 = vmatpush2.bf16.msra.mxu0 %v12377_v6  ;;  %10064 = vmatprep.subr.bf16.mxu1 %v12242_v61  ;;  %v12346_v19 = vcombine.high %v3617_v2, %v3621_v25  ;;  %v3481_v39 = vld [vmem:[%s17896_s7 + $0x1a98] sm:$0xff]  ;;  %v12345_v15 = vcombine.low %v3617_v2, %v3621_v25  ;;  %v10357_v42 = vrot.slane %v17606_v62, %v17947_v14  ;;  %v10268_v20 = vmul.f32 0.25, %v10218_v50 }
 0x66b   :  { %10105 = vmatprep.subr.bf16.mxu0 %v12370_v52  ;;  %v3485_v28 = vld [vmem:[%s17896_s7 + $0x1ab8] sm:$0xff]  ;;  %v10252_v40 = vrot.slane %v10251_v5, 1  ;;  %v12217_v52 = vcombine.low %v3489_v26, %v3493_v54  ;;  %v10365_v10 = vrot.slane %v17606_v62, %v15956_v53 }
 0x66c   :  { %v3609_v6 = vld [vmem:[%s17896_s7 + $0x1e98] sm:$0xff]  ;;  %v12210_v27 = vcombine.high %v3481_v39, %v3485_v28  ;;  %v12209_v16 = vcombine.low %v3481_v39, %v3485_v28 }
 0x66d   :  { %10065 = vmatpush2.bf16.msra.mxu1 %v12241_v23  ;;  %v3613_v61 = vld [vmem:[%s17896_s7 + $0x1eb8] sm:$0xff] }
 0x66e   :  { %10106 = vmatpush2.bf16.msra.mxu0 %v12369_v59  ;;  %10066 = vmatprep.subr.bf16.mxu1 %v12234_v56  ;;  %v12338_v22 = vcombine.high %v3609_v6, %v3613_v61  ;;  %v3473_v23 = vld [vmem:[%s17896_s7 + $0x1a58] sm:$0xff]  ;;  %v10342_v59 = vmul.f32 %v10308_v60, %v10293_v41  ;;  %v10253_v56 = vadd.f32 %v10252_v40, %v10251_v5  ;;  %v10276_v5 = vadd.f32 1e-05, %v10268_v20 }
 0x66f   :  { %10107 = vmatprep.subr.bf16.mxu0 %v12362_v55  ;;  %v3477_v49 = vld [vmem:[%s17896_s7 + $0x1a78] sm:$0xff]  ;;  %v10344_v55 = vmul.f32 %v10316_v7, %v10295_v29  ;;  %v12337_v47 = vcombine.low %v3609_v6, %v3613_v61  ;;  %v17652_v60 = vsub.s32 7, %v17948_v57  ;;  %v13207_v6 = vld [vmem:[%s17899_s8] sm:$0xff] }
 0x670   :  { %v3601_v24 = vld [vmem:[%s17896_s7 + $0x1e58] sm:$0xff]  ;;  %v12202_v1 = vcombine.high %v3473_v23, %v3477_v49  ;;  %v10273_v53 = vmul.f32 0.25, %v10253_v56  ;;  %v12201_v26 = vcombine.low %v3473_v23, %v3477_v49  ;;  %13188 = vrsqrt.f32 %v10276_v5  ;;  %v13124_v56 = vld [vmem:[%s17900_s11 + $0x30] sm:$0xff]  }
 0x671   :  { %10067 = vmatpush2.bf16.msra.mxu1 %v12233_v17  ;;  %v3605_v30 = vld [vmem:[%s17896_s7 + $0x1e78] sm:$0xff]  ;;  %v10270_v17 = vmul.f32 0.25, %v10232_v58  ;;  %v10393_v54 = vadd.f32 %v10365_v10, %v10344_v55  ;;  %v3683_v61 = vrot.slane %v13207_v6, %v17643_v38  ;;  %v3687_v50 = vrot.slane %v13207_v6, %v17652_v60  ;;  %v13127_v10 = vld [vmem:[%s17900_s11 + $0xe8] sm:$0xff]  }
 0x672   :  { %10108 = vmatpush2.bf16.msra.mxu0 %v12361_v32  ;;  %10068 = vmatprep.subr.bf16.mxu1 %v12226_v44  ;;  %v12330_v32 = vcombine.high %v3601_v24, %v3605_v30  ;;  %v3465_v14 = vld [vmem:[%s17896_s7 + $0x1a18] sm:$0xff]  ;;  %v12329_v2 = vcombine.low %v3601_v24, %v3605_v30  ;;  %v10281_v45 = vadd.f32 1e-05, %v10273_v53 }
 0x673   :  { %10109 = vmatprep.subr.bf16.mxu0 %v12354_v3  ;;  %v3469_v44 = vld [vmem:[%s17896_s7 + $0x1a38] sm:$0xff]  ;;  %v10391_v3 = vadd.f32 %v10357_v42, %v10342_v59  ;;  %v10278_v63 = vadd.f32 1e-05, %v10270_v17  ;;  %v10401_v4 = vmul.f32 0.2, %v10393_v54  ;;  %v13126_v42 = vld [vmem:[%s17900_s11 + $0x68] sm:$0xff]  }
 0x674   :  { %v3593_v18 = vld [vmem:[%s17896_s7 + $0x1e18] sm:$0xff]  ;;  %v12194_v25 = vcombine.high %v3465_v14, %v3469_v44  ;;  %v13128_v17 = vld [vmem:[%s17900_s11 + $0x28] sm:$0xff]  }
 0x675   :  { %10069 = vmatpush2.bf16.msra.mxu1 %v12225_v48  ;;  %v3597_v51 = vld [vmem:[%s17896_s7 + $0x1e38] sm:$0xff]  ;;  %v10240_v48 = vsel %vm10130_vm4, %v10208_v8, 0.0  ;;  %13190 = vrsqrt.f32 %v10278_v63  ;;  %v10409_v7 = vmax.f32 %v10393_v54, %v10401_v4  ;;  %v13132_v54 = vld [vmem:[%s17900_s11 + $0x20] sm:$0xff]  }
 0x676   :  { %10110 = vmatpush2.bf16.msra.mxu0 %v12353_v37  ;;  %10070 = vmatprep.subr.bf16.mxu1 %v12218_v11  ;;  %v12322_v12 = vcombine.high %v3593_v18, %v3597_v51  ;;  %v10399_v37 = vmul.f32 0.2, %v10391_v3  ;;  %v12193_v11 = vcombine.low %v3465_v14, %v3469_v44  ;;  %v12321_v39 = vcombine.low %v3593_v18, %v3597_v51  ;;  %v13118_v28 = vld [vmem:[%s17900_s11 + $0x78] sm:$0xff]   ;;  %v13129_v14 = vld [vmem:[%s17900_s11 + $0xa8] sm:$0xff]   ;;  %v13130_v44 = vld [vmem:[%s17900_s11 + $0x60] sm:$0xff]  }
 0x677   :  { %10111 = vmatprep.subr.bf16.mxu0 %v12346_v19  ;;  %v10241_v19 = vrot.slane %v10240_v48, 4  ;;  %v13119_v41 = vld [vmem:[%s17900_s11 + $0xf8] sm:$0xff]   ;;  %13192 = vrsqrt.f32 %v10281_v45  ;;  %v10417_v59 = vpack.c.bf16 %v10409_v7, %v10409_v7  ;;  %v13131_v51 = vld [vmem:[%s17900_s11 + $0xe0] sm:$0xff]   ;;  %v10312_v45 = vrot.slane %v17583_v0, %v15953_v31 }
 0x678   :  { %v10407_v40 = vmax.f32 %v10391_v3, %v10399_v37  ;;  %v13120_v29 = vld [vmem:[%s17900_s11 + $0x38] sm:$0xff]   ;;  %v13133_v63 = vld [vmem:[%s17900_s11 + $0xa0] sm:$0xff]  }
 0x679   :  { %10071 = vmatpush2.bf16.msra.mxu1 %v12217_v52  ;;  %v10242_v52 = vadd.f32 %v10241_v19, %v10240_v48  ;;  %v13121_v57 = vld [vmem:[%s17900_s11 + $0xb8] sm:$0xff]  }
 0x67a   :  { %10112 = vmatpush2.bf16.msra.mxu0 %v12345_v15  ;;  %10072 = vmatprep.subr.bf16.mxu1 %v12210_v27  ;;  %v13122_v15 = vld [vmem:[%s17900_s11 + $0x70] sm:$0xff]   ;;  %v10415_v58 = vpack.c.bf16 %v10407_v40, %v10407_v40  ;;  %v13134_v48 = vld [vmem:[%s17900_s11 + $0x58] sm:$0xff]   ;;  %v10361_v40 = vrot.slane %v17606_v62, %v15953_v31 }
 0x67b   :  { %10113 = vmatprep.subr.bf16.mxu0 %v12338_v22  ;;  %v13123_v22 = vld [vmem:[%s17900_s11 + $0xf0] sm:$0xff]   ;;  %v10243_v24 = vrot.slane %v10242_v52, 2  ;;  %v13136_v4 = vld [vmem:[%s17900_s11 + $0x18] sm:$0xff]  }
 0x67c   :  { %v13141_v31 = vld [vmem:[%s17900_s11 + $0x90] sm:$0xff]  }
 0x67d   :  { %10073 = vmatpush2.bf16.msra.mxu1 %v12209_v16  ;;  %v10244_v8 = vadd.f32 %v10243_v24, %v10242_v52  ;;  %v13189_v53 = vpop.eup %13188 }
 0x67e   :  { %10114 = vmatpush2.bf16.msra.mxu0 %v12337_v47  ;;  %10074 = vmatprep.subr.bf16.mxu1 %v12202_v1  ;;  %v10292_v5 = vmul.f32 %v13189_v53, %v17477_v33  ;;  %v13135_v33 = vld [vmem:[%s17900_s11 + $0xd8] sm:$0xff]   ;;  %v13155_v53 = vld [vmem:[%s17900_s11 + $0x128] sm:$0xff]  }
 0x67f   :  { %10115 = vmatprep.subr.bf16.mxu0 %v12330_v32 }
 0x681   :  { %10075 = vmatpush2.bf16.msra.mxu1 %v12201_v26 }
 0x682   :  { %10116 = vmatpush2.bf16.msra.mxu0 %v12329_v2  ;;  %10076 = vmatprep.subr.bf16.mxu1 %v12194_v25  ;;  %v13191_v3 = vpop.eup %13190  ;;  %v10304_v2 = vrot.slane %v17583_v0, %v17946_v46  ;;  %v10245_v25 = vrot.slane %v10244_v8, 1 }
 0x683   :  { %10117 = vmatprep.subr.bf16.mxu0 %v12322_v12  ;;  %v10294_v12 = vmul.f32 %v13191_v3, %v17486_v35  ;;  %v10353_v35 = vrot.slane %v17606_v62, %v17946_v46  ;;  %v13139_v46 = vld [vmem:[%s17900_s11 + $0xd0] sm:$0xff]   ;;  %v13157_v3 = vld [vmem:[%s17900_s11 + $0x120] sm:$0xff]  }
 0x684   :  { %v13193_v26 = vpop.eup %13192  ;;  %v10341_v19 = vmul.f32 %v10304_v2, %v10292_v5  ;;  %v13158_v5 = vld [vmem:[%s17900_s11 + $0x158] sm:$0xff]  }
 0x685   :  { %10077 = vmatpush2.bf16.msra.mxu1 %v12193_v11  ;;  %v10297_v37 = vmul.f32 %v13193_v26, %v17513_v36  ;;  %v10324_v11 = vrot.slane %v17583_v0, %v16773_v43  ;;  %v13138_v36 = vld [vmem:[%s17900_s11 + $0x50] sm:$0xff]   ;;  %v13159_v2 = vld [vmem:[%s17900_s11 + $0x118] sm:$0xff]  }
 0x686   :  { %10118 = vmatpush2.bf16.msra.mxu0 %v12321_v39  ;;  %12813 = vmatprep.subr.bf16.mxu1 %v13118_v28  ;;  %v10246_v39 = vadd.f32 %v10245_v25, %v10244_v8  ;;  %v13137_v28 = vld [vmem:[%s17900_s11 + $0x98] sm:$0xff]   ;;  %v10390_v7 = vadd.f32 %v10353_v35, %v10341_v19 }
 0x687   :  { %12835 = vmatprep.subr.bf16.mxu0 %v13119_v41  ;;  %v10343_v41 = vmul.f32 %v10312_v45, %v10294_v12  ;;  %v10346_v6 = vmul.f32 %v10324_v11, %v10297_v37  ;;  %v13162_v45 = vld [vmem:[%s17900_s11 + $0x148] sm:$0xff]   ;;  %v13164_v37 = vld [vmem:[%s17900_s11 + $0x140] sm:$0xff]  }
 0x688   :  { %v9834_v27 = vpop.f32.mrf.mxu1  ;;  %10079 = vmatmul.mubr.bf16.vlgmr.msra.gmra.mxu1 %v14510_v34  ;;  %v13125_v34 = vld [vmem:[%s17900_s11 + $0xb0] sm:$0xff]   ;;  %v10272_v52 = vmul.f32 0.25, %v10246_v39  ;;  %v13165_v11 = vld [vmem:[%s17900_s11 + $0x100] sm:$0xff]  }
 0x689   :  { %v9835_v23 = vadd.f32 %v9834_v27, %v3683_v61  ;;  %v9875_v49 = vpop.f32.mrf.mxu0  ;;  %10120 = vmatmul.mubr.bf16.vlgmr.msra.gmra.mxu0 %v15155_v13  ;;  %12814 = vmatpush3.bf16.msra.mxu1 %v13120_v29  ;;  %v10373_v61 = vrot.slane %v17606_v62, %v16773_v43  ;;  %v13140_v29 = vld [vmem:[%s17900_s11 + $0x10] sm:$0xff]   ;;  %v13143_v43 = vld [vmem:[%s17900_s11 + $0xc8] sm:$0xff]  }
 0x68a   :  { %10973 = vmatprep.mubr.bf16.mxu1 %v10415_v58  ;;  %12836 = vmatpush3.bf16.msra.mxu0 %v13121_v57  ;;  %v9836_v30 = vpop.f32.mrf.mxu1  ;;  %v13142_v57 = vld [vmem:[%s17900_s11 + $0x48] sm:$0xff]   ;;  %v10398_v58 = vmul.f32 0.2, %v10390_v7 }
 0x68b   :  { %v17682_v55 = vadd.f32 %v9875_v49, %v9835_v23  ;;  %11013 = vmatprep.mubr.bf16.mxu0 %v10417_v59  ;;  %v9837_v13 = vadd.f32 %v9836_v30, %v3687_v50  ;;  %v9877_v16 = vpop.f32.mrf.mxu0  ;;  %12815 = vmatprep.subr.bf16.mxu1 %v13122_v15  ;;  %v10392_v50 = vadd.f32 %v10361_v40, %v10343_v41  ;;  %v13144_v27 = vld [vmem:[%s17900_s11 + $0x8] sm:$0xff]   ;;  %v13146_v49 = vld [vmem:[%s17900_s11 + $0x40] sm:$0xff]  }
 0x68c   :  { %v9838_v20 = vpop.f32.mrf.mxu1  ;;  %12837 = vmatprep.subr.bf16.mxu0 %v13123_v22  ;;  %v10395_v15 = vadd.f32 %v10373_v61, %v10346_v6  ;;  %v10280_v22 = vadd.f32 1e-05, %v10272_v52  ;;  %v13145_v23 = vld [vmem:[%s17900_s11 + $0x88] sm:$0xff]   ;;  %v13148_v30 = vld [vmem:[%s17900_s11] sm:$0xff]  }
 0x68d   :  { %v17687_v47 = vadd.f32 %v9877_v16, %v9837_v13  ;;  %v9879_v1 = vpop.f32.mrf.mxu0  ;;  %12816 = vmatpush3.bf16.msra.mxu1 %v13124_v56  ;;  %v10400_v59 = vmul.f32 0.2, %v10392_v50  ;;  %v13147_v56 = vld [vmem:[%s17900_s11 + $0xc0] sm:$0xff]   ;;  %v13150_v13 = vld [vmem:[%s17900_s11 + $0x178] sm:$0xff]  }
 0x68e   :  { %12838 = vmatpush3.bf16.msra.mxu0 %v13125_v34  ;;  %v9839_v32 = vpop.f32.mrf.mxu1  ;;  %12817 = vmatprep.subr.bf16.mxu1 %v13126_v42  ;;  %v10403_v24 = vmul.f32 0.2, %v10395_v15  ;;  %v10406_v34 = vmax.f32 %v10390_v7, %v10398_v58  ;;  %13194 = vrsqrt.f32 %v10280_v22  ;;  %v13149_v42 = vld [vmem:[%s17900_s11 + $0x80] sm:$0xff]   ;;  %v13151_v20 = vld [vmem:[%s17900_s11 + $0x138] sm:$0xff]  }
 0x68f   :  { %v9880_v18 = vpop.f32.mrf.mxu0  ;;  %12839 = vmatprep.subr.bf16.mxu0 %v13127_v10  ;;  %v10408_v16 = vmax.f32 %v10392_v50, %v10400_v59  ;;  %v13170_v50 = vld [vmem:[%s17900_s11 + $0x1e8] sm:$0xff]   ;;  %v13174_v58 = vld [vmem:[%s17900_s11 + $0x1d8] sm:$0xff]  }
 0x690   :  { %v10411_v10 = vmax.f32 %v10395_v15, %v10403_v24  ;;  %v10414_v1 = vpack.c.bf16 %v10406_v34, %v10406_v34  ;;  %v13156_v18 = vld [vmem:[%s17900_s11 + $0x160] sm:$0xff]   ;;  %v13175_v22 = vld [vmem:[%s17900_s11 + $0x198] sm:$0xff]   ;;  %v13179_v34 = vld [vmem:[%s17900_s11 + $0x188] sm:$0xff]  }
 0x691   :  { %12818 = vmatpush3.bf16.msra.mxu1 %v13128_v17  ;;  %v13152_v17 = vld [vmem:[%s17900_s11 + $0x170] sm:$0xff]   ;;  %v10416_v8 = vpack.c.bf16 %v10408_v16, %v10408_v16  ;;  %v13172_v15 = vld [vmem:[%s17900_s11 + $0x1e0] sm:$0xff]  }
 0x692   :  { %12840 = vmatpush3.bf16.msra.mxu0 %v13129_v14  ;;  %12819 = vmatprep.subr.bf16.mxu1 %v13130_v44  ;;  %v10419_v32 = vpack.c.bf16 %v10411_v10, %v10411_v10  ;;  %v13153_v14 = vld [vmem:[%s17900_s11 + $0x130] sm:$0xff]   ;;  %v13154_v44 = vld [vmem:[%s17900_s11 + $0x168] sm:$0xff]  }
 0x693   :  { %12841 = vmatprep.subr.bf16.mxu0 %v13131_v51 }
 0x695   :  { %12820 = vmatpush3.bf16.msra.mxu1 %v13132_v54  ;;  %v10320_v54 = vrot.slane %v17583_v0, %v16770_v9 }
 0x696   :  { %12842 = vmatpush3.bf16.msra.mxu0 %v13133_v63  ;;  %12821 = vmatprep.subr.bf16.mxu1 %v13134_v48  ;;  %v10369_v63 = vrot.slane %v17606_v62, %v16770_v9  ;;  %v13161_v48 = vld [vmem:[%s17900_s11 + $0x110] sm:$0xff]   ;;  %v13163_v9 = vld [vmem:[%s17900_s11 + $0x108] sm:$0xff]  }
 0x697   :  { %12843 = vmatprep.subr.bf16.mxu0 %v13135_v33 }
 0x699   :  { %12822 = vmatpush3.bf16.msra.mxu1 %v13136_v4 }
 0x69a   :  { %12844 = vmatpush3.bf16.msra.mxu0 %v13137_v28  ;;  %12823 = vmatprep.subr.bf16.mxu1 %v13138_v36 }
 0x69b   :  { %12845 = vmatprep.subr.bf16.mxu0 %v13139_v46  ;;  %v13195_v51 = vpop.eup %13194 }
 0x69c   :  { %v10296_v26 = vmul.f32 %v13195_v51, %v17609_v21  ;;  %v13160_v21 = vld [vmem:[%s17900_s11 + $0x150] sm:$0xff]  }
 0x69d   :  { %12824 = vmatpush3.bf16.msra.mxu1 %v13140_v29 }
 0x69e   :  { %12846 = vmatpush3.bf16.msra.mxu0 %v13141_v31  ;;  %12825 = vmatprep.subr.bf16.mxu1 %v13142_v57  ;;  %v10345_v25 = vmul.f32 %v10320_v54, %v10296_v26  ;;  %v13166_v31 = vld [vmem:[%s17900_s11 + $0x1f8] sm:$0xff]  }
 0x69f   :  { %12847 = vmatprep.subr.bf16.mxu0 %v13143_v43  ;;  %v13167_v57 = vld [vmem:[%s17900_s11 + $0x1b8] sm:$0xff]   ;;  %v13171_v43 = vld [vmem:[%s17900_s11 + $0x1a8] sm:$0xff]  }
 0x6a0   :  { %v10394_v12 = vadd.f32 %v10369_v63, %v10345_v25 }
 0x6a1   :  { %12826 = vmatpush3.bf16.msra.mxu1 %v13144_v27  ;;  %v13173_v27 = vld [vmem:[%s17900_s11 + $0x1a0] sm:$0xff]  }
 0x6a2   :  { %12848 = vmatpush3.bf16.msra.mxu0 %v13145_v23  ;;  %12827 = vmatprep.subr.bf16.mxu1 %v13146_v49  ;;  %v10402_v33 = vmul.f32 0.2, %v10394_v12  ;;  %v13176_v23 = vld [vmem:[%s17900_s11 + $0x1d0] sm:$0xff]  }
 0x6a3   :  { %12849 = vmatprep.subr.bf16.mxu0 %v13147_v56  ;;  %v13177_v49 = vld [vmem:[%s17900_s11 + $0x190] sm:$0xff]   ;;  %v13178_v56 = vld [vmem:[%s17900_s11 + $0x1c8] sm:$0xff]  }
 0x6a4   :  { %v10410_v4 = vmax.f32 %v10394_v12, %v10402_v33 }
 0x6a5   :  { %12828 = vmatpush3.bf16.msra.mxu1 %v13148_v30 }
 0x6a6   :  { %12850 = vmatpush3.bf16.msra.mxu0 %v13149_v42  ;;  %12857 = vmatprep.subr.bf16.mxu1 %v13150_v13  ;;  %v10418_v19 = vpack.c.bf16 %v10410_v4, %v10410_v4 }
 0x6a7   :  { %12879 = vmatprep.subr.bf16.mxu0 %v13166_v31 }
 0x6a8   :  { %10974 = vmatmul.mubr.bf16.vlgmr.msra.gmra.mxu1 %v10414_v1 }
 0x6a9   :  { %11014 = vmatmul.mubr.bf16.vlgmr.msra.gmra.mxu0 %v10416_v8  ;;  %12858 = vmatpush3.bf16.msra.mxu1 %v13151_v20  ;;  %v13180_v20 = vld [vmem:[%s17900_s11 + $0x1c0] sm:$0xff]  }
 0x6aa   :  { %11053 = vmatprep.mubr.bf16.mxu1 %v10419_v32  ;;  %12859 = vmatprep.subr.bf16.mxu1 %v13152_v17  ;;  %v13181_v17 = vld [vmem:[%s17900_s11 + $0x180] sm:$0xff]  }
 0x6ab   :  { %12880 = vmatpush3.bf16.msra.mxu0 %v13167_v57 }
 0x6ad   :  { %12860 = vmatpush3.bf16.msra.mxu1 %v13153_v14 }
 0x6ae   :  { %12861 = vmatprep.subr.bf16.mxu1 %v13154_v44 }
 0x6b1   :  { %12862 = vmatpush3.bf16.msra.mxu1 %v13155_v53 }
 0x6b2   :  { %12863 = vmatprep.subr.bf16.mxu1 %v13156_v18 }
 0x6b5   :  { %12864 = vmatpush3.bf16.msra.mxu1 %v13157_v3 }
 0x6b6   :  { %12865 = vmatprep.subr.bf16.mxu1 %v13158_v5 }
 0x6b9   :  { %12866 = vmatpush3.bf16.msra.mxu1 %v13159_v2 }
 0x6ba   :  { %12867 = vmatprep.subr.bf16.mxu1 %v13160_v21 }
 0x6bd   :  { %12868 = vmatpush3.bf16.msra.mxu1 %v13161_v48 }
 0x6be   :  { %12869 = vmatprep.subr.bf16.mxu1 %v13162_v45 }
 0x6c1   :  { %12870 = vmatpush3.bf16.msra.mxu1 %v13163_v9 }
 0x6c2   :  { %12871 = vmatprep.subr.bf16.mxu1 %v13164_v37 }
 0x6c5   :  { %12872 = vmatpush3.bf16.msra.mxu1 %v13165_v11 }
 0x6c8   :  { %v9916_v35 = vpop.f32.mrf.mxu1  ;;  %11054 = vmatmul.mubr.bf16.vlgmr.msra.gmra.mxu1 %v10418_v19 }
 0x6c9   :  { %v9917_v39 = vadd.f32 %v9916_v35, %v17682_v55  ;;  %v9957_v28 = vpop.f32.mrf.mxu0  ;;  %v13168_v55 = vld [vmem:[%s17900_s11 + $0x1f0] sm:$0xff]  }
 0x6ca   :  { %v9918_v36 = vpop.f32.mrf.mxu1  ;;  %12881 = vmatprep.subr.bf16.mxu0 %v13168_v55 }
 0x6cb   :  { %v9958_v41 = vadd.f32 %v9957_v28, %v9917_v39  ;;  %v9919_v40 = vadd.f32 %v9918_v36, %v17687_v47  ;;  %v9959_v46 = vpop.f32.mrf.mxu0  ;;  %v13169_v47 = vld [vmem:[%s17900_s11 + $0x1b0] sm:$0xff]  }
 0x6cc   :  { %v9920_v6 = vpop.f32.mrf.mxu1  ;;  %12882 = vmatpush3.bf16.msra.mxu0 %v13169_v47 }
 0x6cd   :  { %v9960_v61 = vadd.f32 %v9959_v46, %v9919_v40  ;;  %v9961_v29 = vpop.f32.mrf.mxu0  ;;  %12883 = vmatprep.subr.bf16.mxu0 %v13170_v50 }
 0x6ce   :  { %v9921_v7 = vpop.f32.mrf.mxu1 }
 0x6cf   :  { %v9962_v52 = vpop.f32.mrf.mxu0 }
 0x6d0   :  { %12884 = vmatpush3.bf16.msra.mxu0 %v13171_v43 }
 0x6d1   :  { %12885 = vmatprep.subr.bf16.mxu0 %v13172_v15 }
 0x6d4   :  { %12886 = vmatpush3.bf16.msra.mxu0 %v13173_v27 }
 0x6d5   :  { %12887 = vmatprep.subr.bf16.mxu0 %v13174_v58 }
 0x6d8   :  { %12888 = vmatpush3.bf16.msra.mxu0 %v13175_v22 }
 0x6d9   :  { %12889 = vmatprep.subr.bf16.mxu0 %v13176_v23 }
 0x6dc   :  { %12890 = vmatpush3.bf16.msra.mxu0 %v13177_v49 }
 0x6dd   :  { %12891 = vmatprep.subr.bf16.mxu0 %v13178_v56  ;;  %v12379_v56 = vld [vmem:[%s17903_s12] ss:$0 sm:$0xff] }
 0x6e0   :  { %12892 = vmatpush3.bf16.msra.mxu0 %v13179_v34 }
 0x6e1   :  { %12893 = vmatprep.subr.bf16.mxu0 %v13180_v20 }
 0x6e4   :  { %12894 = vmatpush3.bf16.msra.mxu0 %v13181_v17 }
 0x708   :  { %v9998_v59 = vpop.f32.mrf.mxu1 }
 0x709   :  { %v9999_v24 = vadd.f32 %v9998_v59, %v9958_v41  ;;  %v10039_v30 = vpop.f32.mrf.mxu0 }
 0x70a   :  { %v10000_v42 = vpop.f32.mrf.mxu1 }
 0x70b   :  { %v10040_v13 = vadd.f32 %v10039_v30, %v9999_v24  ;;  %v10041_v16 = vpop.f32.mrf.mxu0  ;;  %v10001_v14 = vadd.f32 %v10000_v42, %v9960_v61 }
 0x70c   :  { %v10002_v10 = vpop.f32.mrf.mxu1 }
 0x70d   :  { %v10043_v1 = vpop.f32.mrf.mxu0  ;;  %v10042_v53 = vadd.f32 %v10041_v16, %v10001_v14 }
 0x70e   :  { %v10003_v8 = vpop.f32.mrf.mxu1 }
 0x70f   :  { %v10044_v32 = vpop.f32.mrf.mxu0 }
 0x748   :  { %v10080_v44 = vpop.f32.mrf.mxu1 }
 0x749   :  { %v10081_v18 = vadd.f32 %v10080_v44, %v10040_v13  ;;  %v10121_v51 = vpop.f32.mrf.mxu0 }
 0x74a   :  { %v10082_v3 = vpop.f32.mrf.mxu1 }
 0x74b   :  { %v10122_v26 = vadd.f32 %v10121_v51, %v10081_v18  ;;  %v10083_v54 = vadd.f32 %v10082_v3, %v10042_v53  ;;  %v10123_v5 = vpop.f32.mrf.mxu0  ;;  %v10328_v3 = vrot.slane %v17583_v0, %v17643_v38 }
 0x74c   :  { %v10084_v2 = vpop.f32.mrf.mxu1 }
 0x74d   :  { %v10173_v25 = vsel %vm10130_vm4, %v10122_v26, 0.0  ;;  %v10124_v63 = vadd.f32 %v10123_v5, %v10083_v54  ;;  %v10125_v21 = vpop.f32.mrf.mxu0  ;;  %v10377_v5 = vrot.slane %v17606_v62, %v17643_v38  ;;  %v10332_v2 = vrot.slane %v17583_v0, %v17652_v60 }
 0x74e   :  { %v10174_v48 = vrot.slane %v10173_v25, 4  ;;  %v10085_v12 = vpop.f32.mrf.mxu1 }
 0x74f   :  { %v10180_v45 = vsel %vm10130_vm4, %v10124_v63, 0.0  ;;  %v10126_v9 = vpop.f32.mrf.mxu0 }
 0x750   :  { %v10175_v33 = vadd.f32 %v10174_v48, %v10173_v25  ;;  %v10181_v37 = vrot.slane %v10180_v45, 4  ;;  %v10381_v48 = vrot.slane %v17606_v62, %v17652_v60 }
 0x752   :  { %v10176_v11 = vrot.slane %v10175_v33, 2  ;;  %v10182_v4 = vadd.f32 %v10181_v37, %v10180_v45 }
 0x754   :  { %v10177_v19 = vadd.f32 %v10176_v11, %v10175_v33  ;;  %v10183_v35 = vrot.slane %v10182_v4, 2 }
 0x756   :  { %v10178_v39 = vrot.slane %v10177_v19, 1  ;;  %v10184_v28 = vadd.f32 %v10183_v35, %v10182_v4 }
 0x758   :  { %v10179_v36 = vadd.f32 %v10178_v39, %v10177_v19  ;;  %v10185_v41 = vrot.slane %v10184_v28, 1 }
 0x75a   :  { %v10194_v40 = vmul.f32 0.25, %v10179_v36  ;;  %v10186_v46 = vadd.f32 %v10185_v41, %v10184_v28 }
 0x75c   :  { %v10202_v6 = vsub.f32 %v10122_v26, %v10194_v40  ;;  %v10195_v61 = vmul.f32 0.25, %v10186_v46 }
 0x75e   :  { %v10210_v29 = vmul.f32 %v10202_v6, %v10202_v6  ;;  %v10203_v7 = vsub.f32 %v10124_v63, %v10195_v61 }
 0x760   :  { %v10254_v52 = vsel %vm10130_vm4, %v10210_v29, 0.0  ;;  %v10211_v31 = vmul.f32 %v10203_v7, %v10203_v7 }
 0x761   :  { %v10255_v57 = vrot.slane %v10254_v52, 4 }
 0x762   :  { %v10261_v55 = vsel %vm10130_vm4, %v10211_v31, 0.0 }
 0x763   :  { %v10256_v47 = vadd.f32 %v10255_v57, %v10254_v52  ;;  %v10262_v50 = vrot.slane %v10261_v55, 4 }
 0x765   :  { %v10257_v43 = vrot.slane %v10256_v47, 2  ;;  %v10263_v15 = vadd.f32 %v10262_v50, %v10261_v55 }
 0x767   :  { %v10258_v27 = vadd.f32 %v10257_v43, %v10256_v47  ;;  %v10264_v58 = vrot.slane %v10263_v15, 2 }
 0x768   :  { %v12829_v22 = vpop.f32.mrf.mxu1 }
 0x769   :  { %v10259_v23 = vrot.slane %v10258_v27, 1  ;;  %v10265_v49 = vadd.f32 %v10264_v58, %v10263_v15  ;;  %v12851_v59 = vpop.f32.mrf.mxu0 }
 0x76a   :  { %v12830_v24 = vpop.f32.mrf.mxu1 }
 0x76b   :  { %v10260_v30 = vadd.f32 %v10259_v23, %v10258_v27  ;;  %v10266_v34 = vrot.slane %v10265_v49, 1  ;;  %v12831_v42 = vadd.f32 %v12830_v24, %v12829_v22  ;;  %v12852_v13 = vpop.f32.mrf.mxu0 }
 0x76c   :  { %v12853_v16 = vadd.f32 %v12852_v13, %v12851_v59  ;;  %v12832_v10 = vpop.f32.mrf.mxu1 }
 0x76d   :  { %v10274_v20 = vmul.f32 0.25, %v10260_v30  ;;  %v10267_v1 = vadd.f32 %v10266_v34, %v10265_v49  ;;  %v10976_v17 = vadd.f32 %v12831_v42, %v12379_v56  ;;  %v12854_v8 = vpop.f32.mrf.mxu0 }
 0x76e   :  { %v12833_v32 = vpop.f32.mrf.mxu1 }
 0x76f   :  { %v10282_v14 = vadd.f32 1e-05, %v10274_v20  ;;  %v10275_v44 = vmul.f32 0.25, %v10267_v1  ;;  %v11016_v53 = vadd.f32 %v12853_v16, %v10976_v17  ;;  %v12855_v18 = vpop.f32.mrf.mxu0 }
 0x771   :  { %13196 = vrsqrt.f32 %v10282_v14  ;;  %v10283_v51 = vadd.f32 1e-05, %v10275_v44 }
 0x773   :  { %13198 = vrsqrt.f32 %v10283_v51 }
 0x77e   :  { %v13197_v26 = vpop.eup %13196 }
 0x77f   :  { %v10298_v54 = vmul.f32 %v13197_v26, %v10202_v6 }
 0x780   :  { %v13199_v25 = vpop.eup %13198 }
 0x781   :  { %v10347_v63 = vmul.f32 %v10328_v3, %v10298_v54  ;;  %v10299_v21 = vmul.f32 %v13199_v25, %v10203_v7 }
 0x783   :  { %v10396_v12 = vadd.f32 %v10377_v5, %v10347_v63  ;;  %v10348_v45 = vmul.f32 %v10332_v2, %v10299_v21 }
 0x785   :  { %v10404_v9 = vmul.f32 0.2, %v10396_v12  ;;  %v10397_v33 = vadd.f32 %v10381_v48, %v10348_v45 }
 0x787   :  { %v10405_v37 = vmul.f32 0.2, %v10397_v33  ;;  %v10412_v11 = vmax.f32 %v10396_v12, %v10404_v9 }
 0x788   :  { %v12873_v4 = vpop.f32.mrf.mxu1 }
 0x789   :  { %v10413_v19 = vmax.f32 %v10397_v33, %v10405_v37  ;;  %v10420_v28 = vpack.c.bf16 %v10412_v11, %v10412_v11 }
 0x78a   :  { %v12874_v35 = vpop.f32.mrf.mxu1 }
 0x78b   :  { %v12875_v39 = vadd.f32 %v12874_v35, %v12873_v4  ;;  %v10421_v38 = vpack.c.bf16 %v10413_v19, %v10413_v19 }
 0x78c   :  { %v12876_v36 = vpop.f32.mrf.mxu1 }
 0x78d   :  { %v11056_v0 = vadd.f32 %v12875_v39, %v11016_v53  ;;  %11093 = vmatprep.mubr.bf16.mxu0 %v10421_v38 }
 0x78e   :  { %v12877_v41 = vpop.f32.mrf.mxu1  ;;  %11094 = vmatmul.mubr.bf16.vlgmr.msra.gmra.mxu0 %v10420_v28 }
 0x84e   :  { %v12895_v40 = vpop.f32.mrf.mxu0 }
 0x850   :  { %v12896_v46 = vpop.f32.mrf.mxu0 }
 0x851   :  { %v12897_v62 = vadd.f32 %v12896_v46, %v12895_v40 }
 0x852   :  { %v12898_v60 = vpop.f32.mrf.mxu0 }
 0x853   :  { %v11096_v6 = vadd.f32 %v12897_v62, %v11056_v0 }
 0x854   :  { %v12899_v61 = vpop.f32.mrf.mxu0 }
 0x855   :  { %v12444_v29 = vmul.f32 -1.442695, %v11096_v6 }
 0x857   :  { %13200 = vpow2.f32 %v12444_v29 }
 0x864   :  { %v13201_v7 = vpop.eup %13200 }
 0x865   :  { %v11104_v52 = vadd.f32 1.0, %v13201_v7 }
 0x867   :  { %13202 = vrcp.f32 %v11104_v52 }
 0x874   :  { %v13203_v31 = vpop.eup %13202 }
 0x875   :  { %11107 = vst [vmem:[%s17904_s13] sm:$0xf] %v13203_v31 }

</bundles_post_ra>
